<compile_context>
chip_gen: v5e
topology: v5e:2x2
jax: 0.10.0
libtpu: 0.0.40
codegen_flags: <defaults>
</compile_context>

<pallas_src>
import functools

import jax
import jax.numpy as jnp
from jax.experimental import pallas as pl
from jax.experimental.pallas import tpu as pltpu


# ----------------------------------------------------------------------------
# Fused branch kernel: conv1x1 -> dilated conv3x3 -> deconv(k=2,s=2) [+ReLU]
# ----------------------------------------------------------------------------
def _branch_kernel(x_ref, w1_ref, b1_ref, w2_ref, b2_ref, w3_ref, b3_ref,
                   o_ref, acc_ref, t3_ref, *, TB, H, W, C, d, relu_out):
    """TB images per grid step; every intermediate stays in VMEM.

    x_ref  : (TB, H, W, Cin)  bf16   NHWC activation block
    w1_ref : (Cin, C)         bf16   1x1 conv weight  [ci, co]
    b1_ref : (1, C)           f32
    w2_ref : (9, C, C)        bf16   3x3 dilated taps [kh*3+kw, ci, co]
    b2_ref : (1, C)           f32
    w3_ref : (2, C, 2C)       bf16   deconv weight    [a, ci, b*C+co]
    b3_ref : (1, 2C)          f32    deconv bias tiled over b
    o_ref  : (TB, H, 2*W*2C)         folded, lane-dense output
    acc_ref: (TB, H, W, C)    f32    scratch accumulator (dilated conv)
    t3_ref : (TB, H, W, 2C)   o.dt   scratch used for the sublane->lane fold
    """
    Cin = x_ref.shape[-1]
    M = TB * H * W

    # ---- 1x1 conv: (M, Cin) @ (Cin, C) on the MXU (bf16 in, f32 acc) ----
    xf = x_ref[...].reshape(M, Cin)
    t1 = jnp.dot(xf, w1_ref[...], preferred_element_type=jnp.float32) + b1_ref[...]
    t1 = t1.astype(jnp.bfloat16)                       # cast exactly once

    # ---- dilated 3x3 conv (padding == dilation == d), on the UNPADDED image ----
    # Center tap (no shift) initializes the accumulator -> no memset needed.
    acc_ref[...] = jnp.dot(
        t1, w2_ref[4], preferred_element_type=jnp.float32).reshape(TB, H, W, C)
    for kh in range(3):
        for kw in range(3):
            if kh == 1 and kw == 1:
                continue
            dh, dw = (kh - 1) * d, (kw - 1) * d
            hl, hh = max(0, -dh), min(H, H - dh)       # valid output rows
            wl, wh = max(0, -dw), min(W, W - dw)       # valid output cols
            if hl >= hh or wl >= wh:
                continue                               # tap fully out of range
            y = jnp.dot(t1, w2_ref[kh * 3 + kw],
                        preferred_element_type=jnp.float32).reshape(TB, H, W, C)
            # Zero-padding of the conv == simply not adding out-of-range taps.
            acc_ref[:, hl:hh, wl:wh, :] += y[:, hl + dh:hh + dh, wl + dw:wh + dw, :]

    t2 = (acc_ref[...].reshape(M, C) + b2_ref[...]).astype(jnp.bfloat16)

    # ---- ConvTranspose2d(k=2, s=2): two per-parity (C, 2C) matmuls ----
    # out[n, 2h+a, 2w+b, co] == t3_a[n*H*W + h*W + w, b*C + co]
    for a in range(2):
        t3 = jnp.dot(t2, w3_ref[a], preferred_element_type=jnp.float32) + b3_ref[...]
        if relu_out:                                   # inter-branch nn.ReLU fused
            t3 = jnp.maximum(t3, 0.0)
        # Free reshape (leading dims only), then fold W into the lane axis with
        # W simple ref copies (strided VMEM reads + static lane-slice stores).
        t3_ref[...] = t3.reshape(TB, H, W, 2 * C).astype(o_ref.dtype)
        for wi in range(W):
            start = (a * W + wi) * 2 * C
            o_ref[:, :, start:start + 2 * C] = t3_ref[:, :, wi, :]


def _pick_tb(batch):
    """Largest divisor of `batch` that still leaves >=2 grid steps (and <=8)."""
    target = max(1, min(8, batch // 2))
    for tb in range(target, 0, -1):
        if batch % tb == 0:
            return tb
    return 1


def _run_branch(x_nhwc, p, dilation, *, relu_out, out_dtype):
    """x_nhwc: (B, H, W, Cin) -> (B, 2H, 2W, C)  (C = branch output channels)."""
    x_nhwc = x_nhwc.astype(jnp.bfloat16)
    B, H, W, Cin = x_nhwc.shape
    C = p["conv1_w"].shape[0]
    d = dilation
    TB = _pick_tb(B)

    # One-time tiny weight repacking (XLA glue).
    w1 = p["conv1_w"].reshape(C, Cin).T.astype(jnp.bfloat16)                  # (Cin, C)
    w2 = jnp.transpose(p["conv2_w"], (2, 3, 1, 0)).reshape(9, C, C).astype(jnp.bfloat16)
    w3 = jnp.transpose(p["deconv_w"], (2, 0, 3, 1)).reshape(2, C, 2 * C).astype(jnp.bfloat16)
    b1 = p["conv1_b"].reshape(1, C).astype(jnp.float32)
    b2 = p["conv2_b"].reshape(1, C).astype(jnp.float32)
    b3 = jnp.tile(p["deconv_b"], 2).reshape(1, 2 * C).astype(jnp.float32)

    # VMEM request derived from the actual (double-buffered) block sizes.
    out_isz = jnp.dtype(out_dtype).itemsize
    est = (2 * TB * H * W * Cin * 2                      # input block, double-buffered
           + 2 * TB * H * 4 * W * C * out_isz            # output block, double-buffered
           + TB * H * W * C * 4                          # acc scratch (f32)
           + TB * H * W * 2 * C * out_isz                # fold scratch
           + 2 * ((Cin * C + 9 * C * C + 4 * C * C) * 2 + 8 * C * 4)   # weights/biases
           + 4 * TB * H * W * max(Cin, 2 * C) * 4)       # live f32 intermediates
    vmem_limit = int(min(64 * 1024 * 1024, max(32 * 1024 * 1024, 4 * est)))

    kernel = functools.partial(_branch_kernel, TB=TB, H=H, W=W, C=C, d=d,
                               relu_out=relu_out)
    out = pl.pallas_call(
        kernel,
        out_shape=jax.ShapeDtypeStruct((B, H, 4 * W * C), out_dtype),
        grid=(B // TB,),
        in_specs=[
            pl.BlockSpec((TB, H, W, Cin), lambda i: (i, 0, 0, 0)),
            pl.BlockSpec((Cin, C), lambda i: (0, 0)),
            pl.BlockSpec((1, C), lambda i: (0, 0)),
            pl.BlockSpec((9, C, C), lambda i: (0, 0, 0)),
            pl.BlockSpec((1, C), lambda i: (0, 0)),
            pl.BlockSpec((2, C, 2 * C), lambda i: (0, 0, 0)),
            pl.BlockSpec((1, 2 * C), lambda i: (0, 0)),
        ],
        out_specs=pl.BlockSpec((TB, H, 4 * W * C), lambda i: (i, 0, 0)),
        scratch_shapes=[
            pltpu.VMEM((TB, H, W, C), jnp.float32),
            pltpu.VMEM((TB, H, W, 2 * C), out_dtype),
        ],
        compiler_params=pltpu.CompilerParams(
            dimension_semantics=("parallel",),
            vmem_limit_bytes=vmem_limit),
    )(x_nhwc, w1, b1, w2, b2, w3, b3)

    # (B, H, 4WC) row-major == (B, H, 2, W, 2, C): free regroup to (B, 2H, 2W, C).
    return out.reshape(B, 2 * H, 2 * W, C)


# ----------------------------------------------------------------------------
# Module forward
# ----------------------------------------------------------------------------
def largefield_upsample_connection(x_nchw, params, option):
    # NCHW -> NHWC once at entry (smallest tensor); cast fused into the transpose.
    x = jnp.transpose(x_nchw, (0, 2, 3, 1)).astype(jnp.bfloat16)
    if option == 1:
        y = _run_branch(x, params["funa"], 6, relu_out=False, out_dtype=jnp.float32)
    else:
        # nn.ReLU between funa and funb is fused into funa's kernel; the
        # inter-branch activation stays bf16 (half the HBM traffic).
        y = _run_branch(x, params["funa"], 6, relu_out=True, out_dtype=jnp.bfloat16)
        y = _run_branch(y, params["funb"], 12, relu_out=False, out_dtype=jnp.float32)
    return jnp.transpose(y, (0, 3, 1, 2))                    # NHWC -> NCHW


def init_params(key, in_places, factor1, factor2, scale=0.05):
    c1 = in_places // factor1
    c2 = in_places // factor2
    ks = jax.random.split(key, 12)

    def w(k, shape):
        return scale * jax.random.normal(k, shape, jnp.float32)

    return {
        "funa": {
            "conv1_w": w(ks[0], (c1, in_places, 1, 1)), "conv1_b": w(ks[1], (c1,)),
            "conv2_w": w(ks[2], (c1, c1, 3, 3)),        "conv2_b": w(ks[3], (c1,)),
            "deconv_w": w(ks[4], (c1, c1, 2, 2)),       "deconv_b": w(ks[5], (c1,)),
        },
        "funb": {
            "conv1_w": w(ks[6], (c2, c1, 1, 1)),  "conv1_b": w(ks[7], (c2,)),
            "conv2_w": w(ks[8], (c2, c2, 3, 3)),  "conv2_b": w(ks[9], (c2,)),
            "deconv_w": w(ks[10], (c2, c2, 2, 2)), "deconv_b": w(ks[11], (c2,)),
        },
    }


# ----------------------------------------------------------------------------
# Pure-JAX reference (verification only)
# ----------------------------------------------------------------------------
def ref_forward(x, params, option):
    hp = jax.lax.Precision.HIGHEST

    def conv(x, w, b, dil, pad):
        y = jax.lax.conv_general_dilated(
            x, w, window_strides=(1, 1), padding=((pad, pad), (pad, pad)),
            rhs_dilation=(dil, dil),
            dimension_numbers=("NCHW", "OIHW", "NCHW"), precision=hp)
        return y + b[None, :, None, None]

    def deconv(x, w, b):
        y = jnp.einsum("nchw,cdab->ndhawb", x, w, precision=hp)
        n, d, h, _, wd, _ = y.shape
        return y.reshape(n, d, 2 * h, 2 * wd) + b[None, :, None, None]

    def branch(x, p, dil):
        x = conv(x, p["conv1_w"], p["conv1_b"], 1, 0)
        x = conv(x, p["conv2_w"], p["conv2_b"], dil, dil)
        return deconv(x, p["deconv_w"], p["deconv_b"])

    y = branch(x, params["funa"], 6)
    if option != 1:
        y = jnp.maximum(y, 0.0)
        y = branch(y, params["funb"], 12)
    return y


# ----------------------------------------------------------------------------
if __name__ == "__main__":
    in_places, factor1, factor2 = 16, 2, 4
    B, H, W = 2, 16, 16

    key = jax.random.PRNGKey(0)
    kx, kp = jax.random.split(key)
    x = jax.random.normal(kx, (B, in_places, H, W), jnp.float32)   # NCHW input
    params = init_params(kp, in_places, factor1, factor2)

    fwd = jax.jit(largefield_upsample_connection, static_argnums=2)
    out1 = jax.block_until_ready(fwd(x, params, 1))
    out2 = jax.block_until_ready(fwd(x, params, 2))

    assert out1.shape == (B, in_places // factor1, 2 * H, 2 * W), out1.shape
    assert out2.shape == (B, in_places // factor2, 4 * H, 4 * W), out2.shape

    ref1 = ref_forward(x, params, 1)
    ref2 = ref_forward(x, params, 2)
    err1 = float(jnp.max(jnp.abs(out1 - ref1)))
    err2 = float(jnp.max(jnp.abs(out2 - ref2)))
    assert jnp.allclose(out1, ref1, atol=2e-2, rtol=2e-2), err1
    assert jnp.allclose(out2, ref2, atol=2e-2, rtol=2e-2), err2

    print("KERNEL_OK")
</pallas_src>

<mosaic_0001>
module attributes {stable_mosaic.version = 11 : i64} {
  func.func @_branch_kernel(%arg0: i32, %arg1: memref<1x16x16x16xbf16, #tpu.memory_space<vmem>>, %arg2: memref<16x8xbf16, #tpu.memory_space<vmem>>, %arg3: memref<1x8xf32, #tpu.memory_space<vmem>>, %arg4: memref<9x8x8xbf16, #tpu.memory_space<vmem>>, %arg5: memref<1x8xf32, #tpu.memory_space<vmem>>, %arg6: memref<2x8x16xbf16, #tpu.memory_space<vmem>>, %arg7: memref<1x16xf32, #tpu.memory_space<vmem>>, %arg8: memref<1x16x512xf32, #tpu.memory_space<vmem>>, %arg9: memref<1x16x16x8xf32, #tpu.memory_space<vmem>>, %arg10: memref<1x16x16x16xf32, #tpu.memory_space<vmem>>) attributes {dimension_semantics = [#tpu.dimension_semantics<parallel>], iteration_bounds = array<i64: 2>, scalar_prefetch = 0 : i64, scratch_operands = 2 : i64, tpu.core_type = #tpu.core_type<tc>, window_params = [{transform_indices = @transform_0, window_bounds = array<i64: 1, 16, 16, 16>}, {pipeline_mode = #tpu.pipeline_mode<synchronous>, transform_indices = @transform_1, window_bounds = array<i64: 16, 8>}, {pipeline_mode = #tpu.pipeline_mode<synchronous>, transform_indices = @transform_2, window_bounds = array<i64: 1, 8>}, {pipeline_mode = #tpu.pipeline_mode<synchronous>, transform_indices = @transform_3, window_bounds = array<i64: 9, 8, 8>}, {pipeline_mode = #tpu.pipeline_mode<synchronous>, transform_indices = @transform_4, window_bounds = array<i64: 1, 8>}, {pipeline_mode = #tpu.pipeline_mode<synchronous>, transform_indices = @transform_5, window_bounds = array<i64: 2, 8, 16>}, {pipeline_mode = #tpu.pipeline_mode<synchronous>, transform_indices = @transform_6, window_bounds = array<i64: 1, 16>}, {transform_indices = @transform_7, window_bounds = array<i64: 1, 16, 512>}]} {
    %c0 = arith.constant 0 : index
    %c0_0 = arith.constant 0 : index
    %c0_1 = arith.constant 0 : index
    %c0_2 = arith.constant 0 : index
    %0 = vector.load %arg1[%c0, %c0_0, %c0_1, %c0_2] : memref<1x16x16x16xbf16, #tpu.memory_space<vmem>>, vector<1x16x16x16xbf16>
    %1 = vector.shape_cast %0 : vector<1x16x16x16xbf16> to vector<256x16xbf16>
    %c0_3 = arith.constant 0 : index
    %c0_4 = arith.constant 0 : index
    %2 = vector.load %arg2[%c0_3, %c0_4] : memref<16x8xbf16, #tpu.memory_space<vmem>>, vector<16x8xbf16>
    %cst = arith.constant dense<0.000000e+00> : vector<256x8xf32>
    %3 = tpu.matmul %1, %2, %cst {dimension_numbers = #tpu.dot_dimension_numbers<[1], [0], [0], [1], [0, 0, 1, 1], [], []>} : vector<256x16xbf16>, vector<16x8xbf16>, vector<256x8xf32> -> vector<256x8xf32>
    %c0_5 = arith.constant 0 : index
    %c0_6 = arith.constant 0 : index
    %4 = vector.load %arg3[%c0_5, %c0_6] : memref<1x8xf32, #tpu.memory_space<vmem>>, vector<1x8xf32>
    %5 = vector.broadcast %4 : vector<1x8xf32> to vector<256x8xf32>
    %6 = arith.addf %3, %5 : vector<256x8xf32>
    %7 = arith.truncf %6 : vector<256x8xf32> to vector<256x8xbf16>
    %c4 = arith.constant 4 : index
    %c0_7 = arith.constant 0 : index
    %c0_8 = arith.constant 0 : index
    %8 = vector.load %arg4[%c4, %c0_7, %c0_8] : memref<9x8x8xbf16, #tpu.memory_space<vmem>>, vector<1x8x8xbf16>
    %9 = vector.shape_cast %8 : vector<1x8x8xbf16> to vector<8x8xbf16>
    %cst_9 = arith.constant dense<0.000000e+00> : vector<256x8xf32>
    %10 = tpu.matmul %7, %9, %cst_9 {dimension_numbers = #tpu.dot_dimension_numbers<[1], [0], [0], [1], [0, 0, 1, 1], [], []>} : vector<256x8xbf16>, vector<8x8xbf16>, vector<256x8xf32> -> vector<256x8xf32>
    %11 = vector.shape_cast %10 : vector<256x8xf32> to vector<1x16x16x8xf32>
    %c0_10 = arith.constant 0 : index
    %c0_11 = arith.constant 0 : index
    %c0_12 = arith.constant 0 : index
    %c0_13 = arith.constant 0 : index
    %12 = vector.load %arg9[%c0_10, %c0_11, %c0_12, %c0_13] : memref<1x16x16x8xf32, #tpu.memory_space<vmem>>, vector<1x16x16x8xf32>
    tpu.vector_store %arg9[%c0_10, %c0_11, %c0_12, %c0_13], %11 {strides = array<i32>} : memref<1x16x16x8xf32, #tpu.memory_space<vmem>>, vector<1x16x16x8xf32>,
    %c0_14 = arith.constant 0 : index
    %c0_15 = arith.constant 0 : index
    %c0_16 = arith.constant 0 : index
    %13 = vector.load %arg4[%c0_14, %c0_15, %c0_16] : memref<9x8x8xbf16, #tpu.memory_space<vmem>>, vector<1x8x8xbf16>
    %14 = vector.shape_cast %13 : vector<1x8x8xbf16> to vector<8x8xbf16>
    %cst_17 = arith.constant dense<0.000000e+00> : vector<256x8xf32>
    %15 = tpu.matmul %7, %14, %cst_17 {dimension_numbers = #tpu.dot_dimension_numbers<[1], [0], [0], [1], [0, 0, 1, 1], [], []>} : vector<256x8xbf16>, vector<8x8xbf16>, vector<256x8xf32> -> vector<256x8xf32>
    %16 = vector.shape_cast %15 : vector<256x8xf32> to vector<1x16x16x8xf32>
    %c0_18 = arith.constant 0 : index
    %c6 = arith.constant 6 : index
    %c6_19 = arith.constant 6 : index
    %c0_20 = arith.constant 0 : index
    %17 = vector.load %arg9[%c0_18, %c6, %c6_19, %c0_20] : memref<1x16x16x8xf32, #tpu.memory_space<vmem>>, vector<1x10x10x8xf32>
    %18 = vector.extract_strided_slice %16 {offsets = [0, 0, 0, 0], sizes = [1, 10, 10, 8], strides = [1, 1, 1, 1]} : vector<1x16x16x8xf32> to vector<1x10x10x8xf32>
    %19 = arith.addf %17, %18 : vector<1x10x10x8xf32>
    %c0_21 = arith.constant 0 : index
    %c6_22 = arith.constant 6 : index
    %c6_23 = arith.constant 6 : index
    %c0_24 = arith.constant 0 : index
    %20 = vector.load %arg9[%c0_21, %c6_22, %c6_23, %c0_24] : memref<1x16x16x8xf32, #tpu.memory_space<vmem>>, vector<1x10x10x8xf32>
    tpu.vector_store %arg9[%c0_21, %c6_22, %c6_23, %c0_24], %19 {strides = array<i32>} : memref<1x16x16x8xf32, #tpu.memory_space<vmem>>, vector<1x10x10x8xf32>,
    %c1 = arith.constant 1 : index
    %c0_25 = arith.constant 0 : index
    %c0_26 = arith.constant 0 : index
    %21 = vector.load %arg4[%c1, %c0_25, %c0_26] : memref<9x8x8xbf16, #tpu.memory_space<vmem>>, vector<1x8x8xbf16>
    %22 = vector.shape_cast %21 : vector<1x8x8xbf16> to vector<8x8xbf16>
    %cst_27 = arith.constant dense<0.000000e+00> : vector<256x8xf32>
    %23 = tpu.matmul %7, %22, %cst_27 {dimension_numbers = #tpu.dot_dimension_numbers<[1], [0], [0], [1], [0, 0, 1, 1], [], []>} : vector<256x8xbf16>, vector<8x8xbf16>, vector<256x8xf32> -> vector<256x8xf32>
    %24 = vector.shape_cast %23 : vector<256x8xf32> to vector<1x16x16x8xf32>
    %c0_28 = arith.constant 0 : index
    %c6_29 = arith.constant 6 : index
    %c0_30 = arith.constant 0 : index
    %c0_31 = arith.constant 0 : index
    %25 = vector.load %arg9[%c0_28, %c6_29, %c0_30, %c0_31] : memref<1x16x16x8xf32, #tpu.memory_space<vmem>>, vector<1x10x16x8xf32>
    %26 = vector.extract_strided_slice %24 {offsets = [0, 0, 0, 0], sizes = [1, 10, 16, 8], strides = [1, 1, 1, 1]} : vector<1x16x16x8xf32> to vector<1x10x16x8xf32>
    %27 = arith.addf %25, %26 : vector<1x10x16x8xf32>
    %c0_32 = arith.constant 0 : index
    %c6_33 = arith.constant 6 : index
    %c0_34 = arith.constant 0 : index
    %c0_35 = arith.constant 0 : index
    %28 = vector.load %arg9[%c0_32, %c6_33, %c0_34, %c0_35] : memref<1x16x16x8xf32, #tpu.memory_space<vmem>>, vector<1x10x16x8xf32>
    tpu.vector_store %arg9[%c0_32, %c6_33, %c0_34, %c0_35], %27 {strides = array<i32>} : memref<1x16x16x8xf32, #tpu.memory_space<vmem>>, vector<1x10x16x8xf32>,
    %c2 = arith.constant 2 : index
    %c0_36 = arith.constant 0 : index
    %c0_37 = arith.constant 0 : index
    %29 = vector.load %arg4[%c2, %c0_36, %c0_37] : memref<9x8x8xbf16, #tpu.memory_space<vmem>>, vector<1x8x8xbf16>
    %30 = vector.shape_cast %29 : vector<1x8x8xbf16> to vector<8x8xbf16>
    %cst_38 = arith.constant dense<0.000000e+00> : vector<256x8xf32>
    %31 = tpu.matmul %7, %30, %cst_38 {dimension_numbers = #tpu.dot_dimension_numbers<[1], [0], [0], [1], [0, 0, 1, 1], [], []>} : vector<256x8xbf16>, vector<8x8xbf16>, vector<256x8xf32> -> vector<256x8xf32>
    %32 = vector.shape_cast %31 : vector<256x8xf32> to vector<1x16x16x8xf32>
    %c0_39 = arith.constant 0 : index
    %c6_40 = arith.constant 6 : index
    %c0_41 = arith.constant 0 : index
    %c0_42 = arith.constant 0 : index
    %33 = vector.load %arg9[%c0_39, %c6_40, %c0_41, %c0_42] : memref<1x16x16x8xf32, #tpu.memory_space<vmem>>, vector<1x10x10x8xf32>
    %34 = vector.extract_strided_slice %32 {offsets = [0, 0, 6, 0], sizes = [1, 10, 10, 8], strides = [1, 1, 1, 1]} : vector<1x16x16x8xf32> to vector<1x10x10x8xf32>
    %35 = arith.addf %33, %34 : vector<1x10x10x8xf32>
    %c0_43 = arith.constant 0 : index
    %c6_44 = arith.constant 6 : index
    %c0_45 = arith.constant 0 : index
    %c0_46 = arith.constant 0 : index
    %36 = vector.load %arg9[%c0_43, %c6_44, %c0_45, %c0_46] : memref<1x16x16x8xf32, #tpu.memory_space<vmem>>, vector<1x10x10x8xf32>
    tpu.vector_store %arg9[%c0_43, %c6_44, %c0_45, %c0_46], %35 {strides = array<i32>} : memref<1x16x16x8xf32, #tpu.memory_space<vmem>>, vector<1x10x10x8xf32>,
    %c3 = arith.constant 3 : index
    %c0_47 = arith.constant 0 : index
    %c0_48 = arith.constant 0 : index
    %37 = vector.load %arg4[%c3, %c0_47, %c0_48] : memref<9x8x8xbf16, #tpu.memory_space<vmem>>, vector<1x8x8xbf16>
    %38 = vector.shape_cast %37 : vector<1x8x8xbf16> to vector<8x8xbf16>
    %cst_49 = arith.constant dense<0.000000e+00> : vector<256x8xf32>
    %39 = tpu.matmul %7, %38, %cst_49 {dimension_numbers = #tpu.dot_dimension_numbers<[1], [0], [0], [1], [0, 0, 1, 1], [], []>} : vector<256x8xbf16>, vector<8x8xbf16>, vector<256x8xf32> -> vector<256x8xf32>
    %40 = vector.shape_cast %39 : vector<256x8xf32> to vector<1x16x16x8xf32>
    %c0_50 = arith.constant 0 : index
    %c0_51 = arith.constant 0 : index
    %c6_52 = arith.constant 6 : index
    %c0_53 = arith.constant 0 : index
    %41 = vector.load %arg9[%c0_50, %c0_51, %c6_52, %c0_53] : memref<1x16x16x8xf32, #tpu.memory_space<vmem>>, vector<1x16x10x8xf32>
    %42 = vector.extract_strided_slice %40 {offsets = [0, 0, 0, 0], sizes = [1, 16, 10, 8], strides = [1, 1, 1, 1]} : vector<1x16x16x8xf32> to vector<1x16x10x8xf32>
    %43 = arith.addf %41, %42 : vector<1x16x10x8xf32>
    %c0_54 = arith.constant 0 : index
    %c0_55 = arith.constant 0 : index
    %c6_56 = arith.constant 6 : index
    %c0_57 = arith.constant 0 : index
    %44 = vector.load %arg9[%c0_54, %c0_55, %c6_56, %c0_57] : memref<1x16x16x8xf32, #tpu.memory_space<vmem>>, vector<1x16x10x8xf32>
    tpu.vector_store %arg9[%c0_54, %c0_55, %c6_56, %c0_57], %43 {strides = array<i32>} : memref<1x16x16x8xf32, #tpu.memory_space<vmem>>, vector<1x16x10x8xf32>,
    %c5 = arith.constant 5 : index
    %c0_58 = arith.constant 0 : index
    %c0_59 = arith.constant 0 : index
    %45 = vector.load %arg4[%c5, %c0_58, %c0_59] : memref<9x8x8xbf16, #tpu.memory_space<vmem>>, vector<1x8x8xbf16>
    %46 = vector.shape_cast %45 : vector<1x8x8xbf16> to vector<8x8xbf16>
    %cst_60 = arith.constant dense<0.000000e+00> : vector<256x8xf32>
    %47 = tpu.matmul %7, %46, %cst_60 {dimension_numbers = #tpu.dot_dimension_numbers<[1], [0], [0], [1], [0, 0, 1, 1], [], []>} : vector<256x8xbf16>, vector<8x8xbf16>, vector<256x8xf32> -> vector<256x8xf32>
    %48 = vector.shape_cast %47 : vector<256x8xf32> to vector<1x16x16x8xf32>
    %c0_61 = arith.constant 0 : index
    %c0_62 = arith.constant 0 : index
    %c0_63 = arith.constant 0 : index
    %c0_64 = arith.constant 0 : index
    %49 = vector.load %arg9[%c0_61, %c0_62, %c0_63, %c0_64] : memref<1x16x16x8xf32, #tpu.memory_space<vmem>>, vector<1x16x10x8xf32>
    %50 = vector.extract_strided_slice %48 {offsets = [0, 0, 6, 0], sizes = [1, 16, 10, 8], strides = [1, 1, 1, 1]} : vector<1x16x16x8xf32> to vector<1x16x10x8xf32>
    %51 = arith.addf %49, %50 : vector<1x16x10x8xf32>
    %c0_65 = arith.constant 0 : index
    %c0_66 = arith.constant 0 : index
    %c0_67 = arith.constant 0 : index
    %c0_68 = arith.constant 0 : index
    %52 = vector.load %arg9[%c0_65, %c0_66, %c0_67, %c0_68] : memref<1x16x16x8xf32, #tpu.memory_space<vmem>>, vector<1x16x10x8xf32>
    tpu.vector_store %arg9[%c0_65, %c0_66, %c0_67, %c0_68], %51 {strides = array<i32>} : memref<1x16x16x8xf32, #tpu.memory_space<vmem>>, vector<1x16x10x8xf32>,
    %c6_69 = arith.constant 6 : index
    %c0_70 = arith.constant 0 : index
    %c0_71 = arith.constant 0 : index
    %53 = vector.load %arg4[%c6_69, %c0_70, %c0_71] : memref<9x8x8xbf16, #tpu.memory_space<vmem>>, vector<1x8x8xbf16>
    %54 = vector.shape_cast %53 : vector<1x8x8xbf16> to vector<8x8xbf16>
    %cst_72 = arith.constant dense<0.000000e+00> : vector<256x8xf32>
    %55 = tpu.matmul %7, %54, %cst_72 {dimension_numbers = #tpu.dot_dimension_numbers<[1], [0], [0], [1], [0, 0, 1, 1], [], []>} : vector<256x8xbf16>, vector<8x8xbf16>, vector<256x8xf32> -> vector<256x8xf32>
    %56 = vector.shape_cast %55 : vector<256x8xf32> to vector<1x16x16x8xf32>
    %c0_73 = arith.constant 0 : index
    %c0_74 = arith.constant 0 : index
    %c6_75 = arith.constant 6 : index
    %c0_76 = arith.constant 0 : index
    %57 = vector.load %arg9[%c0_73, %c0_74, %c6_75, %c0_76] : memref<1x16x16x8xf32, #tpu.memory_space<vmem>>, vector<1x10x10x8xf32>
    %58 = vector.extract_strided_slice %56 {offsets = [0, 6, 0, 0], sizes = [1, 10, 10, 8], strides = [1, 1, 1, 1]} : vector<1x16x16x8xf32> to vector<1x10x10x8xf32>
    %59 = arith.addf %57, %58 : vector<1x10x10x8xf32>
    %c0_77 = arith.constant 0 : index
    %c0_78 = arith.constant 0 : index
    %c6_79 = arith.constant 6 : index
    %c0_80 = arith.constant 0 : index
    %60 = vector.load %arg9[%c0_77, %c0_78, %c6_79, %c0_80] : memref<1x16x16x8xf32, #tpu.memory_space<vmem>>, vector<1x10x10x8xf32>
    tpu.vector_store %arg9[%c0_77, %c0_78, %c6_79, %c0_80], %59 {strides = array<i32>} : memref<1x16x16x8xf32, #tpu.memory_space<vmem>>, vector<1x10x10x8xf32>,
    %c7 = arith.constant 7 : index
    %c0_81 = arith.constant 0 : index
    %c0_82 = arith.constant 0 : index
    %61 = vector.load %arg4[%c7, %c0_81, %c0_82] : memref<9x8x8xbf16, #tpu.memory_space<vmem>>, vector<1x8x8xbf16>
    %62 = vector.shape_cast %61 : vector<1x8x8xbf16> to vector<8x8xbf16>
    %cst_83 = arith.constant dense<0.000000e+00> : vector<256x8xf32>
    %63 = tpu.matmul %7, %62, %cst_83 {dimension_numbers = #tpu.dot_dimension_numbers<[1], [0], [0], [1], [0, 0, 1, 1], [], []>} : vector<256x8xbf16>, vector<8x8xbf16>, vector<256x8xf32> -> vector<256x8xf32>
    %64 = vector.shape_cast %63 : vector<256x8xf32> to vector<1x16x16x8xf32>
    %c0_84 = arith.constant 0 : index
    %c0_85 = arith.constant 0 : index
    %c0_86 = arith.constant 0 : index
    %c0_87 = arith.constant 0 : index
    %65 = vector.load %arg9[%c0_84, %c0_85, %c0_86, %c0_87] : memref<1x16x16x8xf32, #tpu.memory_space<vmem>>, vector<1x10x16x8xf32>
    %66 = vector.extract_strided_slice %64 {offsets = [0, 6, 0, 0], sizes = [1, 10, 16, 8], strides = [1, 1, 1, 1]} : vector<1x16x16x8xf32> to vector<1x10x16x8xf32>
    %67 = arith.addf %65, %66 : vector<1x10x16x8xf32>
    %c0_88 = arith.constant 0 : index
    %c0_89 = arith.constant 0 : index
    %c0_90 = arith.constant 0 : index
    %c0_91 = arith.constant 0 : index
    %68 = vector.load %arg9[%c0_88, %c0_89, %c0_90, %c0_91] : memref<1x16x16x8xf32, #tpu.memory_space<vmem>>, vector<1x10x16x8xf32>
    tpu.vector_store %arg9[%c0_88, %c0_89, %c0_90, %c0_91], %67 {strides = array<i32>} : memref<1x16x16x8xf32, #tpu.memory_space<vmem>>, vector<1x10x16x8xf32>,
    %c8 = arith.constant 8 : index
    %c0_92 = arith.constant 0 : index
    %c0_93 = arith.constant 0 : index
    %69 = vector.load %arg4[%c8, %c0_92, %c0_93] : memref<9x8x8xbf16, #tpu.memory_space<vmem>>, vector<1x8x8xbf16>
    %70 = vector.shape_cast %69 : vector<1x8x8xbf16> to vector<8x8xbf16>
    %cst_94 = arith.constant dense<0.000000e+00> : vector<256x8xf32>
    %71 = tpu.matmul %7, %70, %cst_94 {dimension_numbers = #tpu.dot_dimension_numbers<[1], [0], [0], [1], [0, 0, 1, 1], [], []>} : vector<256x8xbf16>, vector<8x8xbf16>, vector<256x8xf32> -> vector<256x8xf32>
    %72 = vector.shape_cast %71 : vector<256x8xf32> to vector<1x16x16x8xf32>
    %c0_95 = arith.constant 0 : index
    %c0_96 = arith.constant 0 : index
    %c0_97 = arith.constant 0 : index
    %c0_98 = arith.constant 0 : index
    %73 = vector.load %arg9[%c0_95, %c0_96, %c0_97, %c0_98] : memref<1x16x16x8xf32, #tpu.memory_space<vmem>>, vector<1x10x10x8xf32>
    %74 = vector.extract_strided_slice %72 {offsets = [0, 6, 6, 0], sizes = [1, 10, 10, 8], strides = [1, 1, 1, 1]} : vector<1x16x16x8xf32> to vector<1x10x10x8xf32>
    %75 = arith.addf %73, %74 : vector<1x10x10x8xf32>
    %c0_99 = arith.constant 0 : index
    %c0_100 = arith.constant 0 : index
    %c0_101 = arith.constant 0 : index
    %c0_102 = arith.constant 0 : index
    %76 = vector.load %arg9[%c0_99, %c0_100, %c0_101, %c0_102] : memref<1x16x16x8xf32, #tpu.memory_space<vmem>>, vector<1x10x10x8xf32>
    tpu.vector_store %arg9[%c0_99, %c0_100, %c0_101, %c0_102], %75 {strides = array<i32>} : memref<1x16x16x8xf32, #tpu.memory_space<vmem>>, vector<1x10x10x8xf32>,
    %c0_103 = arith.constant 0 : index
    %c0_104 = arith.constant 0 : index
    %c0_105 = arith.constant 0 : index
    %c0_106 = arith.constant 0 : index
    %77 = vector.load %arg9[%c0_103, %c0_104, %c0_105, %c0_106] : memref<1x16x16x8xf32, #tpu.memory_space<vmem>>, vector<1x16x16x8xf32>
    %78 = vector.shape_cast %77 : vector<1x16x16x8xf32> to vector<256x8xf32>
    %c0_107 = arith.constant 0 : index
    %c0_108 = arith.constant 0 : index
    %79 = vector.load %arg5[%c0_107, %c0_108] : memref<1x8xf32, #tpu.memory_space<vmem>>, vector<1x8xf32>
    %80 = vector.broadcast %79 : vector<1x8xf32> to vector<256x8xf32>
    %81 = arith.addf %78, %80 : vector<256x8xf32>
    %82 = arith.truncf %81 : vector<256x8xf32> to vector<256x8xbf16>
    %c0_109 = arith.constant 0 : index
    %c0_110 = arith.constant 0 : index
    %c0_111 = arith.constant 0 : index
    %83 = vector.load %arg6[%c0_109, %c0_110, %c0_111] : memref<2x8x16xbf16, #tpu.memory_space<vmem>>, vector<1x8x16xbf16>
    %84 = vector.shape_cast %83 : vector<1x8x16xbf16> to vector<8x16xbf16>
    %cst_112 = arith.constant dense<0.000000e+00> : vector<256x16xf32>
    %85 = tpu.matmul %82, %84, %cst_112 {dimension_numbers = #tpu.dot_dimension_numbers<[1], [0], [0], [1], [0, 0, 1, 1], [], []>} : vector<256x8xbf16>, vector<8x16xbf16>, vector<256x16xf32> -> vector<256x16xf32>
    %c0_113 = arith.constant 0 : index
    %c0_114 = arith.constant 0 : index
    %86 = vector.load %arg7[%c0_113, %c0_114] : memref<1x16xf32, #tpu.memory_space<vmem>>, vector<1x16xf32>
    %87 = vector.broadcast %86 : vector<1x16xf32> to vector<256x16xf32>
    %88 = arith.addf %85, %87 : vector<256x16xf32>
    %89 = vector.shape_cast %88 : vector<256x16xf32> to vector<1x16x16x16xf32>
    %c0_115 = arith.constant 0 : index
    %c0_116 = arith.constant 0 : index
    %c0_117 = arith.constant 0 : index
    %c0_118 = arith.constant 0 : index
    %90 = vector.load %arg10[%c0_115, %c0_116, %c0_117, %c0_118] : memref<1x16x16x16xf32, #tpu.memory_space<vmem>>, vector<1x16x16x16xf32>
    tpu.vector_store %arg10[%c0_115, %c0_116, %c0_117, %c0_118], %89 {strides = array<i32>} : memref<1x16x16x16xf32, #tpu.memory_space<vmem>>, vector<1x16x16x16xf32>,
    %c0_119 = arith.constant 0 : index
    %c0_120 = arith.constant 0 : index
    %c0_121 = arith.constant 0 : index
    %c0_122 = arith.constant 0 : index
    %91 = vector.load %arg10[%c0_119, %c0_120, %c0_121, %c0_122] : memref<1x16x16x16xf32, #tpu.memory_space<vmem>>, vector<1x16x1x16xf32>
    %92 = vector.shape_cast %91 : vector<1x16x1x16xf32> to vector<1x16x16xf32>
    %c0_123 = arith.constant 0 : index
    %c0_124 = arith.constant 0 : index
    %c0_125 = arith.constant 0 : index
    %93 = vector.load %arg8[%c0_123, %c0_124, %c0_125] : memref<1x16x512xf32, #tpu.memory_space<vmem>>, vector<1x16x16xf32>
    tpu.vector_store %arg8[%c0_123, %c0_124, %c0_125], %92 {strides = array<i32>} : memref<1x16x512xf32, #tpu.memory_space<vmem>>, vector<1x16x16xf32>,
    %c0_126 = arith.constant 0 : index
    %c0_127 = arith.constant 0 : index
    %c1_128 = arith.constant 1 : index
    %c0_129 = arith.constant 0 : index
    %94 = vector.load %arg10[%c0_126, %c0_127, %c1_128, %c0_129] : memref<1x16x16x16xf32, #tpu.memory_space<vmem>>, vector<1x16x1x16xf32>
    %95 = vector.shape_cast %94 : vector<1x16x1x16xf32> to vector<1x16x16xf32>
    %c0_130 = arith.constant 0 : index
    %c0_131 = arith.constant 0 : index
    %c16 = arith.constant 16 : index
    %96 = vector.load %arg8[%c0_130, %c0_131, %c16] : memref<1x16x512xf32, #tpu.memory_space<vmem>>, vector<1x16x16xf32>
    tpu.vector_store %arg8[%c0_130, %c0_131, %c16], %95 {strides = array<i32>} : memref<1x16x512xf32, #tpu.memory_space<vmem>>, vector<1x16x16xf32>,
    %c0_132 = arith.constant 0 : index
    %c0_133 = arith.constant 0 : index
    %c2_134 = arith.constant 2 : index
    %c0_135 = arith.constant 0 : index
    %97 = vector.load %arg10[%c0_132, %c0_133, %c2_134, %c0_135] : memref<1x16x16x16xf32, #tpu.memory_space<vmem>>, vector<1x16x1x16xf32>
    %98 = vector.shape_cast %97 : vector<1x16x1x16xf32> to vector<1x16x16xf32>
    %c0_136 = arith.constant 0 : index
    %c0_137 = arith.constant 0 : index
    %c32 = arith.constant 32 : index
    %99 = vector.load %arg8[%c0_136, %c0_137, %c32] : memref<1x16x512xf32, #tpu.memory_space<vmem>>, vector<1x16x16xf32>
    tpu.vector_store %arg8[%c0_136, %c0_137, %c32], %98 {strides = array<i32>} : memref<1x16x512xf32, #tpu.memory_space<vmem>>, vector<1x16x16xf32>,
    %c0_138 = arith.constant 0 : index
    %c0_139 = arith.constant 0 : index
    %c3_140 = arith.constant 3 : index
    %c0_141 = arith.constant 0 : index
    %100 = vector.load %arg10[%c0_138, %c0_139, %c3_140, %c0_141] : memref<1x16x16x16xf32, #tpu.memory_space<vmem>>, vector<1x16x1x16xf32>
    %101 = vector.shape_cast %100 : vector<1x16x1x16xf32> to vector<1x16x16xf32>
    %c0_142 = arith.constant 0 : index
    %c0_143 = arith.constant 0 : index
    %c48 = arith.constant 48 : index
    %102 = vector.load %arg8[%c0_142, %c0_143, %c48] : memref<1x16x512xf32, #tpu.memory_space<vmem>>, vector<1x16x16xf32>
    tpu.vector_store %arg8[%c0_142, %c0_143, %c48], %101 {strides = array<i32>} : memref<1x16x512xf32, #tpu.memory_space<vmem>>, vector<1x16x16xf32>,
    %c0_144 = arith.constant 0 : index
    %c0_145 = arith.constant 0 : index
    %c4_146 = arith.constant 4 : index
    %c0_147 = arith.constant 0 : index
    %103 = vector.load %arg10[%c0_144, %c0_145, %c4_146, %c0_147] : memref<1x16x16x16xf32, #tpu.memory_space<vmem>>, vector<1x16x1x16xf32>
    %104 = vector.shape_cast %103 : vector<1x16x1x16xf32> to vector<1x16x16xf32>
    %c0_148 = arith.constant 0 : index
    %c0_149 = arith.constant 0 : index
    %c64 = arith.constant 64 : index
    %105 = vector.load %arg8[%c0_148, %c0_149, %c64] : memref<1x16x512xf32, #tpu.memory_space<vmem>>, vector<1x16x16xf32>
    tpu.vector_store %arg8[%c0_148, %c0_149, %c64], %104 {strides = array<i32>} : memref<1x16x512xf32, #tpu.memory_space<vmem>>, vector<1x16x16xf32>,
    %c0_150 = arith.constant 0 : index
    %c0_151 = arith.constant 0 : index
    %c5_152 = arith.constant 5 : index
    %c0_153 = arith.constant 0 : index
    %106 = vector.load %arg10[%c0_150, %c0_151, %c5_152, %c0_153] : memref<1x16x16x16xf32, #tpu.memory_space<vmem>>, vector<1x16x1x16xf32>
    %107 = vector.shape_cast %106 : vector<1x16x1x16xf32> to vector<1x16x16xf32>
    %c0_154 = arith.constant 0 : index
    %c0_155 = arith.constant 0 : index
    %c80 = arith.constant 80 : index
    %108 = vector.load %arg8[%c0_154, %c0_155, %c80] : memref<1x16x512xf32, #tpu.memory_space<vmem>>, vector<1x16x16xf32>
    tpu.vector_store %arg8[%c0_154, %c0_155, %c80], %107 {strides = array<i32>} : memref<1x16x512xf32, #tpu.memory_space<vmem>>, vector<1x16x16xf32>,
    %c0_156 = arith.constant 0 : index
    %c0_157 = arith.constant 0 : index
    %c6_158 = arith.constant 6 : index
    %c0_159 = arith.constant 0 : index
    %109 = vector.load %arg10[%c0_156, %c0_157, %c6_158, %c0_159] : memref<1x16x16x16xf32, #tpu.memory_space<vmem>>, vector<1x16x1x16xf32>
    %110 = vector.shape_cast %109 : vector<1x16x1x16xf32> to vector<1x16x16xf32>
    %c0_160 = arith.constant 0 : index
    %c0_161 = arith.constant 0 : index
    %c96 = arith.constant 96 : index
    %111 = vector.load %arg8[%c0_160, %c0_161, %c96] : memref<1x16x512xf32, #tpu.memory_space<vmem>>, vector<1x16x16xf32>
    tpu.vector_store %arg8[%c0_160, %c0_161, %c96], %110 {strides = array<i32>} : memref<1x16x512xf32, #tpu.memory_space<vmem>>, vector<1x16x16xf32>,
    %c0_162 = arith.constant 0 : index
    %c0_163 = arith.constant 0 : index
    %c7_164 = arith.constant 7 : index
    %c0_165 = arith.constant 0 : index
    %112 = vector.load %arg10[%c0_162, %c0_163, %c7_164, %c0_165] : memref<1x16x16x16xf32, #tpu.memory_space<vmem>>, vector<1x16x1x16xf32>
    %113 = vector.shape_cast %112 : vector<1x16x1x16xf32> to vector<1x16x16xf32>
    %c0_166 = arith.constant 0 : index
    %c0_167 = arith.constant 0 : index
    %c112 = arith.constant 112 : index
    %114 = vector.load %arg8[%c0_166, %c0_167, %c112] : memref<1x16x512xf32, #tpu.memory_space<vmem>>, vector<1x16x16xf32>
    tpu.vector_store %arg8[%c0_166, %c0_167, %c112], %113 {strides = array<i32>} : memref<1x16x512xf32, #tpu.memory_space<vmem>>, vector<1x16x16xf32>,
    %c0_168 = arith.constant 0 : index
    %c0_169 = arith.constant 0 : index
    %c8_170 = arith.constant 8 : index
    %c0_171 = arith.constant 0 : index
    %115 = vector.load %arg10[%c0_168, %c0_169, %c8_170, %c0_171] : memref<1x16x16x16xf32, #tpu.memory_space<vmem>>, vector<1x16x1x16xf32>
    %116 = vector.shape_cast %115 : vector<1x16x1x16xf32> to vector<1x16x16xf32>
    %c0_172 = arith.constant 0 : index
    %c0_173 = arith.constant 0 : index
    %c128 = arith.constant 128 : index
    %117 = vector.load %arg8[%c0_172, %c0_173, %c128] : memref<1x16x512xf32, #tpu.memory_space<vmem>>, vector<1x16x16xf32>
    tpu.vector_store %arg8[%c0_172, %c0_173, %c128], %116 {strides = array<i32>} : memref<1x16x512xf32, #tpu.memory_space<vmem>>, vector<1x16x16xf32>,
    %c0_174 = arith.constant 0 : index
    %c0_175 = arith.constant 0 : index
    %c9 = arith.constant 9 : index
    %c0_176 = arith.constant 0 : index
    %118 = vector.load %arg10[%c0_174, %c0_175, %c9, %c0_176] : memref<1x16x16x16xf32, #tpu.memory_space<vmem>>, vector<1x16x1x16xf32>
    %119 = vector.shape_cast %118 : vector<1x16x1x16xf32> to vector<1x16x16xf32>
    %c0_177 = arith.constant 0 : index
    %c0_178 = arith.constant 0 : index
    %c144 = arith.constant 144 : index
    %120 = vector.load %arg8[%c0_177, %c0_178, %c144] : memref<1x16x512xf32, #tpu.memory_space<vmem>>, vector<1x16x16xf32>
    tpu.vector_store %arg8[%c0_177, %c0_178, %c144], %119 {strides = array<i32>} : memref<1x16x512xf32, #tpu.memory_space<vmem>>, vector<1x16x16xf32>,
    %c0_179 = arith.constant 0 : index
    %c0_180 = arith.constant 0 : index
    %c10 = arith.constant 10 : index
    %c0_181 = arith.constant 0 : index
    %121 = vector.load %arg10[%c0_179, %c0_180, %c10, %c0_181] : memref<1x16x16x16xf32, #tpu.memory_space<vmem>>, vector<1x16x1x16xf32>
    %122 = vector.shape_cast %121 : vector<1x16x1x16xf32> to vector<1x16x16xf32>
    %c0_182 = arith.constant 0 : index
    %c0_183 = arith.constant 0 : index
    %c160 = arith.constant 160 : index
    %123 = vector.load %arg8[%c0_182, %c0_183, %c160] : memref<1x16x512xf32, #tpu.memory_space<vmem>>, vector<1x16x16xf32>
    tpu.vector_store %arg8[%c0_182, %c0_183, %c160], %122 {strides = array<i32>} : memref<1x16x512xf32, #tpu.memory_space<vmem>>, vector<1x16x16xf32>,
    %c0_184 = arith.constant 0 : index
    %c0_185 = arith.constant 0 : index
    %c11 = arith.constant 11 : index
    %c0_186 = arith.constant 0 : index
    %124 = vector.load %arg10[%c0_184, %c0_185, %c11, %c0_186] : memref<1x16x16x16xf32, #tpu.memory_space<vmem>>, vector<1x16x1x16xf32>
    %125 = vector.shape_cast %124 : vector<1x16x1x16xf32> to vector<1x16x16xf32>
    %c0_187 = arith.constant 0 : index
    %c0_188 = arith.constant 0 : index
    %c176 = arith.constant 176 : index
    %126 = vector.load %arg8[%c0_187, %c0_188, %c176] : memref<1x16x512xf32, #tpu.memory_space<vmem>>, vector<1x16x16xf32>
    tpu.vector_store %arg8[%c0_187, %c0_188, %c176], %125 {strides = array<i32>} : memref<1x16x512xf32, #tpu.memory_space<vmem>>, vector<1x16x16xf32>,
    %c0_189 = arith.constant 0 : index
    %c0_190 = arith.constant 0 : index
    %c12 = arith.constant 12 : index
    %c0_191 = arith.constant 0 : index
    %127 = vector.load %arg10[%c0_189, %c0_190, %c12, %c0_191] : memref<1x16x16x16xf32, #tpu.memory_space<vmem>>, vector<1x16x1x16xf32>
    %128 = vector.shape_cast %127 : vector<1x16x1x16xf32> to vector<1x16x16xf32>
    %c0_192 = arith.constant 0 : index
    %c0_193 = arith.constant 0 : index
    %c192 = arith.constant 192 : index
    %129 = vector.load %arg8[%c0_192, %c0_193, %c192] : memref<1x16x512xf32, #tpu.memory_space<vmem>>, vector<1x16x16xf32>
    tpu.vector_store %arg8[%c0_192, %c0_193, %c192], %128 {strides = array<i32>} : memref<1x16x512xf32, #tpu.memory_space<vmem>>, vector<1x16x16xf32>,
    %c0_194 = arith.constant 0 : index
    %c0_195 = arith.constant 0 : index
    %c13 = arith.constant 13 : index
    %c0_196 = arith.constant 0 : index
    %130 = vector.load %arg10[%c0_194, %c0_195, %c13, %c0_196] : memref<1x16x16x16xf32, #tpu.memory_space<vmem>>, vector<1x16x1x16xf32>
    %131 = vector.shape_cast %130 : vector<1x16x1x16xf32> to vector<1x16x16xf32>
    %c0_197 = arith.constant 0 : index
    %c0_198 = arith.constant 0 : index
    %c208 = arith.constant 208 : index
    %132 = vector.load %arg8[%c0_197, %c0_198, %c208] : memref<1x16x512xf32, #tpu.memory_space<vmem>>, vector<1x16x16xf32>
    tpu.vector_store %arg8[%c0_197, %c0_198, %c208], %131 {strides = array<i32>} : memref<1x16x512xf32, #tpu.memory_space<vmem>>, vector<1x16x16xf32>,
    %c0_199 = arith.constant 0 : index
    %c0_200 = arith.constant 0 : index
    %c14 = arith.constant 14 : index
    %c0_201 = arith.constant 0 : index
    %133 = vector.load %arg10[%c0_199, %c0_200, %c14, %c0_201] : memref<1x16x16x16xf32, #tpu.memory_space<vmem>>, vector<1x16x1x16xf32>
    %134 = vector.shape_cast %133 : vector<1x16x1x16xf32> to vector<1x16x16xf32>
    %c0_202 = arith.constant 0 : index
    %c0_203 = arith.constant 0 : index
    %c224 = arith.constant 224 : index
    %135 = vector.load %arg8[%c0_202, %c0_203, %c224] : memref<1x16x512xf32, #tpu.memory_space<vmem>>, vector<1x16x16xf32>
    tpu.vector_store %arg8[%c0_202, %c0_203, %c224], %134 {strides = array<i32>} : memref<1x16x512xf32, #tpu.memory_space<vmem>>, vector<1x16x16xf32>,
    %c0_204 = arith.constant 0 : index
    %c0_205 = arith.constant 0 : index
    %c15 = arith.constant 15 : index
    %c0_206 = arith.constant 0 : index
    %136 = vector.load %arg10[%c0_204, %c0_205, %c15, %c0_206] : memref<1x16x16x16xf32, #tpu.memory_space<vmem>>, vector<1x16x1x16xf32>
    %137 = vector.shape_cast %136 : vector<1x16x1x16xf32> to vector<1x16x16xf32>
    %c0_207 = arith.constant 0 : index
    %c0_208 = arith.constant 0 : index
    %c240 = arith.constant 240 : index
    %138 = vector.load %arg8[%c0_207, %c0_208, %c240] : memref<1x16x512xf32, #tpu.memory_space<vmem>>, vector<1x16x16xf32>
    tpu.vector_store %arg8[%c0_207, %c0_208, %c240], %137 {strides = array<i32>} : memref<1x16x512xf32, #tpu.memory_space<vmem>>, vector<1x16x16xf32>,
    %c1_209 = arith.constant 1 : index
    %c0_210 = arith.constant 0 : index
    %c0_211 = arith.constant 0 : index
    %139 = vector.load %arg6[%c1_209, %c0_210, %c0_211] : memref<2x8x16xbf16, #tpu.memory_space<vmem>>, vector<1x8x16xbf16>
    %140 = vector.shape_cast %139 : vector<1x8x16xbf16> to vector<8x16xbf16>
    %cst_212 = arith.constant dense<0.000000e+00> : vector<256x16xf32>
    %141 = tpu.matmul %82, %140, %cst_212 {dimension_numbers = #tpu.dot_dimension_numbers<[1], [0], [0], [1], [0, 0, 1, 1], [], []>} : vector<256x8xbf16>, vector<8x16xbf16>, vector<256x16xf32> -> vector<256x16xf32>
    %c0_213 = arith.constant 0 : index
    %c0_214 = arith.constant 0 : index
    %142 = vector.load %arg7[%c0_213, %c0_214] : memref<1x16xf32, #tpu.memory_space<vmem>>, vector<1x16xf32>
    %143 = vector.broadcast %142 : vector<1x16xf32> to vector<256x16xf32>
    %144 = arith.addf %141, %143 : vector<256x16xf32>
    %145 = vector.shape_cast %144 : vector<256x16xf32> to vector<1x16x16x16xf32>
    %c0_215 = arith.constant 0 : index
    %c0_216 = arith.constant 0 : index
    %c0_217 = arith.constant 0 : index
    %c0_218 = arith.constant 0 : index
    %146 = vector.load %arg10[%c0_215, %c0_216, %c0_217, %c0_218] : memref<1x16x16x16xf32, #tpu.memory_space<vmem>>, vector<1x16x16x16xf32>
    tpu.vector_store %arg10[%c0_215, %c0_216, %c0_217, %c0_218], %145 {strides = array<i32>} : memref<1x16x16x16xf32, #tpu.memory_space<vmem>>, vector<1x16x16x16xf32>,
    %c0_219 = arith.constant 0 : index
    %c0_220 = arith.constant 0 : index
    %c0_221 = arith.constant 0 : index
    %c0_222 = arith.constant 0 : index
    %147 = vector.load %arg10[%c0_219, %c0_220, %c0_221, %c0_222] : memref<1x16x16x16xf32, #tpu.memory_space<vmem>>, vector<1x16x1x16xf32>
    %148 = vector.shape_cast %147 : vector<1x16x1x16xf32> to vector<1x16x16xf32>
    %c0_223 = arith.constant 0 : index
    %c0_224 = arith.constant 0 : index
    %c256 = arith.constant 256 : index
    %149 = vector.load %arg8[%c0_223, %c0_224, %c256] : memref<1x16x512xf32, #tpu.memory_space<vmem>>, vector<1x16x16xf32>
    tpu.vector_store %arg8[%c0_223, %c0_224, %c256], %148 {strides = array<i32>} : memref<1x16x512xf32, #tpu.memory_space<vmem>>, vector<1x16x16xf32>,
    %c0_225 = arith.constant 0 : index
    %c0_226 = arith.constant 0 : index
    %c1_227 = arith.constant 1 : index
    %c0_228 = arith.constant 0 : index
    %150 = vector.load %arg10[%c0_225, %c0_226, %c1_227, %c0_228] : memref<1x16x16x16xf32, #tpu.memory_space<vmem>>, vector<1x16x1x16xf32>
    %151 = vector.shape_cast %150 : vector<1x16x1x16xf32> to vector<1x16x16xf32>
    %c0_229 = arith.constant 0 : index
    %c0_230 = arith.constant 0 : index
    %c272 = arith.constant 272 : index
    %152 = vector.load %arg8[%c0_229, %c0_230, %c272] : memref<1x16x512xf32, #tpu.memory_space<vmem>>, vector<1x16x16xf32>
    tpu.vector_store %arg8[%c0_229, %c0_230, %c272], %151 {strides = array<i32>} : memref<1x16x512xf32, #tpu.memory_space<vmem>>, vector<1x16x16xf32>,
    %c0_231 = arith.constant 0 : index
    %c0_232 = arith.constant 0 : index
    %c2_233 = arith.constant 2 : index
    %c0_234 = arith.constant 0 : index
    %153 = vector.load %arg10[%c0_231, %c0_232, %c2_233, %c0_234] : memref<1x16x16x16xf32, #tpu.memory_space<vmem>>, vector<1x16x1x16xf32>
    %154 = vector.shape_cast %153 : vector<1x16x1x16xf32> to vector<1x16x16xf32>
    %c0_235 = arith.constant 0 : index
    %c0_236 = arith.constant 0 : index
    %c288 = arith.constant 288 : index
    %155 = vector.load %arg8[%c0_235, %c0_236, %c288] : memref<1x16x512xf32, #tpu.memory_space<vmem>>, vector<1x16x16xf32>
    tpu.vector_store %arg8[%c0_235, %c0_236, %c288], %154 {strides = array<i32>} : memref<1x16x512xf32, #tpu.memory_space<vmem>>, vector<1x16x16xf32>,
    %c0_237 = arith.constant 0 : index
    %c0_238 = arith.constant 0 : index
    %c3_239 = arith.constant 3 : index
    %c0_240 = arith.constant 0 : index
    %156 = vector.load %arg10[%c0_237, %c0_238, %c3_239, %c0_240] : memref<1x16x16x16xf32, #tpu.memory_space<vmem>>, vector<1x16x1x16xf32>
    %157 = vector.shape_cast %156 : vector<1x16x1x16xf32> to vector<1x16x16xf32>
    %c0_241 = arith.constant 0 : index
    %c0_242 = arith.constant 0 : index
    %c304 = arith.constant 304 : index
    %158 = vector.load %arg8[%c0_241, %c0_242, %c304] : memref<1x16x512xf32, #tpu.memory_space<vmem>>, vector<1x16x16xf32>
    tpu.vector_store %arg8[%c0_241, %c0_242, %c304], %157 {strides = array<i32>} : memref<1x16x512xf32, #tpu.memory_space<vmem>>, vector<1x16x16xf32>,
    %c0_243 = arith.constant 0 : index
    %c0_244 = arith.constant 0 : index
    %c4_245 = arith.constant 4 : index
    %c0_246 = arith.constant 0 : index
    %159 = vector.load %arg10[%c0_243, %c0_244, %c4_245, %c0_246] : memref<1x16x16x16xf32, #tpu.memory_space<vmem>>, vector<1x16x1x16xf32>
    %160 = vector.shape_cast %159 : vector<1x16x1x16xf32> to vector<1x16x16xf32>
    %c0_247 = arith.constant 0 : index
    %c0_248 = arith.constant 0 : index
    %c320 = arith.constant 320 : index
    %161 = vector.load %arg8[%c0_247, %c0_248, %c320] : memref<1x16x512xf32, #tpu.memory_space<vmem>>, vector<1x16x16xf32>
    tpu.vector_store %arg8[%c0_247, %c0_248, %c320], %160 {strides = array<i32>} : memref<1x16x512xf32, #tpu.memory_space<vmem>>, vector<1x16x16xf32>,
    %c0_249 = arith.constant 0 : index
    %c0_250 = arith.constant 0 : index
    %c5_251 = arith.constant 5 : index
    %c0_252 = arith.constant 0 : index
    %162 = vector.load %arg10[%c0_249, %c0_250, %c5_251, %c0_252] : memref<1x16x16x16xf32, #tpu.memory_space<vmem>>, vector<1x16x1x16xf32>
    %163 = vector.shape_cast %162 : vector<1x16x1x16xf32> to vector<1x16x16xf32>
    %c0_253 = arith.constant 0 : index
    %c0_254 = arith.constant 0 : index
    %c336 = arith.constant 336 : index
    %164 = vector.load %arg8[%c0_253, %c0_254, %c336] : memref<1x16x512xf32, #tpu.memory_space<vmem>>, vector<1x16x16xf32>
    tpu.vector_store %arg8[%c0_253, %c0_254, %c336], %163 {strides = array<i32>} : memref<1x16x512xf32, #tpu.memory_space<vmem>>, vector<1x16x16xf32>,
    %c0_255 = arith.constant 0 : index
    %c0_256 = arith.constant 0 : index
    %c6_257 = arith.constant 6 : index
    %c0_258 = arith.constant 0 : index
    %165 = vector.load %arg10[%c0_255, %c0_256, %c6_257, %c0_258] : memref<1x16x16x16xf32, #tpu.memory_space<vmem>>, vector<1x16x1x16xf32>
    %166 = vector.shape_cast %165 : vector<1x16x1x16xf32> to vector<1x16x16xf32>
    %c0_259 = arith.constant 0 : index
    %c0_260 = arith.constant 0 : index
    %c352 = arith.constant 352 : index
    %167 = vector.load %arg8[%c0_259, %c0_260, %c352] : memref<1x16x512xf32, #tpu.memory_space<vmem>>, vector<1x16x16xf32>
    tpu.vector_store %arg8[%c0_259, %c0_260, %c352], %166 {strides = array<i32>} : memref<1x16x512xf32, #tpu.memory_space<vmem>>, vector<1x16x16xf32>,
    %c0_261 = arith.constant 0 : index
    %c0_262 = arith.constant 0 : index
    %c7_263 = arith.constant 7 : index
    %c0_264 = arith.constant 0 : index
    %168 = vector.load %arg10[%c0_261, %c0_262, %c7_263, %c0_264] : memref<1x16x16x16xf32, #tpu.memory_space<vmem>>, vector<1x16x1x16xf32>
    %169 = vector.shape_cast %168 : vector<1x16x1x16xf32> to vector<1x16x16xf32>
    %c0_265 = arith.constant 0 : index
    %c0_266 = arith.constant 0 : index
    %c368 = arith.constant 368 : index
    %170 = vector.load %arg8[%c0_265, %c0_266, %c368] : memref<1x16x512xf32, #tpu.memory_space<vmem>>, vector<1x16x16xf32>
    tpu.vector_store %arg8[%c0_265, %c0_266, %c368], %169 {strides = array<i32>} : memref<1x16x512xf32, #tpu.memory_space<vmem>>, vector<1x16x16xf32>,
    %c0_267 = arith.constant 0 : index
    %c0_268 = arith.constant 0 : index
    %c8_269 = arith.constant 8 : index
    %c0_270 = arith.constant 0 : index
    %171 = vector.load %arg10[%c0_267, %c0_268, %c8_269, %c0_270] : memref<1x16x16x16xf32, #tpu.memory_space<vmem>>, vector<1x16x1x16xf32>
    %172 = vector.shape_cast %171 : vector<1x16x1x16xf32> to vector<1x16x16xf32>
    %c0_271 = arith.constant 0 : index
    %c0_272 = arith.constant 0 : index
    %c384 = arith.constant 384 : index
    %173 = vector.load %arg8[%c0_271, %c0_272, %c384] : memref<1x16x512xf32, #tpu.memory_space<vmem>>, vector<1x16x16xf32>
    tpu.vector_store %arg8[%c0_271, %c0_272, %c384], %172 {strides = array<i32>} : memref<1x16x512xf32, #tpu.memory_space<vmem>>, vector<1x16x16xf32>,
    %c0_273 = arith.constant 0 : index
    %c0_274 = arith.constant 0 : index
    %c9_275 = arith.constant 9 : index
    %c0_276 = arith.constant 0 : index
    %174 = vector.load %arg10[%c0_273, %c0_274, %c9_275, %c0_276] : memref<1x16x16x16xf32, #tpu.memory_space<vmem>>, vector<1x16x1x16xf32>
    %175 = vector.shape_cast %174 : vector<1x16x1x16xf32> to vector<1x16x16xf32>
    %c0_277 = arith.constant 0 : index
    %c0_278 = arith.constant 0 : index
    %c400 = arith.constant 400 : index
    %176 = vector.load %arg8[%c0_277, %c0_278, %c400] : memref<1x16x512xf32, #tpu.memory_space<vmem>>, vector<1x16x16xf32>
    tpu.vector_store %arg8[%c0_277, %c0_278, %c400], %175 {strides = array<i32>} : memref<1x16x512xf32, #tpu.memory_space<vmem>>, vector<1x16x16xf32>,
    %c0_279 = arith.constant 0 : index
    %c0_280 = arith.constant 0 : index
    %c10_281 = arith.constant 10 : index
    %c0_282 = arith.constant 0 : index
    %177 = vector.load %arg10[%c0_279, %c0_280, %c10_281, %c0_282] : memref<1x16x16x16xf32, #tpu.memory_space<vmem>>, vector<1x16x1x16xf32>
    %178 = vector.shape_cast %177 : vector<1x16x1x16xf32> to vector<1x16x16xf32>
    %c0_283 = arith.constant 0 : index
    %c0_284 = arith.constant 0 : index
    %c416 = arith.constant 416 : index
    %179 = vector.load %arg8[%c0_283, %c0_284, %c416] : memref<1x16x512xf32, #tpu.memory_space<vmem>>, vector<1x16x16xf32>
    tpu.vector_store %arg8[%c0_283, %c0_284, %c416], %178 {strides = array<i32>} : memref<1x16x512xf32, #tpu.memory_space<vmem>>, vector<1x16x16xf32>,
    %c0_285 = arith.constant 0 : index
    %c0_286 = arith.constant 0 : index
    %c11_287 = arith.constant 11 : index
    %c0_288 = arith.constant 0 : index
    %180 = vector.load %arg10[%c0_285, %c0_286, %c11_287, %c0_288] : memref<1x16x16x16xf32, #tpu.memory_space<vmem>>, vector<1x16x1x16xf32>
    %181 = vector.shape_cast %180 : vector<1x16x1x16xf32> to vector<1x16x16xf32>
    %c0_289 = arith.constant 0 : index
    %c0_290 = arith.constant 0 : index
    %c432 = arith.constant 432 : index
    %182 = vector.load %arg8[%c0_289, %c0_290, %c432] : memref<1x16x512xf32, #tpu.memory_space<vmem>>, vector<1x16x16xf32>
    tpu.vector_store %arg8[%c0_289, %c0_290, %c432], %181 {strides = array<i32>} : memref<1x16x512xf32, #tpu.memory_space<vmem>>, vector<1x16x16xf32>,
    %c0_291 = arith.constant 0 : index
    %c0_292 = arith.constant 0 : index
    %c12_293 = arith.constant 12 : index
    %c0_294 = arith.constant 0 : index
    %183 = vector.load %arg10[%c0_291, %c0_292, %c12_293, %c0_294] : memref<1x16x16x16xf32, #tpu.memory_space<vmem>>, vector<1x16x1x16xf32>
    %184 = vector.shape_cast %183 : vector<1x16x1x16xf32> to vector<1x16x16xf32>
    %c0_295 = arith.constant 0 : index
    %c0_296 = arith.constant 0 : index
    %c448 = arith.constant 448 : index
    %185 = vector.load %arg8[%c0_295, %c0_296, %c448] : memref<1x16x512xf32, #tpu.memory_space<vmem>>, vector<1x16x16xf32>
    tpu.vector_store %arg8[%c0_295, %c0_296, %c448], %184 {strides = array<i32>} : memref<1x16x512xf32, #tpu.memory_space<vmem>>, vector<1x16x16xf32>,
    %c0_297 = arith.constant 0 : index
    %c0_298 = arith.constant 0 : index
    %c13_299 = arith.constant 13 : index
    %c0_300 = arith.constant 0 : index
    %186 = vector.load %arg10[%c0_297, %c0_298, %c13_299, %c0_300] : memref<1x16x16x16xf32, #tpu.memory_space<vmem>>, vector<1x16x1x16xf32>
    %187 = vector.shape_cast %186 : vector<1x16x1x16xf32> to vector<1x16x16xf32>
    %c0_301 = arith.constant 0 : index
    %c0_302 = arith.constant 0 : index
    %c464 = arith.constant 464 : index
    %188 = vector.load %arg8[%c0_301, %c0_302, %c464] : memref<1x16x512xf32, #tpu.memory_space<vmem>>, vector<1x16x16xf32>
    tpu.vector_store %arg8[%c0_301, %c0_302, %c464], %187 {strides = array<i32>} : memref<1x16x512xf32, #tpu.memory_space<vmem>>, vector<1x16x16xf32>,
    %c0_303 = arith.constant 0 : index
    %c0_304 = arith.constant 0 : index
    %c14_305 = arith.constant 14 : index
    %c0_306 = arith.constant 0 : index
    %189 = vector.load %arg10[%c0_303, %c0_304, %c14_305, %c0_306] : memref<1x16x16x16xf32, #tpu.memory_space<vmem>>, vector<1x16x1x16xf32>
    %190 = vector.shape_cast %189 : vector<1x16x1x16xf32> to vector<1x16x16xf32>
    %c0_307 = arith.constant 0 : index
    %c0_308 = arith.constant 0 : index
    %c480 = arith.constant 480 : index
    %191 = vector.load %arg8[%c0_307, %c0_308, %c480] : memref<1x16x512xf32, #tpu.memory_space<vmem>>, vector<1x16x16xf32>
    tpu.vector_store %arg8[%c0_307, %c0_308, %c480], %190 {strides = array<i32>} : memref<1x16x512xf32, #tpu.memory_space<vmem>>, vector<1x16x16xf32>,
    %c0_309 = arith.constant 0 : index
    %c0_310 = arith.constant 0 : index
    %c15_311 = arith.constant 15 : index
    %c0_312 = arith.constant 0 : index
    %192 = vector.load %arg10[%c0_309, %c0_310, %c15_311, %c0_312] : memref<1x16x16x16xf32, #tpu.memory_space<vmem>>, vector<1x16x1x16xf32>
    %193 = vector.shape_cast %192 : vector<1x16x1x16xf32> to vector<1x16x16xf32>
    %c0_313 = arith.constant 0 : index
    %c0_314 = arith.constant 0 : index
    %c496 = arith.constant 496 : index
    %194 = vector.load %arg8[%c0_313, %c0_314, %c496] : memref<1x16x512xf32, #tpu.memory_space<vmem>>, vector<1x16x16xf32>
    tpu.vector_store %arg8[%c0_313, %c0_314, %c496], %193 {strides = array<i32>} : memref<1x16x512xf32, #tpu.memory_space<vmem>>, vector<1x16x16xf32>,
    return
  }
  func.func @transform_0(%arg0: i32) -> (i32, i32, i32, i32) {
    %c0_i32 = arith.constant 0 : i32
    %c0_i32_0 = arith.constant 0 : i32
    %c0_i32_1 = arith.constant 0 : i32
    %c0_i32_2 = arith.constant 0 : i32
    return %arg0, %c0_i32, %c0_i32_0, %c0_i32_1 : i32, i32, i32, i32
  }
  func.func @transform_1(%arg0: i32) -> (i32, i32) {
    %c0_i32 = arith.constant 0 : i32
    %c0_i32_0 = arith.constant 0 : i32
    %c0_i32_1 = arith.constant 0 : i32
    return %c0_i32, %c0_i32_0 : i32, i32
  }
  func.func @transform_2(%arg0: i32) -> (i32, i32) {
    %c0_i32 = arith.constant 0 : i32
    %c0_i32_0 = arith.constant 0 : i32
    %c0_i32_1 = arith.constant 0 : i32
    return %c0_i32, %c0_i32_0 : i32, i32
  }
  func.func @transform_3(%arg0: i32) -> (i32, i32, i32) {
    %c0_i32 = arith.constant 0 : i32
    %c0_i32_0 = arith.constant 0 : i32
    %c0_i32_1 = arith.constant 0 : i32
    %c0_i32_2 = arith.constant 0 : i32
    return %c0_i32, %c0_i32_0, %c0_i32_1 : i32, i32, i32
  }
  func.func @transform_4(%arg0: i32) -> (i32, i32) {
    %c0_i32 = arith.constant 0 : i32
    %c0_i32_0 = arith.constant 0 : i32
    %c0_i32_1 = arith.constant 0 : i32
    return %c0_i32, %c0_i32_0 : i32, i32
  }
  func.func @transform_5(%arg0: i32) -> (i32, i32, i32) {
    %c0_i32 = arith.constant 0 : i32
    %c0_i32_0 = arith.constant 0 : i32
    %c0_i32_1 = arith.constant 0 : i32
    %c0_i32_2 = arith.constant 0 : i32
    return %c0_i32, %c0_i32_0, %c0_i32_1 : i32, i32, i32
  }
  func.func @transform_6(%arg0: i32) -> (i32, i32) {
    %c0_i32 = arith.constant 0 : i32
    %c0_i32_0 = arith.constant 0 : i32
    %c0_i32_1 = arith.constant 0 : i32
    return %c0_i32, %c0_i32_0 : i32, i32
  }
  func.func @transform_7(%arg0: i32) -> (i32, i32, i32) {
    %c0_i32 = arith.constant 0 : i32
    %c0_i32_0 = arith.constant 0 : i32
    %c0_i32_1 = arith.constant 0 : i32
    return %arg0, %c0_i32, %c0_i32_0 : i32, i32, i32
  }
}

</mosaic_0001>

<bundles_post_ra>
// kernel: tile.9
= control target key start
LH: loop header
LB: loop body
LE: loop exit
PB: predicated region body
PF: predicated region fallthrough
CT: control target
= control target key end

     0   :  { %vm7_vm0 = vcmask 64512   ;;  %vm13_vm1 = vcmask 130112   ;;  %s39_s0 = inlined_call_operand.vmem [shape: f32[2,8], index: 0, kind: input, shape index: {}]   ;;  %s40_s1 = inlined_call_operand.vmem [shape: f32[1,16], index: 1, kind: output, shape index: {}]  }
   0x1   :  { %v4_v0 = vld [vmem:[%s39_s0] sm:$0x3]  ;;  %s22_s0 = smov 8  }
   0x2   :  { %5 = vst [vmem:[#allocation1] sm:$0x3] %v4_v0 }
   0x9   :  { %v10_v1 = vld [vmem:[#allocation1 + $0x1] sm:$0x1]   ;;  %v6_v2 = vld [vmem:[#allocation1] sm:$0x1]  }
   0xa   :  { %11 = vrot.lane.b32.xlu0 %v10_v1, %s22_s0  ;;  %8 = vst.msk [vmem:[#allocation0] sm:$0x1] %vm7_vm0, %v6_v2  }
  0x7c   :  { %v12_v3 = vpop.permute.xlu0 %11  }
  0x7d   :  { %14 = vst.msk [vmem:[#allocation0] sm:$0x1] %vm13_vm1, %v12_v3  }
  0x84   :  { %v17_v4 = vld [vmem:[#allocation0] sm:$0x1] }
  0x85   :  { %20 = vst [vmem:[%s40_s1] sm:$0x1] %v17_v4 }

// kernel: tile.8
= control target key start
LH: loop header
LB: loop body
LE: loop exit
PB: predicated region body
PF: predicated region fallthrough
CT: control target
= control target key end

     0   :  { %2 = vsyncpa [#allocation1], 0  ;;  %s48_s8 = smov [#allocation0]   ;;  %s65_s0 = inlined_call_operand.hbm [shape: f32[8], index: 0, kind: input, shape index: {}]   ;;  %s66_s1 = inlined_call_operand.vmem [shape: f32[2,8], index: 1, kind: output, shape index: {}]  }
   0x1   :  { %s8_s0 = sshll.u32 %s65_s0, 4  ;;  %s10_s9 = sshll.u32 %s48_s8, 4  ;;  %s9_s0 = int_to_ptr.hbm [resolvable:$true] %s8_s0  ;;  %s11_s9 = int_to_ptr.vmem [resolvable:$true] %s10_s9 }
   0x2   :  { %13 = dma.hbm_to_vmem [thread:$0]  %s9_s0, 16, %s11_s9, [#allocation1]  }
   0x3   :  { %46 = dma.done.wait [#allocation1], 16  }
   0x4   :  { %47 = vsyncadd [#allocation1], 4294967280  ;;  %v18_v0 = vld [vmem:[#allocation0] ss:$0 sm:$0xff] }
   0x5   :  { %19 = vst [vmem:[%s66_s1] sm:$0x3] %v18_v0 }
   0x6   :  { %20 = vsyncpa [#allocation1], 1 }

// kernel: largefield_upsample_connection.1
= control target key start
LH: loop header
LB: loop body
LE: loop exit
PB: predicated region body
PF: predicated region fallthrough
CT: control target
= control target key end

     0   :  { %s5216_s24 = smov 0   ;;  %s7665_s0 = inlined_call_operand.vmem [shape: bf16[2,16,16,16], index: 0, kind: input, shape index: {}]   ;;  %s7666_s1 = inlined_call_operand.vmem [shape: bf16[16,8], index: 1, kind: input, shape index: {}]   ;;  %s7667_s2 = inlined_call_operand.vmem [shape: f32[1,8], index: 2, kind: input, shape index: {}]   ;;  %s7668_s3 = inlined_call_operand.vmem [shape: bf16[9,8,8], index: 3, kind: input, shape index: {}]   ;;  %s7669_s4 = inlined_call_operand.vmem [shape: f32[1,8], index: 4, kind: input, shape index: {}]   ;;  %s7670_s5 = inlined_call_operand.vmem [shape: bf16[2,8,16], index: 5, kind: input, shape index: {}]   ;;  %s7671_s6 = inlined_call_operand.vmem [shape: f32[1,16], index: 6, kind: input, shape index: {}]   ;;  %s7672_s7 = inlined_call_operand.vmem [shape: f32[2,16,512], index: 7, kind: output, shape index: {}]  }
   0x1 LB: > { %s4840_s25 = sadd.s32 4294967295, %s5167_s24   ;;  %p4844_p0 = scmp.ge.s32.totalorder %s5167_s24, 1  ;;  %s5167_s24 = sphi %s5216_s24, %s17_s24  }
   0x2   : > { %p237_p1 = scmp.lt.s32.totalorder %s5167_s24, 3 }
   0x4   : > { %p238_p2 = pnand %p4844_p0, %p237_p1 }
   0x6   : > { %241 = sbr.rel (%p238_p2) target bundleno = 1524 (0x5f4), region = 48 }
   0xb   : > { %v5138_v0 = vld [vmem:[%s7666_s1] sm:$0xff]  ;;  %p269_p3 = scmp.lt.s32.totalorder %s4840_s25, 1  ;;  %vm404_vm0 = vcmask 130048   ;;  %vm609_vm1 = vcmask 1043456   ;;  %v4983_v8 = vld [vmem:[%s7668_s3 + $0x8] sm:$0xf] }
   0xc   : > { %460 = vmatpush.bf16.msra.mxu0 %v5138_v0  ;;  %v1022_v9 = vsel %vm609_vm1, %v4983_v8, 0  ;;  %v4933_v10 = vld [vmem:[%s7668_s3 + $0x10] sm:$0xf]  ;;  %v734_v11 = vld [vmem:[%s7668_s3] sm:$0xf]  ;;  %vm560_vm2 = vcmask 64512  }
   0xd   : > { %s7752_s25 = smov (!%p269_p3, %s4840_s25), 1  ;;  %v4966_v12 = vld [vmem:[%s7668_s3 + $0x4] sm:$0xf]  ;;  %v611_v13 = vsel %vm609_vm1, %v4933_v10, 0  ;;  %v736_v14 = vsel %vm609_vm1, %v734_v11, 0  ;;  %vm857_vm3 = vcmask 58368  }
   0xe   : > { %s5120_s28 = sshll.u32 %s7752_s25, 7  ;;  %v880_v15 = vsel %vm609_vm1, %v4966_v12, 0  ;;  %620 = vmatpush.bf16.msra.mxu1 %v611_v13  ;;  %745 = vmatpush.bf16.msra.mxu2 %v736_v14  ;;  %v5000_v16 = vld [vmem:[%s7668_s3 + $0xc] sm:$0xf]  ;;  %v5276_v21 = vld [vmem:[%s7667_s2] ss:$0 sm:$0xff] }
   0xf   : > { %s5233_s8 = scalar_lea.vmem %s7665_s0, %s5120_s28  ;;  %889 = vmatpush.bf16.msra.mxu3 %v880_v15  ;;  %v1235_v18 = vsel %vm609_vm1, %v5000_v16, 0  ;;  %vm1141_vm4 = vcmask 1041408   ;;  %vm2514_vm5 = vcmask 1041409   ;;  %vm2517_vm6 = vcmask 1042434   ;;  %s5169_s18 = smov 48  }
  0x10   : > { %v5122_v1 = vld [vmem:[%s5233_s8] sm:$0xff]  ;;  %v5123_v2 = vld [vmem:[%s5233_s8 + $0x8] sm:$0xff]  ;;  %v5124_v3 = vld [vmem:[%s5233_s8 + $0x10] sm:$0xff]  ;;  %1031 = vmatpush.bf16.msrb.mxu0 %v1022_v9  ;;  %vm2520_vm7 = vcmask 1043459   ;;  %vm2523_vm8 = vcmask 1044484   ;;  %vm2526_vm9 = vcmask 1045509  }
  0x11   : > { %4917 = vmatmul.msk.bf16.vlgmr.msra.gmra.mxu0 %vm404_vm0, %v5122_v1  ;;  %v5125_v4 = vld [vmem:[%s5233_s8 + $0x18] sm:$0xff]  ;;  %v5126_v5 = vld [vmem:[%s5233_s8 + $0x20] sm:$0xff]  ;;  %v5127_v6 = vld [vmem:[%s5233_s8 + $0x28] sm:$0xff]  ;;  %vm2529_vm10 = vcmask 1046534   ;;  %vm2532_vm11 = vcmask 1047559   ;;  %s5170_s19 = smov 32  }
  0x12   : > { %v5128_v7 = vld [vmem:[%s5233_s8 + $0x30] sm:$0xff]  ;;  %v5129_v17 = vld [vmem:[%s5233_s8 + $0x38] sm:$0xff]  ;;  %1244 = vmatpush.bf16.msrb.mxu1 %v1235_v18  ;;  %v5130_v19 = vld [vmem:[%s5233_s8 + $0x40] sm:$0xff]  ;;  %s5171_s20 = smov 16   ;;  %s5172_s21 = smov 80   ;;  %vm2618_vm12 = vcmask 261248  }
  0x13   : > { %v5131_v26 = vld [vmem:[%s5233_s8 + $0x48] sm:$0xff]  ;;  %v5132_v32 = vld [vmem:[%s5233_s8 + $0x50] sm:$0xff]  ;;  %v5133_v38 = vld [vmem:[%s5233_s8 + $0x58] sm:$0xff]  ;;  %s5173_s22 = smov 96   ;;  %s5174_s23 = smov 64   ;;  %vm2687_vm13 = vcmask 392448  }
  0x14   : > { %v5134_v44 = vld [vmem:[%s5233_s8 + $0x60] sm:$0xff]  ;;  %v5135_v50 = vld [vmem:[%s5233_s8 + $0x68] sm:$0xff]  ;;  %v5136_v56 = vld [vmem:[%s5233_s8 + $0x70] sm:$0xff]  ;;  %s5175_s28 = smov 112   ;;  %s5121_s29 = sshll.u32 %s7752_s25, 6  ;;  %vm2756_vm14 = vcmask 523648  }
  0x15   : > { %v5137_v62 = vld [vmem:[%s5233_s8 + $0x78] sm:$0xff]  ;;  %s6900_s25 = scalar_lea.vmem %s7672_s7, %s5121_s29  ;;  %vm2825_vm15 = vcmask 654848  }
  0x21   : > { %4918 = vmatmul.msk.bf16.gmra.mxu0 %vm404_vm0, %v5123_v2 }
  0x31   : > { %4919 = vmatmul.msk.bf16.gmra.mxu0 %vm404_vm0, %v5124_v3 }
  0x41   : > { %4920 = vmatmul.msk.bf16.gmra.mxu0 %vm404_vm0, %v5125_v4 }
  0x51   : > { %4921 = vmatmul.msk.bf16.gmra.mxu0 %vm404_vm0, %v5126_v5 }
  0x61   : > { %4922 = vmatmul.msk.bf16.gmra.mxu0 %vm404_vm0, %v5127_v6 }
  0x71   : > { %4923 = vmatmul.msk.bf16.gmra.mxu0 %vm404_vm0, %v5128_v7 }
  0x81   : > { %4924 = vmatmul.msk.bf16.gmra.mxu0 %vm404_vm0, %v5129_v17 }
  0x8e   : > { %v462_v20 = vpop.f32.mrf.mxu0 }
  0x8f   : > { %v463_v23 = vadd.f32 %v5276_v21, %v462_v20 }
  0x91   : > { %4925 = vmatmul.msk.bf16.gmra.mxu0 %vm404_vm0, %v5130_v19 }
  0x96   : > { %v464_v22 = vpop.f32.mrf.mxu0 }
  0x97   : > { %v465_v24 = vadd.f32 %v5276_v21, %v464_v22 }
  0x99   : > { %v5280_v25 = vpack.c.bf16 %v465_v24, %v463_v23 }
  0x9b   : > { %4934 = vmatmul.msk.bf16.vlgmr.msra.gmra.mxu1 %vm560_vm2, %v5280_v25  ;;  %4950 = vmatmul.msk.bf16.vlgmr.msra.gmra.mxu2 %vm560_vm2, %v5280_v25 }
  0x9c   : > { %4967 = vmatmul.msk.bf16.vlgmr.msra.gmra.mxu3 %vm560_vm2, %v5280_v25 }
  0x9e   : > { %v467_v27 = vpop.f32.mrf.mxu0 }
  0x9f   : > { %v468_v29 = vadd.f32 %v5276_v21, %v467_v27 }
  0xa1   : > { %4926 = vmatmul.msk.bf16.gmra.mxu0 %vm404_vm0, %v5131_v26 }
  0xa6   : > { %v469_v28 = vpop.f32.mrf.mxu0 }
  0xa7   : > { %v470_v30 = vadd.f32 %v5276_v21, %v469_v28 }
  0xa9   : > { %v5292_v31 = vpack.c.bf16 %v470_v30, %v468_v29 }
  0xab   : > { %4935 = vmatmul.msk.bf16.gmra.mxu1 %vm560_vm2, %v5292_v31  ;;  %4951 = vmatmul.msk.bf16.gmra.mxu2 %vm560_vm2, %v5292_v31 }
  0xac   : > { %4968 = vmatmul.msk.bf16.gmra.mxu3 %vm560_vm2, %v5292_v31 }
  0xae   : > { %v472_v33 = vpop.f32.mrf.mxu0 }
  0xaf   : > { %v473_v35 = vadd.f32 %v5276_v21, %v472_v33 }
  0xb1   : > { %4927 = vmatmul.msk.bf16.gmra.mxu0 %vm404_vm0, %v5132_v32 }
  0xb6   : > { %v474_v34 = vpop.f32.mrf.mxu0 }
  0xb7   : > { %v475_v36 = vadd.f32 %v5276_v21, %v474_v34 }
  0xb9   : > { %v5304_v37 = vpack.c.bf16 %v475_v36, %v473_v35 }
  0xbb   : > { %4936 = vmatmul.msk.bf16.gmra.mxu1 %vm560_vm2, %v5304_v37  ;;  %4952 = vmatmul.msk.bf16.gmra.mxu2 %vm560_vm2, %v5304_v37 }
  0xbc   : > { %4969 = vmatmul.msk.bf16.gmra.mxu3 %vm560_vm2, %v5304_v37 }
  0xbe   : > { %v477_v39 = vpop.f32.mrf.mxu0 }
  0xbf   : > { %v478_v41 = vadd.f32 %v5276_v21, %v477_v39 }
  0xc1   : > { %4928 = vmatmul.msk.bf16.gmra.mxu0 %vm404_vm0, %v5133_v38 }
  0xc6   : > { %v479_v40 = vpop.f32.mrf.mxu0 }
  0xc7   : > { %v480_v42 = vadd.f32 %v5276_v21, %v479_v40 }
  0xc9   : > { %v5316_v43 = vpack.c.bf16 %v480_v42, %v478_v41 }
  0xcb   : > { %4937 = vmatmul.msk.bf16.gmra.mxu1 %vm560_vm2, %v5316_v43  ;;  %4953 = vmatmul.msk.bf16.gmra.mxu2 %vm560_vm2, %v5316_v43 }
  0xcc   : > { %4970 = vmatmul.msk.bf16.gmra.mxu3 %vm560_vm2, %v5316_v43 }
  0xce   : > { %v482_v45 = vpop.f32.mrf.mxu0 }
  0xcf   : > { %v483_v47 = vadd.f32 %v5276_v21, %v482_v45 }
  0xd1   : > { %4929 = vmatmul.msk.bf16.gmra.mxu0 %vm404_vm0, %v5134_v44 }
  0xd6   : > { %v484_v46 = vpop.f32.mrf.mxu0 }
  0xd7   : > { %v485_v48 = vadd.f32 %v5276_v21, %v484_v46 }
  0xd9   : > { %v5328_v49 = vpack.c.bf16 %v485_v48, %v483_v47 }
  0xdb   : > { %4938 = vmatmul.msk.bf16.gmra.mxu1 %vm560_vm2, %v5328_v49  ;;  %4954 = vmatmul.msk.bf16.gmra.mxu2 %vm560_vm2, %v5328_v49 }
  0xdc   : > { %4971 = vmatmul.msk.bf16.gmra.mxu3 %vm560_vm2, %v5328_v49 }
  0xde   : > { %v487_v51 = vpop.f32.mrf.mxu0 }
  0xdf   : > { %v488_v53 = vadd.f32 %v5276_v21, %v487_v51 }
  0xe1   : > { %4930 = vmatmul.msk.bf16.gmra.mxu0 %vm404_vm0, %v5135_v50 }
  0xe6   : > { %v489_v52 = vpop.f32.mrf.mxu0 }
  0xe7   : > { %v490_v54 = vadd.f32 %v5276_v21, %v489_v52 }
  0xe9   : > { %v5340_v55 = vpack.c.bf16 %v490_v54, %v488_v53 }
  0xeb   : > { %4939 = vmatmul.msk.bf16.gmra.mxu1 %vm560_vm2, %v5340_v55  ;;  %4955 = vmatmul.msk.bf16.gmra.mxu2 %vm560_vm2, %v5340_v55 }
  0xec   : > { %4972 = vmatmul.msk.bf16.gmra.mxu3 %vm560_vm2, %v5340_v55 }
  0xee   : > { %v492_v57 = vpop.f32.mrf.mxu0 }
  0xef   : > { %v493_v59 = vadd.f32 %v5276_v21, %v492_v57 }
  0xf1   : > { %4931 = vmatmul.msk.bf16.gmra.mxu0 %vm404_vm0, %v5136_v56 }
  0xf6   : > { %v494_v58 = vpop.f32.mrf.mxu0 }
  0xf7   : > { %v495_v60 = vadd.f32 %v5276_v21, %v494_v58 }
  0xf9   : > { %v5352_v61 = vpack.c.bf16 %v495_v60, %v493_v59 }
  0xfb   : > { %4940 = vmatmul.msk.bf16.gmra.mxu1 %vm560_vm2, %v5352_v61  ;;  %4956 = vmatmul.msk.bf16.gmra.mxu2 %vm560_vm2, %v5352_v61 }
  0xfc   : > { %4973 = vmatmul.msk.bf16.gmra.mxu3 %vm560_vm2, %v5352_v61 }
  0xfe   : > { %v497_v63 = vpop.f32.mrf.mxu0 }
  0xff   : > { %v498_v1 = vadd.f32 %v5276_v21, %v497_v63 }
 0x101   : > { %4932 = vmatmul.msk.bf16.gmra.mxu0 %vm404_vm0, %v5137_v62 }
 0x106   : > { %v499_v0 = vpop.f32.mrf.mxu0 }
 0x107   : > { %v500_v2 = vadd.f32 %v5276_v21, %v499_v0 }
 0x109   : > { %v5364_v3 = vpack.c.bf16 %v500_v2, %v498_v1 }
 0x10b   : > { %4941 = vmatmul.msk.bf16.gmra.mxu1 %vm560_vm2, %v5364_v3  ;;  %4957 = vmatmul.msk.bf16.gmra.mxu2 %vm560_vm2, %v5364_v3 }
 0x10c   : > { %4974 = vmatmul.msk.bf16.gmra.mxu3 %vm560_vm2, %v5364_v3 }
 0x10e   : > { %v502_v4 = vpop.f32.mrf.mxu0 }
 0x10f   : > { %v503_v6 = vadd.f32 %v5276_v21, %v502_v4 }
 0x111   : > { %4984 = vmatmul.msk.bf16.vlgmr.msrb.gmra.mxu0 %vm560_vm2, %v5280_v25 }
 0x116   : > { %v504_v5 = vpop.f32.mrf.mxu0 }
 0x117   : > { %v505_v7 = vadd.f32 %v5276_v21, %v504_v5 }
 0x118   : > { %v622_v8 = vpop.f32.mrf.mxu1 }
 0x119   : > { %v5376_v9 = vpack.c.bf16 %v505_v7, %v503_v6  ;;  %702 = vst.msk [vmem:[#allocation2] sm:$0xff] %vm560_vm2, %v622_v8 }
 0x11b   : > { %4942 = vmatmul.msk.bf16.gmra.mxu1 %vm560_vm2, %v5376_v9  ;;  %4958 = vmatmul.msk.bf16.gmra.mxu2 %vm560_vm2, %v5376_v9 }
 0x11c   : > { %4975 = vmatmul.msk.bf16.gmra.mxu3 %vm560_vm2, %v5376_v9 }
 0x11e   : > { %v507_v10 = vpop.f32.mrf.mxu0  ;;  %v5385_v11 = vpop.f32.mrf.mxu2 }
 0x11f   : > { %v5387_v12 = vpop.f32.mrf.mxu3  ;;  %v508_v16 = vadd.f32 %v5276_v21, %v507_v10 }
 0x120   : > { %v624_v13 = vpop.f32.mrf.mxu1 }
 0x121   : > { %703 = vst.msk [vmem:[#allocation2 + $0x8] sm:$0xff] %vm560_vm2, %v624_v13  ;;  %4985 = vmatmul.msk.bf16.gmra.mxu0 %vm560_vm2, %v5292_v31 }
 0x126   : > { %v509_v14 = vpop.f32.mrf.mxu0  ;;  %v5392_v15 = vpop.f32.mrf.mxu2 }
 0x127   : > { %v510_v17 = vadd.f32 %v5276_v21, %v509_v14  ;;  %v5396_v18 = vpop.f32.mrf.mxu3 }
 0x128   : > { %v627_v19 = vpop.f32.mrf.mxu1 }
 0x129   : > { %v5398_v20 = vpack.c.bf16 %v510_v17, %v508_v16  ;;  %704 = vst.msk [vmem:[#allocation2 + $0x10] sm:$0xff] %vm560_vm2, %v627_v19 }
 0x12b   : > { %4943 = vmatmul.msk.bf16.gmra.mxu1 %vm560_vm2, %v5398_v20  ;;  %4959 = vmatmul.msk.bf16.gmra.mxu2 %vm560_vm2, %v5398_v20 }
 0x12c   : > { %4976 = vmatmul.msk.bf16.gmra.mxu3 %vm560_vm2, %v5398_v20 }
 0x12e   : > { %v512_v22 = vpop.f32.mrf.mxu0  ;;  %v5407_v23 = vpop.f32.mrf.mxu2 }
 0x12f   : > { %v5409_v24 = vpop.f32.mrf.mxu3  ;;  %v513_v29 = vadd.f32 %v5276_v21, %v512_v22 }
 0x130   : > { %v629_v26 = vpop.f32.mrf.mxu1 }
 0x131   : > { %705 = vst.msk [vmem:[#allocation2 + $0x18] sm:$0xff] %vm560_vm2, %v629_v26  ;;  %4986 = vmatmul.msk.bf16.gmra.mxu0 %vm560_vm2, %v5304_v37  ;;  %v5034_v26 = vld [vmem:[%s7668_s3 + $0x18] sm:$0xf] }
 0x136   : > { %v514_v27 = vpop.f32.mrf.mxu0  ;;  %v5414_v28 = vpop.f32.mrf.mxu2 }
 0x137   : > { %v515_v30 = vadd.f32 %v5276_v21, %v514_v27  ;;  %v5418_v32 = vpop.f32.mrf.mxu3 }
 0x138   : > { %v632_v33 = vpop.f32.mrf.mxu1 }
 0x139   : > { %v5420_v34 = vpack.c.bf16 %v515_v30, %v513_v29  ;;  %706 = vst.msk [vmem:[#allocation2 + $0x20] sm:$0xff] %vm560_vm2, %v632_v33  ;;  %v1727_v33 = vsel %vm609_vm1, %v5034_v26, 0 }
 0x13a   : > { %1736 = vmatpush.bf16.msrb.mxu3 %v1727_v33 }
 0x13b   : > { %4944 = vmatmul.msk.bf16.gmra.mxu1 %vm560_vm2, %v5420_v34  ;;  %4960 = vmatmul.msk.bf16.gmra.mxu2 %vm560_vm2, %v5420_v34 }
 0x13c   : > { %4977 = vmatmul.msk.bf16.gmra.mxu3 %vm560_vm2, %v5420_v34 }
 0x13e   : > { %v517_v35 = vpop.f32.mrf.mxu0  ;;  %v5429_v36 = vpop.f32.mrf.mxu2 }
 0x13f   : > { %v5431_v38 = vpop.f32.mrf.mxu3  ;;  %v518_v42 = vadd.f32 %v5276_v21, %v517_v35  ;;  %v5017_v35 = vld [vmem:[%s7668_s3 + $0x14] sm:$0xf] }
 0x140   : > { %v634_v39 = vpop.f32.mrf.mxu1 }
 0x141   : > { %707 = vst.msk [vmem:[#allocation2 + $0x28] sm:$0xff] %vm560_vm2, %v634_v39  ;;  %4987 = vmatmul.msk.bf16.gmra.mxu0 %vm560_vm2, %v5316_v43 }
 0x146   : > { %v519_v40 = vpop.f32.mrf.mxu0  ;;  %v5436_v41 = vpop.f32.mrf.mxu2 }
 0x147   : > { %v520_v44 = vadd.f32 %v5276_v21, %v519_v40  ;;  %v5440_v45 = vpop.f32.mrf.mxu3  ;;  %v1425_v40 = vsel %vm609_vm1, %v5017_v35, 0 }
 0x148   : > { %v637_v46 = vpop.f32.mrf.mxu1  ;;  %1434 = vmatpush.bf16.msrb.mxu2 %v1425_v40 }
 0x149   : > { %v5442_v47 = vpack.c.bf16 %v520_v44, %v518_v42  ;;  %708 = vst.msk [vmem:[#allocation2 + $0x30] sm:$0xff] %vm560_vm2, %v637_v46 }
 0x14b   : > { %4945 = vmatmul.msk.bf16.gmra.mxu1 %vm560_vm2, %v5442_v47  ;;  %4961 = vmatmul.msk.bf16.gmra.mxu2 %vm560_vm2, %v5442_v47 }
 0x14c   : > { %4978 = vmatmul.msk.bf16.gmra.mxu3 %vm560_vm2, %v5442_v47 }
 0x14e   : > { %v522_v48 = vpop.f32.mrf.mxu0  ;;  %v5451_v50 = vpop.f32.mrf.mxu2 }
 0x14f   : > { %v5453_v51 = vpop.f32.mrf.mxu3  ;;  %v523_v56 = vadd.f32 %v5276_v21, %v522_v48 }
 0x150   : > { %v639_v52 = vpop.f32.mrf.mxu1 }
 0x151   : > { %709 = vst.msk [vmem:[#allocation2 + $0x38] sm:$0xff] %vm560_vm2, %v639_v52  ;;  %4988 = vmatmul.msk.bf16.gmra.mxu0 %vm560_vm2, %v5328_v49 }
 0x156   : > { %v524_v53 = vpop.f32.mrf.mxu0  ;;  %v5458_v54 = vpop.f32.mrf.mxu2 }
 0x157   : > { %v525_v57 = vadd.f32 %v5276_v21, %v524_v53  ;;  %v5462_v58 = vpop.f32.mrf.mxu3 }
 0x158   : > { %v642_v59 = vpop.f32.mrf.mxu1 }
 0x159   : > { %v5464_v60 = vpack.c.bf16 %v525_v57, %v523_v56  ;;  %710 = vst.msk [vmem:[#allocation2 + $0x40] sm:$0xff] %vm560_vm2, %v642_v59  ;;  %v5051_v57 = vld [vmem:[%s7668_s3 + $0x1c] sm:$0xf]  ;;  %v5068_v59 = vld [vmem:[%s7668_s3 + $0x20] sm:$0xf] }
 0x15b   : > { %4946 = vmatmul.msk.bf16.gmra.mxu1 %vm560_vm2, %v5464_v60  ;;  %4962 = vmatmul.msk.bf16.gmra.mxu2 %vm560_vm2, %v5464_v60 }
 0x15c   : > { %4979 = vmatmul.msk.bf16.gmra.mxu3 %vm560_vm2, %v5464_v60 }
 0x15e   : > { %v527_v62 = vpop.f32.mrf.mxu0  ;;  %v5473_v63 = vpop.f32.mrf.mxu2 }
 0x15f   : > { %v5475_v0 = vpop.f32.mrf.mxu3  ;;  %v528_v5 = vadd.f32 %v5276_v21, %v527_v62 }
 0x160   : > { %v644_v1 = vpop.f32.mrf.mxu1 }
 0x161   : > { %711 = vst.msk [vmem:[#allocation2 + $0x48] sm:$0xff] %vm560_vm2, %v644_v1  ;;  %4989 = vmatmul.msk.bf16.gmra.mxu0 %vm560_vm2, %v5340_v55 }
 0x166   : > { %v529_v2 = vpop.f32.mrf.mxu0  ;;  %v5480_v4 = vpop.f32.mrf.mxu2 }
 0x167   : > { %v530_v6 = vadd.f32 %v5276_v21, %v529_v2  ;;  %v5484_v7 = vpop.f32.mrf.mxu3 }
 0x168   : > { %v647_v8 = vpop.f32.mrf.mxu1 }
 0x169   : > { %v5486_v10 = vpack.c.bf16 %v530_v6, %v528_v5  ;;  %712 = vst.msk [vmem:[#allocation2 + $0x50] sm:$0xff] %vm560_vm2, %v647_v8  ;;  %v1869_v5 = vsel %vm609_vm1, %v5051_v57, 0  ;;  %v2011_v6 = vsel %vm609_vm1, %v5068_v59, 0 }
 0x16a   : > { %1878 = vmatpush.bf16.msra.mxu0 %v1869_v5  ;;  %2020 = vmatpush.bf16.msra.mxu1 %v2011_v6 }
 0x16b   : > { %4947 = vmatmul.msk.bf16.gmra.mxu1 %vm560_vm2, %v5486_v10  ;;  %4963 = vmatmul.msk.bf16.gmra.mxu2 %vm560_vm2, %v5486_v10 }
 0x16c   : > { %4980 = vmatmul.msk.bf16.gmra.mxu3 %vm560_vm2, %v5486_v10 }
 0x16e   : > { %v532_v13 = vpop.f32.mrf.mxu0  ;;  %v5495_v14 = vpop.f32.mrf.mxu2 }
 0x16f   : > { %v5497_v16 = vpop.f32.mrf.mxu3  ;;  %v533_v27 = vadd.f32 %v5276_v21, %v532_v13 }
 0x170   : > { %v649_v17 = vpop.f32.mrf.mxu1 }
 0x171   : > { %713 = vst.msk [vmem:[#allocation2 + $0x58] sm:$0xff] %vm560_vm2, %v649_v17  ;;  %4990 = vmatmul.msk.bf16.gmra.mxu0 %vm560_vm2, %v5352_v61 }
 0x176   : > { %v534_v19 = vpop.f32.mrf.mxu0  ;;  %v5502_v22 = vpop.f32.mrf.mxu2 }
 0x177   : > { %v535_v29 = vadd.f32 %v5276_v21, %v534_v19  ;;  %v5509_v30 = vpop.f32.mrf.mxu3 }
 0x178   : > { %v652_v39 = vpop.f32.mrf.mxu1 }
 0x179   : > { %v5516_v42 = vpack.c.bf16 %v535_v29, %v533_v27  ;;  %714 = vst.msk [vmem:[#allocation2 + $0x60] sm:$0xff] %vm560_vm2, %v652_v39 }
 0x17b   : > { %4948 = vmatmul.msk.bf16.gmra.mxu1 %vm560_vm2, %v5516_v42  ;;  %4964 = vmatmul.msk.bf16.gmra.mxu2 %vm560_vm2, %v5516_v42 }
 0x17c   : > { %4981 = vmatmul.msk.bf16.gmra.mxu3 %vm560_vm2, %v5516_v42 }
 0x17e   : > { %v537_v44 = vpop.f32.mrf.mxu0  ;;  %v5525_v46 = vpop.f32.mrf.mxu2 }
 0x17f   : > { %v5527_v48 = vpop.f32.mrf.mxu3  ;;  %v538_v62 = vadd.f32 %v5276_v21, %v537_v44 }
 0x180   : > { %v654_v52 = vpop.f32.mrf.mxu1 }
 0x181   : > { %715 = vst.msk [vmem:[#allocation2 + $0x68] sm:$0xff] %vm560_vm2, %v654_v52  ;;  %4991 = vmatmul.msk.bf16.gmra.mxu0 %vm560_vm2, %v5364_v3 }
 0x186   : > { %v539_v53 = vpop.f32.mrf.mxu0  ;;  %v5532_v56 = vpop.f32.mrf.mxu2 }
 0x187   : > { %v540_v1 = vadd.f32 %v5276_v21, %v539_v53  ;;  %v5542_v2 = vpop.f32.mrf.mxu3 }
 0x188   : > { %v816_v8 = vld [vmem:[#allocation2 + $0x66] sm:$0xff]  ;;  %v817_v13 = vld [vmem:[#allocation2 + $0x6e] sm:$0x3]  ;;  %v657_v17 = vpop.f32.mrf.mxu1 }
 0x189   : > { %v836_v19 = vadd.f32 %v816_v8, %v5385_v11  ;;  %v837_v26 = vadd.f32 %v817_v13, %v5392_v15  ;;  %v5548_v27 = vpack.c.bf16 %v540_v1, %v538_v62  ;;  %716 = vst.msk [vmem:[#allocation2 + $0x70] sm:$0xff] %vm560_vm2, %v657_v17 }
 0x18b   : > { %856 = vst.msk [vmem:[#allocation2 + $0x66] sm:$0xff] %vm560_vm2, %v836_v19  ;;  %4949 = vmatmul.msk.bf16.gmra.mxu1 %vm560_vm2, %v5548_v27  ;;  %4965 = vmatmul.msk.bf16.gmra.mxu2 %vm560_vm2, %v5548_v27 }
 0x18c   : > { %858 = vst.msk [vmem:[#allocation2 + $0x6e] sm:$0x3] %vm857_vm3, %v837_v26  ;;  %4982 = vmatmul.msk.bf16.gmra.mxu3 %vm560_vm2, %v5548_v27 }
 0x18e   : > { %v5559_v21 = vpop.f32.mrf.mxu2  ;;  %v1033_v11 = vpop.f32.mrf.mxu0 }
 0x18f   : > { %v5561_v15 = vpop.f32.mrf.mxu3 }
 0x190   : > { %v659_v29 = vpop.f32.mrf.mxu1 }
 0x191   : > { %717 = vst.msk [vmem:[#allocation2 + $0x78] sm:$0xff] %vm560_vm2, %v659_v29  ;;  %4992 = vmatmul.msk.bf16.gmra.mxu0 %vm560_vm2, %v5376_v9 }
 0x192   : > { %v959_v33 = vld [vmem:[#allocation2 + $0x60] sm:$0xff] }
 0x193   : > { %v960_v35 = vld [vmem:[#allocation2 + $0x68] sm:$0xff]  ;;  %v979_v39 = vadd.f32 %v959_v33, %v5387_v12  ;;  %v1142_v12 = vrot.slane %v1033_v11, 6 }
 0x194   : > { %v980_v40 = vadd.f32 %v960_v35, %v5396_v18 }
 0x195   : > { %999 = vst.msk [vmem:[#allocation2 + $0x60] sm:$0xff] %vm560_vm2, %v979_v39 }
 0x196   : > { %1000 = vst.msk [vmem:[#allocation2 + $0x68] sm:$0xff] %vm560_vm2, %v980_v40  ;;  %v5570_v44 = vpop.f32.mrf.mxu2  ;;  %v1035_v52 = vpop.f32.mrf.mxu0 }
 0x197   : > { %v5572_v53 = vpop.f32.mrf.mxu3  ;;  %v1143_v62 = vrot.slane %v1035_v52, 6 }
 0x198   : > { %v818_v57 = vld [vmem:[#allocation2 + $0x76] sm:$0xff]  ;;  %v819_v59 = vld [vmem:[#allocation2 + $0x7e] sm:$0x3]  ;;  %v662_v1 = vpop.f32.mrf.mxu1 }
 0x199   : > { %v838_v5 = vadd.f32 %v818_v57, %v5407_v23  ;;  %v839_v6 = vadd.f32 %v819_v59, %v5414_v28  ;;  %718 = vst.msk [vmem:[#allocation2 + $0x80] sm:$0xff] %vm560_vm2, %v662_v1  ;;  %v1144_v8 = vsel %vm1141_vm4, %v1142_v12, %v1143_v62 }
 0x19b   : > { %859 = vst.msk [vmem:[#allocation2 + $0x76] sm:$0xff] %vm560_vm2, %v838_v5  ;;  %5001 = vmatmul.msk.bf16.vlgmr.msrb.gmra.mxu1 %vm560_vm2, %v5280_v25  ;;  %5018 = vmatmul.msk.bf16.vlgmr.msrb.gmra.mxu2 %vm560_vm2, %v5280_v25 }
 0x19c   : > { %860 = vst.msk [vmem:[#allocation2 + $0x7e] sm:$0x3] %vm857_vm3, %v839_v6  ;;  %v1101_v18 = vld [vmem:[#allocation2 + $0x60] sm:$0xff]  ;;  %5035 = vmatmul.msk.bf16.vlgmr.msrb.gmra.mxu3 %vm560_vm2, %v5280_v25 }
 0x19d   : > { %v1102_v23 = vld [vmem:[#allocation2 + $0x68] sm:$0x3]  ;;  %v1192_v28 = vadd.f32 %v1144_v8, %v1101_v18 }
 0x19e   : > { %v1193_v13 = vadd.f32 %v1143_v62, %v1102_v23  ;;  %v5586_v17 = vpop.f32.mrf.mxu2  ;;  %v1038_v19 = vpop.f32.mrf.mxu0 }
 0x19f   : > { %1212 = vst.msk [vmem:[#allocation2 + $0x60] sm:$0xff] %vm560_vm2, %v1192_v28  ;;  %v5589_v26 = vpop.f32.mrf.mxu3 }
 0x1a0   : > { %1213 = vst.msk [vmem:[#allocation2 + $0x68] sm:$0x3] %vm857_vm3, %v1193_v13  ;;  %v664_v11 = vpop.f32.mrf.mxu1 }
 0x1a1   : > { %719 = vst.msk [vmem:[#allocation2 + $0x88] sm:$0xff] %vm560_vm2, %v664_v11  ;;  %4993 = vmatmul.msk.bf16.gmra.mxu0 %vm560_vm2, %v5398_v20 }
 0x1a2   : > { %v961_v29 = vld [vmem:[#allocation2 + $0x70] sm:$0xff] }
 0x1a3   : > { %v962_v33 = vld [vmem:[#allocation2 + $0x78] sm:$0xff]  ;;  %v981_v35 = vadd.f32 %v961_v29, %v5409_v24  ;;  %v1145_v24 = vrot.slane %v1038_v19, 6 }
 0x1a4   : > { %v982_v39 = vadd.f32 %v962_v33, %v5418_v32 }
 0x1a5   : > { %1001 = vst.msk [vmem:[#allocation2 + $0x70] sm:$0xff] %vm560_vm2, %v981_v35 }
 0x1a6   : > { %1002 = vst.msk [vmem:[#allocation2 + $0x78] sm:$0xff] %vm560_vm2, %v982_v39  ;;  %v5599_v40 = vpop.f32.mrf.mxu2  ;;  %v1040_v52 = vpop.f32.mrf.mxu0 }
 0x1a7   : > { %v5601_v57 = vpop.f32.mrf.mxu3  ;;  %v1146_v1 = vrot.slane %v1040_v52, 6 }
 0x1a8   : > { %v820_v59 = vld [vmem:[#allocation2 + $0x86] sm:$0xff]  ;;  %v821_v62 = vld [vmem:[#allocation2 + $0x8e] sm:$0x3]  ;;  %v667_v5 = vpop.f32.mrf.mxu1 }
 0x1a9   : > { %v840_v6 = vadd.f32 %v820_v59, %v5429_v36  ;;  %v841_v12 = vadd.f32 %v821_v62, %v5436_v41  ;;  %720 = vst.msk [vmem:[#allocation2 + $0x90] sm:$0xff] %vm560_vm2, %v667_v5  ;;  %v1147_v18 = vsel %vm1141_vm4, %v1145_v24, %v1146_v1 }
 0x1ab   : > { %861 = vst.msk [vmem:[#allocation2 + $0x86] sm:$0xff] %vm560_vm2, %v840_v6  ;;  %5002 = vmatmul.msk.bf16.gmra.mxu1 %vm560_vm2, %v5292_v31  ;;  %5019 = vmatmul.msk.bf16.gmra.mxu2 %vm560_vm2, %v5292_v31 }
 0x1ac   : > { %862 = vst.msk [vmem:[#allocation2 + $0x8e] sm:$0x3] %vm857_vm3, %v841_v12  ;;  %v1103_v32 = vld [vmem:[#allocation2 + $0x70] sm:$0xff]  ;;  %5036 = vmatmul.msk.bf16.gmra.mxu3 %vm560_vm2, %v5292_v31 }
 0x1ad   : > { %v1104_v36 = vld [vmem:[#allocation2 + $0x78] sm:$0x3]  ;;  %v1194_v41 = vadd.f32 %v1147_v18, %v1103_v32 }
 0x1ae   : > { %v1195_v8 = vadd.f32 %v1146_v1, %v1104_v36  ;;  %v5615_v23 = vpop.f32.mrf.mxu2  ;;  %v1043_v28 = vpop.f32.mrf.mxu0 }
 0x1af   : > { %1214 = vst.msk [vmem:[#allocation2 + $0x70] sm:$0xff] %vm560_vm2, %v1194_v41  ;;  %v5618_v13 = vpop.f32.mrf.mxu3 }
 0x1b0   : > { %1215 = vst.msk [vmem:[#allocation2 + $0x78] sm:$0x3] %vm857_vm3, %v1195_v8  ;;  %v669_v19 = vpop.f32.mrf.mxu1 }
 0x1b1   : > { %721 = vst.msk [vmem:[#allocation2 + $0x98] sm:$0xff] %vm560_vm2, %v669_v19  ;;  %4994 = vmatmul.msk.bf16.gmra.mxu0 %vm560_vm2, %v5420_v34 }
 0x1b2   : > { %v963_v11 = vld [vmem:[#allocation2 + $0x80] sm:$0xff] }
 0x1b3   : > { %v964_v29 = vld [vmem:[#allocation2 + $0x88] sm:$0xff]  ;;  %v983_v33 = vadd.f32 %v963_v11, %v5431_v38  ;;  %v1148_v38 = vrot.slane %v1043_v28, 6 }
 0x1b4   : > { %v984_v35 = vadd.f32 %v964_v29, %v5440_v45 }
 0x1b5   : > { %1003 = vst.msk [vmem:[#allocation2 + $0x80] sm:$0xff] %vm560_vm2, %v983_v33 }
 0x1b6   : > { %1004 = vst.msk [vmem:[#allocation2 + $0x88] sm:$0xff] %vm560_vm2, %v984_v35  ;;  %v5628_v39 = vpop.f32.mrf.mxu2  ;;  %v1045_v52 = vpop.f32.mrf.mxu0 }
 0x1b7   : > { %v5630_v59 = vpop.f32.mrf.mxu3  ;;  %v1149_v5 = vrot.slane %v1045_v52, 6 }
 0x1b8   : > { %v822_v62 = vld [vmem:[#allocation2 + $0x96] sm:$0xff]  ;;  %v823_v1 = vld [vmem:[#allocation2 + $0x9e] sm:$0x3]  ;;  %v672_v6 = vpop.f32.mrf.mxu1 }
 0x1b9   : > { %v842_v12 = vadd.f32 %v822_v62, %v5451_v50  ;;  %v843_v24 = vadd.f32 %v823_v1, %v5458_v54  ;;  %722 = vst.msk [vmem:[#allocation2 + $0xa0] sm:$0xff] %vm560_vm2, %v672_v6  ;;  %v1150_v32 = vsel %vm1141_vm4, %v1148_v38, %v1149_v5 }
 0x1bb   : > { %863 = vst.msk [vmem:[#allocation2 + $0x96] sm:$0xff] %vm560_vm2, %v842_v12  ;;  %5003 = vmatmul.msk.bf16.gmra.mxu1 %vm560_vm2, %v5304_v37  ;;  %5020 = vmatmul.msk.bf16.gmra.mxu2 %vm560_vm2, %v5304_v37 }
 0x1bc   : > { %864 = vst.msk [vmem:[#allocation2 + $0x9e] sm:$0x3] %vm857_vm3, %v843_v24  ;;  %v1105_v45 = vld [vmem:[#allocation2 + $0x80] sm:$0xff]  ;;  %5037 = vmatmul.msk.bf16.gmra.mxu3 %vm560_vm2, %v5304_v37 }
 0x1bd   : > { %v1106_v50 = vld [vmem:[#allocation2 + $0x88] sm:$0x3]  ;;  %v1196_v54 = vadd.f32 %v1150_v32, %v1105_v45 }
 0x1be   : > { %v1197_v18 = vadd.f32 %v1149_v5, %v1106_v50  ;;  %v797_v36 = vpop.f32.mrf.mxu2  ;;  %v1048_v41 = vpop.f32.mrf.mxu0 }
 0x1bf   : > { %1216 = vst.msk [vmem:[#allocation2 + $0x80] sm:$0xff] %vm560_vm2, %v1196_v54  ;;  %v941_v8 = vpop.f32.mrf.mxu3 }
 0x1c0   : > { %1217 = vst.msk [vmem:[#allocation2 + $0x88] sm:$0x3] %vm857_vm3, %v1197_v18  ;;  %v674_v28 = vpop.f32.mrf.mxu1 }
 0x1c1   : > { %723 = vst.msk [vmem:[#allocation2 + $0xa8] sm:$0xff] %vm560_vm2, %v674_v28  ;;  %4995 = vmatmul.msk.bf16.gmra.mxu0 %vm560_vm2, %v5442_v47 }
 0x1c2   : > { %v965_v19 = vld [vmem:[#allocation2 + $0x90] sm:$0xff] }
 0x1c3   : > { %v966_v11 = vld [vmem:[#allocation2 + $0x98] sm:$0xff]  ;;  %v985_v29 = vadd.f32 %v965_v19, %v5453_v51  ;;  %v1151_v51 = vrot.slane %v1048_v41, 6 }
 0x1c4   : > { %v986_v33 = vadd.f32 %v966_v11, %v5462_v58 }
 0x1c5   : > { %1005 = vst.msk [vmem:[#allocation2 + $0x90] sm:$0xff] %vm560_vm2, %v985_v29 }
 0x1c6   : > { %1006 = vst.msk [vmem:[#allocation2 + $0x98] sm:$0xff] %vm560_vm2, %v986_v33  ;;  %v798_v35 = vpop.f32.mrf.mxu2  ;;  %v1050_v52 = vpop.f32.mrf.mxu0 }
 0x1c7   : > { %v942_v62 = vpop.f32.mrf.mxu3  ;;  %v1152_v6 = vrot.slane %v1050_v52, 6 }
 0x1c8   : > { %v824_v1 = vld [vmem:[#allocation2 + $0xa6] sm:$0xff]  ;;  %v825_v5 = vld [vmem:[#allocation2 + $0xae] sm:$0x3]  ;;  %v677_v12 = vpop.f32.mrf.mxu1 }
 0x1c9   : > { %v844_v24 = vadd.f32 %v824_v1, %v5473_v63  ;;  %v845_v38 = vadd.f32 %v825_v5, %v5480_v4  ;;  %724 = vst.msk [vmem:[#allocation2 + $0xb0] sm:$0xff] %vm560_vm2, %v677_v12  ;;  %v1153_v45 = vsel %vm1141_vm4, %v1151_v51, %v1152_v6 }
 0x1cb   : > { %865 = vst.msk [vmem:[#allocation2 + $0xa6] sm:$0xff] %vm560_vm2, %v844_v24  ;;  %5004 = vmatmul.msk.bf16.gmra.mxu1 %vm560_vm2, %v5316_v43  ;;  %5021 = vmatmul.msk.bf16.gmra.mxu2 %vm560_vm2, %v5316_v43 }
 0x1cc   : > { %866 = vst.msk [vmem:[#allocation2 + $0xae] sm:$0x3] %vm857_vm3, %v845_v38  ;;  %v1107_v58 = vld [vmem:[#allocation2 + $0x90] sm:$0xff]  ;;  %5038 = vmatmul.msk.bf16.gmra.mxu3 %vm560_vm2, %v5316_v43 }
 0x1cd   : > { %v1108_v63 = vld [vmem:[#allocation2 + $0x98] sm:$0x3]  ;;  %v1198_v4 = vadd.f32 %v1153_v45, %v1107_v58 }
 0x1ce   : > { %v1199_v32 = vadd.f32 %v1152_v6, %v1108_v63  ;;  %v800_v50 = vpop.f32.mrf.mxu2  ;;  %v1053_v54 = vpop.f32.mrf.mxu0 }
 0x1cf   : > { %1218 = vst.msk [vmem:[#allocation2 + $0x90] sm:$0xff] %vm560_vm2, %v1198_v4  ;;  %v944_v18 = vpop.f32.mrf.mxu3 }
 0x1d0   : > { %1219 = vst.msk [vmem:[#allocation2 + $0x98] sm:$0x3] %vm857_vm3, %v1199_v32  ;;  %v679_v36 = vpop.f32.mrf.mxu1 }
 0x1d1   : > { %725 = vst.msk [vmem:[#allocation2 + $0xb8] sm:$0xff] %vm560_vm2, %v679_v36  ;;  %4996 = vmatmul.msk.bf16.gmra.mxu0 %vm560_vm2, %v5464_v60 }
 0x1d2   : > { %v967_v41 = vld [vmem:[#allocation2 + $0xa0] sm:$0xff] }
 0x1d3   : > { %v968_v8 = vld [vmem:[#allocation2 + $0xa8] sm:$0xff]  ;;  %v987_v28 = vadd.f32 %v967_v41, %v5475_v0  ;;  %v1154_v0 = vrot.slane %v1053_v54, 6 }
 0x1d4   : > { %v988_v19 = vadd.f32 %v968_v8, %v5484_v7 }
 0x1d5   : > { %1007 = vst.msk [vmem:[#allocation2 + $0xa0] sm:$0xff] %vm560_vm2, %v987_v28 }
 0x1d6   : > { %1008 = vst.msk [vmem:[#allocation2 + $0xa8] sm:$0xff] %vm560_vm2, %v988_v19  ;;  %v801_v11 = vpop.f32.mrf.mxu2  ;;  %v1055_v29 = vpop.f32.mrf.mxu0 }
 0x1d7   : > { %v945_v33 = vpop.f32.mrf.mxu3  ;;  %v1155_v62 = vrot.slane %v1055_v29, 6 }
 0x1d8   : > { %v826_v35 = vld [vmem:[#allocation2 + $0xb6] sm:$0xff]  ;;  %v827_v52 = vld [vmem:[#allocation2 + $0xbe] sm:$0x3]  ;;  %v682_v1 = vpop.f32.mrf.mxu1 }
 0x1d9   : > { %v846_v5 = vadd.f32 %v826_v35, %v5495_v14  ;;  %v847_v6 = vadd.f32 %v827_v52, %v5502_v22  ;;  %726 = vst.msk [vmem:[#allocation2 + $0xc0] sm:$0xff] %vm560_vm2, %v682_v1  ;;  %v1156_v12 = vsel %vm1141_vm4, %v1154_v0, %v1155_v62 }
 0x1db   : > { %867 = vst.msk [vmem:[#allocation2 + $0xb6] sm:$0xff] %vm560_vm2, %v846_v5  ;;  %5005 = vmatmul.msk.bf16.gmra.mxu1 %vm560_vm2, %v5328_v49  ;;  %5022 = vmatmul.msk.bf16.gmra.mxu2 %vm560_vm2, %v5328_v49 }
 0x1dc   : > { %868 = vst.msk [vmem:[#allocation2 + $0xbe] sm:$0x3] %vm857_vm3, %v847_v6  ;;  %v1109_v7 = vld [vmem:[#allocation2 + $0xa0] sm:$0xff]  ;;  %5039 = vmatmul.msk.bf16.gmra.mxu3 %vm560_vm2, %v5328_v49 }
 0x1dd   : > { %v1110_v14 = vld [vmem:[#allocation2 + $0xa8] sm:$0x3]  ;;  %v1200_v22 = vadd.f32 %v1156_v12, %v1109_v7 }
 0x1de   : > { %v1201_v24 = vadd.f32 %v1155_v62, %v1110_v14  ;;  %v803_v38 = vpop.f32.mrf.mxu2  ;;  %v1058_v51 = vpop.f32.mrf.mxu0 }
 0x1df   : > { %1220 = vst.msk [vmem:[#allocation2 + $0xa0] sm:$0xff] %vm560_vm2, %v1200_v22  ;;  %v947_v58 = vpop.f32.mrf.mxu3 }
 0x1e0   : > { %1221 = vst.msk [vmem:[#allocation2 + $0xa8] sm:$0x3] %vm857_vm3, %v1201_v24  ;;  %v684_v45 = vpop.f32.mrf.mxu1 }
 0x1e1   : > { %727 = vst.msk [vmem:[#allocation2 + $0xc8] sm:$0xff] %vm560_vm2, %v684_v45  ;;  %4997 = vmatmul.msk.bf16.gmra.mxu0 %vm560_vm2, %v5486_v10 }
 0x1e2   : > { %v969_v63 = vld [vmem:[#allocation2 + $0xb0] sm:$0xff] }
 0x1e3   : > { %v970_v4 = vld [vmem:[#allocation2 + $0xb8] sm:$0xff]  ;;  %v989_v32 = vadd.f32 %v969_v63, %v5497_v16  ;;  %v1157_v16 = vrot.slane %v1058_v51, 6 }
 0x1e4   : > { %v990_v50 = vadd.f32 %v970_v4, %v5509_v30 }
 0x1e5   : > { %1009 = vst.msk [vmem:[#allocation2 + $0xb0] sm:$0xff] %vm560_vm2, %v989_v32 }
 0x1e6   : > { %1010 = vst.msk [vmem:[#allocation2 + $0xb8] sm:$0xff] %vm560_vm2, %v990_v50  ;;  %v804_v54 = vpop.f32.mrf.mxu2  ;;  %v1060_v18 = vpop.f32.mrf.mxu0 }
 0x1e7   : > { %v948_v36 = vpop.f32.mrf.mxu3  ;;  %v1158_v28 = vrot.slane %v1060_v18, 6 }
 0x1e8   : > { %v828_v41 = vld [vmem:[#allocation2 + $0xc6] sm:$0xff]  ;;  %v829_v8 = vld [vmem:[#allocation2 + $0xce] sm:$0x3]  ;;  %v687_v19 = vpop.f32.mrf.mxu1 }
 0x1e9   : > { %v848_v11 = vadd.f32 %v828_v41, %v5525_v46  ;;  %v849_v29 = vadd.f32 %v829_v8, %v5532_v56  ;;  %728 = vst.msk [vmem:[#allocation2 + $0xd0] sm:$0xff] %vm560_vm2, %v687_v19  ;;  %v1159_v33 = vsel %vm1141_vm4, %v1157_v16, %v1158_v28 }
 0x1eb   : > { %869 = vst.msk [vmem:[#allocation2 + $0xc6] sm:$0xff] %vm560_vm2, %v848_v11  ;;  %5006 = vmatmul.msk.bf16.gmra.mxu1 %vm560_vm2, %v5340_v55  ;;  %5023 = vmatmul.msk.bf16.gmra.mxu2 %vm560_vm2, %v5340_v55 }
 0x1ec   : > { %870 = vst.msk [vmem:[#allocation2 + $0xce] sm:$0x3] %vm857_vm3, %v849_v29  ;;  %v1111_v30 = vld [vmem:[#allocation2 + $0xb0] sm:$0xff]  ;;  %5040 = vmatmul.msk.bf16.gmra.mxu3 %vm560_vm2, %v5340_v55 }
 0x1ed   : > { %v1112_v46 = vld [vmem:[#allocation2 + $0xb8] sm:$0x3]  ;;  %v1202_v56 = vadd.f32 %v1159_v33, %v1111_v30 }
 0x1ee   : > { %v1203_v35 = vadd.f32 %v1158_v28, %v1112_v46  ;;  %v806_v52 = vpop.f32.mrf.mxu2  ;;  %v1063_v62 = vpop.f32.mrf.mxu0 }
 0x1ef   : > { %1222 = vst.msk [vmem:[#allocation2 + $0xb0] sm:$0xff] %vm560_vm2, %v1202_v56  ;;  %v950_v1 = vpop.f32.mrf.mxu3 }
 0x1f0   : > { %1223 = vst.msk [vmem:[#allocation2 + $0xb8] sm:$0x3] %vm857_vm3, %v1203_v35  ;;  %v689_v5 = vpop.f32.mrf.mxu1 }
 0x1f1   : > { %729 = vst.msk [vmem:[#allocation2 + $0xd8] sm:$0xff] %vm560_vm2, %v689_v5  ;;  %4998 = vmatmul.msk.bf16.gmra.mxu0 %vm560_vm2, %v5516_v42 }
 0x1f2   : > { %v971_v6 = vld [vmem:[#allocation2 + $0xc0] sm:$0xff] }
 0x1f3   : > { %v972_v0 = vld [vmem:[#allocation2 + $0xc8] sm:$0xff]  ;;  %v991_v7 = vadd.f32 %v971_v6, %v5527_v48  ;;  %v1160_v48 = vrot.slane %v1063_v62, 6 }
 0x1f4   : > { %v992_v12 = vadd.f32 %v972_v0, %v5542_v2 }
 0x1f5   : > { %1011 = vst.msk [vmem:[#allocation2 + $0xc0] sm:$0xff] %vm560_vm2, %v991_v7 }
 0x1f6   : > { %1012 = vst.msk [vmem:[#allocation2 + $0xc8] sm:$0xff] %vm560_vm2, %v992_v12  ;;  %v807_v14 = vpop.f32.mrf.mxu2  ;;  %v1065_v22 = vpop.f32.mrf.mxu0 }
 0x1f7   : > { %v951_v24 = vpop.f32.mrf.mxu3  ;;  %v1161_v58 = vrot.slane %v1065_v22, 6 }
 0x1f8   : > { %v830_v38 = vld [vmem:[#allocation2 + $0xd6] sm:$0xff]  ;;  %v831_v51 = vld [vmem:[#allocation2 + $0xde] sm:$0x3]  ;;  %v692_v45 = vpop.f32.mrf.mxu1 }
 0x1f9   : > { %v850_v63 = vadd.f32 %v830_v38, %v5559_v21  ;;  %v851_v4 = vadd.f32 %v831_v51, %v5570_v44  ;;  %730 = vst.msk [vmem:[#allocation2 + $0xe0] sm:$0xff] %vm560_vm2, %v692_v45  ;;  %v1162_v32 = vsel %vm1141_vm4, %v1160_v48, %v1161_v58 }
 0x1fb   : > { %871 = vst.msk [vmem:[#allocation2 + $0xd6] sm:$0xff] %vm560_vm2, %v850_v63  ;;  %5007 = vmatmul.msk.bf16.gmra.mxu1 %vm560_vm2, %v5352_v61  ;;  %5024 = vmatmul.msk.bf16.gmra.mxu2 %vm560_vm2, %v5352_v61 }
 0x1fc   : > { %872 = vst.msk [vmem:[#allocation2 + $0xde] sm:$0x3] %vm857_vm3, %v851_v4  ;;  %v1113_v2 = vld [vmem:[#allocation2 + $0xc0] sm:$0xff]  ;;  %5041 = vmatmul.msk.bf16.gmra.mxu3 %vm560_vm2, %v5352_v61 }
 0x1fd   : > { %v1114_v21 = vld [vmem:[#allocation2 + $0xc8] sm:$0x3]  ;;  %v1204_v44 = vadd.f32 %v1162_v32, %v1113_v2 }
 0x1fe   : > { %v1205_v50 = vadd.f32 %v1161_v58, %v1114_v21  ;;  %v809_v54 = vpop.f32.mrf.mxu2  ;;  %v1068_v18 = vpop.f32.mrf.mxu0  ;;  %v1326_v32 = vld [vmem:[#allocation2 + $0x6] sm:$0xff] }
 0x1ff   : > { %1224 = vst.msk [vmem:[#allocation2 + $0xc0] sm:$0xff] %vm560_vm2, %v1204_v44  ;;  %v953_v36 = vpop.f32.mrf.mxu3 }
 0x200   : > { %1225 = vst.msk [vmem:[#allocation2 + $0xc8] sm:$0x3] %vm857_vm3, %v1205_v50  ;;  %v694_v41 = vpop.f32.mrf.mxu1 }
 0x201   : > { %731 = vst.msk [vmem:[#allocation2 + $0xe8] sm:$0xff] %vm560_vm2, %v694_v41  ;;  %4999 = vmatmul.msk.bf16.gmra.mxu0 %vm560_vm2, %v5548_v27 }
 0x202   : > { %v973_v8 = vld [vmem:[#allocation2 + $0xd0] sm:$0xff] }
 0x203   : > { %v974_v28 = vld [vmem:[#allocation2 + $0xd8] sm:$0xff]  ;;  %v993_v19 = vadd.f32 %v973_v8, %v5561_v15  ;;  %v1163_v15 = vrot.slane %v1068_v18, 6 }
 0x204   : > { %v994_v11 = vadd.f32 %v974_v28, %v5572_v53 }
 0x205   : > { %1013 = vst.msk [vmem:[#allocation2 + $0xd0] sm:$0xff] %vm560_vm2, %v993_v19  ;;  %v1327_v19 = vld [vmem:[#allocation2 + $0xe] sm:$0x3] }
 0x206   : > { %1014 = vst.msk [vmem:[#allocation2 + $0xd8] sm:$0xff] %vm560_vm2, %v994_v11  ;;  %v810_v29 = vpop.f32.mrf.mxu2  ;;  %v1070_v16 = vpop.f32.mrf.mxu0 }
 0x207   : > { %v954_v30 = vpop.f32.mrf.mxu3  ;;  %v1164_v56 = vrot.slane %v1070_v16, 6 }
 0x208   : > { %v832_v33 = vld [vmem:[#allocation2 + $0xe6] sm:$0xff]  ;;  %v833_v46 = vld [vmem:[#allocation2 + $0xee] sm:$0x3]  ;;  %v697_v35 = vpop.f32.mrf.mxu1 }
 0x209   : > { %v852_v52 = vadd.f32 %v832_v33, %v5586_v17  ;;  %v853_v62 = vadd.f32 %v833_v46, %v5599_v40  ;;  %732 = vst.msk [vmem:[#allocation2 + $0xf0] sm:$0xff] %vm560_vm2, %v697_v35  ;;  %v1165_v1 = vsel %vm1141_vm4, %v1163_v15, %v1164_v56 }
 0x20b   : > { %873 = vst.msk [vmem:[#allocation2 + $0xe6] sm:$0xff] %vm560_vm2, %v852_v52  ;;  %5008 = vmatmul.msk.bf16.gmra.mxu1 %vm560_vm2, %v5364_v3  ;;  %5025 = vmatmul.msk.bf16.gmra.mxu2 %vm560_vm2, %v5364_v3 }
 0x20c   : > { %874 = vst.msk [vmem:[#allocation2 + $0xee] sm:$0x3] %vm857_vm3, %v853_v62  ;;  %v1115_v53 = vld [vmem:[#allocation2 + $0xd0] sm:$0xff]  ;;  %5042 = vmatmul.msk.bf16.gmra.mxu3 %vm560_vm2, %v5364_v3 }
 0x20d   : > { %v1116_v17 = vld [vmem:[#allocation2 + $0xd8] sm:$0x3]  ;;  %v1206_v40 = vadd.f32 %v1165_v1, %v1115_v53 }
 0x20e   : > { %v1207_v5 = vadd.f32 %v1164_v56, %v1116_v17  ;;  %v812_v6 = vpop.f32.mrf.mxu2  ;;  %v1073_v0 = vpop.f32.mrf.mxu0  ;;  %v1328_v17 = vld [vmem:[#allocation2 + $0x16] sm:$0xff] }
 0x20f   : > { %1226 = vst.msk [vmem:[#allocation2 + $0xd0] sm:$0xff] %vm560_vm2, %v1206_v40  ;;  %v956_v7 = vpop.f32.mrf.mxu3 }
 0x210   : > { %1227 = vst.msk [vmem:[#allocation2 + $0xd8] sm:$0x3] %vm857_vm3, %v1207_v5  ;;  %v699_v12 = vpop.f32.mrf.mxu1 }
 0x211   : > { %733 = vst.msk [vmem:[#allocation2 + $0xf8] sm:$0xff] %vm560_vm2, %v699_v12  ;;  %5052 = vmatmul.msk.bf16.vlgmr.msra.gmra.mxu0 %vm560_vm2, %v5280_v25 }
 0x212   : > { %v975_v14 = vld [vmem:[#allocation2 + $0xe0] sm:$0xff] }
 0x213   : > { %v976_v22 = vld [vmem:[#allocation2 + $0xe8] sm:$0xff]  ;;  %v995_v24 = vadd.f32 %v975_v14, %v5589_v26  ;;  %v1166_v26 = vrot.slane %v1073_v0, 6 }
 0x214   : > { %v996_v38 = vadd.f32 %v976_v22, %v5601_v57 }
 0x215   : > { %1015 = vst.msk [vmem:[#allocation2 + $0xe0] sm:$0xff] %vm560_vm2, %v995_v24 }
 0x216   : > { %1016 = vst.msk [vmem:[#allocation2 + $0xe8] sm:$0xff] %vm560_vm2, %v996_v38  ;;  %v813_v51 = vpop.f32.mrf.mxu2  ;;  %v1075_v58 = vpop.f32.mrf.mxu0 }
 0x217   : > { %v957_v45 = vpop.f32.mrf.mxu3  ;;  %v1167_v48 = vrot.slane %v1075_v58, 6 }
 0x218   : > { %v834_v63 = vld [vmem:[#allocation2 + $0xf6] sm:$0xff]  ;;  %v835_v4 = vld [vmem:[#allocation2 + $0xfe] sm:$0x3]  ;;  %v1246_v2 = vpop.f32.mrf.mxu1 }
 0x219   : > { %v854_v21 = vadd.f32 %v834_v63, %v5615_v23  ;;  %v855_v44 = vadd.f32 %v835_v4, %v5628_v39  ;;  %v1358_v50 = vadd.f32 %v1326_v32, %v1246_v2  ;;  %v1168_v54 = vsel %vm1141_vm4, %v1166_v26, %v1167_v48  ;;  %v1329_v63 = vld [vmem:[#allocation2 + $0x1e] sm:$0x3] }
 0x21b   : > { %875 = vst.msk [vmem:[#allocation2 + $0xf6] sm:$0xff] %vm560_vm2, %v854_v21  ;;  %5009 = vmatmul.msk.bf16.gmra.mxu1 %vm560_vm2, %v5376_v9  ;;  %5026 = vmatmul.msk.bf16.gmra.mxu2 %vm560_vm2, %v5376_v9 }
 0x21c   : > { %876 = vst.msk [vmem:[#allocation2 + $0xfe] sm:$0x3] %vm857_vm3, %v855_v44  ;;  %v1117_v57 = vld [vmem:[#allocation2 + $0xe0] sm:$0xff]  ;;  %5043 = vmatmul.msk.bf16.gmra.mxu3 %vm560_vm2, %v5376_v9 }
 0x21d   : > { %v1118_v23 = vld [vmem:[#allocation2 + $0xe8] sm:$0x3]  ;;  %v1208_v39 = vadd.f32 %v1168_v54, %v1117_v57  ;;  %1390 = vst.msk [vmem:[#allocation2 + $0x6] sm:$0xff] %vm560_vm2, %v1358_v50 }
 0x21e   : > { %v1209_v18 = vadd.f32 %v1167_v48, %v1118_v23  ;;  %v1078_v36 = vpop.f32.mrf.mxu0  ;;  %v1436_v41 = vpop.f32.mrf.mxu2  ;;  %v1330_v57 = vld [vmem:[#allocation2 + $0x26] sm:$0xff] }
 0x21f   : > { %1228 = vst.msk [vmem:[#allocation2 + $0xe0] sm:$0xff] %vm560_vm2, %v1208_v39  ;;  %v1738_v8 = vpop.f32.mrf.mxu3  ;;  %v1580_v35 = vrot.slane %v1436_v41, 6  ;;  %v1169_v0 = vrot.slane %v1078_v36, 6 }
 0x220   : > { %1229 = vst.msk [vmem:[#allocation2 + $0xe8] sm:$0x3] %vm857_vm3, %v1209_v18  ;;  %v1248_v28 = vpop.f32.mrf.mxu1 }
 0x221   : > { %v1359_v11 = vadd.f32 %v1327_v19, %v1248_v28  ;;  %5053 = vmatmul.msk.bf16.gmra.mxu0 %vm560_vm2, %v5292_v31 }
 0x222   : > { %v977_v29 = vld [vmem:[#allocation2 + $0xf0] sm:$0xff] }
 0x223   : > { %v978_v16 = vld [vmem:[#allocation2 + $0xf8] sm:$0xff]  ;;  %v997_v30 = vadd.f32 %v977_v29, %v5618_v13  ;;  %1391 = vst.msk [vmem:[#allocation2 + $0xe] sm:$0x3] %vm857_vm3, %v1359_v11  ;;  %v1331_v11 = vld [vmem:[#allocation2 + $0x2e] sm:$0x3] }
 0x224   : > { %v998_v33 = vadd.f32 %v978_v16, %v5630_v59  ;;  %v1517_v53 = vld [vmem:[#allocation2 + $0x8] sm:$0x3]  ;;  %v1516_v40 = vld [vmem:[#allocation2] sm:$0xff] }
 0x225   : > { %1017 = vst.msk [vmem:[#allocation2 + $0xf0] sm:$0xff] %vm560_vm2, %v997_v30 }
 0x226   : > { %1018 = vst.msk [vmem:[#allocation2 + $0xf8] sm:$0xff] %vm560_vm2, %v998_v33  ;;  %v1080_v46 = vpop.f32.mrf.mxu0  ;;  %v1438_v56 = vpop.f32.mrf.mxu2 }
 0x227   : > { %v1581_v52 = vrot.slane %v1438_v56, 6  ;;  %v1739_v62 = vpop.f32.mrf.mxu3  ;;  %v1170_v15 = vrot.slane %v1080_v46, 6 }
 0x228   : > { %v1251_v1 = vpop.f32.mrf.mxu1  ;;  %v1332_v62 = vld [vmem:[#allocation2 + $0x36] sm:$0xff] }
 0x229   : > { %v1582_v13 = vsel %vm1141_vm4, %v1580_v35, %v1581_v52  ;;  %v1661_v5 = vadd.f32 %v1581_v52, %v1517_v53  ;;  %v1360_v6 = vadd.f32 %v1328_v17, %v1251_v1  ;;  %v1171_v12 = vsel %vm1141_vm4, %v1169_v0, %v1170_v15 }
 0x22a   : > { %v1660_v59 = vadd.f32 %v1582_v13, %v1516_v40 }
 0x22b   : > { %1693 = vst.msk [vmem:[#allocation2 + $0x8] sm:$0x3] %vm857_vm3, %v1661_v5  ;;  %5010 = vmatmul.msk.bf16.gmra.mxu1 %vm560_vm2, %v5398_v20  ;;  %5027 = vmatmul.msk.bf16.gmra.mxu2 %vm560_vm2, %v5398_v20 }
 0x22c   : > { %v1119_v7 = vld [vmem:[#allocation2 + $0xf0] sm:$0xff]  ;;  %1692 = vst.msk [vmem:[#allocation2] sm:$0xff] %vm560_vm2, %v1660_v59  ;;  %5044 = vmatmul.msk.bf16.gmra.mxu3 %vm560_vm2, %v5398_v20  ;;  %v1333_v59 = vld [vmem:[#allocation2 + $0x3e] sm:$0x3] }
 0x22d   : > { %v1120_v14 = vld [vmem:[#allocation2 + $0xf8] sm:$0x3]  ;;  %v1210_v22 = vadd.f32 %v1171_v12, %v1119_v7  ;;  %1392 = vst.msk [vmem:[#allocation2 + $0x16] sm:$0xff] %vm560_vm2, %v1360_v6 }
 0x22e   : > { %v1211_v24 = vadd.f32 %v1170_v15, %v1120_v14  ;;  %v1083_v38 = vpop.f32.mrf.mxu0  ;;  %v1441_v51 = vpop.f32.mrf.mxu2 }
 0x22f   : > { %1230 = vst.msk [vmem:[#allocation2 + $0xf0] sm:$0xff] %vm560_vm2, %v1210_v22  ;;  %v1741_v58 = vpop.f32.mrf.mxu3  ;;  %v1583_v32 = vrot.slane %v1441_v51, 6 }
 0x230   : > { %1231 = vst.msk [vmem:[#allocation2 + $0xf8] sm:$0x3] %vm857_vm3, %v1211_v24  ;;  %v1253_v45 = vpop.f32.mrf.mxu1 }
 0x231   : > { %v1361_v4 = vadd.f32 %v1329_v63, %v1253_v45  ;;  %5054 = vmatmul.msk.bf16.gmra.mxu0 %vm560_vm2, %v5304_v37  ;;  %v1334_v45 = vld [vmem:[#allocation2 + $0x46] sm:$0xff] }
 0x233   : > { %1393 = vst.msk [vmem:[#allocation2 + $0x1e] sm:$0x3] %vm857_vm3, %v1361_v4 }
 0x234   : > { %v1519_v50 = vld [vmem:[#allocation2 + $0x18] sm:$0x3]  ;;  %v1518_v54 = vld [vmem:[#allocation2 + $0x10] sm:$0xff] }
 0x236   : > { %v1084_v48 = vpop.f32.mrf.mxu0  ;;  %v1443_v2 = vpop.f32.mrf.mxu2 }
 0x237   : > { %v1584_v21 = vrot.slane %v1443_v2, 6  ;;  %v1742_v44 = vpop.f32.mrf.mxu3 }
 0x238   : > { %v1256_v26 = vpop.f32.mrf.mxu1 }
 0x239   : > { %v1585_v23 = vsel %vm1141_vm4, %v1583_v32, %v1584_v21  ;;  %v1663_v39 = vadd.f32 %v1584_v21, %v1519_v50  ;;  %v1362_v18 = vadd.f32 %v1330_v57, %v1256_v26  ;;  %v1335_v57 = vld [vmem:[#allocation2 + $0x4e] sm:$0x3] }
 0x23a   : > { %v1662_v36 = vadd.f32 %v1585_v23, %v1518_v54 }
 0x23b   : > { %1695 = vst.msk [vmem:[#allocation2 + $0x18] sm:$0x3] %vm857_vm3, %v1663_v39  ;;  %5011 = vmatmul.msk.bf16.gmra.mxu1 %vm560_vm2, %v5420_v34  ;;  %5028 = vmatmul.msk.bf16.gmra.mxu2 %vm560_vm2, %v5420_v34 }
 0x23c   : > { %1694 = vst.msk [vmem:[#allocation2 + $0x10] sm:$0xff] %vm560_vm2, %v1662_v36  ;;  %5045 = vmatmul.msk.bf16.gmra.mxu3 %vm560_vm2, %v5420_v34 }
 0x23d   : > { %1394 = vst.msk [vmem:[#allocation2 + $0x26] sm:$0xff] %vm560_vm2, %v1362_v18 }
 0x23e   : > { %v1086_v41 = vpop.f32.mrf.mxu0  ;;  %v1446_v8 = vpop.f32.mrf.mxu2 }
 0x23f   : > { %v1744_v28 = vpop.f32.mrf.mxu3  ;;  %v1586_v33 = vrot.slane %v1446_v8, 6 }
 0x240   : > { %v1258_v19 = vpop.f32.mrf.mxu1 }
 0x241   : > { %v1363_v29 = vadd.f32 %v1331_v11, %v1258_v19  ;;  %5055 = vmatmul.msk.bf16.gmra.mxu0 %vm560_vm2, %v5316_v43  ;;  %v1336_v19 = vld [vmem:[#allocation2 + $0x56] sm:$0xff] }
 0x243   : > { %1395 = vst.msk [vmem:[#allocation2 + $0x2e] sm:$0x3] %vm857_vm3, %v1363_v29 }
 0x244   : > { %v1521_v35 = vld [vmem:[#allocation2 + $0x28] sm:$0x3]  ;;  %v1520_v15 = vld [vmem:[#allocation2 + $0x20] sm:$0xff] }
 0x246   : > { %v1087_v16 = vpop.f32.mrf.mxu0  ;;  %v1448_v30 = vpop.f32.mrf.mxu2 }
 0x247   : > { %v1587_v46 = vrot.slane %v1448_v30, 6  ;;  %v1745_v56 = vpop.f32.mrf.mxu3 }
 0x248   : > { %v1261_v52 = vpop.f32.mrf.mxu1 }
 0x249   : > { %v1588_v53 = vsel %vm1141_vm4, %v1586_v33, %v1587_v46  ;;  %v1665_v1 = vadd.f32 %v1587_v46, %v1521_v35  ;;  %v1364_v17 = vadd.f32 %v1332_v62, %v1261_v52  ;;  %v1337_v62 = vld [vmem:[#allocation2 + $0x5e] sm:$0x3] }
 0x24a   : > { %v1664_v40 = vadd.f32 %v1588_v53, %v1520_v15  ;;  %v2304_v53 = vld [vmem:[%s7670_s5] sm:$0xf] }
 0x24b   : > { %1697 = vst.msk [vmem:[#allocation2 + $0x28] sm:$0x3] %vm857_vm3, %v1665_v1  ;;  %5012 = vmatmul.msk.bf16.gmra.mxu1 %vm560_vm2, %v5442_v47  ;;  %5029 = vmatmul.msk.bf16.gmra.mxu2 %vm560_vm2, %v5442_v47  ;;  %v2358_v1 = vsel %vm609_vm1, %v2304_v53, 0 }
 0x24c   : > { %1696 = vst.msk [vmem:[#allocation2 + $0x20] sm:$0xff] %vm560_vm2, %v1664_v40  ;;  %5046 = vmatmul.msk.bf16.gmra.mxu3 %vm560_vm2, %v5442_v47  ;;  %2367 = vmatpush.bf16.msra.mxu2 %v2358_v1 }
 0x24d   : > { %1396 = vst.msk [vmem:[#allocation2 + $0x36] sm:$0xff] %vm560_vm2, %v1364_v17 }
 0x24e   : > { %v1089_v13 = vpop.f32.mrf.mxu0  ;;  %v1451_v5 = vpop.f32.mrf.mxu2 }
 0x24f   : > { %v1747_v6 = vpop.f32.mrf.mxu3  ;;  %v1589_v22 = vrot.slane %v1451_v5, 6 }
 0x250   : > { %v1263_v0 = vpop.f32.mrf.mxu1 }
 0x251   : > { %v1365_v7 = vadd.f32 %v1333_v59, %v1263_v0  ;;  %5056 = vmatmul.msk.bf16.gmra.mxu0 %vm560_vm2, %v5328_v49 }
 0x253   : > { %1397 = vst.msk [vmem:[#allocation2 + $0x3e] sm:$0x3] %vm857_vm3, %v1365_v7  ;;  %v1338_v7 = vld [vmem:[#allocation2 + $0x66] sm:$0xff] }
 0x254   : > { %v1523_v51 = vld [vmem:[#allocation2 + $0x38] sm:$0x3]  ;;  %v1522_v63 = vld [vmem:[#allocation2 + $0x30] sm:$0xff] }
 0x256   : > { %v1090_v12 = vpop.f32.mrf.mxu0  ;;  %v1453_v14 = vpop.f32.mrf.mxu2 }
 0x257   : > { %v1590_v24 = vrot.slane %v1453_v14, 6  ;;  %v1748_v38 = vpop.f32.mrf.mxu3 }
 0x258   : > { %v1266_v58 = vpop.f32.mrf.mxu1 }
 0x259   : > { %v1591_v4 = vsel %vm1141_vm4, %v1589_v22, %v1590_v24  ;;  %v1667_v48 = vadd.f32 %v1590_v24, %v1523_v51  ;;  %v1366_v2 = vadd.f32 %v1334_v45, %v1266_v58 }
 0x25a   : > { %v1666_v32 = vadd.f32 %v1591_v4, %v1522_v63  ;;  %v1806_v63 = vld [vmem:[#allocation2 + $0x6] sm:$0xff] }
 0x25b   : > { %1699 = vst.msk [vmem:[#allocation2 + $0x38] sm:$0x3] %vm857_vm3, %v1667_v48  ;;  %5013 = vmatmul.msk.bf16.gmra.mxu1 %vm560_vm2, %v5464_v60  ;;  %5030 = vmatmul.msk.bf16.gmra.mxu2 %vm560_vm2, %v5464_v60 }
 0x25c   : > { %1698 = vst.msk [vmem:[#allocation2 + $0x30] sm:$0xff] %vm560_vm2, %v1666_v32  ;;  %5047 = vmatmul.msk.bf16.gmra.mxu3 %vm560_vm2, %v5464_v60 }
 0x25d   : > { %1398 = vst.msk [vmem:[#allocation2 + $0x46] sm:$0xff] %vm560_vm2, %v1366_v2  ;;  %v1339_v2 = vld [vmem:[#allocation2 + $0x6e] sm:$0x3] }
 0x25e   : > { %v1092_v21 = vpop.f32.mrf.mxu0  ;;  %v1456_v44 = vpop.f32.mrf.mxu2 }
 0x25f   : > { %v1750_v50 = vpop.f32.mrf.mxu3  ;;  %v1592_v18 = vrot.slane %v1456_v44, 6 }
 0x260   : > { %v1268_v26 = vpop.f32.mrf.mxu1 }
 0x261   : > { %v1367_v54 = vadd.f32 %v1335_v57, %v1268_v26  ;;  %5057 = vmatmul.msk.bf16.gmra.mxu0 %vm560_vm2, %v5340_v55 }
 0x263   : > { %1399 = vst.msk [vmem:[#allocation2 + $0x4e] sm:$0x3] %vm857_vm3, %v1367_v54  ;;  %v1807_v54 = vld [vmem:[#allocation2 + $0xe] sm:$0x3] }
 0x264   : > { %v1525_v8 = vld [vmem:[#allocation2 + $0x48] sm:$0x3]  ;;  %v1524_v11 = vld [vmem:[#allocation2 + $0x40] sm:$0xff] }
 0x266   : > { %v1093_v23 = vpop.f32.mrf.mxu0  ;;  %v1458_v39 = vpop.f32.mrf.mxu2 }
 0x267   : > { %v1593_v36 = vrot.slane %v1458_v39, 6  ;;  %v1751_v41 = vpop.f32.mrf.mxu3 }
 0x268   : > { %v1271_v28 = vpop.f32.mrf.mxu1 }
 0x269   : > { %v1594_v29 = vsel %vm1141_vm4, %v1592_v18, %v1593_v36  ;;  %v1669_v16 = vadd.f32 %v1593_v36, %v1525_v8  ;;  %v1368_v30 = vadd.f32 %v1336_v19, %v1271_v28  ;;  %v1340_v36 = vld [vmem:[#allocation2 + $0x76] sm:$0xff] }
 0x26a   : > { %v1668_v33 = vadd.f32 %v1594_v29, %v1524_v11 }
 0x26b   : > { %1701 = vst.msk [vmem:[#allocation2 + $0x48] sm:$0x3] %vm857_vm3, %v1669_v16  ;;  %5014 = vmatmul.msk.bf16.gmra.mxu1 %vm560_vm2, %v5486_v10  ;;  %5031 = vmatmul.msk.bf16.gmra.mxu2 %vm560_vm2, %v5486_v10 }
 0x26c   : > { %1700 = vst.msk [vmem:[#allocation2 + $0x40] sm:$0xff] %vm560_vm2, %v1668_v33  ;;  %5048 = vmatmul.msk.bf16.gmra.mxu3 %vm560_vm2, %v5486_v10  ;;  %v1808_v33 = vld [vmem:[#allocation2 + $0x16] sm:$0xff] }
 0x26d   : > { %1400 = vst.msk [vmem:[#allocation2 + $0x56] sm:$0xff] %vm560_vm2, %v1368_v30 }
 0x26e   : > { %v1095_v46 = vpop.f32.mrf.mxu0  ;;  %v1461_v56 = vpop.f32.mrf.mxu2 }
 0x26f   : > { %v1753_v35 = vpop.f32.mrf.mxu3  ;;  %v1595_v13 = vrot.slane %v1461_v56, 6 }
 0x270   : > { %v1273_v52 = vpop.f32.mrf.mxu1  ;;  %v1341_v35 = vld [vmem:[#allocation2 + $0x7e] sm:$0x3] }
 0x271   : > { %v1369_v15 = vadd.f32 %v1337_v62, %v1273_v52  ;;  %5058 = vmatmul.msk.bf16.gmra.mxu0 %vm560_vm2, %v5352_v61 }
 0x273   : > { %1401 = vst.msk [vmem:[#allocation2 + $0x5e] sm:$0x3] %vm857_vm3, %v1369_v15 }
 0x274   : > { %v1527_v0 = vld [vmem:[#allocation2 + $0x58] sm:$0x3]  ;;  %v1526_v12 = vld [vmem:[#allocation2 + $0x50] sm:$0xff] }
 0x276   : > { %v1096_v17 = vpop.f32.mrf.mxu0  ;;  %v1463_v40 = vpop.f32.mrf.mxu2 }
 0x277   : > { %v1596_v5 = vrot.slane %v1463_v40, 6  ;;  %v1754_v6 = vpop.f32.mrf.mxu3  ;;  %v1809_v40 = vld [vmem:[#allocation2 + $0x1e] sm:$0x3] }
 0x278   : > { %v1276_v59 = vpop.f32.mrf.mxu1 }
 0x279   : > { %v1597_v14 = vsel %vm1141_vm4, %v1595_v13, %v1596_v5  ;;  %v1671_v22 = vadd.f32 %v1596_v5, %v1527_v0  ;;  %v1370_v24 = vadd.f32 %v1338_v7, %v1276_v59  ;;  %v1342_v0 = vld [vmem:[#allocation2 + $0x86] sm:$0xff] }
 0x27a   : > { %v1670_v38 = vadd.f32 %v1597_v14, %v1526_v12 }
 0x27b   : > { %1703 = vst.msk [vmem:[#allocation2 + $0x58] sm:$0x3] %vm857_vm3, %v1671_v22  ;;  %5015 = vmatmul.msk.bf16.gmra.mxu1 %vm560_vm2, %v5516_v42  ;;  %5032 = vmatmul.msk.bf16.gmra.mxu2 %vm560_vm2, %v5516_v42 }
 0x27c   : > { %1702 = vst.msk [vmem:[#allocation2 + $0x50] sm:$0xff] %vm560_vm2, %v1670_v38  ;;  %5049 = vmatmul.msk.bf16.gmra.mxu3 %vm560_vm2, %v5516_v42 }
 0x27d   : > { %1402 = vst.msk [vmem:[#allocation2 + $0x66] sm:$0xff] %vm560_vm2, %v1370_v24  ;;  %v5101_v24 = vld [vmem:[%s7670_s5 + $0x4] sm:$0xf] }
 0x27e   : > { %v1098_v51 = vpop.f32.mrf.mxu0  ;;  %v1466_v58 = vpop.f32.mrf.mxu2 }
 0x27f   : > { %v1756_v45 = vpop.f32.mrf.mxu3  ;;  %v1598_v50 = vrot.slane %v1466_v58, 6  ;;  %v3582_v58 = vsel %vm609_vm1, %v5101_v24, 0  ;;  %vm2894_vm1 = vcmask 786048  }
 0x280   : > { %v1826_v4 = vadd.f32 %v1806_v63, %v1756_v45  ;;  %v1278_v48 = vpop.f32.mrf.mxu1  ;;  %v1810_v63 = vld [vmem:[#allocation2 + $0x26] sm:$0xff]  ;;  %3591 = vmatpush.bf16.msra.mxu3 %v3582_v58 }
 0x281   : > { %v1371_v32 = vadd.f32 %v1339_v2, %v1278_v48  ;;  %5059 = vmatmul.msk.bf16.gmra.mxu0 %vm560_vm2, %v5364_v3  ;;  %v1343_v2 = vld [vmem:[#allocation2 + $0x8e] sm:$0x3] }
 0x282   : > { %1846 = vst.msk [vmem:[#allocation2 + $0x6] sm:$0xff] %vm560_vm2, %v1826_v4 }
 0x283   : > { %1403 = vst.msk [vmem:[#allocation2 + $0x6e] sm:$0x3] %vm857_vm3, %v1371_v32 }
 0x284   : > { %v1529_v23 = vld [vmem:[#allocation2 + $0x68] sm:$0x3]  ;;  %v1528_v41 = vld [vmem:[#allocation2 + $0x60] sm:$0xff] }
 0x286   : > { %v1099_v21 = vpop.f32.mrf.mxu0  ;;  %v1468_v44 = vpop.f32.mrf.mxu2 }
 0x287   : > { %v1599_v26 = vrot.slane %v1468_v44, 6  ;;  %v1758_v57 = vpop.f32.mrf.mxu3 }
 0x288   : > { %v1827_v39 = vadd.f32 %v1807_v54, %v1758_v57  ;;  %v1281_v18 = vpop.f32.mrf.mxu1  ;;  %v1811_v57 = vld [vmem:[#allocation2 + $0x2e] sm:$0x3] }
 0x289   : > { %v1600_v8 = vsel %vm1141_vm4, %v1598_v50, %v1599_v26  ;;  %v1673_v28 = vadd.f32 %v1599_v26, %v1529_v23  ;;  %v1372_v19 = vadd.f32 %v1340_v36, %v1281_v18  ;;  %v1344_v18 = vld [vmem:[#allocation2 + $0x96] sm:$0xff] }
 0x28a   : > { %v1672_v11 = vadd.f32 %v1600_v8, %v1528_v41  ;;  %1847 = vst.msk [vmem:[#allocation2 + $0xe] sm:$0x3] %vm857_vm3, %v1827_v39 }
 0x28b   : > { %1705 = vst.msk [vmem:[#allocation2 + $0x68] sm:$0x3] %vm857_vm3, %v1673_v28  ;;  %5016 = vmatmul.msk.bf16.gmra.mxu1 %vm560_vm2, %v5548_v27  ;;  %5033 = vmatmul.msk.bf16.gmra.mxu2 %vm560_vm2, %v5548_v27 }
 0x28c   : > { %1704 = vst.msk [vmem:[#allocation2 + $0x60] sm:$0xff] %vm560_vm2, %v1672_v11  ;;  %5050 = vmatmul.msk.bf16.gmra.mxu3 %vm560_vm2, %v5548_v27 }
 0x28d   : > { %1404 = vst.msk [vmem:[#allocation2 + $0x76] sm:$0xff] %vm560_vm2, %v1372_v19 }
 0x28e   : > { %v1471_v29 = vpop.f32.mrf.mxu2  ;;  %v1880_v16 = vpop.f32.mrf.mxu0 }
 0x28f   : > { %v1761_v30 = vpop.f32.mrf.mxu3  ;;  %v1601_v53 = vrot.slane %v1471_v29, 6 }
 0x290   : > { %v1828_v46 = vadd.f32 %v1808_v33, %v1761_v30  ;;  %v1283_v56 = vpop.f32.mrf.mxu1  ;;  %v1812_v30 = vld [vmem:[#allocation2 + $0x36] sm:$0xff] }
 0x291   : > { %v1373_v52 = vadd.f32 %v1341_v35, %v1283_v56  ;;  %5060 = vmatmul.msk.bf16.gmra.mxu0 %vm560_vm2, %v5376_v9  ;;  %v1345_v56 = vld [vmem:[#allocation2 + $0x9e] sm:$0x3] }
 0x292   : > { %1848 = vst.msk [vmem:[#allocation2 + $0x16] sm:$0xff] %vm560_vm2, %v1828_v46 }
 0x293   : > { %1405 = vst.msk [vmem:[#allocation2 + $0x7e] sm:$0x3] %vm857_vm3, %v1373_v52 }
 0x294   : > { %v1531_v13 = vld [vmem:[#allocation2 + $0x78] sm:$0x3]  ;;  %v1530_v59 = vld [vmem:[#allocation2 + $0x70] sm:$0xff] }
 0x296   : > { %v1473_v62 = vpop.f32.mrf.mxu2  ;;  %v1881_v15 = vpop.f32.mrf.mxu0 }
 0x297   : > { %v1602_v1 = vrot.slane %v1473_v62, 6  ;;  %v1763_v17 = vpop.f32.mrf.mxu3 }
 0x298   : > { %v1829_v5 = vadd.f32 %v1809_v40, %v1763_v17  ;;  %v1286_v6 = vpop.f32.mrf.mxu1 }
 0x299   : > { %v1603_v7 = vsel %vm1141_vm4, %v1601_v53, %v1602_v1  ;;  %v1675_v12 = vadd.f32 %v1602_v1, %v1531_v13  ;;  %v1374_v14 = vadd.f32 %v1342_v0, %v1286_v6  ;;  %v1813_v1 = vld [vmem:[#allocation2 + $0x3e] sm:$0x3] }
 0x29a   : > { %v1674_v22 = vadd.f32 %v1603_v7, %v1530_v59  ;;  %1849 = vst.msk [vmem:[#allocation2 + $0x1e] sm:$0x3] %vm857_vm3, %v1829_v5  ;;  %v1346_v5 = vld [vmem:[#allocation2 + $0xa6] sm:$0xff] }
 0x29b   : > { %1707 = vst.msk [vmem:[#allocation2 + $0x78] sm:$0x3] %vm857_vm3, %v1675_v12  ;;  %5069 = vmatmul.msk.bf16.vlgmr.msra.gmra.mxu1 %vm560_vm2, %v5280_v25 }
 0x29c   : > { %1706 = vst.msk [vmem:[#allocation2 + $0x70] sm:$0xff] %vm560_vm2, %v1674_v22 }
 0x29d   : > { %1406 = vst.msk [vmem:[#allocation2 + $0x86] sm:$0xff] %vm560_vm2, %v1374_v14 }
 0x29e   : > { %v1476_v38 = vpop.f32.mrf.mxu2  ;;  %v1883_v51 = vpop.f32.mrf.mxu0 }
 0x29f   : > { %v1766_v45 = vpop.f32.mrf.mxu3  ;;  %v1604_v44 = vrot.slane %v1476_v38, 6  ;;  %v1814_v38 = vld [vmem:[#allocation2 + $0x46] sm:$0xff] }
 0x2a0   : > { %v1830_v4 = vadd.f32 %v1810_v63, %v1766_v45  ;;  %v1288_v48 = vpop.f32.mrf.mxu1  ;;  %v1347_v45 = vld [vmem:[#allocation2 + $0xae] sm:$0x3] }
 0x2a1   : > { %v1375_v32 = vadd.f32 %v1343_v2, %v1288_v48  ;;  %5061 = vmatmul.msk.bf16.gmra.mxu0 %vm560_vm2, %v5398_v20 }
 0x2a2   : > { %1850 = vst.msk [vmem:[#allocation2 + $0x26] sm:$0xff] %vm560_vm2, %v1830_v4 }
 0x2a3   : > { %1407 = vst.msk [vmem:[#allocation2 + $0x8e] sm:$0x3] %vm857_vm3, %v1375_v32 }
 0x2a4   : > { %v1533_v54 = vld [vmem:[#allocation2 + $0x88] sm:$0x3]  ;;  %v1532_v36 = vld [vmem:[#allocation2 + $0x80] sm:$0xff] }
 0x2a6   : > { %v1478_v25 = vpop.f32.mrf.mxu2  ;;  %v1884_v21 = vpop.f32.mrf.mxu0 }
 0x2a7   : > { %v1605_v50 = vrot.slane %v1478_v25, 6  ;;  %v1768_v26 = vpop.f32.mrf.mxu3  ;;  %v1815_v25 = vld [vmem:[#allocation2 + $0x4e] sm:$0x3] }
 0x2a8   : > { %v1831_v23 = vadd.f32 %v1811_v57, %v1768_v26  ;;  %v1291_v39 = vpop.f32.mrf.mxu1  ;;  %v1348_v26 = vld [vmem:[#allocation2 + $0xb6] sm:$0xff] }
 0x2a9   : > { %v1606_v41 = vsel %vm1141_vm4, %v1604_v44, %v1605_v50  ;;  %v1677_v8 = vadd.f32 %v1605_v50, %v1533_v54  ;;  %v1376_v28 = vadd.f32 %v1344_v18, %v1291_v39 }
 0x2aa   : > { %v1676_v19 = vadd.f32 %v1606_v41, %v1532_v36  ;;  %1851 = vst.msk [vmem:[#allocation2 + $0x2e] sm:$0x3] %vm857_vm3, %v1831_v23 }
 0x2ab   : > { %1709 = vst.msk [vmem:[#allocation2 + $0x88] sm:$0x3] %vm857_vm3, %v1677_v8  ;;  %5070 = vmatmul.msk.bf16.gmra.mxu1 %vm560_vm2, %v5292_v31 }
 0x2ac   : > { %1708 = vst.msk [vmem:[#allocation2 + $0x80] sm:$0xff] %vm560_vm2, %v1676_v19 }
 0x2ad   : > { %1408 = vst.msk [vmem:[#allocation2 + $0x96] sm:$0xff] %vm560_vm2, %v1376_v28  ;;  %v1816_v28 = vld [vmem:[#allocation2 + $0x56] sm:$0xff] }
 0x2ae   : > { %v1481_v11 = vpop.f32.mrf.mxu2  ;;  %v1886_v29 = vpop.f32.mrf.mxu0 }
 0x2af   : > { %v1771_v16 = vpop.f32.mrf.mxu3  ;;  %v1607_v62 = vrot.slane %v1481_v11, 6  ;;  %v1349_v29 = vld [vmem:[#allocation2 + $0xbe] sm:$0x3] }
 0x2b0   : > { %v1832_v33 = vadd.f32 %v1812_v30, %v1771_v16  ;;  %v1293_v46 = vpop.f32.mrf.mxu1 }
 0x2b1   : > { %v1377_v35 = vadd.f32 %v1345_v56, %v1293_v46  ;;  %5062 = vmatmul.msk.bf16.gmra.mxu0 %vm560_vm2, %v5420_v34 }
 0x2b2   : > { %1852 = vst.msk [vmem:[#allocation2 + $0x36] sm:$0xff] %vm560_vm2, %v1832_v33 }
 0x2b3   : > { %1409 = vst.msk [vmem:[#allocation2 + $0x9e] sm:$0x3] %vm857_vm3, %v1377_v35  ;;  %v1817_v35 = vld [vmem:[#allocation2 + $0x5e] sm:$0x3] }
 0x2b4   : > { %v1535_v17 = vld [vmem:[#allocation2 + $0x98] sm:$0x3]  ;;  %v1534_v6 = vld [vmem:[#allocation2 + $0x90] sm:$0xff] }
 0x2b6   : > { %v1483_v31 = vpop.f32.mrf.mxu2  ;;  %v1887_v52 = vpop.f32.mrf.mxu0 }
 0x2b7   : > { %v1608_v15 = vrot.slane %v1483_v31, 6  ;;  %v1773_v53 = vpop.f32.mrf.mxu3 }
 0x2b8   : > { %v1833_v40 = vadd.f32 %v1813_v1, %v1773_v53  ;;  %v1296_v13 = vpop.f32.mrf.mxu1 }
 0x2b9   : > { %v1609_v0 = vsel %vm1141_vm4, %v1607_v62, %v1608_v15  ;;  %v1679_v59 = vadd.f32 %v1608_v15, %v1535_v17  ;;  %v1378_v7 = vadd.f32 %v1346_v5, %v1296_v13  ;;  %v1350_v15 = vld [vmem:[#allocation2 + $0xc6] sm:$0xff] }
 0x2ba   : > { %v1678_v12 = vadd.f32 %v1609_v0, %v1534_v6  ;;  %1853 = vst.msk [vmem:[#allocation2 + $0x3e] sm:$0x3] %vm857_vm3, %v1833_v40 }
 0x2bb   : > { %1711 = vst.msk [vmem:[#allocation2 + $0x98] sm:$0x3] %vm857_vm3, %v1679_v59  ;;  %5071 = vmatmul.msk.bf16.gmra.mxu1 %vm560_vm2, %v5304_v37  ;;  %v1818_v59 = vld [vmem:[#allocation2 + $0x66] sm:$0xff] }
 0x2bc   : > { %1710 = vst.msk [vmem:[#allocation2 + $0x90] sm:$0xff] %vm560_vm2, %v1678_v12 }
 0x2bd   : > { %1410 = vst.msk [vmem:[#allocation2 + $0xa6] sm:$0xff] %vm560_vm2, %v1378_v7 }
 0x2be   : > { %v1486_v14 = vpop.f32.mrf.mxu2  ;;  %v1889_v22 = vpop.f32.mrf.mxu0 }
 0x2bf   : > { %v1776_v24 = vpop.f32.mrf.mxu3  ;;  %v1610_v48 = vrot.slane %v1486_v14, 6  ;;  %v1351_v14 = vld [vmem:[#allocation2 + $0xce] sm:$0x3] }
 0x2c0   : > { %v1834_v51 = vadd.f32 %v1814_v38, %v1776_v24  ;;  %v1298_v58 = vpop.f32.mrf.mxu1 }
 0x2c1   : > { %v1379_v63 = vadd.f32 %v1347_v45, %v1298_v58  ;;  %5063 = vmatmul.msk.bf16.gmra.mxu0 %vm560_vm2, %v5442_v47  ;;  %v1819_v45 = vld [vmem:[#allocation2 + $0x6e] sm:$0x3] }
 0x2c2   : > { %1854 = vst.msk [vmem:[#allocation2 + $0x46] sm:$0xff] %vm560_vm2, %v1834_v51 }
 0x2c3   : > { %1411 = vst.msk [vmem:[#allocation2 + $0xae] sm:$0x3] %vm857_vm3, %v1379_v63 }
 0x2c4   : > { %v1537_v21 = vld [vmem:[#allocation2 + $0xa8] sm:$0x3]  ;;  %v1536_v57 = vld [vmem:[#allocation2 + $0xa0] sm:$0xff] }
 0x2c6   : > { %v1488_v37 = vpop.f32.mrf.mxu2  ;;  %v1890_v4 = vpop.f32.mrf.mxu0 }
 0x2c7   : > { %v1611_v2 = vrot.slane %v1488_v37, 6  ;;  %v1778_v32 = vpop.f32.mrf.mxu3 }
 0x2c8   : > { %v1835_v44 = vadd.f32 %v1815_v25, %v1778_v32  ;;  %v1301_v50 = vpop.f32.mrf.mxu1 }
 0x2c9   : > { %v1612_v54 = vsel %vm1141_vm4, %v1610_v48, %v1611_v2  ;;  %v1681_v23 = vadd.f32 %v1611_v2, %v1537_v21  ;;  %v1380_v39 = vadd.f32 %v1348_v26, %v1301_v50  ;;  %v1352_v48 = vld [vmem:[#allocation2 + $0xd6] sm:$0xff] }
 0x2ca   : > { %v1680_v18 = vadd.f32 %v1612_v54, %v1536_v57  ;;  %1855 = vst.msk [vmem:[#allocation2 + $0x4e] sm:$0x3] %vm857_vm3, %v1835_v44  ;;  %v1948_v57 = vld [vmem:[#allocation2] sm:$0xff] }
 0x2cb   : > { %1713 = vst.msk [vmem:[#allocation2 + $0xa8] sm:$0x3] %vm857_vm3, %v1681_v23  ;;  %5072 = vmatmul.msk.bf16.gmra.mxu1 %vm560_vm2, %v5316_v43  ;;  %v1820_v23 = vld [vmem:[#allocation2 + $0x76] sm:$0xff] }
 0x2cc   : > { %1712 = vst.msk [vmem:[#allocation2 + $0xa0] sm:$0xff] %vm560_vm2, %v1680_v18 }
 0x2cd   : > { %1412 = vst.msk [vmem:[#allocation2 + $0xb6] sm:$0xff] %vm560_vm2, %v1380_v39 }
 0x2ce   : > { %v1491_v36 = vpop.f32.mrf.mxu2  ;;  %v1892_v41 = vpop.f32.mrf.mxu0 }
 0x2cf   : > { %v1781_v8 = vpop.f32.mrf.mxu3  ;;  %v1613_v33 = vrot.slane %v1491_v36, 6  ;;  %v1353_v41 = vld [vmem:[#allocation2 + $0xde] sm:$0x3] }
 0x2d0   : > { %v1836_v19 = vadd.f32 %v1816_v28, %v1781_v8  ;;  %v1303_v11 = vpop.f32.mrf.mxu1 }
 0x2d1   : > { %v1381_v16 = vadd.f32 %v1349_v29, %v1303_v11  ;;  %5064 = vmatmul.msk.bf16.gmra.mxu0 %vm560_vm2, %v5464_v60 }
 0x2d2   : > { %1856 = vst.msk [vmem:[#allocation2 + $0x56] sm:$0xff] %vm560_vm2, %v1836_v19  ;;  %v1949_v19 = vld [vmem:[#allocation2 + $0x8] sm:$0xff] }
 0x2d3   : > { %1413 = vst.msk [vmem:[#allocation2 + $0xbe] sm:$0x3] %vm857_vm3, %v1381_v16 }
 0x2d4   : > { %v1539_v31 = vld [vmem:[#allocation2 + $0xb8] sm:$0x3]  ;;  %v1538_v53 = vld [vmem:[#allocation2 + $0xb0] sm:$0xff] }
 0x2d6   : > { %v1493_v43 = vpop.f32.mrf.mxu2  ;;  %v1893_v30 = vpop.f32.mrf.mxu0 }
 0x2d7   : > { %v1614_v46 = vrot.slane %v1493_v43, 6  ;;  %v1783_v56 = vpop.f32.mrf.mxu3  ;;  %v1821_v43 = vld [vmem:[#allocation2 + $0x7e] sm:$0x3] }
 0x2d8   : > { %v1837_v52 = vadd.f32 %v1817_v35, %v1783_v56  ;;  %v1306_v62 = vpop.f32.mrf.mxu1  ;;  %v1354_v35 = vld [vmem:[#allocation2 + $0xe6] sm:$0xff] }
 0x2d9   : > { %v1615_v1 = vsel %vm1141_vm4, %v1613_v33, %v1614_v46  ;;  %v1683_v17 = vadd.f32 %v1614_v46, %v1539_v31  ;;  %v1382_v40 = vadd.f32 %v1350_v15, %v1306_v62 }
 0x2da   : > { %v1682_v13 = vadd.f32 %v1615_v1, %v1538_v53  ;;  %1857 = vst.msk [vmem:[#allocation2 + $0x5e] sm:$0x3] %vm857_vm3, %v1837_v52 }
 0x2db   : > { %1715 = vst.msk [vmem:[#allocation2 + $0xb8] sm:$0x3] %vm857_vm3, %v1683_v17  ;;  %5073 = vmatmul.msk.bf16.gmra.mxu1 %vm560_vm2, %v5328_v49 }
 0x2dc   : > { %1714 = vst.msk [vmem:[#allocation2 + $0xb0] sm:$0xff] %vm560_vm2, %v1682_v13 }
 0x2dd   : > { %1414 = vst.msk [vmem:[#allocation2 + $0xc6] sm:$0xff] %vm560_vm2, %v1382_v40  ;;  %v1950_v40 = vld [vmem:[#allocation2 + $0x10] sm:$0xff] }
 0x2de   : > { %v1496_v5 = vpop.f32.mrf.mxu2  ;;  %v1895_v6 = vpop.f32.mrf.mxu0 }
 0x2df   : > { %v1786_v0 = vpop.f32.mrf.mxu3  ;;  %v1616_v38 = vrot.slane %v1496_v5, 6  ;;  %v1822_v5 = vld [vmem:[#allocation2 + $0x86] sm:$0xff] }
 0x2e0   : > { %v1838_v7 = vadd.f32 %v1818_v59, %v1786_v0  ;;  %v1308_v12 = vpop.f32.mrf.mxu1 }
 0x2e1   : > { %v1383_v22 = vadd.f32 %v1351_v14, %v1308_v12  ;;  %5065 = vmatmul.msk.bf16.gmra.mxu0 %vm560_vm2, %v5486_v10 }
 0x2e2   : > { %1858 = vst.msk [vmem:[#allocation2 + $0x66] sm:$0xff] %vm560_vm2, %v1838_v7  ;;  %v1355_v7 = vld [vmem:[#allocation2 + $0xee] sm:$0x3] }
 0x2e3   : > { %1415 = vst.msk [vmem:[#allocation2 + $0xce] sm:$0x3] %vm857_vm3, %v1383_v22  ;;  %v1951_v22 = vld [vmem:[#allocation2 + $0x18] sm:$0xff] }
 0x2e4   : > { %v1541_v63 = vld [vmem:[#allocation2 + $0xc8] sm:$0x3]  ;;  %v1540_v2 = vld [vmem:[#allocation2 + $0xc0] sm:$0xff] }
 0x2e6   : > { %v1498_v49 = vpop.f32.mrf.mxu2  ;;  %v1896_v24 = vpop.f32.mrf.mxu0 }
 0x2e7   : > { %v1617_v51 = vrot.slane %v1498_v49, 6  ;;  %v1788_v58 = vpop.f32.mrf.mxu3 }
 0x2e8   : > { %v1839_v37 = vadd.f32 %v1819_v45, %v1788_v58  ;;  %v1311_v4 = vpop.f32.mrf.mxu1 }
 0x2e9   : > { %v1618_v32 = vsel %vm1141_vm4, %v1616_v38, %v1617_v51  ;;  %v1685_v25 = vadd.f32 %v1617_v51, %v1541_v63  ;;  %v1384_v21 = vadd.f32 %v1352_v48, %v1311_v4  ;;  %v1823_v51 = vld [vmem:[#allocation2 + $0x8e] sm:$0x3]  ;;  %v1356_v4 = vld [vmem:[#allocation2 + $0xf6] sm:$0xff] }
 0x2ea   : > { %v1684_v44 = vadd.f32 %v1618_v32, %v1540_v2  ;;  %1859 = vst.msk [vmem:[#allocation2 + $0x6e] sm:$0x3] %vm857_vm3, %v1839_v37 }
 0x2eb   : > { %1717 = vst.msk [vmem:[#allocation2 + $0xc8] sm:$0x3] %vm857_vm3, %v1685_v25  ;;  %5074 = vmatmul.msk.bf16.gmra.mxu1 %vm560_vm2, %v5340_v55 }
 0x2ec   : > { %1716 = vst.msk [vmem:[#allocation2 + $0xc0] sm:$0xff] %vm560_vm2, %v1684_v44 }
 0x2ed   : > { %1416 = vst.msk [vmem:[#allocation2 + $0xd6] sm:$0xff] %vm560_vm2, %v1384_v21 }
 0x2ee   : > { %v1501_v50 = vpop.f32.mrf.mxu2  ;;  %v1898_v26 = vpop.f32.mrf.mxu0 }
 0x2ef   : > { %v1791_v54 = vpop.f32.mrf.mxu3  ;;  %v1968_v39 = vadd.f32 %v1948_v57, %v1898_v26  ;;  %v1619_v11 = vrot.slane %v1501_v50, 6  ;;  %v1952_v26 = vld [vmem:[#allocation2 + $0x20] sm:$0xff] }
 0x2f0   : > { %v1840_v18 = vadd.f32 %v1820_v23, %v1791_v54  ;;  %v1313_v36 = vpop.f32.mrf.mxu1  ;;  %v1824_v54 = vld [vmem:[#allocation2 + $0x96] sm:$0xff] }
 0x2f1   : > { %1988 = vst.msk [vmem:[#allocation2] sm:$0xff] %vm560_vm2, %v1968_v39  ;;  %v1385_v8 = vadd.f32 %v1353_v41, %v1313_v36  ;;  %5066 = vmatmul.msk.bf16.gmra.mxu0 %vm560_vm2, %v5516_v42  ;;  %v1357_v36 = vld [vmem:[#allocation2 + $0xfe] sm:$0x3] }
 0x2f2   : > { %1860 = vst.msk [vmem:[#allocation2 + $0x76] sm:$0xff] %vm560_vm2, %v1840_v18 }
 0x2f3   : > { %1417 = vst.msk [vmem:[#allocation2 + $0xde] sm:$0x3] %vm857_vm3, %v1385_v8 }
 0x2f4   : > { %v1543_v33 = vld [vmem:[#allocation2 + $0xd8] sm:$0x3]  ;;  %v1542_v31 = vld [vmem:[#allocation2 + $0xd0] sm:$0xff] }
 0x2f6   : > { %v1503_v55 = vpop.f32.mrf.mxu2  ;;  %v1900_v28 = vpop.f32.mrf.mxu0 }
 0x2f7   : > { %v1620_v29 = vrot.slane %v1503_v55, 6  ;;  %v1793_v16 = vpop.f32.mrf.mxu3  ;;  %v1969_v30 = vadd.f32 %v1949_v19, %v1900_v28  ;;  %v1953_v55 = vld [vmem:[#allocation2 + $0x28] sm:$0xff] }
 0x2f8   : > { %v1841_v46 = vadd.f32 %v1821_v43, %v1793_v16  ;;  %v1316_v56 = vpop.f32.mrf.mxu1 }
 0x2f9   : > { %v1621_v52 = vsel %vm1141_vm4, %v1619_v11, %v1620_v29  ;;  %v1687_v62 = vadd.f32 %v1620_v29, %v1543_v33  ;;  %1989 = vst.msk [vmem:[#allocation2 + $0x8] sm:$0xff] %vm560_vm2, %v1969_v30  ;;  %v1386_v15 = vadd.f32 %v1354_v35, %v1316_v56  ;;  %v1825_v29 = vld [vmem:[#allocation2 + $0x9e] sm:$0x3] }
 0x2fa   : > { %v1686_v53 = vadd.f32 %v1621_v52, %v1542_v31  ;;  %1861 = vst.msk [vmem:[#allocation2 + $0x7e] sm:$0x3] %vm857_vm3, %v1841_v46 }
 0x2fb   : > { %1719 = vst.msk [vmem:[#allocation2 + $0xd8] sm:$0x3] %vm857_vm3, %v1687_v62  ;;  %5075 = vmatmul.msk.bf16.gmra.mxu1 %vm560_vm2, %v5352_v61  ;;  %v1954_v62 = vld [vmem:[#allocation2 + $0x30] sm:$0xff] }
 0x2fc   : > { %1718 = vst.msk [vmem:[#allocation2 + $0xd0] sm:$0xff] %vm560_vm2, %v1686_v53 }
 0x2fd   : > { %1418 = vst.msk [vmem:[#allocation2 + $0xe6] sm:$0xff] %vm560_vm2, %v1386_v15 }
 0x2fe   : > { %v1506_v1 = vpop.f32.mrf.mxu2  ;;  %v1903_v17 = vpop.f32.mrf.mxu0 }
 0x2ff   : > { %v1796_v13 = vpop.f32.mrf.mxu3  ;;  %v1970_v6 = vadd.f32 %v1950_v40, %v1903_v17  ;;  %v1622_v49 = vrot.slane %v1506_v1, 6  ;;  %v1955_v17 = vld [vmem:[#allocation2 + $0x38] sm:$0xff] }
 0x300   : > { %v1842_v0 = vadd.f32 %v1822_v5, %v1796_v13  ;;  %v1318_v59 = vpop.f32.mrf.mxu1 }
 0x301   : > { %1990 = vst.msk [vmem:[#allocation2 + $0x10] sm:$0xff] %vm560_vm2, %v1970_v6  ;;  %v1387_v12 = vadd.f32 %v1355_v7, %v1318_v59  ;;  %5067 = vmatmul.msk.bf16.gmra.mxu0 %vm560_vm2, %v5548_v27  ;;  %v1956_v6 = vld [vmem:[#allocation2 + $0x40] sm:$0xff]  ;;  %v1957_v7 = vld [vmem:[#allocation2 + $0x48] sm:$0xff] }
 0x302   : > { %1862 = vst.msk [vmem:[#allocation2 + $0x86] sm:$0xff] %vm560_vm2, %v1842_v0 }
 0x303   : > { %1419 = vst.msk [vmem:[#allocation2 + $0xee] sm:$0x3] %vm857_vm3, %v1387_v12 }
 0x304   : > { %v1545_v45 = vld [vmem:[#allocation2 + $0xe8] sm:$0x3]  ;;  %v1544_v48 = vld [vmem:[#allocation2 + $0xe0] sm:$0xff] }
 0x306   : > { %v1508_v61 = vpop.f32.mrf.mxu2  ;;  %v1905_v14 = vpop.f32.mrf.mxu0 }
 0x307   : > { %v1623_v24 = vrot.slane %v1508_v61, 6  ;;  %v1798_v38 = vpop.f32.mrf.mxu3  ;;  %v1971_v58 = vadd.f32 %v1951_v22, %v1905_v14  ;;  %v1958_v22 = vld [vmem:[#allocation2 + $0x50] sm:$0xff] }
 0x308   : > { %v1843_v63 = vadd.f32 %v1823_v51, %v1798_v38  ;;  %v1321_v37 = vpop.f32.mrf.mxu1  ;;  %v1959_v38 = vld [vmem:[#allocation2 + $0x58] sm:$0xff] }
 0x309   : > { %v1624_v2 = vsel %vm1141_vm4, %v1622_v49, %v1623_v24  ;;  %v1689_v32 = vadd.f32 %v1623_v24, %v1545_v45  ;;  %1991 = vst.msk [vmem:[#allocation2 + $0x18] sm:$0xff] %vm560_vm2, %v1971_v58  ;;  %v1388_v25 = vadd.f32 %v1356_v4, %v1321_v37 }
 0x30a   : > { %v1688_v21 = vadd.f32 %v1624_v2, %v1544_v48  ;;  %1863 = vst.msk [vmem:[#allocation2 + $0x8e] sm:$0x3] %vm857_vm3, %v1843_v63  ;;  %v1960_v63 = vld [vmem:[#allocation2 + $0x60] sm:$0xff]  ;;  %v1961_v48 = vld [vmem:[#allocation2 + $0x68] sm:$0xff] }
 0x30b   : > { %1721 = vst.msk [vmem:[#allocation2 + $0xe8] sm:$0x3] %vm857_vm3, %v1689_v32  ;;  %5076 = vmatmul.msk.bf16.gmra.mxu1 %vm560_vm2, %v5364_v3 }
 0x30c   : > { %1720 = vst.msk [vmem:[#allocation2 + $0xe0] sm:$0xff] %vm560_vm2, %v1688_v21  ;;  %v1962_v21 = vld [vmem:[#allocation2 + $0x70] sm:$0xff] }
 0x30d   : > { %1420 = vst.msk [vmem:[#allocation2 + $0xf6] sm:$0xff] %vm560_vm2, %v1388_v25 }
 0x30e   : > { %v1511_v44 = vpop.f32.mrf.mxu2  ;;  %v1908_v50 = vpop.f32.mrf.mxu0 }
 0x30f   : > { %v1801_v57 = vpop.f32.mrf.mxu3  ;;  %v1972_v23 = vadd.f32 %v1952_v26, %v1908_v50  ;;  %v1625_v28 = vrot.slane %v1511_v44, 6  ;;  %v1963_v26 = vld [vmem:[#allocation2 + $0x78] sm:$0xff] }
 0x310   : > { %v1844_v39 = vadd.f32 %v1824_v54, %v1801_v57  ;;  %v1323_v18 = vpop.f32.mrf.mxu1 }
 0x311   : > { %1992 = vst.msk [vmem:[#allocation2 + $0x20] sm:$0xff] %vm560_vm2, %v1972_v23  ;;  %v1389_v41 = vadd.f32 %v1357_v36, %v1323_v18 }
 0x312   : > { %1864 = vst.msk [vmem:[#allocation2 + $0x96] sm:$0xff] %vm560_vm2, %v1844_v39  ;;  %v1964_v39 = vld [vmem:[#allocation2 + $0x80] sm:$0xff] }
 0x313   : > { %1421 = vst.msk [vmem:[#allocation2 + $0xfe] sm:$0x3] %vm857_vm3, %v1389_v41  ;;  %v1965_v41 = vld [vmem:[#allocation2 + $0x88] sm:$0xff] }
 0x314   : > { %v1547_v43 = vld [vmem:[#allocation2 + $0xf8] sm:$0x3]  ;;  %v1546_v46 = vld [vmem:[#allocation2 + $0xf0] sm:$0xff] }
 0x316   : > { %v1513_v3 = vpop.f32.mrf.mxu2  ;;  %v1910_v8 = vpop.f32.mrf.mxu0 }
 0x317   : > { %v1626_v19 = vrot.slane %v1513_v3, 6  ;;  %v1803_v11 = vpop.f32.mrf.mxu3  ;;  %v1973_v16 = vadd.f32 %v1953_v55, %v1910_v8 }
 0x318   : > { %v1845_v30 = vadd.f32 %v1825_v29, %v1803_v11  ;;  %v2022_v33 = vpop.f32.mrf.mxu1 }
 0x319   : > { %v1627_v56 = vsel %vm1141_vm4, %v1625_v28, %v1626_v19  ;;  %v1691_v35 = vadd.f32 %v1626_v19, %v1547_v43  ;;  %1993 = vst.msk [vmem:[#allocation2 + $0x28] sm:$0xff] %vm560_vm2, %v1973_v16  ;;  %v1966_v28 = vld [vmem:[#allocation2 + $0x90] sm:$0xff]  ;;  %v2091_v16 = vld [vmem:[#allocation2 + $0x8] sm:$0x3]  ;;  %v2090_v43 = vld [vmem:[#allocation2] sm:$0xff] }
 0x31a   : > { %v1690_v31 = vadd.f32 %v1627_v56, %v1546_v46  ;;  %1865 = vst.msk [vmem:[#allocation2 + $0x9e] sm:$0x3] %vm857_vm3, %v1845_v30 }
 0x31b   : > { %1723 = vst.msk [vmem:[#allocation2 + $0xf8] sm:$0x3] %vm857_vm3, %v1691_v35  ;;  %5077 = vmatmul.msk.bf16.gmra.mxu1 %vm560_vm2, %v5376_v9 }
 0x31c   : > { %1722 = vst.msk [vmem:[#allocation2 + $0xf0] sm:$0xff] %vm560_vm2, %v1690_v31 }
 0x31e   : > { %v1913_v52 = vpop.f32.mrf.mxu0 }
 0x31f   : > { %v1974_v15 = vadd.f32 %v1954_v62, %v1913_v52  ;;  %v6016_v52 = vld [vmem:[%s7669_s4] ss:$0 sm:$0xff] }
 0x320   : > { %v2023_v53 = vpop.f32.mrf.mxu1 }
 0x321   : > { %1994 = vst.msk [vmem:[#allocation2 + $0x30] sm:$0xff] %vm560_vm2, %v1974_v15 }
 0x326   : > { %v1915_v1 = vpop.f32.mrf.mxu0 }
 0x327   : > { %v1975_v40 = vadd.f32 %v1955_v17, %v1915_v1 }
 0x328   : > { %v2025_v13 = vpop.f32.mrf.mxu1 }
 0x329   : > { %1995 = vst.msk [vmem:[#allocation2 + $0x38] sm:$0xff] %vm560_vm2, %v1975_v40 }
 0x32b   : > { %5078 = vmatmul.msk.bf16.gmra.mxu1 %vm560_vm2, %v5398_v20 }
 0x32e   : > { %v1918_v5 = vpop.f32.mrf.mxu0 }
 0x32f   : > { %v1976_v9 = vadd.f32 %v1956_v6, %v1918_v5  ;;  %v2093_v6 = vld [vmem:[#allocation2 + $0x18] sm:$0x3] }
 0x330   : > { %v2026_v0 = vpop.f32.mrf.mxu1 }
 0x331   : > { %1996 = vst.msk [vmem:[#allocation2 + $0x40] sm:$0xff] %vm560_vm2, %v1976_v9 }
 0x336   : > { %v1920_v59 = vpop.f32.mrf.mxu0 }
 0x337   : > { %v1977_v12 = vadd.f32 %v1957_v7, %v1920_v59 }
 0x338   : > { %v2028_v61 = vpop.f32.mrf.mxu1 }
 0x339   : > { %1997 = vst.msk [vmem:[#allocation2 + $0x48] sm:$0xff] %vm560_vm2, %v1977_v12 }
 0x33b   : > { %5079 = vmatmul.msk.bf16.gmra.mxu1 %vm560_vm2, %v5420_v34 }
 0x33e   : > { %v1923_v14 = vpop.f32.mrf.mxu0 }
 0x33f   : > { %v1978_v49 = vadd.f32 %v1958_v22, %v1923_v14 }
 0x340   : > { %v2029_v24 = vpop.f32.mrf.mxu1 }
 0x341   : > { %1998 = vst.msk [vmem:[#allocation2 + $0x50] sm:$0xff] %vm560_vm2, %v1978_v49 }
 0x346   : > { %v1925_v20 = vpop.f32.mrf.mxu0 }
 0x347   : > { %v1979_v51 = vadd.f32 %v1959_v38, %v1925_v20 }
 0x348   : > { %v2031_v58 = vpop.f32.mrf.mxu1 }
 0x349   : > { %1999 = vst.msk [vmem:[#allocation2 + $0x58] sm:$0xff] %vm560_vm2, %v1979_v51  ;;  %v2095_v51 = vld [vmem:[#allocation2 + $0x28] sm:$0x3]  ;;  %v2094_v58 = vld [vmem:[#allocation2 + $0x20] sm:$0xff] }
 0x34b   : > { %5080 = vmatmul.msk.bf16.gmra.mxu1 %vm560_vm2, %v5442_v47 }
 0x34e   : > { %v1928_v45 = vpop.f32.mrf.mxu0 }
 0x34f   : > { %v1980_v37 = vadd.f32 %v1960_v63, %v1928_v45 }
 0x350   : > { %v2032_v4 = vpop.f32.mrf.mxu1 }
 0x351   : > { %2000 = vst.msk [vmem:[#allocation2 + $0x60] sm:$0xff] %vm560_vm2, %v1980_v37 }
 0x356   : > { %v1930_v34 = vpop.f32.mrf.mxu0 }
 0x357   : > { %v1981_v2 = vadd.f32 %v1961_v48, %v1930_v34 }
 0x358   : > { %v2034_v32 = vpop.f32.mrf.mxu1 }
 0x359   : > { %2001 = vst.msk [vmem:[#allocation2 + $0x68] sm:$0xff] %vm560_vm2, %v1981_v2 }
 0x35b   : > { %5081 = vmatmul.msk.bf16.gmra.mxu1 %vm560_vm2, %v5464_v60 }
 0x35e   : > { %v1933_v25 = vpop.f32.mrf.mxu0 }
 0x35f   : > { %v1982_v44 = vadd.f32 %v1962_v21, %v1933_v25 }
 0x360   : > { %v2035_v50 = vpop.f32.mrf.mxu1 }
 0x361   : > { %2002 = vst.msk [vmem:[#allocation2 + $0x70] sm:$0xff] %vm560_vm2, %v1982_v44 }
 0x366   : > { %v1935_v47 = vpop.f32.mrf.mxu0 }
 0x367   : > { %v1983_v57 = vadd.f32 %v1963_v26, %v1935_v47  ;;  %v2097_v47 = vld [vmem:[#allocation2 + $0x38] sm:$0x3]  ;;  %v2096_v26 = vld [vmem:[#allocation2 + $0x30] sm:$0xff] }
 0x368   : > { %v2037_v54 = vpop.f32.mrf.mxu1 }
 0x369   : > { %2003 = vst.msk [vmem:[#allocation2 + $0x78] sm:$0xff] %vm560_vm2, %v1983_v57 }
 0x36b   : > { %5082 = vmatmul.msk.bf16.gmra.mxu1 %vm560_vm2, %v5486_v10 }
 0x36e   : > { %v1938_v23 = vpop.f32.mrf.mxu0 }
 0x36f   : > { %v1984_v18 = vadd.f32 %v1964_v39, %v1938_v23 }
 0x370   : > { %v2038_v36 = vpop.f32.mrf.mxu1 }
 0x371   : > { %2004 = vst.msk [vmem:[#allocation2 + $0x80] sm:$0xff] %vm560_vm2, %v1984_v18 }
 0x376   : > { %v1940_v60 = vpop.f32.mrf.mxu0 }
 0x377   : > { %v1985_v3 = vadd.f32 %v1965_v41, %v1940_v60 }
 0x378   : > { %v2040_v8 = vpop.f32.mrf.mxu1 }
 0x379   : > { %2005 = vst.msk [vmem:[#allocation2 + $0x88] sm:$0xff] %vm560_vm2, %v1985_v3  ;;  %v2130_v10 = vrot.slane %v2040_v8, 6 }
 0x37b   : > { %5083 = vmatmul.msk.bf16.gmra.mxu1 %vm560_vm2, %v5516_v42  ;;  %v1967_v42 = vld [vmem:[#allocation2 + $0x98] sm:$0xff] }
 0x37e   : > { %v1943_v55 = vpop.f32.mrf.mxu0 }
 0x37f   : > { %v1986_v19 = vadd.f32 %v1966_v28, %v1943_v55 }
 0x380   : > { %v2042_v11 = vpop.f32.mrf.mxu1 }
 0x381   : > { %2006 = vst.msk [vmem:[#allocation2 + $0x90] sm:$0xff] %vm560_vm2, %v1986_v19  ;;  %v2131_v29 = vrot.slane %v2042_v11, 6  ;;  %v2099_v19 = vld [vmem:[#allocation2 + $0x48] sm:$0x3]  ;;  %v2098_v11 = vld [vmem:[#allocation2 + $0x40] sm:$0xff] }
 0x383   : > { %v2132_v30 = vsel %vm1141_vm4, %v2130_v10, %v2131_v29  ;;  %v2181_v33 = vadd.f32 %v2131_v29, %v2091_v16 }
 0x384   : > { %v2180_v46 = vadd.f32 %v2132_v30, %v2090_v43 }
 0x385   : > { %2201 = vst.msk [vmem:[#allocation2 + $0x8] sm:$0x3] %vm857_vm3, %v2181_v33 }
 0x386   : > { %2200 = vst.msk [vmem:[#allocation2] sm:$0xff] %vm560_vm2, %v2180_v46  ;;  %v1945_v56 = vpop.f32.mrf.mxu0 }
 0x387   : > { %v1987_v35 = vadd.f32 %v1967_v42, %v1945_v56 }
 0x388   : > { %v2045_v31 = vpop.f32.mrf.mxu1 }
 0x389   : > { %2007 = vst.msk [vmem:[#allocation2 + $0x98] sm:$0xff] %vm560_vm2, %v1987_v35  ;;  %v2133_v13 = vrot.slane %v2045_v31, 6 }
 0x38b   : > { %5084 = vmatmul.msk.bf16.gmra.mxu1 %vm560_vm2, %v5548_v27  ;;  %v2092_v27 = vld [vmem:[#allocation2 + $0x10] sm:$0xff] }
 0x38c   : > { %v2221_v62 = vld [vmem:[#allocation2 + $0x8] sm:$0xff] }
 0x38d   : > { %v2220_v15 = vld [vmem:[#allocation2] sm:$0xff]  ;;  %v2257_v53 = vadd.f32 %v6016_v52, %v2221_v62 }
 0x38e   : > { %v2256_v1 = vadd.f32 %v6016_v52, %v2220_v15  ;;  %v2101_v15 = vld [vmem:[#allocation2 + $0x58] sm:$0x3] }
 0x390   : > { %v2047_v17 = vpop.f32.mrf.mxu1  ;;  %v2288_v40 = vpack.c.bf16 %v2257_v53, %v2256_v1  ;;  %v2100_v53 = vld [vmem:[#allocation2 + $0x50] sm:$0xff] }
 0x391   : > { %v2134_v5 = vrot.slane %v2047_v17, 6 }
 0x392   : > { %5085 = vmatmul.msk.bf16.vlgmr.msra.gmra.mxu2 %vm560_vm2, %v2288_v40  ;;  %5102 = vmatmul.msk.bf16.vlgmr.msra.gmra.mxu3 %vm560_vm2, %v2288_v40 }
 0x393   : > { %v2135_v9 = vsel %vm1141_vm4, %v2133_v13, %v2134_v5  ;;  %v2183_v0 = vadd.f32 %v2134_v5, %v2093_v6 }
 0x394   : > { %v2182_v59 = vadd.f32 %v2135_v9, %v2092_v27 }
 0x395   : > { %2203 = vst.msk [vmem:[#allocation2 + $0x18] sm:$0x3] %vm857_vm3, %v2183_v0 }
 0x396   : > { %2202 = vst.msk [vmem:[#allocation2 + $0x10] sm:$0xff] %vm560_vm2, %v2182_v59 }
 0x398   : > { %v2050_v7 = vpop.f32.mrf.mxu1 }
 0x399   : > { %v2136_v20 = vrot.slane %v2050_v7, 6 }
 0x39c   : > { %v2223_v12 = vld [vmem:[#allocation2 + $0x18] sm:$0xff] }
 0x39d   : > { %v2222_v61 = vld [vmem:[#allocation2 + $0x10] sm:$0xff]  ;;  %v2259_v14 = vadd.f32 %v6016_v52, %v2223_v12 }
 0x39e   : > { %v2258_v22 = vadd.f32 %v6016_v52, %v2222_v61  ;;  %v2103_v61 = vld [vmem:[#allocation2 + $0x68] sm:$0x3] }
 0x3a0   : > { %v2052_v49 = vpop.f32.mrf.mxu1  ;;  %v2289_v24 = vpack.c.bf16 %v2259_v14, %v2258_v22  ;;  %v2102_v14 = vld [vmem:[#allocation2 + $0x60] sm:$0xff] }
 0x3a1   : > { %v2137_v38 = vrot.slane %v2052_v49, 6 }
 0x3a2   : > { %5086 = vmatmul.msk.bf16.gmra.mxu2 %vm560_vm2, %v2289_v24  ;;  %5103 = vmatmul.msk.bf16.gmra.mxu3 %vm560_vm2, %v2289_v24 }
 0x3a3   : > { %v2138_v45 = vsel %vm1141_vm4, %v2136_v20, %v2137_v38  ;;  %v2185_v63 = vadd.f32 %v2137_v38, %v2095_v51 }
 0x3a4   : > { %v2184_v37 = vadd.f32 %v2138_v45, %v2094_v58 }
 0x3a5   : > { %2205 = vst.msk [vmem:[#allocation2 + $0x28] sm:$0x3] %vm857_vm3, %v2185_v63 }
 0x3a6   : > { %2204 = vst.msk [vmem:[#allocation2 + $0x20] sm:$0xff] %vm560_vm2, %v2184_v37 }
 0x3a8   : > { %v2055_v4 = vpop.f32.mrf.mxu1 }
 0x3a9   : > { %v2139_v44 = vrot.slane %v2055_v4, 6 }
 0x3ac   : > { %v2225_v34 = vld [vmem:[#allocation2 + $0x28] sm:$0xff] }
 0x3ad   : > { %v2224_v48 = vld [vmem:[#allocation2 + $0x20] sm:$0xff]  ;;  %v2261_v2 = vadd.f32 %v6016_v52, %v2225_v34 }
 0x3ae   : > { %v2260_v32 = vadd.f32 %v6016_v52, %v2224_v48  ;;  %v2105_v48 = vld [vmem:[#allocation2 + $0x78] sm:$0x3] }
 0x3b0   : > { %v2057_v25 = vpop.f32.mrf.mxu1  ;;  %v2290_v21 = vpack.c.bf16 %v2261_v2, %v2260_v32  ;;  %v2104_v2 = vld [vmem:[#allocation2 + $0x70] sm:$0xff] }
 0x3b1   : > { %v2140_v50 = vrot.slane %v2057_v25, 6 }
 0x3b2   : > { %5087 = vmatmul.msk.bf16.gmra.mxu2 %vm560_vm2, %v2290_v21  ;;  %5104 = vmatmul.msk.bf16.gmra.mxu3 %vm560_vm2, %v2290_v21 }
 0x3b3   : > { %v2141_v57 = vsel %vm1141_vm4, %v2139_v44, %v2140_v50  ;;  %v2187_v54 = vadd.f32 %v2140_v50, %v2097_v47 }
 0x3b4   : > { %v2186_v23 = vadd.f32 %v2141_v57, %v2096_v26 }
 0x3b5   : > { %2207 = vst.msk [vmem:[#allocation2 + $0x38] sm:$0x3] %vm857_vm3, %v2187_v54 }
 0x3b6   : > { %2206 = vst.msk [vmem:[#allocation2 + $0x30] sm:$0xff] %vm560_vm2, %v2186_v23 }
 0x3b8   : > { %v2060_v39 = vpop.f32.mrf.mxu1 }
 0x3b9   : > { %v2142_v55 = vrot.slane %v2060_v39, 6 }
 0x3bc   : > { %v2227_v18 = vld [vmem:[#allocation2 + $0x38] sm:$0xff] }
 0x3bd   : > { %v2226_v36 = vld [vmem:[#allocation2 + $0x30] sm:$0xff]  ;;  %v2263_v60 = vadd.f32 %v6016_v52, %v2227_v18 }
 0x3be   : > { %v2262_v41 = vadd.f32 %v6016_v52, %v2226_v36  ;;  %v2107_v36 = vld [vmem:[#allocation2 + $0x88] sm:$0x3] }
 0x3c0   : > { %v2062_v3 = vpop.f32.mrf.mxu1  ;;  %v2291_v8 = vpack.c.bf16 %v2263_v60, %v2262_v41  ;;  %v2106_v60 = vld [vmem:[#allocation2 + $0x80] sm:$0xff] }
 0x3c1   : > { %v2143_v28 = vrot.slane %v2062_v3, 6 }
 0x3c2   : > { %5088 = vmatmul.msk.bf16.gmra.mxu2 %vm560_vm2, %v2291_v8  ;;  %5105 = vmatmul.msk.bf16.gmra.mxu3 %vm560_vm2, %v2291_v8 }
 0x3c3   : > { %v2144_v10 = vsel %vm1141_vm4, %v2142_v55, %v2143_v28  ;;  %v2189_v29 = vadd.f32 %v2143_v28, %v2099_v19 }
 0x3c4   : > { %v2188_v16 = vadd.f32 %v2144_v10, %v2098_v11 }
 0x3c5   : > { %2209 = vst.msk [vmem:[#allocation2 + $0x48] sm:$0x3] %vm857_vm3, %v2189_v29 }
 0x3c6   : > { %2208 = vst.msk [vmem:[#allocation2 + $0x40] sm:$0xff] %vm560_vm2, %v2188_v16 }
 0x3c8   : > { %v2065_v43 = vpop.f32.mrf.mxu1 }
 0x3c9   : > { %v2145_v31 = vrot.slane %v2065_v43, 6 }
 0x3cc   : > { %v2229_v30 = vld [vmem:[#allocation2 + $0x48] sm:$0xff] }
 0x3cd   : > { %v2228_v33 = vld [vmem:[#allocation2 + $0x40] sm:$0xff]  ;;  %v2265_v46 = vadd.f32 %v6016_v52, %v2229_v30 }
 0x3ce   : > { %v2264_v56 = vadd.f32 %v6016_v52, %v2228_v33  ;;  %v2109_v33 = vld [vmem:[#allocation2 + $0x98] sm:$0x3] }
 0x3d0   : > { %v2067_v42 = vpop.f32.mrf.mxu1  ;;  %v2292_v35 = vpack.c.bf16 %v2265_v46, %v2264_v56  ;;  %v6081_v46 = vld [vmem:[%s7671_s6] ss:$0 sm:$0xff]  ;;  %v2108_v56 = vld [vmem:[#allocation2 + $0x90] sm:$0xff] }
 0x3d1   : > { %v2146_v62 = vrot.slane %v2067_v42, 6 }
 0x3d2   : > { %5089 = vmatmul.msk.bf16.gmra.mxu2 %vm560_vm2, %v2292_v35  ;;  %5106 = vmatmul.msk.bf16.gmra.mxu3 %vm560_vm2, %v2292_v35 }
 0x3d3   : > { %v2147_v1 = vsel %vm1141_vm4, %v2145_v31, %v2146_v62  ;;  %v2191_v17 = vadd.f32 %v2146_v62, %v2101_v15 }
 0x3d4   : > { %v2190_v40 = vadd.f32 %v2147_v1, %v2100_v53  ;;  %v6091_v1 = vld [vmem:[%s7671_s6] ss:$0 sm:$0xff] }
 0x3d5   : > { %2211 = vst.msk [vmem:[#allocation2 + $0x58] sm:$0x3] %vm857_vm3, %v2191_v17 }
 0x3d6   : > { %2210 = vst.msk [vmem:[#allocation2 + $0x50] sm:$0xff] %vm560_vm2, %v2190_v40 }
 0x3d8   : > { %v2070_v13 = vpop.f32.mrf.mxu1 }
 0x3d9   : > { %v2148_v7 = vrot.slane %v2070_v13, 6 }
 0x3dc   : > { %v2231_v5 = vld [vmem:[#allocation2 + $0x58] sm:$0xff] }
 0x3dd   : > { %v2230_v6 = vld [vmem:[#allocation2 + $0x50] sm:$0xff]  ;;  %v2267_v27 = vadd.f32 %v6016_v52, %v2231_v5 }
 0x3de   : > { %v2266_v9 = vadd.f32 %v6016_v52, %v2230_v6 }
 0x3e0   : > { %v2072_v0 = vpop.f32.mrf.mxu1  ;;  %v2293_v59 = vpack.c.bf16 %v2267_v27, %v2266_v9 }
 0x3e1   : > { %v2149_v12 = vrot.slane %v2072_v0, 6 }
 0x3e2   : > { %5090 = vmatmul.msk.bf16.gmra.mxu2 %vm560_vm2, %v2293_v59  ;;  %5107 = vmatmul.msk.bf16.gmra.mxu3 %vm560_vm2, %v2293_v59 }
 0x3e3   : > { %v2150_v22 = vsel %vm1141_vm4, %v2148_v7, %v2149_v12  ;;  %v2193_v49 = vadd.f32 %v2149_v12, %v2103_v61 }
 0x3e4   : > { %v2192_v24 = vadd.f32 %v2150_v22, %v2102_v14 }
 0x3e5   : > { %2213 = vst.msk [vmem:[#allocation2 + $0x68] sm:$0x3] %vm857_vm3, %v2193_v49 }
 0x3e6   : > { %2212 = vst.msk [vmem:[#allocation2 + $0x60] sm:$0xff] %vm560_vm2, %v2192_v24 }
 0x3e8   : > { %v2075_v20 = vpop.f32.mrf.mxu1 }
 0x3e9   : > { %v2151_v4 = vrot.slane %v2075_v20, 6 }
 0x3ec   : > { %v2233_v38 = vld [vmem:[#allocation2 + $0x68] sm:$0xff] }
 0x3ed   : > { %v2232_v51 = vld [vmem:[#allocation2 + $0x60] sm:$0xff]  ;;  %v2269_v58 = vadd.f32 %v6016_v52, %v2233_v38 }
 0x3ee   : > { %v2268_v45 = vadd.f32 %v6016_v52, %v2232_v51 }
 0x3f0   : > { %v2077_v63 = vpop.f32.mrf.mxu1  ;;  %v2294_v37 = vpack.c.bf16 %v2269_v58, %v2268_v45 }
 0x3f1   : > { %v2152_v34 = vrot.slane %v2077_v63, 6  ;;  %v2241_v63 = vld [vmem:[#allocation2 + $0xa8] sm:$0xff] }
 0x3f2   : > { %5091 = vmatmul.msk.bf16.gmra.mxu2 %vm560_vm2, %v2294_v37  ;;  %5108 = vmatmul.msk.bf16.gmra.mxu3 %vm560_vm2, %v2294_v37 }
 0x3f3   : > { %v2153_v32 = vsel %vm1141_vm4, %v2151_v4, %v2152_v34  ;;  %v2195_v25 = vadd.f32 %v2152_v34, %v2105_v48  ;;  %v2240_v48 = vld [vmem:[#allocation2 + $0xa0] sm:$0xff] }
 0x3f4   : > { %v2194_v21 = vadd.f32 %v2153_v32, %v2104_v2 }
 0x3f5   : > { %2215 = vst.msk [vmem:[#allocation2 + $0x78] sm:$0x3] %vm857_vm3, %v2195_v25 }
 0x3f6   : > { %2214 = vst.msk [vmem:[#allocation2 + $0x70] sm:$0xff] %vm560_vm2, %v2194_v21 }
 0x3f8   : > { %v2080_v44 = vpop.f32.mrf.mxu1 }
 0x3f9   : > { %v2154_v39 = vrot.slane %v2080_v44, 6 }
 0x3fc   : > { %v2235_v50 = vld [vmem:[#allocation2 + $0x78] sm:$0xff] }
 0x3fd   : > { %v2234_v47 = vld [vmem:[#allocation2 + $0x70] sm:$0xff]  ;;  %v2271_v26 = vadd.f32 %v6016_v52, %v2235_v50  ;;  %v2276_v50 = vadd.f32 %v6016_v52, %v2240_v48 }
 0x3fe   : > { %v2270_v57 = vadd.f32 %v6016_v52, %v2234_v47  ;;  %v2277_v47 = vadd.f32 %v6016_v52, %v2241_v63 }
 0x400   : > { %v2082_v54 = vpop.f32.mrf.mxu1  ;;  %v2295_v23 = vpack.c.bf16 %v2271_v26, %v2270_v57 }
 0x401   : > { %v2155_v18 = vrot.slane %v2082_v54, 6 }
 0x402   : > { %5092 = vmatmul.msk.bf16.gmra.mxu2 %vm560_vm2, %v2295_v23  ;;  %5109 = vmatmul.msk.bf16.gmra.mxu3 %vm560_vm2, %v2295_v23 }
 0x403   : > { %v2156_v41 = vsel %vm1141_vm4, %v2154_v39, %v2155_v18  ;;  %v2197_v3 = vadd.f32 %v2155_v18, %v2107_v36  ;;  %v2298_v36 = vpack.c.bf16 %v2277_v47, %v2276_v50 }
 0x404   : > { %v2196_v8 = vadd.f32 %v2156_v41, %v2106_v60 }
 0x405   : > { %2217 = vst.msk [vmem:[#allocation2 + $0x88] sm:$0x3] %vm857_vm3, %v2197_v3 }
 0x406   : > { %2216 = vst.msk [vmem:[#allocation2 + $0x80] sm:$0xff] %vm560_vm2, %v2196_v8 }
 0x408   : > { %v2085_v55 = vpop.f32.mrf.mxu1 }
 0x409   : > { %v2157_v43 = vrot.slane %v2085_v55, 6 }
 0x40c   : > { %v2237_v28 = vld [vmem:[#allocation2 + $0x88] sm:$0xff] }
 0x40d   : > { %v2236_v19 = vld [vmem:[#allocation2 + $0x80] sm:$0xff]  ;;  %v2273_v11 = vadd.f32 %v6016_v52, %v2237_v28 }
 0x40e   : > { %v2272_v10 = vadd.f32 %v6016_v52, %v2236_v19 }
 0x410   : > { %v2087_v29 = vpop.f32.mrf.mxu1  ;;  %v2296_v16 = vpack.c.bf16 %v2273_v11, %v2272_v10 }
 0x411   : > { %v2158_v30 = vrot.slane %v2087_v29, 6 }
 0x412   : > { %5093 = vmatmul.msk.bf16.gmra.mxu2 %vm560_vm2, %v2296_v16  ;;  %5110 = vmatmul.msk.bf16.gmra.mxu3 %vm560_vm2, %v2296_v16 }
 0x413   : > { %v2159_v42 = vsel %vm1141_vm4, %v2157_v43, %v2158_v30  ;;  %v2199_v35 = vadd.f32 %v2158_v30, %v2109_v33 }
 0x414   : > { %v2198_v31 = vadd.f32 %v2159_v42, %v2108_v56 }
 0x415   : > { %2219 = vst.msk [vmem:[#allocation2 + $0x98] sm:$0x3] %vm857_vm3, %v2199_v35  ;;  %v2369_v62 = vpop.f32.mrf.mxu2  ;;  %v3593_v15 = vpop.f32.mrf.mxu3  ;;  %vm3032_vm3 = vcmask 1048448  }
 0x416   : > { %2218 = vst.msk [vmem:[#allocation2 + $0x90] sm:$0xff] %vm560_vm2, %v2198_v31  ;;  %v2370_v53 = vadd.f32 %v6081_v46, %v2369_v62  ;;  %v3594_v12 = vadd.f32 %v6091_v1, %v3593_v15 }
 0x418   : > { %2449 = vst.msk [vmem:[#allocation3] sm:$0xff] %vm404_vm0, %v2370_v53 }
 0x41c   : > { %v2239_v17 = vld [vmem:[#allocation2 + $0x98] sm:$0xff] }
 0x41d   : > { %v2371_v40 = vpop.f32.mrf.mxu2  ;;  %v3595_v13 = vpop.f32.mrf.mxu3  ;;  %v2238_v5 = vld [vmem:[#allocation2 + $0x90] sm:$0xff]  ;;  %v2275_v6 = vadd.f32 %v6016_v52, %v2239_v17 }
 0x41e   : > { %v2372_v27 = vadd.f32 %v6081_v46, %v2371_v40  ;;  %v2274_v9 = vadd.f32 %v6016_v52, %v2238_v5  ;;  %v3596_v34 = vadd.f32 %v6091_v1, %v3595_v13 }
 0x41f   : > { %v6096_v0 = vld [vmem:[#allocation3] sm:$0x1]  ;;  %v2690_v59 = vld [vmem:[#allocation3 + $0x3] sm:$0x1]  ;;  %v2621_v7 = vld [vmem:[#allocation3 + $0x2] sm:$0x1] }
 0x420   : > { %7673 = vst [vmem:[#allocation4_spill] sm:$0xff] %v6096_v0  ;;  %v2297_v61 = vpack.c.bf16 %v2275_v6, %v2274_v9  ;;  %v2552_v14 = vld [vmem:[#allocation3 + $0x1] sm:$0x1]  ;;  %v2828_v22 = vld [vmem:[#allocation3 + $0x5] sm:$0x1] }
 0x421   : > { %2450 = vst.msk [vmem:[#allocation3 + $0x8] sm:$0xff] %vm404_vm0, %v2372_v27  ;;  %v2897_v49 = vld [vmem:[#allocation3 + $0x6] sm:$0x1]  ;;  %v2759_v24 = vld [vmem:[#allocation3 + $0x4] sm:$0x1]  ;;  %v2243_v27 = vld [vmem:[#allocation2 + $0xb8] sm:$0xff] }
 0x422   : > { %v2966_v20 = vld [vmem:[#allocation3 + $0x7] sm:$0x1]  ;;  %5094 = vmatmul.msk.bf16.gmra.mxu2 %vm560_vm2, %v2297_v61  ;;  %5111 = vmatmul.msk.bf16.gmra.mxu3 %vm560_vm2, %v2297_v61  ;;  %v2242_v61 = vld [vmem:[#allocation2 + $0xb0] sm:$0xff] }
 0x423   : > { %3673 = vst.msk [vmem:[#allocation3] sm:$0xff] %vm404_vm0, %v3594_v12  ;;  %v2278_v47 = vadd.f32 %v6016_v52, %v2242_v61 }
 0x425   : > { %v2374_v38 = vpop.f32.mrf.mxu2  ;;  %v3598_v51 = vpop.f32.mrf.mxu3 }
 0x426   : > { %v2375_v58 = vadd.f32 %v6081_v46, %v2374_v38  ;;  %v3599_v8 = vadd.f32 %v6091_v1, %v3598_v51 }
 0x428   : > { %v6104_v45 = vld [vmem:[#allocation3 + $0x8] sm:$0x1]  ;;  %v3099_v37 = vld [vmem:[#allocation3 + $0x9] sm:$0x1]  ;;  %v3167_v4 = vld [vmem:[#allocation3 + $0xa] sm:$0x1] }
 0x429   : > { %7674 = vst [vmem:[#allocation5_spill] sm:$0xff] %v6104_v45  ;;  %v6108_v2 = vld [vmem:[#allocation3 + $0xc] sm:$0x1]  ;;  %v6110_v32 = vld [vmem:[#allocation3 + $0xd] sm:$0x1] }
 0x42a   : > { %2451 = vst.msk [vmem:[#allocation3 + $0x10] sm:$0xff] %vm404_vm0, %v2375_v58  ;;  %v6112_v25 = vld [vmem:[#allocation3 + $0xb] sm:$0x1]  ;;  %v6114_v21 = vld [vmem:[#allocation3 + $0xf] sm:$0x1] }
 0x42b   : > { %v6116_v44 = vld [vmem:[#allocation3 + $0xe] sm:$0x1] }
 0x42c   : > { %3674 = vst.msk [vmem:[#allocation3 + $0x8] sm:$0xff] %vm404_vm0, %v3596_v34 }
 0x42d   : > { %v2376_v26 = vpop.f32.mrf.mxu2  ;;  %v3600_v57 = vpop.f32.mrf.mxu3 }
 0x42e   : > { %v2377_v54 = vadd.f32 %v6081_v46, %v2376_v26  ;;  %v3601_v12 = vadd.f32 %v6091_v1, %v3600_v57 }
 0x430   : > { %2452 = vst.msk [vmem:[#allocation3 + $0x18] sm:$0xff] %vm404_vm0, %v2377_v54 }
 0x431   : > { %v6122_v23 = vld [vmem:[#allocation3 + $0x10] sm:$0x1]  ;;  %v2691_v39 = vld [vmem:[#allocation3 + $0x13] sm:$0x1]  ;;  %v2622_v18 = vld [vmem:[#allocation3 + $0x12] sm:$0x1] }
 0x432   : > { %7675 = vst [vmem:[#allocation6_spill] sm:$0xff] %v6122_v23  ;;  %v2722_v60 = vrot.slane %v2691_v39, 7  ;;  %v2653_v41 = vrot.slane %v2622_v18, 7  ;;  %v2553_v3 = vld [vmem:[#allocation3 + $0x11] sm:$0x1]  ;;  %5095 = vmatmul.msk.bf16.gmra.mxu2 %vm560_vm2, %v2298_v36  ;;  %5112 = vmatmul.msk.bf16.gmra.mxu3 %vm560_vm2, %v2298_v36 }
 0x433   : > { %v2584_v55 = vrot.slane %v2553_v3, 7  ;;  %v2829_v28 = vld [vmem:[#allocation3 + $0x15] sm:$0x1]  ;;  %v2898_v19 = vld [vmem:[#allocation3 + $0x16] sm:$0x1] }
 0x434   : > { %v6129_v11 = vsel %vm2514_vm5, %v2722_v60, %v2690_v59  ;;  %v6132_v10 = vsel %vm2514_vm5, %v2653_v41, %v2621_v7  ;;  %v2860_v29 = vrot.slane %v2829_v28, 7  ;;  %v2929_v16 = vrot.slane %v2898_v19, 7  ;;  %v2760_v43 = vld [vmem:[#allocation3 + $0x14] sm:$0x1]  ;;  %v2967_v30 = vld [vmem:[#allocation3 + $0x17] sm:$0x1] }
 0x435   : > { %v6135_v33 = vsel %vm2514_vm5, %v2584_v55, %v2552_v14  ;;  %v2791_v56 = vrot.slane %v2760_v43, 7  ;;  %v2998_v42 = vrot.slane %v2967_v30, 7  ;;  %3675 = vst.msk [vmem:[#allocation3 + $0x10] sm:$0xff] %vm404_vm0, %v3599_v8  ;;  %v2379_v62 = vpop.f32.mrf.mxu2  ;;  %v3603_v15 = vpop.f32.mrf.mxu3 }
 0x436   : > { %v6139_v35 = vsel %vm2514_vm5, %v2860_v29, %v2828_v22  ;;  %v6142_v31 = vsel %vm2514_vm5, %v2929_v16, %v2897_v49  ;;  %v2380_v40 = vadd.f32 %v6081_v46, %v2379_v62 }
 0x437   : > { %v6145_v53 = vsel %vm2514_vm5, %v2791_v56, %v2759_v24  ;;  %v6148_v17 = vsel %vm2514_vm5, %v2998_v42, %v2966_v20  ;;  %v6151_v13 = vld [vmem:[#allocation3 + $0x18] sm:$0x1]  ;;  %v3100_v5 = vld [vmem:[#allocation3 + $0x19] sm:$0x1]  ;;  %v3168_v6 = vld [vmem:[#allocation3 + $0x1a] sm:$0x1] }
 0x438   : > { %7676 = vst [vmem:[#allocation7_spill] sm:$0xff] %v6151_v13  ;;  %v3131_v9 = vrot.slane %v3100_v5, 7  ;;  %v3199_v59 = vrot.slane %v3168_v6, 7  ;;  %v3304_v7 = vld [vmem:[#allocation3 + $0x1c] sm:$0x1] }
 0x439   : > { %2453 = vst.msk [vmem:[#allocation3 + $0x20] sm:$0xff] %vm404_vm0, %v2380_v40  ;;  %v3335_v14 = vrot.slane %v3304_v7, 7  ;;  %v3372_v22 = vld [vmem:[#allocation3 + $0x1d] sm:$0x1]  ;;  %v3236_v49 = vld [vmem:[#allocation3 + $0x1b] sm:$0x1] }
 0x43a   : > { %v6156_v24 = vsel %vm2514_vm5, %v3131_v9, %v3099_v37  ;;  %v6159_v20 = vsel %vm2514_vm5, %v3199_v59, %v3167_v4  ;;  %v3403_v38 = vrot.slane %v3372_v22, 7  ;;  %v3267_v51 = vrot.slane %v3236_v49, 7  ;;  %v3508_v58 = vld [vmem:[#allocation3 + $0x1f] sm:$0x1]  ;;  %v3440_v63 = vld [vmem:[#allocation3 + $0x1e] sm:$0x1] }
 0x43b   : > { %v6163_v34 = vsel %vm2514_vm5, %v3335_v14, %v6108_v2  ;;  %v3539_v48 = vrot.slane %v3508_v58, 7  ;;  %v3471_v50 = vrot.slane %v3440_v63, 7  ;;  %3676 = vst.msk [vmem:[#allocation3 + $0x18] sm:$0xff] %vm404_vm0, %v3601_v12  ;;  %v2279_v37 = vadd.f32 %v6016_v52, %v2243_v27  ;;  %v2244_v22 = vld [vmem:[#allocation2 + $0xc0] sm:$0xff] }
 0x43c   : > { %v6170_v4 = vsel %vm2514_vm5, %v3403_v38, %v6110_v32  ;;  %v6174_v26 = vsel %vm2514_vm5, %v3267_v51, %v6112_v25 }
 0x43d   : > { %v2381_v57 = vpop.f32.mrf.mxu2  ;;  %v3605_v54 = vpop.f32.mrf.mxu3  ;;  %v6178_v2 = vsel %vm2514_vm5, %v3539_v48, %v6114_v21  ;;  %v6182_v39 = vsel %vm2514_vm5, %v3471_v50, %v6116_v44  ;;  %v2299_v25 = vpack.c.bf16 %v2279_v37, %v2278_v47  ;;  %v3604_v21 = vadd.f32 %v6091_v1, %v3603_v15 }
 0x43e   : > { %v2382_v18 = vadd.f32 %v6081_v46, %v2381_v57  ;;  %v3606_v14 = vadd.f32 %v6091_v1, %v3605_v54  ;;  %v2280_v54 = vadd.f32 %v6016_v52, %v2244_v22 }
 0x440   : > { %v6185_v36 = vld [vmem:[#allocation3 + $0x20] sm:$0x1]  ;;  %v2692_v32 = vld [vmem:[#allocation3 + $0x23] sm:$0x1]  ;;  %v2623_v60 = vld [vmem:[#allocation3 + $0x22] sm:$0x1] }
 0x441   : > { %7677 = vst [vmem:[#allocation8_spill] sm:$0xff] %v6185_v36  ;;  %v2724_v41 = vrot.slane %v2692_v32, 6  ;;  %v2655_v3 = vrot.slane %v2623_v60, 6  ;;  %v2554_v8 = vld [vmem:[#allocation3 + $0x21] sm:$0x1] }
 0x442   : > { %2454 = vst.msk [vmem:[#allocation3 + $0x28] sm:$0xff] %vm404_vm0, %v2382_v18  ;;  %v2586_v55 = vrot.slane %v2554_v8, 6  ;;  %v2830_v28 = vld [vmem:[#allocation3 + $0x25] sm:$0x1]  ;;  %v2899_v19 = vld [vmem:[#allocation3 + $0x26] sm:$0x1]  ;;  %5096 = vmatmul.msk.bf16.gmra.mxu2 %vm560_vm2, %v2299_v25  ;;  %5113 = vmatmul.msk.bf16.gmra.mxu3 %vm560_vm2, %v2299_v25 }
 0x443   : > { %v6193_v44 = vsel %vm2517_vm6, %v2724_v41, %v6129_v11  ;;  %v6197_v29 = vsel %vm2517_vm6, %v2655_v3, %v6132_v10  ;;  %v2862_v16 = vrot.slane %v2830_v28, 6  ;;  %v2931_v43 = vrot.slane %v2899_v19, 6  ;;  %v2761_v30 = vld [vmem:[#allocation3 + $0x24] sm:$0x1]  ;;  %v2968_v56 = vld [vmem:[#allocation3 + $0x27] sm:$0x1] }
 0x444   : > { %v6201_v42 = vsel %vm2517_vm6, %v2586_v55, %v6135_v33  ;;  %v2793_v62 = vrot.slane %v2761_v30, 6  ;;  %v3000_v15 = vrot.slane %v2968_v56, 6  ;;  %3677 = vst.msk [vmem:[#allocation3 + $0x20] sm:$0xff] %vm404_vm0, %v3604_v21 }
 0x445   : > { %v2863_v11 = vsel %vm2517_vm6, %v2862_v16, %v6139_v35  ;;  %v2932_v40 = vsel %vm2517_vm6, %v2931_v43, %v6142_v31  ;;  %v2384_v10 = vpop.f32.mrf.mxu2  ;;  %v3608_v5 = vpop.f32.mrf.mxu3  ;;  %v2245_v35 = vld [vmem:[#allocation2 + $0xc8] sm:$0xff] }
 0x446   : > { %v2794_v6 = vsel %vm2517_vm6, %v2793_v62, %v6145_v53  ;;  %v3001_v27 = vsel %vm2517_vm6, %v3000_v15, %v6148_v17  ;;  %v2385_v33 = vadd.f32 %v6081_v46, %v2384_v10  ;;  %v2281_v18 = vadd.f32 %v6016_v52, %v2245_v35 }
 0x447   : > { %v3609_v55 = vadd.f32 %v6091_v1, %v3608_v5 }
 0x448   : > { %2455 = vst.msk [vmem:[#allocation3 + $0x30] sm:$0xff] %vm404_vm0, %v2385_v33 }
 0x449   : > { %v6213_v9 = vld [vmem:[#allocation3 + $0x28] sm:$0x1]  ;;  %v3101_v59 = vld [vmem:[#allocation3 + $0x29] sm:$0x1]  ;;  %v3169_v7 = vld [vmem:[#allocation3 + $0x2a] sm:$0x1] }
 0x44a   : > { %7678 = vst [vmem:[#allocation9_spill] sm:$0xff] %v6213_v9  ;;  %v3133_v12 = vrot.slane %v3101_v59, 6  ;;  %v3201_v61 = vrot.slane %v3169_v7, 6  ;;  %v3305_v31 = vld [vmem:[#allocation3 + $0x2c] sm:$0x1] }
 0x44b   : > { %v3337_v49 = vrot.slane %v3305_v31, 6  ;;  %v3373_v53 = vld [vmem:[#allocation3 + $0x2d] sm:$0x1]  ;;  %v3237_v38 = vld [vmem:[#allocation3 + $0x2b] sm:$0x1] }
 0x44c   : > { %v3134_v17 = vsel %vm2517_vm6, %v3133_v12, %v6156_v24  ;;  %v3202_v51 = vsel %vm2517_vm6, %v3201_v61, %v6159_v20  ;;  %v3405_v58 = vrot.slane %v3373_v53, 6  ;;  %v3269_v63 = vrot.slane %v3237_v38, 6  ;;  %v3509_v48 = vld [vmem:[#allocation3 + $0x2f] sm:$0x1]  ;;  %v3441_v50 = vld [vmem:[#allocation3 + $0x2e] sm:$0x1] }
 0x44d   : > { %v3338_v47 = vsel %vm2517_vm6, %v3337_v49, %v6163_v34  ;;  %v3541_v37 = vrot.slane %v3509_v48, 6  ;;  %v3473_v57 = vrot.slane %v3441_v50, 6  ;;  %3678 = vst.msk [vmem:[#allocation3 + $0x28] sm:$0xff] %vm404_vm0, %v3606_v14  ;;  %v2386_v32 = vpop.f32.mrf.mxu2  ;;  %v3610_v60 = vpop.f32.mrf.mxu3  ;;  %v2246_v49 = vld [vmem:[#allocation2 + $0xd0] sm:$0xff] }
 0x44e   : > { %v3406_v24 = vsel %vm2517_vm6, %v3405_v58, %v6170_v4  ;;  %v3270_v20 = vsel %vm2517_vm6, %v3269_v63, %v6174_v26  ;;  %v2387_v41 = vadd.f32 %v6081_v46, %v2386_v32  ;;  %v2300_v4 = vpack.c.bf16 %v2281_v18, %v2280_v54  ;;  %v4110_v9 = vld [vmem:[#allocation3 + $0x16] sm:$0x1] }
 0x44f   : > { %v3542_v25 = vsel %vm2517_vm6, %v3541_v37, %v6178_v2  ;;  %v3474_v34 = vsel %vm2517_vm6, %v3473_v57, %v6182_v39  ;;  %v6235_v3 = vld [vmem:[#allocation3 + $0x30] sm:$0x1]  ;;  %v6237_v8 = vld [vmem:[#allocation3 + $0x33] sm:$0x1]  ;;  %v6240_v21 = vld [vmem:[#allocation3 + $0x32] sm:$0x1]  ;;  %v3611_v22 = vadd.f32 %v6091_v1, %v3610_v60  ;;  %v2282_v32 = vadd.f32 %v6016_v52, %v2246_v49 }
 0x450   : > { %7679 = vst [vmem:[#allocation10_spill] sm:$0xff] %v6235_v3  ;;  %v6242_v26 = vld [vmem:[#allocation3 + $0x31] sm:$0x1]  ;;  %v2831_v2 = vld [vmem:[#allocation3 + $0x35] sm:$0x1] }
 0x451   : > { %2456 = vst.msk [vmem:[#allocation3 + $0x38] sm:$0xff] %vm404_vm0, %v2387_v41  ;;  %v2900_v28 = vld [vmem:[#allocation3 + $0x36] sm:$0x1]  ;;  %v2864_v39 = vrot.slane %v2831_v2, 5  ;;  %v2762_v16 = vld [vmem:[#allocation3 + $0x34] sm:$0x1] }
 0x452   : > { %5097 = vmatmul.msk.bf16.gmra.mxu2 %vm560_vm2, %v2300_v4  ;;  %5114 = vmatmul.msk.bf16.gmra.mxu3 %vm560_vm2, %v2300_v4  ;;  %v2933_v19 = vrot.slane %v2900_v28, 5  ;;  %v2969_v43 = vld [vmem:[#allocation3 + $0x37] sm:$0x1]  ;;  %v2795_v30 = vrot.slane %v2762_v16, 5 }
 0x453   : > { %v3002_v56 = vrot.slane %v2969_v43, 5  ;;  %3679 = vst.msk [vmem:[#allocation3 + $0x30] sm:$0xff] %vm404_vm0, %v3609_v55  ;;  %v6249_v62 = vsel %vm2520_vm7, %v2864_v39, %v2863_v11  ;;  %v2247_v11 = vld [vmem:[#allocation2 + $0xd8] sm:$0xff] }
 0x454   : > { %v6252_v15 = vsel %vm2520_vm7, %v2933_v19, %v2932_v40  ;;  %v6255_v33 = vsel %vm2520_vm7, %v2795_v30, %v2794_v6  ;;  %v2283_v60 = vadd.f32 %v6016_v52, %v2247_v11 }
 0x455   : > { %v2389_v10 = vpop.f32.mrf.mxu2  ;;  %v3613_v5 = vpop.f32.mrf.mxu3  ;;  %v6258_v59 = vsel %vm2520_vm7, %v3002_v56, %v3001_v27 }
 0x456   : > { %7680 = vst [vmem:[#allocation11_spill] sm:$0xff] %v6258_v59  ;;  %v2390_v7 = vadd.f32 %v6081_v46, %v2389_v10  ;;  %v2301_v19 = vpack.c.bf16 %v2283_v60, %v2282_v32 }
 0x458   : > { %v6261_v35 = vld [vmem:[#allocation3 + $0x38] sm:$0x1]  ;;  %v3102_v12 = vld [vmem:[#allocation3 + $0x39] sm:$0x1]  ;;  %v3170_v61 = vld [vmem:[#allocation3 + $0x3a] sm:$0x1] }
 0x459   : > { %7681 = vst [vmem:[#allocation12_spill] sm:$0xff] %v6261_v35  ;;  %v3135_v31 = vrot.slane %v3102_v12, 5  ;;  %v3203_v40 = vrot.slane %v3170_v61, 5  ;;  %v3306_v14 = vld [vmem:[#allocation3 + $0x3c] sm:$0x1]  ;;  %v2249_v61 = vld [vmem:[#allocation2 + $0xe8] sm:$0xff] }
 0x45a   : > { %2457 = vst.msk [vmem:[#allocation3 + $0x40] sm:$0xff] %vm404_vm0, %v2390_v7  ;;  %v3339_v6 = vrot.slane %v3306_v14, 5  ;;  %v3374_v53 = vld [vmem:[#allocation3 + $0x3d] sm:$0x1]  ;;  %v3238_v38 = vld [vmem:[#allocation3 + $0x3b] sm:$0x1] }
 0x45b   : > { %v6266_v27 = vsel %vm2520_vm7, %v3135_v31, %v3134_v17  ;;  %v6269_v58 = vsel %vm2520_vm7, %v3203_v40, %v3202_v51  ;;  %v3407_v63 = vrot.slane %v3374_v53, 5  ;;  %v3271_v48 = vrot.slane %v3238_v38, 5  ;;  %v3510_v50 = vld [vmem:[#allocation3 + $0x3f] sm:$0x1]  ;;  %v3442_v37 = vld [vmem:[#allocation3 + $0x3e] sm:$0x1] }
 0x45c   : > { %7682 = vst [vmem:[#allocation13_spill] sm:$0xff] %v6266_v27  ;;  %v6272_v57 = vsel %vm2520_vm7, %v3339_v6, %v3338_v47  ;;  %v3543_v54 = vrot.slane %v3510_v50, 5  ;;  %v3475_v18 = vrot.slane %v3442_v37, 5  ;;  %v2248_v14 = vld [vmem:[#allocation2 + $0xe0] sm:$0xff]  ;;  %v2285_v50 = vadd.f32 %v6016_v52, %v2249_v61  ;;  %v3974_v35 = vld [vmem:[#allocation3 + $0x14] sm:$0x1] }
 0x45d   : > { %7683 = vst [vmem:[#allocation14_spill] sm:$0xff] %v6269_v58  ;;  %v6278_v17 = vsel %vm2520_vm7, %v3407_v63, %v3406_v24  ;;  %v6281_v51 = vsel %vm2520_vm7, %v3271_v48, %v3270_v20  ;;  %v2391_v41 = vpop.f32.mrf.mxu2  ;;  %v3615_v4 = vpop.f32.mrf.mxu3  ;;  %v3614_v20 = vadd.f32 %v6091_v1, %v3613_v5  ;;  %v2284_v48 = vadd.f32 %v6016_v52, %v2248_v14  ;;  %v6410_v27 = vld [vmem:[#allocation3 + $0x1e] sm:$0x1] }
 0x45e   : > { %7684 = vst [vmem:[#allocation15_spill] sm:$0xff] %v6272_v57  ;;  %v3544_v55 = vsel %vm2520_vm7, %v3543_v54, %v3542_v25  ;;  %v3476_v47 = vsel %vm2520_vm7, %v3475_v18, %v3474_v34  ;;  %v2392_v2 = vadd.f32 %v6081_v46, %v2391_v41  ;;  %v3616_v40 = vadd.f32 %v6091_v1, %v3615_v4  ;;  %v3837_v57 = vld [vmem:[#allocation3 + $0x2] sm:$0x1] }
 0x45f   : > { %3680 = vst.msk [vmem:[#allocation3 + $0x38] sm:$0xff] %vm404_vm0, %v3611_v22 }
 0x460   : > { %7685 = vst [vmem:[#allocation16_spill] sm:$0xff] %v6278_v17  ;;  %v3905_v17 = vld [vmem:[#allocation3 + $0x3] sm:$0x1] }
 0x461   : > { %7686 = vst [vmem:[#allocation17_spill] sm:$0xff] %v6281_v51  ;;  %v6286_v28 = vld [vmem:[#allocation3 + $0x40] sm:$0x1]  ;;  %v6288_v39 = vld [vmem:[#allocation3 + $0x43] sm:$0x1] }
 0x462   : > { %7687 = vst [vmem:[#allocation18_spill] sm:$0xff] %v6286_v28  ;;  %v6291_v24 = vld [vmem:[#allocation3 + $0x42] sm:$0x1]  ;;  %v6293_v16 = vld [vmem:[#allocation3 + $0x41] sm:$0x1]  ;;  %5098 = vmatmul.msk.bf16.gmra.mxu2 %vm560_vm2, %v2301_v19  ;;  %5115 = vmatmul.msk.bf16.gmra.mxu3 %vm560_vm2, %v2301_v19 }
 0x463   : > { %2458 = vst.msk [vmem:[#allocation3 + $0x48] sm:$0xff] %vm404_vm0, %v2392_v2  ;;  %v6296_v43 = vld [vmem:[#allocation3 + $0x45] sm:$0x1]  ;;  %v6298_v25 = vld [vmem:[#allocation3 + $0x46] sm:$0x1]  ;;  %v2302_v2 = vpack.c.bf16 %v2285_v50, %v2284_v48 }
 0x464   : > { %v6302_v34 = vld [vmem:[#allocation3 + $0x44] sm:$0x1]  ;;  %v6304_v30 = vld [vmem:[#allocation3 + $0x47] sm:$0x1]  ;;  %v6403_v51 = vld [vmem:[#allocation3 + $0x21] sm:$0x1] }
 0x465   : > { %7688 = vst [vmem:[#allocation19_spill] sm:$0xff] %v6304_v30  ;;  %v2394_v56 = vpop.f32.mrf.mxu2  ;;  %v3618_v10 = vpop.f32.mrf.mxu3 }
 0x466   : > { %3681 = vst.msk [vmem:[#allocation3 + $0x40] sm:$0xff] %vm404_vm0, %v3614_v20  ;;  %v2395_v7 = vadd.f32 %v6081_v46, %v2394_v56  ;;  %v3619_v56 = vadd.f32 %v6091_v1, %v3618_v10 }
 0x468   : > { %2459 = vst.msk [vmem:[#allocation3 + $0x50] sm:$0xff] %vm404_vm0, %v2395_v7 }
 0x46a   : > { %v6308_v12 = vld [vmem:[#allocation3 + $0x48] sm:$0x1]  ;;  %v6310_v5 = vld [vmem:[#allocation3 + $0x49] sm:$0x1]  ;;  %v6313_v11 = vld [vmem:[#allocation3 + $0x4a] sm:$0x1] }
 0x46b   : > { %7689 = vst [vmem:[#allocation20_spill] sm:$0xff] %v6308_v12  ;;  %v6315_v31 = vld [vmem:[#allocation3 + $0x4c] sm:$0x1]  ;;  %v6318_v22 = vld [vmem:[#allocation3 + $0x4d] sm:$0x1] }
 0x46c   : > { %7690 = vst [vmem:[#allocation21_spill] sm:$0xff] %v6315_v31  ;;  %v6320_v49 = vld [vmem:[#allocation3 + $0x4b] sm:$0x1]  ;;  %v3511_v6 = vld [vmem:[#allocation3 + $0x4f] sm:$0x1] }
 0x46d   : > { %7691 = vst [vmem:[#allocation22_spill] sm:$0xff] %v6318_v22  ;;  %v3443_v53 = vld [vmem:[#allocation3 + $0x4e] sm:$0x1]  ;;  %v3545_v38 = vrot.slane %v3511_v6, 4  ;;  %v2396_v37 = vpop.f32.mrf.mxu2  ;;  %v3620_v54 = vpop.f32.mrf.mxu3  ;;  %v3973_v31 = vld [vmem:[#allocation3 + $0x4] sm:$0x1] }
 0x46e   : > { %7692 = vst [vmem:[#allocation23_spill] sm:$0xff] %v6320_v49  ;;  %v3477_v63 = vrot.slane %v3443_v53, 4  ;;  %v2397_v60 = vadd.f32 %v6081_v46, %v2396_v37  ;;  %v3621_v50 = vadd.f32 %v6091_v1, %v3620_v54  ;;  %v2250_v37 = vld [vmem:[#allocation2 + $0xf0] sm:$0xff]  ;;  %v4141_v49 = vrot.slane %v4110_v9, 7 }
 0x46f   : > { %3682 = vst.msk [vmem:[#allocation3 + $0x48] sm:$0xff] %vm404_vm0, %v3616_v40  ;;  %v6326_v18 = vsel %vm2523_vm8, %v3545_v38, %v3544_v55  ;;  %v6332_v41 = vld [vmem:[#allocation3 + $0x50] sm:$0x1]  ;;  %v6334_v4 = vld [vmem:[#allocation3 + $0x53] sm:$0x1]  ;;  %v2251_v38 = vld [vmem:[#allocation2 + $0xf8] sm:$0xff] }
 0x470   : > { %7693 = vst [vmem:[#allocation24_spill] sm:$0xff] %v6326_v18  ;;  %v6329_v32 = vsel %vm2523_vm8, %v3477_v63, %v3476_v47  ;;  %v6337_v19 = vld [vmem:[#allocation3 + $0x52] sm:$0x1]  ;;  %v6339_v20 = vld [vmem:[#allocation3 + $0x51] sm:$0x1]  ;;  %v2287_v0 = vadd.f32 %v6016_v52, %v2251_v38 }
 0x471   : > { %7694 = vst [vmem:[#allocation25_spill] sm:$0xff] %v6329_v32  ;;  %v6342_v55 = vld [vmem:[#allocation3 + $0x55] sm:$0x1]  ;;  %v6344_v7 = vld [vmem:[#allocation3 + $0x56] sm:$0x1] }
 0x472   : > { %7695 = vst [vmem:[#allocation26_spill] sm:$0xff] %v6332_v41  ;;  %5099 = vmatmul.msk.bf16.gmra.mxu2 %vm560_vm2, %v2302_v2  ;;  %5116 = vmatmul.msk.bf16.gmra.mxu3 %vm560_vm2, %v2302_v2  ;;  %v6348_v47 = vld [vmem:[#allocation3 + $0x54] sm:$0x1]  ;;  %v6350_v61 = vld [vmem:[#allocation3 + $0x57] sm:$0x1] }
 0x473   : > { %2460 = vst.msk [vmem:[#allocation3 + $0x58] sm:$0xff] %vm404_vm0, %v2397_v60  ;;  %v3770_v41 = vld [vmem:[#allocation3 + $0x11] sm:$0x1]  ;;  %v3906_v54 = vld [vmem:[#allocation3 + $0x13] sm:$0x1] }
 0x474   : > { %7696 = vst [vmem:[#allocation27_spill] sm:$0xff] %v6350_v61  ;;  %v3801_v23 = vrot.slane %v3770_v41, 7  ;;  %v3937_v38 = vrot.slane %v3906_v54, 7  ;;  %v4178_v32 = vld [vmem:[#allocation3 + $0x17] sm:$0x1] }
 0x475   : > { %3683 = vst.msk [vmem:[#allocation3 + $0x50] sm:$0xff] %vm404_vm0, %v3619_v56  ;;  %v2399_v40 = vpop.f32.mrf.mxu2  ;;  %v3623_v14 = vpop.f32.mrf.mxu3  ;;  %v4209_v59 = vrot.slane %v4178_v32, 7  ;;  %v6413_v61 = vld [vmem:[#allocation3 + $0x23] sm:$0x1] }
 0x476   : > { %v2400_v6 = vadd.f32 %v6081_v46, %v2399_v40  ;;  %v6424_v32 = vsel %vm2514_vm5, %v3937_v38, %v3905_v17  ;;  %v2728_v38 = vrot.slane %v6288_v39, 4 }
 0x478   : > { %2461 = vst.msk [vmem:[#allocation3 + $0x60] sm:$0xff] %vm404_vm0, %v2400_v6  ;;  %v2286_v6 = vadd.f32 %v6016_v52, %v2250_v37 }
 0x47a   : > { %v6354_v53 = vld [vmem:[#allocation3 + $0x58] sm:$0x1]  ;;  %v6356_v10 = vld [vmem:[#allocation3 + $0x59] sm:$0x1]  ;;  %v6359_v63 = vld [vmem:[#allocation3 + $0x5a] sm:$0x1]  ;;  %v2303_v37 = vpack.c.bf16 %v2287_v0, %v2286_v6 }
 0x47b   : > { %7697 = vst [vmem:[#allocation28_spill] sm:$0xff] %v6354_v53  ;;  %v6361_v48 = vld [vmem:[#allocation3 + $0x5c] sm:$0x1]  ;;  %v6364_v60 = vld [vmem:[#allocation3 + $0x5d] sm:$0x1] }
 0x47c   : > { %7698 = vst [vmem:[#allocation29_spill] sm:$0xff] %v6356_v10  ;;  %v6366_v2 = vld [vmem:[#allocation3 + $0x5b] sm:$0x1]  ;;  %v6368_v56 = vld [vmem:[#allocation3 + $0x5f] sm:$0x1] }
 0x47d   : > { %7699 = vst [vmem:[#allocation30_spill] sm:$0xff] %v6359_v63  ;;  %v6370_v40 = vld [vmem:[#allocation3 + $0x5e] sm:$0x1]  ;;  %v2401_v28 = vpop.f32.mrf.mxu2  ;;  %v6375_v3 = vpop.f32.mrf.mxu3  ;;  %v3838_v53 = vld [vmem:[#allocation3 + $0x12] sm:$0x1] }
 0x47e   : > { %7700 = vst [vmem:[#allocation31_spill] sm:$0xff] %v6361_v48  ;;  %v2402_v36 = vadd.f32 %v6081_v46, %v2401_v28  ;;  %v3624_v28 = vadd.f32 %v6091_v1, %v3623_v14  ;;  %v4446_v6 = vld [vmem:[#allocation3 + $0x1b] sm:$0x1]  ;;  %v3869_v54 = vrot.slane %v3838_v53, 7  ;;  %v6401_v14 = vld [vmem:[#allocation3 + $0x1c] sm:$0x1] }
 0x47f   : > { %7701 = vst [vmem:[#allocation32_spill] sm:$0xff] %v6364_v60  ;;  %v6378_v45 = vld [vmem:[#allocation3 + $0x60] sm:$0x1]  ;;  %v6380_v12 = vld [vmem:[#allocation3 + $0x63] sm:$0x1]  ;;  %v4477_v9 = vrot.slane %v4446_v6, 7 }
 0x480   : > { %7702 = vst [vmem:[#allocation33_spill] sm:$0xff] %v6366_v2  ;;  %v6383_v13 = vld [vmem:[#allocation3 + $0x62] sm:$0x1]  ;;  %v6385_v52 = vld [vmem:[#allocation3 + $0x61] sm:$0x1]  ;;  %v4005_v2 = vrot.slane %v3974_v35, 7 }
 0x481   : > { %7703 = vst [vmem:[#allocation34_spill] sm:$0xff] %v6368_v56  ;;  %v6388_v41 = vld [vmem:[#allocation3 + $0x65] sm:$0x1]  ;;  %v6390_v18 = vld [vmem:[#allocation3 + $0x66] sm:$0x1] }
 0x482   : > { %7704 = vst [vmem:[#allocation35_spill] sm:$0xff] %v6370_v40  ;;  %5100 = vmatmul.msk.bf16.gmra.mxu2 %vm560_vm2, %v2303_v37  ;;  %5117 = vmatmul.msk.bf16.gmra.mxu3 %vm560_vm2, %v2303_v37  ;;  %v6394_v40 = vld [vmem:[#allocation3 + $0x64] sm:$0x1]  ;;  %v6396_v0 = vld [vmem:[#allocation3 + $0x67] sm:$0x1]  ;;  %vm2963_vm2 = vcmask 917248  }
 0x483   : > { %3684 = vst.msk [vmem:[#allocation3 + $0x58] sm:$0xff] %vm404_vm0, %v3621_v50  ;;  %v4042_v50 = vld [vmem:[#allocation3 + $0x15] sm:$0x1]  ;;  %v6399_v56 = vld [vmem:[#allocation3 + $0x1a] sm:$0x1] }
 0x484   : > { %7705 = vst [vmem:[#allocation36_spill] sm:$0xff] %v6378_v45  ;;  %v4310_v45 = vld [vmem:[#allocation3 + $0x19] sm:$0x1]  ;;  %v4073_v37 = vrot.slane %v4042_v50, 7  ;;  %v4041_v53 = vld [vmem:[#allocation3 + $0x5] sm:$0x1] }
 0x485   : > { %2462 = vst.msk [vmem:[#allocation3 + $0x68] sm:$0xff] %vm404_vm0, %v2402_v36  ;;  %v3769_v36 = vld [vmem:[#allocation3 + $0x1] sm:$0x1]  ;;  %v2404_v60 = vpop.f32.mrf.mxu2  ;;  %v6405_v48 = vpop.f32.mrf.mxu3  ;;  %v4341_v58 = vrot.slane %v4310_v45, 7  ;;  %v4177_v35 = vld [vmem:[#allocation3 + $0x7] sm:$0x1] }
 0x486   : > { %7706 = vst [vmem:[#allocation37_spill] sm:$0xff] %v6396_v0  ;;  %v6408_v22 = vsel %vm2514_vm5, %v3801_v23, %v3769_v36  ;;  %v2405_v0 = vadd.f32 %v6081_v46, %v2404_v60  ;;  %v4409_v50 = vrot.slane %v6399_v56, 7  ;;  %v2726_v23 = vrot.slane %v6237_v8, 5  ;;  %v4309_v10 = vld [vmem:[#allocation3 + $0x9] sm:$0x1] }
 0x487   : > { %3685 = vst.msk [vmem:[#allocation3 + $0x60] sm:$0xff] %vm404_vm0, %v3624_v28  ;;  %v4109_v28 = vld [vmem:[#allocation3 + $0x6] sm:$0x1]  ;;  %v6427_v60 = vsel %vm2514_vm5, %v3869_v54, %v3837_v57  ;;  %v4445_v6 = vld [vmem:[#allocation3 + $0xb] sm:$0x1]  ;;  %v2657_v56 = vrot.slane %v6240_v21, 5  ;;  %v6436_v8 = vsel %vm2514_vm5, %v4005_v2, %v3973_v31  ;;  %v6442_v17 = vsel %vm2514_vm5, %v4073_v37, %v4041_v53 }
 0x488   : > { %2463 = vst.msk [vmem:[#allocation3 + $0x70] sm:$0xff] %vm404_vm0, %v2405_v0  ;;  %v6439_v45 = vsel %vm2514_vm5, %v4141_v49, %v4109_v28  ;;  %v3626_v57 = vadd.f32 %v6091_v1, %v6375_v3  ;;  %v2588_v21 = vrot.slane %v6242_v26, 5  ;;  %v6453_v31 = vsel %vm2514_vm5, %v4209_v59, %v4177_v35 }
 0x489   : > { %v6461_v28 = vsel %vm2514_vm5, %v4341_v58, %v4309_v10  ;;  %v6464_v3 = vsel %vm2514_vm5, %v4477_v9, %v4445_v6  ;;  %v2727_v39 = vsel %vm2520_vm7, %v2726_v23, %v6193_v44  ;;  %v2730_v59 = vrot.slane %v6334_v4, 3  ;;  %v4377_v23 = vld [vmem:[#allocation3 + $0xa] sm:$0x1] }
 0x48a   : > { %v2659_v53 = vrot.slane %v6291_v24, 4  ;;  %v2590_v35 = vrot.slane %v6293_v16, 4  ;;  %v2658_v58 = vsel %vm2520_vm7, %v2657_v56, %v6197_v29  ;;  %v2661_v10 = vrot.slane %v6337_v19, 3  ;;  %v6486_v19 = vld [vmem:[#allocation3 + $0x22] sm:$0x1] }
 0x48b   : > { %v2592_v9 = vrot.slane %v6339_v20, 3  ;;  %v2729_v44 = vsel %vm2523_vm8, %v2728_v38, %v2727_v39  ;;  %v2732_v4 = vrot.slane %v6380_v12, 2  ;;  %v2663_v24 = vrot.slane %v6383_v13, 2 }
 0x48c   : > { %v6417_v63 = vld [vmem:[#allocation3 + $0x68] sm:$0x1]  ;;  %v6420_v36 = vld [vmem:[#allocation3 + $0x69] sm:$0x1]  ;;  %v6431_v30 = vld [vmem:[#allocation3 + $0x6a] sm:$0x1]  ;;  %v2589_v16 = vsel %vm2520_vm7, %v2588_v21, %v6201_v42  ;;  %v2731_v38 = vsel %vm2526_vm9, %v2730_v59, %v2729_v44  ;;  %v2660_v13 = vsel %vm2523_vm8, %v2659_v53, %v2658_v58  ;;  %v6494_v42 = vsel %vm2514_vm5, %v4409_v50, %v4377_v23 }
 0x48d   : > { %7707 = vst [vmem:[#allocation38_spill] sm:$0xff] %v6417_v63  ;;  %v6433_v63 = vld [vmem:[#allocation3 + $0x6c] sm:$0x1]  ;;  %v6448_v0 = vld [vmem:[#allocation3 + $0x6d] sm:$0x1]  ;;  %v2406_v6 = vpop.f32.mrf.mxu2  ;;  %v6477_v26 = vpop.f32.mrf.mxu3  ;;  %v2594_v29 = vrot.slane %v6385_v52, 2  ;;  %v2591_v39 = vsel %vm2523_vm8, %v2590_v35, %v2589_v16  ;;  %v2662_v52 = vsel %vm2526_vm9, %v2661_v10, %v2660_v13  ;;  %v3629_v59 = vadd.f32 %v6091_v1, %v6405_v48 }
 0x48e   : > { %v6450_v54 = vld [vmem:[#allocation3 + $0x6b] sm:$0x1]  ;;  %v6455_v2 = vld [vmem:[#allocation3 + $0x6f] sm:$0x1]  ;;  %v6457_v49 = vld [vmem:[#allocation3 + $0x6e] sm:$0x1]  ;;  %v2733_v53 = vsel %vm2529_vm10, %v2732_v4, %v2731_v38  ;;  %v2664_v35 = vsel %vm2529_vm10, %v2663_v24, %v2662_v52 }
 0x48f   : > { %7708 = vst [vmem:[#allocation39_spill] sm:$0xff] %v6457_v49  ;;  %v6488_v20 = vld [vmem:[#allocation3 + $0x70] sm:$0x1]  ;;  %v2697_v56 = vld [vmem:[#allocation3 + $0x73] sm:$0x1]  ;;  %v7710_v48 = vrot.slane %v6401_v14, 7 }
 0x490   : > { %3686 = vst.msk [vmem:[#allocation3 + $0x68] sm:$0xff] %vm404_vm0, %v3626_v57  ;;  %v2407_v57 = vadd.f32 %v6081_v46, %v2406_v6  ;;  %v2628_v12 = vld [vmem:[#allocation3 + $0x72] sm:$0x1]  ;;  %v4513_v21 = vld [vmem:[#allocation3 + $0xc] sm:$0x1]  ;;  %v2734_v6 = vrot.slane %v2697_v56, 1 }
 0x491   : > { %7709 = vst [vmem:[#allocation40_spill] sm:$0xff] %v6488_v20  ;;  %v2665_v37 = vrot.slane %v2628_v12, 1  ;;  %v2559_v49 = vld [vmem:[#allocation3 + $0x71] sm:$0x1]  ;;  %v2593_v20 = vsel %vm2526_vm9, %v2592_v9, %v2591_v39  ;;  %v2835_v50 = vld [vmem:[#allocation3 + $0x75] sm:$0x1]  ;;  %v6515_v4 = vsel %vm2514_vm5, %v7710_v48, %v4513_v21 }
 0x492   : > { %2464 = vst.msk [vmem:[#allocation3 + $0x78] sm:$0xff] %vm404_vm0, %v2407_v57  ;;  %v2596_v58 = vrot.slane %v2559_v49, 1  ;;  %v2904_v44 = vld [vmem:[#allocation3 + $0x76] sm:$0x1]  ;;  %v2735_v16 = vsel %vm2532_vm11, %v2734_v6, %v2733_v53  ;;  %v2595_v10 = vsel %vm2529_vm10, %v2594_v29, %v2593_v20  ;;  %v6506_v57 = vld [vmem:[#allocation3 + $0x74] sm:$0x1] }
 0x493   : > { %v2666_v23 = vsel %vm2532_vm11, %v2665_v37, %v2664_v35  ;;  %v6508_v56 = vld [vmem:[#allocation3 + $0x77] sm:$0x1]  ;;  %v6510_v9 = vld [vmem:[#allocation3 + $0x24] sm:$0x1]  ;;  %2750 = vrot.lane.b32.xlu2 %v2735_v16, %s5169_s18  ;;  %v2866_v37 = vrot.slane %v6296_v43, 4  ;;  %v2935_v24 = vrot.slane %v6298_v25, 4 }
 0x494   : > { %2681 = vrot.lane.b32.xlu1 %v2666_v23, %s5170_s19  ;;  %v2597_v49 = vsel %vm2532_vm11, %v2596_v58, %v2595_v10  ;;  %3687 = vst.msk [vmem:[#allocation3 + $0x70] sm:$0xff] %vm404_vm0, %v3629_v59  ;;  %v3871_v29 = vrot.slane %v6486_v19, 6  ;;  %v2868_v14 = vrot.slane %v6342_v55, 3  ;;  %v2937_v20 = vrot.slane %v6344_v7, 3  ;;  %v4111_v52 = vld [vmem:[#allocation3 + $0x26] sm:$0x1] }
 0x495   : > { %2612 = vrot.lane.b32.xlu0 %v2597_v49, %s5171_s20  ;;  %v2797_v38 = vrot.slane %v6302_v34, 4  ;;  %v7711_v12 = vrot.slane %v6403_v51, 6  ;;  %v2409_v25 = vpop.f32.mrf.mxu2  ;;  %v6534_v13 = vpop.f32.mrf.mxu3  ;;  %v2870_v19 = vrot.slane %v6388_v41, 2  ;;  %v2939_v39 = vrot.slane %v6390_v18, 2 }
 0x496   : > { %v2799_v21 = vrot.slane %v6348_v47, 3  ;;  %v4007_v55 = vrot.slane %v6510_v9, 6  ;;  %v2410_v7 = vadd.f32 %v6081_v46, %v2409_v25  ;;  %v2872_v34 = vrot.slane %v2835_v50, 1 }
 0x497   : > { %v6532_v43 = vsel %vm2517_vm6, %v7711_v12, %v6408_v22  ;;  %v2941_v6 = vrot.slane %v2904_v44, 1  ;;  %v2801_v51 = vrot.slane %v6394_v40, 2  ;;  %v2867_v59 = vsel %vm2523_vm8, %v2866_v37, %v6249_v62  ;;  %v4649_v40 = vld [vmem:[#allocation3 + $0xe] sm:$0x1]  ;;  %v7715_v12 = vld [vmem:[#allocation30_spill] sm:$0xff] }
 0x498   : > { %v2936_v41 = vsel %vm2523_vm8, %v2935_v24, %v6252_v15  ;;  %v2803_v18 = vrot.slane %v6506_v57, 1  ;;  %v7712_v46 = vrot.slane %v6413_v61, 6  ;;  %2465 = vst.msk [vmem:[#allocation3 + $0x80] sm:$0xff] %vm404_vm0, %v2410_v7  ;;  %v2869_v35 = vsel %vm2526_vm9, %v2868_v14, %v2867_v59  ;;  %v6611_v59 = vld [vmem:[%s7671_s6] ss:$0 sm:$0xff] }
 0x499   : > { %v6542_v22 = vld [vmem:[#allocation3 + $0x78] sm:$0x1]  ;;  %v6549_v47 = vld [vmem:[#allocation3 + $0x79] sm:$0x1]  ;;  %v2938_v62 = vsel %vm2526_vm9, %v2937_v20, %v2936_v41  ;;  %v2798_v15 = vsel %vm2523_vm8, %v2797_v38, %v6255_v33  ;;  %v3174_v58 = vld [vmem:[#allocation3 + $0x7a] sm:$0x1]  ;;  %v6566_v44 = vsel %vm2517_vm6, %v3871_v29, %v6427_v60  ;;  %v3631_v61 = vadd.f32 %v6091_v1, %v6477_v26 }
 0x49a   : > { %v6555_v53 = vsel %vm2517_vm6, %v7712_v46, %v6424_v32  ;;  %v6562_v50 = vld [vmem:[#allocation3 + $0x7c] sm:$0x1]  ;;  %v2871_v32 = vsel %vm2529_vm10, %v2870_v19, %v2869_v35  ;;  %v2940_v16 = vsel %vm2529_vm10, %v2939_v39, %v2938_v62  ;;  %v2800_v23 = vsel %vm2526_vm9, %v2799_v21, %v2798_v15  ;;  %v6573_v10 = vld [vmem:[#allocation3 + $0x7d] sm:$0x1]  ;;  %v6575_v57 = vld [vmem:[#allocation3 + $0x7b] sm:$0x1] }
 0x49b   : > { %v4043_v33 = vld [vmem:[#allocation3 + $0x25] sm:$0x1]  ;;  %v2873_v9 = vsel %vm2532_vm11, %v2872_v34, %v2871_v32  ;;  %v2942_v48 = vsel %vm2532_vm11, %v2941_v6, %v2940_v16  ;;  %v2802_v60 = vsel %vm2529_vm10, %v2801_v51, %v2800_v23  ;;  %v6580_v49 = vld [vmem:[#allocation3 + $0x7f] sm:$0x1]  ;;  %v6582_v1 = vld [vmem:[#allocation3 + $0x7e] sm:$0x1] }
 0x49c   : > { %v7713_v26 = vrot.slane %v6410_v27, 7  ;;  %2888 = vrot.lane.b32.xlu2 %v2873_v9, %s5172_s21  ;;  %2957 = vrot.lane.b32.xlu1 %v2942_v48, %s5173_s22  ;;  %v2804_v24 = vsel %vm2532_vm11, %v2803_v18, %v2802_v60  ;;  %v3137_v29 = vrot.slane %v6310_v5, 4  ;;  %v3205_v14 = vrot.slane %v6313_v11, 4  ;;  %3688 = vst.msk [vmem:[#allocation3 + $0x78] sm:$0xff] %vm404_vm0, %v3631_v61  ;;  %v7714_v27 = vld [vmem:[#allocation29_spill] sm:$0xff]  ;;  %v7716_v19 = vld [vmem:[#allocation19_spill] sm:$0xff] }
 0x49d   : > { %v4143_v20 = vrot.slane %v4111_v52, 6  ;;  %2819 = vrot.lane.b32.xlu0 %v2804_v24, %s5174_s23  ;;  %v3139_v38 = vrot.slane %v7714_v27, 3  ;;  %v3207_v25 = vrot.slane %v7715_v12, 3  ;;  %v3004_v39 = vrot.slane %v7716_v19, 4  ;;  %v2411_v7 = vpop.f32.mrf.mxu2  ;;  %v6599_v34 = vpop.f32.mrf.mxu3  ;;  %v7717_v6 = vld [vmem:[#allocation27_spill] sm:$0xff]  ;;  %v7720_v15 = vld [vmem:[#allocation14_spill] sm:$0xff] }
 0x49e   : > { %v6587_v37 = vsel %vm2514_vm5, %v7713_v26, %v4649_v40  ;;  %v4075_v21 = vrot.slane %v4043_v33, 6  ;;  %v3141_v5 = vrot.slane %v6420_v36, 2  ;;  %v3209_v11 = vrot.slane %v6431_v30, 2  ;;  %v7718_v40 = vld [vmem:[#allocation37_spill] sm:$0xff]  ;;  %v4179_v35 = vld [vmem:[#allocation3 + $0x27] sm:$0x1] }
 0x49f   : > { %v3006_v51 = vrot.slane %v7717_v6, 3  ;;  %v6606_v52 = vsel %vm2517_vm6, %v4007_v55, %v6436_v8  ;;  %v2412_v41 = vadd.f32 %v6611_v59, %v2411_v7  ;;  %v3143_v18 = vrot.slane %v6549_v47, 1  ;;  %v7719_v30 = vld [vmem:[#allocation13_spill] sm:$0xff]  ;;  %v7721_v16 = vld [vmem:[#allocation11_spill] sm:$0xff]  ;;  %v7723_v12 = vld [vmem:[#allocation22_spill] sm:$0xff] }
 0x4a0   : > { %v3211_v46 = vrot.slane %v3174_v58, 1  ;;  %v3008_v36 = vrot.slane %v7718_v40, 2  ;;  %v3138_v62 = vsel %vm2523_vm8, %v3137_v29, %v7719_v30  ;;  %v3206_v8 = vsel %vm2523_vm8, %v3205_v14, %v7720_v15  ;;  %v4311_v32 = vld [vmem:[#allocation3 + $0x29] sm:$0x1]  ;;  %v4447_v9 = vld [vmem:[#allocation3 + $0x2b] sm:$0x1] }
 0x4a1   : > { %v3010_v55 = vrot.slane %v6508_v56, 1  ;;  %v6623_v61 = vsel %vm2517_vm6, %v4143_v20, %v6439_v45  ;;  %2466 = vst.msk [vmem:[#allocation3 + $0x88] sm:$0xff] %vm404_vm0, %v2412_v41  ;;  %v3140_v47 = vsel %vm2526_vm9, %v3139_v38, %v3138_v62  ;;  %v3208_v58 = vsel %vm2526_vm9, %v3207_v25, %v3206_v8  ;;  %v6637_v26 = vld [vmem:[#allocation3 + $0x2a] sm:$0x1]  ;;  %v7725_v7 = vld [vmem:[#allocation32_spill] sm:$0xff] }
 0x4a2   : > { %v3005_v23 = vsel %vm2523_vm8, %v3004_v39, %v7721_v16  ;;  %v6632_v33 = vsel %vm2517_vm6, %v4075_v21, %v6442_v17  ;;  %v3142_v56 = vsel %vm2529_vm10, %v3141_v5, %v3140_v47  ;;  %v3210_v45 = vsel %vm2529_vm10, %v3209_v11, %v3208_v58  ;;  %v7722_v27 = vld [vmem:[#allocation21_spill] sm:$0xff]  ;;  %v7724_v39 = vld [vmem:[#allocation31_spill] sm:$0xff]  ;;  %v3772_v47 = vld [vmem:[#allocation3 + $0x31] sm:$0x1] }
 0x4a3   : > { %v3007_v48 = vsel %vm2526_vm9, %v3006_v51, %v3005_v23  ;;  %v4211_v60 = vrot.slane %v4179_v35, 6  ;;  %v3144_v24 = vsel %vm2532_vm11, %v3143_v18, %v3142_v56  ;;  %v3212_v29 = vsel %vm2532_vm11, %v3211_v46, %v3210_v45  ;;  %v7726_v11 = vld [vmem:[#allocation23_spill] sm:$0xff]  ;;  %v4515_v62 = vld [vmem:[#allocation3 + $0x2c] sm:$0x1]  ;;  %v3773_v45 = vld [vmem:[#allocation3 + $0x41] sm:$0x1] }
 0x4a4   : > { %v3009_v14 = vsel %vm2529_vm10, %v3008_v36, %v3007_v48  ;;  %v4343_v20 = vrot.slane %v4311_v32, 6  ;;  %3159 = vrot.lane.b32.xlu2 %v3144_v24, %s5171_s20  ;;  %3227 = vrot.lane.b32.xlu1 %v3212_v29, %s5170_s19  ;;  %v3341_v38 = vrot.slane %v7722_v27, 4  ;;  %v3409_v25 = vrot.slane %v7723_v12, 4  ;;  %v7727_v36 = vld [vmem:[#allocation33_spill] sm:$0xff]  ;;  %v7728_v58 = vld [vmem:[#allocation15_spill] sm:$0xff] }
 0x4a5   : > { %v3011_v17 = vsel %vm2532_vm11, %v3010_v55, %v3009_v14  ;;  %v4479_v19 = vrot.slane %v4447_v9, 6  ;;  %v3343_v21 = vrot.slane %v7724_v39, 3  ;;  %v3411_v5 = vrot.slane %v7725_v7, 3  ;;  %v2414_v41 = vpop.f32.mrf.mxu2  ;;  %v6652_v18 = vpop.f32.mrf.mxu3  ;;  %v6674_v9 = vld [vmem:[#allocation3 + $0x2e] sm:$0x1] }
 0x4a6   : > { %3026 = vrot.lane.b32.xlu0 %v3011_v17, %s5175_s28  ;;  %v3273_v6 = vrot.slane %v7726_v11, 4  ;;  %v4411_v51 = vrot.slane %v6637_v26, 6  ;;  %v3345_v46 = vrot.slane %v6433_v63, 2  ;;  %v3413_v40 = vrot.slane %v6448_v0, 2  ;;  %v7729_v0 = vld [vmem:[#allocation16_spill] sm:$0xff]  ;;  %v7731_v11 = vld [vmem:[#allocation34_spill] sm:$0xff] }
 0x4a7   : > { %v3275_v35 = vrot.slane %v7727_v36, 3  ;;  %v6659_v30 = vsel %vm2517_vm6, %v4211_v60, %v6453_v31  ;;  %v2415_v15 = vadd.f32 %v6611_v59, %v2414_v41  ;;  %v3347_v8 = vrot.slane %v6562_v50, 1  ;;  %v6681_v48 = vld [vmem:[#allocation3 + $0x33] sm:$0x1]  ;;  %v3774_v24 = vld [vmem:[#allocation3 + $0x51] sm:$0x1] }
 0x4a8   : > { %v3415_v55 = vrot.slane %v6573_v10, 1  ;;  %v3277_v32 = vrot.slane %v6450_v54, 2  ;;  %v3342_v63 = vsel %vm2523_vm8, %v3341_v38, %v7728_v58  ;;  %v3410_v16 = vsel %vm2523_vm8, %v3409_v25, %v7729_v0  ;;  %v7730_v10 = vld [vmem:[#allocation17_spill] sm:$0xff]  ;;  %v3775_v27 = vld [vmem:[#allocation3 + $0x61] sm:$0x1] }
 0x4a9   : > { %v3279_v23 = vrot.slane %v6575_v57, 1  ;;  %v6672_v31 = vsel %vm2517_vm6, %v4343_v20, %v6461_v28  ;;  %2467 = vst.msk [vmem:[#allocation3 + $0x90] sm:$0xff] %vm404_vm0, %v2415_v15  ;;  %v3344_v50 = vsel %vm2526_vm9, %v3343_v21, %v3342_v63  ;;  %v3412_v54 = vsel %vm2526_vm9, %v3411_v5, %v3410_v16  ;;  %v3840_v38 = vld [vmem:[#allocation3 + $0x32] sm:$0x1]  ;;  %v3776_v39 = vld [vmem:[#allocation3 + $0x71] sm:$0x1] }
 0x4aa   : > { %v3274_v56 = vsel %vm2523_vm8, %v3273_v6, %v7730_v10  ;;  %v4547_v60 = vrot.slane %v4515_v62, 6  ;;  %v3346_v57 = vsel %vm2529_vm10, %v3345_v46, %v3344_v50  ;;  %v3414_v28 = vsel %vm2529_vm10, %v3413_v40, %v3412_v54  ;;  %v3976_v46 = vld [vmem:[#allocation3 + $0x34] sm:$0x1]  ;;  %v7732_v15 = vld [vmem:[#allocation35_spill] sm:$0xff]  ;;  %v3977_v0 = vld [vmem:[#allocation3 + $0x44] sm:$0x1] }
 0x4ab   : > { %v3276_v26 = vsel %vm2526_vm9, %v3275_v35, %v3274_v56  ;;  %v3805_v29 = vrot.slane %v3772_v47, 5  ;;  %v3348_v14 = vsel %vm2532_vm11, %v3347_v8, %v3346_v57  ;;  %v3416_v20 = vsel %vm2532_vm11, %v3415_v55, %v3414_v28  ;;  %v3909_v47 = vld [vmem:[#allocation3 + $0x43] sm:$0x1]  ;;  %v6721_v54 = vld [vmem:[#allocation3 + $0x35] sm:$0x1]  ;;  %v7735_v57 = vld [vmem:[#allocation25_spill] sm:$0xff] }
 0x4ac   : > { %v3278_v17 = vsel %vm2529_vm10, %v3277_v32, %v3276_v26  ;;  %v6691_v12 = vsel %vm2517_vm6, %v4479_v19, %v6464_v3  ;;  %3363 = vrot.lane.b32.xlu2 %v3348_v14, %s5174_s23  ;;  %3431 = vrot.lane.b32.xlu1 %v3416_v20, %s5172_s21  ;;  %v3807_v21 = vrot.slane %v3773_v45, 4  ;;  %v3941_v7 = vrot.slane %v6681_v48, 5  ;;  %v6700_v3 = vld [vmem:[#allocation3 + $0x36] sm:$0x1]  ;;  %v3841_v45 = vld [vmem:[#allocation3 + $0x42] sm:$0x1] }
 0x4ad   : > { %v3280_v25 = vsel %vm2532_vm11, %v3279_v23, %v3278_v17  ;;  %v4683_v5 = vrot.slane %v6674_v9, 6  ;;  %v3547_v6 = vrot.slane %v7731_v11, 3  ;;  %v3809_v41 = vrot.slane %v3774_v24, 3  ;;  %v2416_v36 = vpop.f32.mrf.mxu2  ;;  %v6710_v35 = vpop.f32.mrf.mxu3  ;;  %v3910_v24 = vld [vmem:[#allocation3 + $0x53] sm:$0x1] }
 0x4ae   : > { %3295 = vrot.lane.b32.xlu0 %v3280_v25, %s5169_s18  ;;  %v6704_v19 = vsel %vm2517_vm6, %v4411_v51, %v6494_v42  ;;  %v6708_v40 = vsel %vm2517_vm6, %v4547_v60, %v6515_v4  ;;  %v3549_v62 = vrot.slane %v6455_v2, 2  ;;  %v3479_v8 = vrot.slane %v7732_v15, 3  ;;  %v7733_v51 = vld [vmem:[#allocation39_spill] sm:$0xff]  ;;  %v6728_v60 = vld [vmem:[#allocation3 + $0x37] sm:$0x1] }
 0x4af   : > { %v3806_v55 = vsel %vm2520_vm7, %v3805_v29, %v6532_v43  ;;  %v3811_v32 = vrot.slane %v3775_v27, 2  ;;  %v2417_v58 = vadd.f32 %v6611_v59, %v2416_v36  ;;  %v3551_v42 = vrot.slane %v6580_v49, 1  ;;  %v7734_v43 = vld [vmem:[#allocation24_spill] sm:$0xff]  ;;  %v3978_v29 = vld [vmem:[#allocation3 + $0x54] sm:$0x1] }
 0x4b0   : > { %v3481_v63 = vrot.slane %v7733_v51, 2  ;;  %v3813_v4 = vrot.slane %v3776_v39, 1  ;;  %v3483_v16 = vrot.slane %v6582_v1, 1  ;;  %v3808_v23 = vsel %vm2523_vm8, %v3807_v21, %v3806_v55  ;;  %v3842_v39 = vld [vmem:[#allocation3 + $0x52] sm:$0x1] }
 0x4b1   : > { %v3873_v2 = vrot.slane %v3840_v38, 5  ;;  %v4009_v50 = vrot.slane %v3976_v46, 5  ;;  %2468 = vst.msk [vmem:[#allocation3 + $0x98] sm:$0xff] %vm404_vm0, %v2417_v58  ;;  %v3548_v10 = vsel %vm2526_vm9, %v3547_v6, %v7734_v43  ;;  %v3810_v56 = vsel %vm2526_vm9, %v3809_v41, %v3808_v23  ;;  %v3911_v38 = vld [vmem:[#allocation3 + $0x63] sm:$0x1] }
 0x4b2   : > { %v3943_v49 = vrot.slane %v3909_v47, 4  ;;  %v4145_v48 = vrot.slane %v6700_v3, 5  ;;  %v3550_v1 = vsel %vm2529_vm10, %v3549_v62, %v3548_v10  ;;  %v3480_v28 = vsel %vm2526_vm9, %v3479_v8, %v7735_v57  ;;  %v3979_v21 = vld [vmem:[#allocation3 + $0x64] sm:$0x1]  ;;  %v6739_v11 = vld [vmem:[#allocation3 + $0x39] sm:$0x1] }
 0x4b3   : > { %v3812_v26 = vsel %vm2529_vm10, %v3811_v32, %v3810_v56  ;;  %v4011_v14 = vrot.slane %v3977_v0, 4  ;;  %v3552_v20 = vsel %vm2532_vm11, %v3551_v42, %v3550_v1  ;;  %v3482_v17 = vsel %vm2529_vm10, %v3481_v63, %v3480_v28  ;;  %v3912_v41 = vld [vmem:[#allocation3 + $0x73] sm:$0x1]  ;;  %v3843_v46 = vld [vmem:[#allocation3 + $0x62] sm:$0x1] }
 0x4b4   : > { %v3814_v27 = vsel %vm2532_vm11, %v3813_v4, %v3812_v26  ;;  %v3942_v25 = vsel %vm2520_vm7, %v3941_v7, %v6555_v53  ;;  %3567 = vrot.lane.b32.xlu2 %v3552_v20, %s5175_s28  ;;  %v3484_v6 = vsel %vm2532_vm11, %v3483_v16, %v3482_v17  ;;  %v3874_v36 = vsel %vm2520_vm7, %v3873_v2, %v6566_v44  ;;  %v3980_v62 = vld [vmem:[#allocation3 + $0x74] sm:$0x1]  ;;  %v3844_v7 = vld [vmem:[#allocation3 + $0x72] sm:$0x1]  ;;  %v4113_v4 = vld [vmem:[#allocation3 + $0x46] sm:$0x1] }
 0x4b5   : > { %3829 = vrot.lane.b32.xlu1 %v3814_v27, %s5171_s20  ;;  %v4010_v15 = vsel %vm2520_vm7, %v4009_v50, %v6606_v52  ;;  %v3945_v53 = vrot.slane %v3910_v24, 3  ;;  %v3875_v8 = vrot.slane %v3841_v45, 4  ;;  %v4013_v55 = vrot.slane %v3978_v29, 3  ;;  %v2419_v47 = vpop.f32.mrf.mxu2  ;;  %v6750_v58 = vpop.f32.mrf.mxu3  ;;  %v4181_v2 = vld [vmem:[#allocation3 + $0x47] sm:$0x1] }
 0x4b6   : > { %3499 = vrot.lane.b32.xlu0 %v3484_v6, %s5173_s22  ;;  %v4077_v32 = vrot.slane %v6721_v54, 5  ;;  %v3947_v42 = vrot.slane %v3911_v38, 2  ;;  %v3877_v51 = vrot.slane %v3842_v39, 3  ;;  %v4015_v63 = vrot.slane %v3979_v21, 2  ;;  %v4045_v57 = vld [vmem:[#allocation3 + $0x45] sm:$0x1] }
 0x4b7   : > { %v4213_v44 = vrot.slane %v6728_v60, 5  ;;  %v2420_v0 = vadd.f32 %v6611_v59, %v2419_v47  ;;  %v3949_v52 = vrot.slane %v3912_v41, 1  ;;  %v3879_v16 = vrot.slane %v3843_v46, 2  ;;  %v6761_v28 = vld [vmem:[#allocation3 + $0x3b] sm:$0x1] }
 0x4b8   : > { %v4017_v23 = vrot.slane %v3980_v62, 1  ;;  %v3944_v50 = vsel %vm2523_vm8, %v3943_v49, %v3942_v25  ;;  %v3881_v43 = vrot.slane %v3844_v7, 1  ;;  %v4012_v54 = vsel %vm2523_vm8, %v4011_v14, %v4010_v15  ;;  %v4114_v29 = vld [vmem:[#allocation3 + $0x56] sm:$0x1]  ;;  %v4182_v14 = vld [vmem:[#allocation3 + $0x57] sm:$0x1] }
 0x4b9   : > { %v4345_v10 = vrot.slane %v6739_v11, 5  ;;  %2469 = vst.msk [vmem:[#allocation3 + $0xa0] sm:$0xff] %vm404_vm0, %v2420_v0  ;;  %v3946_v56 = vsel %vm2526_vm9, %v3945_v53, %v3944_v50  ;;  %v3876_v45 = vsel %vm2523_vm8, %v3875_v8, %v3874_v36  ;;  %v4014_v60 = vsel %vm2526_vm9, %v4013_v55, %v4012_v54  ;;  %v4115_v25 = vld [vmem:[#allocation3 + $0x66] sm:$0x1]  ;;  %v4046_v39 = vld [vmem:[#allocation3 + $0x55] sm:$0x1] }
 0x4ba   : > { %v4147_v1 = vrot.slane %v4113_v4, 4  ;;  %v3948_v26 = vsel %vm2529_vm10, %v3947_v42, %v3946_v56  ;;  %v3878_v49 = vsel %vm2526_vm9, %v3877_v51, %v3876_v45  ;;  %v4016_v24 = vsel %vm2529_vm10, %v4015_v63, %v4014_v60  ;;  %v4183_v21 = vld [vmem:[#allocation3 + $0x67] sm:$0x1]  ;;  %v6769_v6 = vld [vmem:[#allocation3 + $0x3a] sm:$0x1] }
 0x4bb   : > { %v4215_v20 = vrot.slane %v4181_v2, 4  ;;  %v3950_v17 = vsel %vm2532_vm11, %v3949_v52, %v3948_v26  ;;  %v3880_v27 = vsel %vm2529_vm10, %v3879_v16, %v3878_v49  ;;  %v4018_v38 = vsel %vm2532_vm11, %v4017_v23, %v4016_v24  ;;  %v4116_v36 = vld [vmem:[#allocation3 + $0x76] sm:$0x1]  ;;  %v4047_v15 = vld [vmem:[#allocation3 + $0x65] sm:$0x1] }
 0x4bc   : > { %v6775_v41 = vsel %vm2517_vm6, %v4683_v5, %v6587_v37  ;;  %3965 = vrot.lane.b32.xlu2 %v3950_v17, %s5169_s18  ;;  %v3882_v46 = vsel %vm2532_vm11, %v3881_v43, %v3880_v27  ;;  %v4146_v62 = vsel %vm2520_vm7, %v4145_v48, %v6623_v61  ;;  %v4078_v53 = vsel %vm2520_vm7, %v4077_v32, %v6632_v33  ;;  %v4184_v9 = vld [vmem:[#allocation3 + $0x77] sm:$0x1]  ;;  %v4048_v5 = vld [vmem:[#allocation3 + $0x75] sm:$0x1]  ;;  %v4313_v63 = vld [vmem:[#allocation3 + $0x49] sm:$0x1] }
 0x4bd   : > { %4033 = vrot.lane.b32.xlu1 %v4018_v38, %s5174_s23  ;;  %v4149_v37 = vrot.slane %v4114_v29, 3  ;;  %v4079_v7 = vrot.slane %v4045_v57, 4  ;;  %v4217_v8 = vrot.slane %v4182_v14, 3  ;;  %v4481_v55 = vrot.slane %v6761_v28, 5  ;;  %v2421_v47 = vpop.f32.mrf.mxu2  ;;  %v6788_v42 = vpop.f32.mrf.mxu3  ;;  %v4381_v52 = vld [vmem:[#allocation3 + $0x4a] sm:$0x1] }
 0x4be   : > { %3897 = vrot.lane.b32.xlu0 %v3882_v46, %s5170_s19  ;;  %v4151_v51 = vrot.slane %v4115_v25, 2  ;;  %v4081_v3 = vrot.slane %v4046_v39, 3  ;;  %v4214_v61 = vsel %vm2520_vm7, %v4213_v44, %v6659_v30  ;;  %v4219_v48 = vrot.slane %v4183_v21, 2  ;;  %v6796_v43 = vld [vmem:[#allocation3 + $0x3c] sm:$0x1] }
 0x4bf   : > { %v2422_v33 = vadd.f32 %v6611_v59, %v2421_v47  ;;  %v4153_v32 = vrot.slane %v4116_v36, 1  ;;  %v4083_v4 = vrot.slane %v4047_v15, 2  ;;  %v4221_v0 = vrot.slane %v4184_v9, 1  ;;  %v4449_v45 = vld [vmem:[#allocation3 + $0x4b] sm:$0x1] }
 0x4c0   : > { %v4148_v16 = vsel %vm2523_vm8, %v4147_v1, %v4146_v62  ;;  %v4085_v23 = vrot.slane %v4048_v5, 1  ;;  %v4216_v2 = vsel %vm2523_vm8, %v4215_v20, %v4214_v61  ;;  %v4413_v50 = vrot.slane %v6769_v6, 5  ;;  %v6802_v60 = vld [vmem:[#allocation3 + $0x3e] sm:$0x1]  ;;  %v4314_v26 = vld [vmem:[#allocation3 + $0x59] sm:$0x1] }
 0x4c1   : > { %2470 = vst.msk [vmem:[#allocation3 + $0xa8] sm:$0xff] %vm404_vm0, %v2422_v33  ;;  %v4150_v30 = vsel %vm2526_vm9, %v4149_v37, %v4148_v16  ;;  %v4080_v44 = vsel %vm2523_vm8, %v4079_v7, %v4078_v53  ;;  %v4218_v54 = vsel %vm2526_vm9, %v4217_v8, %v4216_v2  ;;  %v4347_v56 = vrot.slane %v4313_v63, 4  ;;  %v4382_v49 = vld [vmem:[#allocation3 + $0x5a] sm:$0x1]  ;;  %v4315_v17 = vld [vmem:[#allocation3 + $0x69] sm:$0x1] }
 0x4c2   : > { %v4152_v1 = vsel %vm2529_vm10, %v4151_v51, %v4150_v30  ;;  %v4082_v57 = vsel %vm2526_vm9, %v4081_v3, %v4080_v44  ;;  %v4220_v28 = vsel %vm2529_vm10, %v4219_v48, %v4218_v54  ;;  %v4415_v24 = vrot.slane %v4381_v52, 4  ;;  %v4450_v38 = vld [vmem:[#allocation3 + $0x5b] sm:$0x1]  ;;  %v4383_v25 = vld [vmem:[#allocation3 + $0x6a] sm:$0x1] }
 0x4c3   : > { %v4154_v29 = vsel %vm2532_vm11, %v4153_v32, %v4152_v1  ;;  %v4084_v14 = vsel %vm2529_vm10, %v4083_v4, %v4082_v57  ;;  %v4222_v20 = vsel %vm2532_vm11, %v4221_v0, %v4220_v28  ;;  %v4346_v27 = vsel %vm2520_vm7, %v4345_v10, %v6672_v31  ;;  %v6814_v39 = vld [vmem:[#allocation3 + $0x4c] sm:$0x1]  ;;  %v4316_v6 = vld [vmem:[#allocation3 + $0x79] sm:$0x1]  ;;  %v4451_v46 = vld [vmem:[#allocation3 + $0x6b] sm:$0x1] }
 0x4c4   : > { %4169 = vrot.lane.b32.xlu2 %v4154_v29, %s5173_s22  ;;  %v4086_v21 = vsel %vm2532_vm11, %v4085_v23, %v4084_v14  ;;  %v4482_v36 = vsel %vm2520_vm7, %v4481_v55, %v6691_v12  ;;  %v4384_v62 = vld [vmem:[#allocation3 + $0x7a] sm:$0x1]  ;;  %v4414_v11 = vsel %vm2520_vm7, %v4413_v50, %v6704_v19  ;;  %v4582_v31 = vld [vmem:[#allocation3 + $0x1d] sm:$0x1]  ;;  %v4349_v10 = vrot.slane %v4314_v26, 3 }
 0x4c5   : > { %4237 = vrot.lane.b32.xlu1 %v4222_v20, %s5175_s28  ;;  %v4452_v15 = vld [vmem:[#allocation3 + $0x7b] sm:$0x1]  ;;  %v4483_v53 = vrot.slane %v4449_v45, 4  ;;  %v4417_v9 = vrot.slane %v4382_v49, 3  ;;  %v4549_v37 = vrot.slane %v6796_v43, 5  ;;  %v2424_v5 = vpop.f32.mrf.mxu2  ;;  %v6825_v7 = vpop.f32.mrf.mxu3  ;;  %v4351_v8 = vrot.slane %v4315_v17, 2 }
 0x4c6   : > { %4101 = vrot.lane.b32.xlu0 %v4086_v21, %s5172_s21  ;;  %v4485_v47 = vrot.slane %v4450_v38, 3  ;;  %v4419_v51 = vrot.slane %v4383_v25, 2  ;;  %v4685_v12 = vrot.slane %v6802_v60, 5  ;;  %v4583_v55 = vld [vmem:[#allocation3 + $0x2d] sm:$0x1]  ;;  %v2425_v19 = vadd.f32 %v6611_v59, %v2424_v5 }
 0x4c7   : > { %v4353_v3 = vrot.slane %v4316_v6, 1  ;;  %v4487_v61 = vrot.slane %v4451_v46, 2  ;;  %v4421_v48 = vrot.slane %v4384_v62, 1  ;;  %v4584_v63 = vld [vmem:[#allocation3 + $0x3d] sm:$0x1]  ;;  %v4348_v33 = vsel %vm2523_vm8, %v4347_v56, %v4346_v27 }
 0x4c8   : > { %v4489_v32 = vrot.slane %v4452_v15, 1  ;;  %v4416_v4 = vsel %vm2523_vm8, %v4415_v24, %v4414_v11  ;;  %v4551_v0 = vrot.slane %v6814_v39, 4  ;;  %v4653_v52 = vld [vmem:[#allocation3 + $0x4e] sm:$0x1]  ;;  %v4585_v16 = vld [vmem:[#allocation3 + $0x4d] sm:$0x1]  ;;  %v4350_v23 = vsel %vm2526_vm9, %v4349_v10, %v4348_v33 }
 0x4c9   : > { %2471 = vst.msk [vmem:[#allocation3 + $0xb0] sm:$0xff] %vm404_vm0, %v2425_v19  ;;  %v4484_v2 = vsel %vm2523_vm8, %v4483_v53, %v4482_v36  ;;  %v4418_v50 = vsel %vm2526_vm9, %v4417_v9, %v4416_v4  ;;  %v4518_v43 = vld [vmem:[#allocation3 + $0x5c] sm:$0x1]  ;;  %v4654_v30 = vld [vmem:[#allocation3 + $0x5e] sm:$0x1]  ;;  %v4613_v44 = vrot.slane %v4582_v31, 7  ;;  %v4352_v54 = vsel %vm2529_vm10, %v4351_v8, %v4350_v23 }
 0x4ca   : > { %v4486_v56 = vsel %vm2526_vm9, %v4485_v47, %v4484_v2  ;;  %v4420_v45 = vsel %vm2529_vm10, %v4419_v51, %v4418_v50  ;;  %v4519_v60 = vld [vmem:[#allocation3 + $0x6c] sm:$0x1]  ;;  %v4581_v1 = vld [vmem:[#allocation3 + $0xd] sm:$0x1]  ;;  %v4586_v57 = vld [vmem:[#allocation3 + $0x5d] sm:$0x1]  ;;  %v4354_v26 = vsel %vm2532_vm11, %v4353_v3, %v4352_v54  ;;  %v4550_v38 = vsel %vm2520_vm7, %v4549_v37, %v6708_v40 }
 0x4cb   : > { %v4615_v28 = vrot.slane %v4583_v55, 6  ;;  %v4488_v49 = vsel %vm2529_vm10, %v4487_v61, %v4486_v56  ;;  %v4422_v24 = vsel %vm2532_vm11, %v4421_v48, %v4420_v45  ;;  %v4655_v29 = vld [vmem:[#allocation3 + $0x6e] sm:$0x1]  ;;  %v4587_v14 = vld [vmem:[#allocation3 + $0x6d] sm:$0x1]  ;;  %v4617_v20 = vrot.slane %v4584_v63, 5 }
 0x4cc   : > { %4369 = vrot.lane.b32.xlu2 %v4354_v26, %s5171_s20  ;;  %v4490_v17 = vsel %vm2532_vm11, %v4489_v32, %v4488_v49  ;;  %v4520_v27 = vld [vmem:[#allocation3 + $0x7c] sm:$0x1]  ;;  %v4687_v25 = vrot.slane %v4653_v52, 4  ;;  %v4588_v39 = vld [vmem:[#allocation3 + $0x7d] sm:$0x1]  ;;  %v4619_v21 = vrot.slane %v4585_v16, 4  ;;  %v4614_v62 = vsel %vm2514_vm5, %v4613_v44, %v4581_v1 }
 0x4cd   : > { %4437 = vrot.lane.b32.xlu1 %v4422_v24, %s5170_s19  ;;  %v4553_v6 = vrot.slane %v4518_v43, 3  ;;  %v4656_v46 = vld [vmem:[#allocation3 + $0x7e] sm:$0x1]  ;;  %v4689_v36 = vrot.slane %v4654_v30, 3  ;;  %v4621_v11 = vrot.slane %v4586_v57, 3  ;;  %v2426_v31 = vpop.f32.mrf.mxu2  ;;  %v6849_v10 = vpop.f32.mrf.mxu3  ;;  %v4555_v15 = vrot.slane %v4519_v60, 2 }
 0x4ce   : > { %4505 = vrot.lane.b32.xlu0 %v4490_v17, %s5169_s18  ;;  %v4691_v53 = vrot.slane %v4655_v29, 2  ;;  %v4616_v9 = vsel %vm2517_vm6, %v4615_v28, %v4614_v62  ;;  %v4623_v5 = vrot.slane %v4587_v14, 2  ;;  %v2427_v40 = vadd.f32 %v6611_v59, %v2426_v31  ;;  %v7736_v50 = vld [vmem:[#allocation7_spill] sm:$0xff]  ;;  %v7737_v30 = vld [vmem:[#allocation9_spill] sm:$0xff]  ;;  %v7738_v54 = vld [vmem:[#allocation12_spill] sm:$0xff] }
 0x4cf   : > { %v4557_v37 = vrot.slane %v4520_v27, 1  ;;  %v4618_v8 = vsel %vm2520_vm7, %v4617_v20, %v4616_v9  ;;  %v4625_v47 = vrot.slane %v4588_v39, 1  ;;  %v4552_v51 = vsel %vm2523_vm8, %v4551_v0, %v4550_v38  ;;  %v7739_v45 = vld [vmem:[#allocation20_spill] sm:$0xff]  ;;  %v7740_v1 = vld [vmem:[#allocation5_spill] sm:$0xff]  ;;  %v7742_v24 = vld [vmem:[#allocation38_spill] sm:$0xff] }
 0x4d0   : > { %v4686_v55 = vsel %vm2520_vm7, %v4685_v12, %v6775_v41  ;;  %v4693_v19 = vrot.slane %v4656_v46, 1  ;;  %v4620_v3 = vsel %vm2523_vm8, %v4619_v21, %v4618_v8  ;;  %2472 = vst.msk [vmem:[#allocation3 + $0xb8] sm:$0xff] %vm404_vm0, %v2427_v40  ;;  %v4554_v61 = vsel %vm2526_vm9, %v4553_v6, %v4552_v51  ;;  %v7741_v28 = vld [vmem:[#allocation28_spill] sm:$0xff]  ;;  %v7743_v21 = vld [vmem:[#allocation6_spill] sm:$0xff] }
 0x4d1   : > { %v4688_v48 = vsel %vm2523_vm8, %v4687_v25, %v4686_v55  ;;  %v4622_v63 = vsel %vm2526_vm9, %v4621_v11, %v4620_v3  ;;  %v4556_v33 = vsel %vm2529_vm10, %v4555_v15, %v4554_v61  ;;  %v3067_v43 = vrot.slane %v7736_v50, 7  ;;  %v7745_v31 = vld [vmem:[#allocation10_spill] sm:$0xff]  ;;  %v7747_v9 = vld [vmem:[#allocation4_spill] sm:$0xff]  ;;  %v4247_v50 = vld [vmem:[#allocation3 + $0x28] sm:$0x1] }
 0x4d2   : > { %v4690_v32 = vsel %vm2526_vm9, %v4689_v36, %v4688_v48  ;;  %v4624_v4 = vsel %vm2529_vm10, %v4623_v5, %v4622_v63  ;;  %v4558_v0 = vsel %vm2532_vm11, %v4557_v37, %v4556_v33  ;;  %v3069_v44 = vrot.slane %v7737_v30, 6  ;;  %v7744_v36 = vld [vmem:[#allocation8_spill] sm:$0xff]  ;;  %v7748_v40 = vld [vmem:[#allocation26_spill] sm:$0xff] }
 0x4d3   : > { %v4692_v41 = vsel %vm2529_vm10, %v4691_v53, %v4690_v32  ;;  %v4626_v12 = vsel %vm2532_vm11, %v4625_v47, %v4624_v4  ;;  %v3071_v56 = vrot.slane %v7738_v54, 5  ;;  %v3073_v60 = vrot.slane %v7739_v45, 4  ;;  %v7749_v47 = vld [vmem:[#allocation36_spill] sm:$0xff]  ;;  %v4248_v54 = vld [vmem:[#allocation3 + $0x38] sm:$0x1] }
 0x4d4   : > { %4573 = vrot.lane.b32.xlu2 %v4558_v0, %s5174_s23  ;;  %v4694_v52 = vsel %vm2532_vm11, %v4693_v19, %v4692_v41  ;;  %v3068_v57 = vsel %vm2514_vm5, %v3067_v43, %v7740_v1  ;;  %v3075_v26 = vrot.slane %v7741_v28, 3  ;;  %v3077_v29 = vrot.slane %v7742_v24, 2  ;;  %v7750_v33 = vld [vmem:[#allocation40_spill] sm:$0xff]  ;;  %v3706_v43 = vld [vmem:[#allocation3 + $0x10] sm:$0x1] }
 0x4d5   : > { %4641 = vrot.lane.b32.xlu1 %v4626_v12, %s5172_s21  ;;  %v2429_v16 = vpop.f32.mrf.mxu2  ;;  %v6872_v23 = vpop.f32.mrf.mxu3  ;;  %v3070_v49 = vsel %vm2517_vm6, %v3069_v44, %v3068_v57  ;;  %v3079_v39 = vrot.slane %v6542_v22, 1  ;;  %v2513_v6 = vrot.slane %v7743_v21, 7  ;;  %v2516_v62 = vrot.slane %v7744_v36, 6  ;;  %v7746_v22 = vld [vmem:[#allocation18_spill] sm:$0xff]  ;;  %v3709_v57 = vld [vmem:[#allocation3 + $0x40] sm:$0x1] }
 0x4d6   : > { %4709 = vrot.lane.b32.xlu0 %v4694_v52, %s5173_s22  ;;  %v2430_v2 = vadd.f32 %v6611_v59, %v2429_v16  ;;  %v3072_v17 = vsel %vm2520_vm7, %v3071_v56, %v3070_v49  ;;  %v2519_v15 = vrot.slane %v7745_v31, 5  ;;  %v2522_v53 = vrot.slane %v7746_v22, 4  ;;  %v3707_v56 = vld [vmem:[#allocation3 + $0x20] sm:$0x1]  ;;  %v3708_v45 = vld [vmem:[#allocation3 + $0x30] sm:$0x1] }
 0x4d7   : > { %v3074_v38 = vsel %vm2523_vm8, %v3073_v60, %v3072_v17  ;;  %v2515_v5 = vsel %vm2514_vm5, %v2513_v6, %v7747_v9  ;;  %v2525_v37 = vrot.slane %v7748_v40, 3  ;;  %v2528_v51 = vrot.slane %v7749_v47, 2  ;;  %v4245_v17 = vld [vmem:[#allocation3 + $0x8] sm:$0x1]  ;;  %v6938_v6 = vld [vmem:[#allocation3 + $0x60] sm:$0x1] }
 0x4d8   : > { %2473 = vst.msk [vmem:[#allocation3 + $0xc0] sm:$0xff] %vm404_vm0, %v2430_v2  ;;  %v3076_v25 = vsel %vm2526_vm9, %v3075_v26, %v3074_v38  ;;  %v2518_v8 = vsel %vm2517_vm6, %v2516_v62, %v2515_v5  ;;  %v2531_v32 = vrot.slane %v7750_v33, 1  ;;  %v4246_v2 = vld [vmem:[#allocation3 + $0x18] sm:$0x1]  ;;  %v3737_v28 = vrot.slane %v3706_v43, 7 }
 0x4d9   : > { %v3078_v46 = vsel %vm2529_vm10, %v3077_v29, %v3076_v25  ;;  %v2521_v3 = vsel %vm2520_vm7, %v2519_v15, %v2518_v8  ;;  %v4277_v1 = vrot.slane %v4246_v2, 7  ;;  %v4279_v49 = vrot.slane %v4247_v50, 6  ;;  %v4250_v38 = vld [vmem:[#allocation3 + $0x58] sm:$0x1]  ;;  %v3705_v25 = vld [vmem:[#allocation3] sm:$0x1] }
 0x4da   : > { %v3080_v11 = vsel %vm2532_vm11, %v3079_v39, %v3078_v46  ;;  %v2524_v48 = vsel %vm2523_vm8, %v2522_v53, %v2521_v3  ;;  %v4281_v24 = vrot.slane %v4248_v54, 5  ;;  %v3739_v29 = vrot.slane %v3707_v56, 6  ;;  %v3710_v39 = vld [vmem:[#allocation3 + $0x50] sm:$0x1]  ;;  %v6936_v21 = vld [vmem:[#allocation3 + $0x68] sm:$0x1] }
 0x4db   : > { %3097 = vst.msk [vmem:[%s6900_s25 + $0x8] sm:$0xff] %vm404_vm0, %v3080_v11  ;;  %v2527_v63 = vsel %vm2526_vm9, %v2525_v37, %v2524_v48  ;;  %v3743_v46 = vrot.slane %v3709_v57, 4  ;;  %v6943_v36 = vld [vmem:[%s7671_s6] ss:$0 sm:$0xff]  ;;  %v6949_v11 = vld [vmem:[#allocation3 + $0x93] sm:$0x1]  ;;  %v4278_v9 = vsel %vm2514_vm5, %v4277_v1, %v4245_v17  ;;  %v3738_v40 = vsel %vm2514_vm5, %v3737_v28, %v3705_v25 }
 0x4dc   : > { %v2530_v4 = vsel %vm2529_vm10, %v2528_v51, %v2527_v63  ;;  %v6947_v62 = vadd.f32 %v6943_v36, %v6534_v13  ;;  %v6951_v31 = vld [vmem:[#allocation3 + $0xa3] sm:$0x1]  ;;  %v6953_v15 = vld [vmem:[#allocation3 + $0xb3] sm:$0x1]  ;;  %v3745_v37 = vrot.slane %v3710_v39, 3  ;;  %v4285_v51 = vrot.slane %v4250_v38, 3 }
 0x4dd   : > { %v2431_v14 = vpop.f32.mrf.mxu2  ;;  %v6885_v20 = vpop.f32.mrf.mxu3  ;;  %v2533_v0 = vsel %vm2532_vm11, %v2531_v32, %v2530_v4  ;;  %v6961_v47 = vld [vmem:[#allocation3 + $0x92] sm:$0x1]  ;;  %v3747_v3 = vrot.slane %v6938_v6, 2  ;;  %v2736_v48 = vrot.slane %v6949_v11, 7  ;;  %v2738_v63 = vrot.slane %v6951_v31, 6 }
 0x4de   : > { %v2432_v27 = vadd.f32 %v6611_v59, %v2431_v14  ;;  %2550 = vst.msk [vmem:[%s6900_s25] sm:$0xff] %vm404_vm0, %v2533_v0  ;;  %v3741_v14 = vrot.slane %v3708_v45, 5  ;;  %v2740_v33 = vrot.slane %v6953_v15, 5  ;;  %v2631_v0 = vld [vmem:[#allocation3 + $0xa2] sm:$0x1]  ;;  %v3740_v2 = vsel %vm2517_vm6, %v3739_v29, %v3738_v40 }
 0x4df   : > { %v6955_v22 = vld [vmem:[#allocation3 + $0xc3] sm:$0x1]  ;;  %v6979_v50 = vadd.f32 %v6943_v36, %v6652_v18  ;;  %v6982_v43 = vld [vmem:[#allocation3 + $0xc2] sm:$0x1]  ;;  %v2667_v54 = vrot.slane %v6961_v47, 7  ;;  %v6995_v18 = vadd.f32 %v6943_v36, %v6825_v7 }
 0x4e0   : > { %2474 = vst.msk [vmem:[#allocation3 + $0xc8] sm:$0xff] %vm404_vm0, %v2432_v27  ;;  %v4249_v27 = vld [vmem:[#allocation3 + $0x48] sm:$0x1]  ;;  %v2742_v32 = vrot.slane %v6955_v22, 4  ;;  %v3742_v45 = vsel %vm2520_vm7, %v3741_v14, %v3740_v2  ;;  %v2561_v57 = vld [vmem:[#allocation3 + $0x91] sm:$0x1] }
 0x4e1   : > { %v4283_v5 = vrot.slane %v4249_v27, 4  ;;  %v2562_v28 = vld [vmem:[#allocation3 + $0xa1] sm:$0x1]  ;;  %v3744_v29 = vsel %vm2523_vm8, %v3743_v46, %v3742_v45  ;;  %v7013_v17 = vld [vmem:[#allocation3 + $0xb1] sm:$0x1]  ;;  %v2673_v40 = vrot.slane %v6982_v43, 4 }
 0x4e2   : > { %v7015_v27 = vld [vmem:[#allocation3 + $0xc1] sm:$0x1]  ;;  %v3746_v25 = vsel %vm2526_vm9, %v3745_v37, %v3744_v29  ;;  %v2698_v39 = vld [vmem:[#allocation3 + $0x83] sm:$0x1] }
 0x4e5   : > { %v2434_v55 = vpop.f32.mrf.mxu2  ;;  %v6912_v19 = vpop.f32.mrf.mxu3 }
 0x4e6   : > { %v2435_v61 = vadd.f32 %v6611_v59, %v2434_v55  ;;  %v4287_v55 = vrot.slane %v6936_v21, 2  ;;  %v2629_v21 = vld [vmem:[#allocation3 + $0x82] sm:$0x1] }
 0x4e8   : > { %2475 = vst.msk [vmem:[#allocation3 + $0xd0] sm:$0xff] %vm404_vm0, %v2435_v61 }
 0x4ed   : > { %v6924_v41 = vpop.permute.xlu2 %2750  ;;  %v2436_v12 = vpop.f32.mrf.mxu2 }
 0x4ee   : > { %v2437_v52 = vadd.f32 %v6611_v59, %v2436_v12  ;;  %v6927_v16 = vpop.f32.mrf.mxu3  ;;  %v6973_v12 = vld [vmem:[#allocation3 + $0xb2] sm:$0x1] }
 0x4ef   : > { %v6957_v53 = vld [vmem:[#allocation3 + $0xd3] sm:$0x1]  ;;  %v2671_v6 = vrot.slane %v6973_v12, 5  ;;  %v7020_v46 = vld [vmem:[#allocation3 + $0xd1] sm:$0x1]  ;;  %v2604_v12 = vrot.slane %v7015_v27, 4 }
 0x4f0   : > { %2476 = vst.msk [vmem:[#allocation3 + $0xd8] sm:$0xff] %vm404_vm0, %v2437_v52  ;;  %v2744_v4 = vrot.slane %v6957_v53, 3  ;;  %v4280_v52 = vsel %vm2517_vm6, %v4279_v49, %v4278_v9  ;;  %v7028_v9 = vsel %vm2529_vm10, %v3747_v3, %v3746_v25  ;;  %v2602_v3 = vrot.slane %v7013_v17, 5  ;;  %v7067_v25 = vld [vmem:[#allocation3 + $0xa4] sm:$0x1] }
 0x4f1   : > { %v4282_v56 = vsel %vm2520_vm7, %v4281_v24, %v4280_v52  ;;  %v7003_v24 = vadd.f32 %v6943_v36, %v6872_v23  ;;  %v2669_v23 = vrot.slane %v2631_v0, 6  ;;  %v2600_v0 = vrot.slane %v2562_v28, 6  ;;  %v7038_v52 = vld [vmem:[#allocation3 + $0xa6] sm:$0x1] }
 0x4f2   : > { %v4284_v49 = vsel %vm2523_vm8, %v4283_v5, %v4282_v56  ;;  %v2668_v56 = vsel %vm2514_vm5, %v2667_v54, %v2629_v21  ;;  %v2606_v45 = vrot.slane %v7020_v46, 3  ;;  %v7046_v28 = vld [vmem:[#allocation3 + $0xc6] sm:$0x1]  ;;  %v7055_v54 = vld [vmem:[#allocation3 + $0xd6] sm:$0x1] }
 0x4f3   : > { %v4286_v38 = vsel %vm2526_vm9, %v4285_v51, %v4284_v49 }
 0x4f4   : > { %v7025_v11 = vsel %vm2529_vm10, %v4287_v55, %v4286_v38  ;;  %v2768_v38 = vld [vmem:[#allocation3 + $0x94] sm:$0x1] }
 0x4f5   : > { %v2439_v44 = vpop.f32.mrf.mxu2 }
 0x4f6   : > { %v6930_v30 = vpop.permute.xlu2 %2888  ;;  %v2440_v60 = vadd.f32 %v6611_v59, %v2439_v44  ;;  %v6934_v26 = vpop.f32.mrf.mxu3  ;;  %v6984_v44 = vld [vmem:[#allocation3 + $0xd2] sm:$0x1] }
 0x4f7   : > { %v2675_v37 = vrot.slane %v6984_v44, 3  ;;  %v2737_v44 = vsel %vm2514_vm5, %v2736_v48, %v2698_v39  ;;  %v2670_v48 = vsel %vm2517_vm6, %v2669_v23, %v2668_v56  ;;  %v2805_v56 = vrot.slane %v2768_v38, 7 }
 0x4f8   : > { %2477 = vst.msk [vmem:[#allocation3 + $0xe0] sm:$0xff] %vm404_vm0, %v2440_v60  ;;  %v6991_v60 = vadd.f32 %v6943_v36, %v6750_v58  ;;  %v7007_v58 = vadd.f32 %v6943_v36, %v6912_v19  ;;  %v2739_v29 = vsel %vm2517_vm6, %v2738_v63, %v2737_v44  ;;  %v2945_v63 = vrot.slane %v7038_v52, 6  ;;  %v7102_v52 = vld [vmem:[#allocation3 + $0xa5] sm:$0x1] }
 0x4f9   : > { %v2741_v27 = vsel %vm2520_vm7, %v2740_v33, %v2739_v29  ;;  %v2905_v33 = vld [vmem:[#allocation3 + $0x86] sm:$0x1]  ;;  %v2951_v44 = vrot.slane %v7055_v54, 3 }
 0x4fa   : > { %v2743_v39 = vsel %vm2523_vm8, %v2742_v32, %v2741_v27 }
 0x4fb   : > { %v2745_v22 = vsel %vm2526_vm9, %v2744_v4, %v2743_v39 }
 0x4fd   : > { %v2441_v13 = vpop.f32.mrf.mxu2 }
 0x4fe   : > { %v3160_v8 = vpop.permute.xlu2 %3159  ;;  %v2442_v61 = vadd.f32 %v6611_v59, %v2441_v13  ;;  %v7009_v14 = vpop.f32.mrf.mxu3  ;;  %v2906_v13 = vld [vmem:[#allocation3 + $0x96] sm:$0x1] }
 0x4ff   : > { %3165 = vst.msk [vmem:[%s6900_s25 + $0x8] sm:$0xff] %vm2618_vm12, %v3160_v8  ;;  %v6997_v1 = vld [vmem:[#allocation3 + $0xe3] sm:$0x1]  ;;  %v7011_v7 = vld [vmem:[#allocation3 + $0xe2] sm:$0x1]  ;;  %v2598_v8 = vrot.slane %v2561_v57, 7 }
 0x500   : > { %2478 = vst.msk [vmem:[#allocation3 + $0xe8] sm:$0xff] %vm404_vm0, %v2442_v61  ;;  %v7022_v19 = vld [vmem:[#allocation3 + $0xe1] sm:$0x1]  ;;  %v2746_v5 = vrot.slane %v6997_v1, 2  ;;  %v2677_v55 = vrot.slane %v7011_v7, 2  ;;  %v2943_v17 = vrot.slane %v2906_v13, 7 }
 0x501   : > { %v2560_v61 = vld [vmem:[#allocation3 + $0x81] sm:$0x1]  ;;  %v2608_v1 = vrot.slane %v7022_v19, 2  ;;  %v7044_v57 = vld [vmem:[#allocation3 + $0xb6] sm:$0x1]  ;;  %v2949_v13 = vrot.slane %v7046_v28, 4 }
 0x502   : > { %v7057_v7 = vld [vmem:[#allocation3 + $0xe6] sm:$0x1]  ;;  %v2599_v31 = vsel %vm2514_vm5, %v2598_v8, %v2560_v61  ;;  %v2947_v23 = vrot.slane %v7044_v57, 5  ;;  %v7078_v8 = vld [vmem:[#allocation3 + $0xc4] sm:$0x1]  ;;  %v2807_v28 = vrot.slane %v7067_v25, 6 }
 0x503   : > { %v2601_v15 = vsel %vm2517_vm6, %v2600_v0, %v2599_v31  ;;  %v7091_v61 = vld [vmem:[#allocation3 + $0xe4] sm:$0x1]  ;;  %v7095_v0 = vadd.f32 %v6943_v36, %v6934_v26  ;;  %v2953_v26 = vrot.slane %v7057_v7, 2  ;;  %v2811_v29 = vrot.slane %v7078_v8, 4  ;;  %v7120_v38 = vld [vmem:[#allocation3 + $0xe5] sm:$0x1] }
 0x504   : > { %v2767_v57 = vld [vmem:[#allocation3 + $0x84] sm:$0x1]  ;;  %v2815_v31 = vrot.slane %v7091_v61, 2 }
 0x505   : > { %v2444_v43 = vpop.f32.mrf.mxu2 }
 0x506   : > { %v7033_v47 = vpop.permute.xlu2 %3363  ;;  %v2682_v51 = vpop.permute.xlu1 %2681  ;;  %v2445_v49 = vadd.f32 %v6611_v59, %v2444_v43  ;;  %v2672_v59 = vsel %vm2520_vm7, %v2671_v6, %v2670_v48  ;;  %v7076_v6 = vld [vmem:[#allocation3 + $0xb4] sm:$0x1]  ;;  %v2944_v43 = vsel %vm2514_vm5, %v2943_v17, %v2905_v33  ;;  %v7117_v17 = vld [vmem:[#allocation3 + $0xd5] sm:$0x1] }
 0x507   : > { %v2613_v2 = vpop.permute.xlu0 %2612  ;;  %v2674_v21 = vsel %vm2523_vm8, %v2673_v40, %v2672_v59  ;;  %v2603_v40 = vsel %vm2520_vm7, %v2602_v3, %v2601_v15  ;;  %v7104_v3 = vld [vmem:[#allocation3 + $0xb5] sm:$0x1]  ;;  %v5160_v15 = vld [vmem:[%s7671_s6] ss:$0 sm:$0xff]  ;;  %v2946_v8 = vsel %vm2517_vm6, %v2945_v63, %v2944_v43  ;;  %v2836_v63 = vld [vmem:[#allocation3 + $0x85] sm:$0x1] }
 0x508   : > { %2619 = vst.msk [vmem:[%s6900_s25] sm:$0xff] %vm2618_vm12, %v2613_v2  ;;  %v2676_v32 = vsel %vm2526_vm9, %v2675_v37, %v2674_v21  ;;  %v2605_v4 = vsel %vm2523_vm8, %v2604_v12, %v2603_v40  ;;  %v2837_v37 = vld [vmem:[#allocation3 + $0x95] sm:$0x1]  ;;  %v3668_v2 = vpop.f32.mrf.mxu3  ;;  %v2876_v21 = vrot.slane %v7102_v52, 6  ;;  %v2878_v25 = vrot.slane %v7104_v3, 5 }
 0x509   : > { %2688 = vst.msk [vmem:[%s6900_s25] sm:$0xff] %vm2687_vm13, %v2682_v51  ;;  %v7089_v51 = vld [vmem:[#allocation3 + $0xd4] sm:$0x1]  ;;  %v7099_v53 = vsel %vm2529_vm10, %v2677_v55, %v2676_v32  ;;  %v2874_v39 = vrot.slane %v2837_v37, 7  ;;  %v7134_v32 = vld [vmem:[#allocation3 + $0x9a] sm:$0x1]  ;;  %v2948_v46 = vsel %vm2520_vm7, %v2947_v23, %v2946_v8 }
 0x50a   : > { %2479 = vst.msk [vmem:[#allocation3 + $0xf0] sm:$0xff] %vm404_vm0, %v2445_v49  ;;  %v2809_v49 = vrot.slane %v7076_v6, 5  ;;  %v2813_v48 = vrot.slane %v7089_v51, 3  ;;  %v2607_v6 = vsel %vm2526_vm9, %v2606_v45, %v2605_v4  ;;  %v7136_v40 = vld [vmem:[#allocation3 + $0xaa] sm:$0x1]  ;;  %v2806_v45 = vsel %vm2514_vm5, %v2805_v56, %v2767_v57 }
 0x50b   : > { %2757 = vst.msk [vmem:[%s6900_s25] sm:$0xff] %vm2756_vm14, %v6924_v41  ;;  %v2747_v41 = vsel %vm2529_vm10, %v2746_v5, %v2745_v22  ;;  %v7109_v5 = vld [vmem:[#allocation3 + $0xc5] sm:$0x1]  ;;  %v2609_v52 = vsel %vm2529_vm10, %v2608_v1, %v2607_v6  ;;  %v2882_v4 = vrot.slane %v7117_v17, 3  ;;  %v7147_v43 = vld [vmem:[#allocation3 + $0xba] sm:$0x1]  ;;  %v2808_v1 = vsel %vm2517_vm6, %v2807_v28, %v2806_v45 }
 0x50c   : > { %v2880_v22 = vrot.slane %v7109_v5, 4  ;;  %v2810_v57 = vsel %vm2520_vm7, %v2809_v49, %v2808_v1  ;;  %v2875_v8 = vsel %vm2514_vm5, %v2874_v39, %v2836_v63  ;;  %v3215_v28 = vrot.slane %v7136_v40, 6  ;;  %v3175_v39 = vld [vmem:[#allocation3 + $0x8a] sm:$0x1]  ;;  %v3180_v63 = vld [vmem:[#allocation3 + $0xda] sm:$0x1] }
 0x50d   : > { %v2446_v59 = vpop.f32.mrf.mxu2  ;;  %v3181_v1 = vld [vmem:[#allocation3 + $0xea] sm:$0x1] }
 0x50e   : > { %v7111_v55 = vpop.permute.xlu2 %3567  ;;  %v2958_v12 = vpop.permute.xlu1 %2957  ;;  %v2447_v33 = vadd.f32 %v5160_v15, %v2446_v59  ;;  %v2950_v15 = vsel %vm2523_vm8, %v2949_v13, %v2948_v46  ;;  %v3213_v13 = vrot.slane %v7134_v32, 7  ;;  %v7169_v46 = vld [vmem:[#allocation3 + $0x80] sm:$0x1]  ;;  %v3217_v32 = vrot.slane %v7147_v43, 5  ;;  %v2974_v43 = vld [vmem:[#allocation3 + $0x87] sm:$0x1] }
 0x50f   : > { %v2820_v27 = vpop.permute.xlu0 %2819  ;;  %3689 = vst.msk [vmem:[#allocation3 + $0x80] sm:$0xff] %vm404_vm0, %v6947_v62 }
 0x510   : > { %2826 = vst.msk [vmem:[%s6900_s25] sm:$0xff] %vm2825_vm15, %v2820_v27  ;;  %v7150_v27 = vadd.f32 %v6943_v36, %v3668_v2  ;;  %v2884_v2 = vrot.slane %v7120_v38, 2 }
 0x511   : > { %2895 = vst.msk [vmem:[%s6900_s25] sm:$0xff] %vm2894_vm1, %v6930_v30  ;;  %v2705_v37 = vld [vmem:[#allocation3 + $0xf3] sm:$0x1]  ;;  %v2636_v59 = vld [vmem:[#allocation3 + $0xf2] sm:$0x1] }
 0x512   : > { %2480 = vst.msk [vmem:[#allocation3 + $0xf8] sm:$0xff] %vm404_vm0, %v2447_v33  ;;  %v2748_v30 = vrot.slane %v2705_v37, 1  ;;  %v2567_v19 = vld [vmem:[#allocation3 + $0xf1] sm:$0x1]  ;;  %v2679_v23 = vrot.slane %v2636_v59, 1 }
 0x513   : > { %v2610_v6 = vrot.slane %v2567_v19, 1  ;;  %2964 = vst.msk [vmem:[%s6900_s25] sm:$0xff] %vm2963_vm2, %v2958_v12  ;;  %v7157_v56 = vld [vmem:[#allocation3 + $0xf6] sm:$0x1]  ;;  %v7162_v33 = vld [vmem:[#allocation3 + $0xf4] sm:$0x1]  ;;  %v2877_v19 = vsel %vm2517_vm6, %v2876_v21, %v2875_v8 }
 0x514   : > { %v2749_v17 = vsel %vm2532_vm11, %v2748_v30, %v2747_v41  ;;  %v7165_v37 = vld [vmem:[#allocation3 + $0xca] sm:$0x1]  ;;  %v2680_v12 = vsel %vm2532_vm11, %v2679_v23, %v7099_v53  ;;  %v2955_v41 = vrot.slane %v7157_v56, 1  ;;  %v7176_v45 = vld [vmem:[#allocation3 + $0xf5] sm:$0x1]  ;;  %v2952_v53 = vsel %vm2526_vm9, %v2951_v44, %v2950_v15 }
 0x515   : > { %2752 = vrot.lane.b32.xlu2 %v2749_v17, %s5169_s18  ;;  %v2611_v49 = vsel %vm2532_vm11, %v2610_v6, %v2609_v52  ;;  %v7179_v30 = vld [vmem:[#allocation3 + $0x90] sm:$0x1]  ;;  %2683 = vrot.lane.b32.xlu1 %v2680_v12, %s5170_s19  ;;  %v2812_v52 = vsel %vm2523_vm8, %v2811_v29, %v2810_v57  ;;  %v2975_v23 = vld [vmem:[#allocation3 + $0x97] sm:$0x1]  ;;  %v7190_v6 = vld [vmem:[#allocation3 + $0xa0] sm:$0x1]  ;;  %v2954_v17 = vsel %vm2529_vm10, %v2953_v26, %v2952_v53 }
 0x516   : > { %2614 = vrot.lane.b32.xlu0 %v2611_v49, %s5171_s20  ;;  %v3228_v40 = vpop.permute.xlu1 %3227  ;;  %v7183_v59 = vpop.permute.xlu2 %3965  ;;  %v2814_v54 = vsel %vm2526_vm9, %v2813_v48, %v2812_v52  ;;  %v2817_v44 = vrot.slane %v7162_v33, 1  ;;  %v2879_v29 = vsel %vm2520_vm7, %v2878_v25, %v2877_v19  ;;  %v2976_v21 = vld [vmem:[#allocation3 + $0xa7] sm:$0x1]  ;;  %v7204_v15 = vld [vmem:[#allocation3 + $0xb7] sm:$0x1]  ;;  %v3214_v26 = vsel %vm2514_vm5, %v3213_v13, %v3175_v39  ;;  %3691 = vst.msk [vmem:[#allocation3 + $0x90] sm:$0xff] %vm404_vm0, %v6979_v50 }
 0x517   : > { %3233 = vst.msk [vmem:[%s6900_s25 + $0x8] sm:$0xff] %vm2687_vm13, %v3228_v40  ;;  %v7206_v57 = vld [vmem:[#allocation3 + $0xb0] sm:$0x1]  ;;  %v2816_v7 = vsel %vm2529_vm10, %v2815_v31, %v2814_v54  ;;  %v2881_v51 = vsel %vm2523_vm8, %v2880_v22, %v2879_v29  ;;  %v3219_v3 = vrot.slane %v7165_v37, 4  ;;  %v7218_v48 = vld [vmem:[#allocation3 + $0xc7] sm:$0x1]  ;;  %v3216_v5 = vsel %vm2517_vm6, %v3215_v28, %v3214_v26 }
 0x518   : > { %v3027_v56 = vpop.permute.xlu0 %3026  ;;  %v7220_v25 = vld [vmem:[#allocation3 + $0xd7] sm:$0x1]  ;;  %v7222_v33 = vld [vmem:[#allocation3 + $0xc0] sm:$0x1]  ;;  %v2883_v8 = vsel %vm2526_vm9, %v2882_v4, %v2881_v51  ;;  %v2886_v61 = vrot.slane %v7176_v45, 1  ;;  %v3221_v31 = vrot.slane %v3180_v63, 3  ;;  %v3218_v37 = vsel %vm2520_vm7, %v3217_v32, %v3216_v5 }
 0x519   : > { %3033 = vst.msk [vmem:[%s6900_s25] sm:$0xff] %vm3032_vm3, %v3027_v56  ;;  %v7226_v12 = vld [vmem:[#allocation3 + $0xfa] sm:$0x1]  ;;  %v7229_v22 = vld [vmem:[#allocation3 + $0xe7] sm:$0x1]  ;;  %v3223_v49 = vrot.slane %v3181_v1, 2  ;;  %v2956_v32 = vsel %vm2532_vm11, %v2955_v41, %v2954_v17  ;;  %v2885_v52 = vsel %vm2529_vm10, %v2884_v2, %v2883_v8  ;;  %v3220_v62 = vsel %vm2523_vm8, %v3219_v3, %v3218_v37 }
 0x51a   : > { %v7231_v13 = vld [vmem:[#allocation3 + $0xd0] sm:$0x1]  ;;  %v3225_v39 = vrot.slane %v7226_v12, 1  ;;  %v3012_v40 = vrot.slane %v2975_v23, 7  ;;  %v7237_v4 = vld [vmem:[#allocation3 + $0xf7] sm:$0x1]  ;;  %v2818_v50 = vsel %vm2532_vm11, %v2817_v44, %v2816_v7  ;;  %v2887_v41 = vsel %vm2532_vm11, %v2886_v61, %v2885_v52 }
 0x51b   : > { %v3014_v45 = vrot.slane %v2976_v21, 6  ;;  %v3016_v53 = vrot.slane %v7204_v15, 5  ;;  %v3018_v28 = vrot.slane %v7218_v48, 4  ;;  %v3020_v63 = vrot.slane %v7220_v25, 3  ;;  %3693 = vst.msk [vmem:[#allocation3 + $0xa0] sm:$0xff] %vm404_vm0, %v6991_v60 }
 0x51c   : > { %v3022_v19 = vrot.slane %v7229_v22, 2  ;;  %v3107_v1 = vld [vmem:[#allocation3 + $0x89] sm:$0x1]  ;;  %v3108_v23 = vld [vmem:[#allocation3 + $0x99] sm:$0x1]  ;;  %v3222_v38 = vsel %vm2526_vm9, %v3221_v31, %v3220_v62  ;;  %3695 = vst.msk [vmem:[#allocation3 + $0xb0] sm:$0xff] %vm404_vm0, %v6995_v18  ;;  %v3013_v15 = vsel %vm2514_vm5, %v3012_v40, %v2974_v43 }
 0x51d   : > { %v3109_v56 = vld [vmem:[#allocation3 + $0xa9] sm:$0x1]  ;;  %2959 = vrot.lane.b32.xlu2 %v2956_v32, %s5173_s22  ;;  %v3110_v2 = vld [vmem:[#allocation3 + $0xb9] sm:$0x1]  ;;  %v3145_v54 = vrot.slane %v3108_v23, 7  ;;  %2821 = vrot.lane.b32.xlu1 %v2818_v50, %s5174_s23  ;;  %v3224_v44 = vsel %vm2529_vm10, %v3223_v49, %v3222_v38  ;;  %3697 = vst.msk [vmem:[#allocation3 + $0xc0] sm:$0xff] %vm404_vm0, %v7003_v24  ;;  %v3015_v48 = vsel %vm2517_vm6, %v3014_v45, %v3013_v15 }
 0x51e   : > { %v3111_v17 = vld [vmem:[#allocation3 + $0xc9] sm:$0x1]  ;;  %v7258_v29 = vld [vmem:[#allocation3 + $0xe0] sm:$0x1]  ;;  %2890 = vrot.lane.b32.xlu0 %v2887_v41, %s5172_s21  ;;  %v3432_v60 = vpop.permute.xlu1 %3431  ;;  %v7262_v21 = vpop.permute.xlu2 %4169  ;;  %v3112_v18 = vld [vmem:[#allocation3 + $0xd9] sm:$0x1]  ;;  %v3226_v32 = vsel %vm2532_vm11, %v3225_v39, %v3224_v44 }
 0x51f   : > { %v3113_v7 = vld [vmem:[#allocation3 + $0xe9] sm:$0x1]  ;;  %v3147_v51 = vrot.slane %v3109_v56, 6  ;;  %v7268_v26 = vld [vmem:[#allocation3 + $0xf0] sm:$0x1]  ;;  %3699 = vst.msk [vmem:[#allocation3 + $0xd0] sm:$0xff] %vm404_vm0, %v7007_v58  ;;  %v3146_v8 = vsel %vm2514_vm5, %v3145_v54, %v3107_v1  ;;  %v3017_v58 = vsel %vm2520_vm7, %v3016_v53, %v3015_v48 }
 0x520   : > { %v3296_v3 = vpop.permute.xlu0 %3295  ;;  %v3114_v25 = vld [vmem:[#allocation3 + $0xf9] sm:$0x1]  ;;  %v3149_v43 = vrot.slane %v3110_v2, 5  ;;  %v3151_v61 = vrot.slane %v3111_v17, 4  ;;  %v3024_v24 = vrot.slane %v7237_v4, 1  ;;  %v3153_v5 = vrot.slane %v3112_v18, 3 }
 0x521   : > { %3301 = vst.msk [vmem:[%s6900_s25 + $0x8] sm:$0xff] %vm2756_vm14, %v3296_v3  ;;  %v3148_v12 = vsel %vm2517_vm6, %v3147_v51, %v3146_v8  ;;  %v3155_v31 = vrot.slane %v3113_v7, 2  ;;  %v4252_v22 = vld [vmem:[#allocation3 + $0x78] sm:$0x1]  ;;  %v3157_v49 = vrot.slane %v3114_v25, 1  ;;  %v3019_v4 = vsel %vm2523_vm8, %v3018_v28, %v3017_v58 }
 0x522   : > { %3369 = vst.msk [vmem:[%s6900_s25 + $0x8] sm:$0xff] %vm2825_vm15, %v7033_v47  ;;  %v3150_v37 = vsel %vm2520_vm7, %v3149_v43, %v3148_v12  ;;  %v4289_v40 = vrot.slane %v4252_v22, 1  ;;  %v3712_v45 = vld [vmem:[#allocation3 + $0x70] sm:$0x1]  ;;  %v3380_v1 = vld [vmem:[#allocation3 + $0x9d] sm:$0x1]  ;;  %v3021_v23 = vsel %vm2526_vm9, %v3020_v63, %v3019_v4 }
 0x523   : > { %3437 = vst.msk [vmem:[%s6900_s25 + $0x8] sm:$0xff] %vm2894_vm1, %v3432_v60  ;;  %v3152_v52 = vsel %vm2523_vm8, %v3151_v61, %v3150_v37  ;;  %v3749_v62 = vrot.slane %v3712_v45, 1  ;;  %v3379_v56 = vld [vmem:[#allocation3 + $0x8d] sm:$0x1]  ;;  %v3382_v39 = vld [vmem:[#allocation3 + $0xbd] sm:$0x1]  ;;  %v3023_v28 = vsel %vm2529_vm10, %v3022_v19, %v3021_v23 }
 0x524   : > { %3701 = vst.msk [vmem:[#allocation3 + $0xe0] sm:$0xff] %vm404_vm0, %v7095_v0  ;;  %v3154_v47 = vsel %vm2526_vm9, %v3153_v5, %v3152_v52  ;;  %v4290_v53 = vsel %vm2532_vm11, %v4289_v40, %v7025_v11  ;;  %v3381_v50 = vld [vmem:[#allocation3 + $0xad] sm:$0x1]  ;;  %v3417_v41 = vrot.slane %v3380_v1, 7  ;;  %v3384_v2 = vld [vmem:[#allocation3 + $0xdd] sm:$0x1]  ;;  %v3025_v11 = vsel %vm2532_vm11, %v3024_v24, %v3023_v28 }
 0x525   : > { %3703 = vst.msk [vmem:[#allocation3 + $0xf0] sm:$0xff] %vm404_vm0, %v7150_v27  ;;  %v3156_v63 = vsel %vm2529_vm10, %v3155_v31, %v3154_v47  ;;  %v3750_v0 = vsel %vm2532_vm11, %v3749_v62, %v7028_v9  ;;  %v3383_v38 = vld [vmem:[#allocation3 + $0xcd] sm:$0x1]  ;;  %v3419_v17 = vrot.slane %v3381_v50, 6  ;;  %3229 = vrot.lane.b32.xlu2 %v3226_v32, %s5170_s19  ;;  %v3386_v27 = vld [vmem:[#allocation3 + $0xfd] sm:$0x1]  ;;  %3028 = vrot.lane.b32.xlu1 %v3025_v11, %s5175_s28 }
 0x526   : > { %v3158_v54 = vsel %vm2532_vm11, %v3157_v49, %v3156_v63  ;;  %4307 = vst.msk [vmem:[%s6900_s25 + $0x18] sm:$0xff] %vm404_vm0, %v4290_v53  ;;  %v3385_v19 = vld [vmem:[#allocation3 + $0xed] sm:$0x1]  ;;  %v3421_v60 = vrot.slane %v3382_v39, 5  ;;  %v4370_v9 = vpop.permute.xlu2 %4369  ;;  %v3418_v15 = vsel %vm2514_vm5, %v3417_v41, %v3379_v56  ;;  %v3423_v18 = vrot.slane %v3383_v38, 4 }
 0x527   : > { %3161 = vrot.lane.b32.xlu0 %v3158_v54, %s5171_s20  ;;  %v3830_v44 = vpop.permute.xlu1 %3829  ;;  %3767 = vst.msk [vmem:[%s6900_s25 + $0x10] sm:$0xff] %vm404_vm0, %v3750_v0  ;;  %v3425_v7 = vrot.slane %v3384_v2, 3  ;;  %v3427_v51 = vrot.slane %v3385_v19, 2  ;;  %v3420_v48 = vsel %vm2517_vm6, %v3419_v17, %v3418_v15  ;;  %v3429_v25 = vrot.slane %v3386_v27, 1  ;;  %v3243_v8 = vld [vmem:[#allocation3 + $0x8b] sm:$0x1] }
 0x528   : > { %v3500_v3 = vpop.permute.xlu0 %3499  ;;  %4375 = vst.msk [vmem:[%s6900_s25 + $0x18] sm:$0xff] %vm2618_vm12, %v4370_v9  ;;  %v3244_v43 = vld [vmem:[#allocation3 + $0x9b] sm:$0x1]  ;;  %v3245_v61 = vld [vmem:[#allocation3 + $0xab] sm:$0x1]  ;;  %v3422_v24 = vsel %vm2520_vm7, %v3421_v60, %v3420_v48 }
 0x529   : > { %3505 = vst.msk [vmem:[%s6900_s25 + $0x8] sm:$0xff] %vm2963_vm2, %v3500_v3  ;;  %v3246_v12 = vld [vmem:[#allocation3 + $0xbb] sm:$0x1]  ;;  %v3247_v5 = vld [vmem:[#allocation3 + $0xcb] sm:$0x1]  ;;  %v3281_v31 = vrot.slane %v3244_v43, 7  ;;  %v3424_v22 = vsel %vm2523_vm8, %v3423_v18, %v3422_v24 }
 0x52a   : > { %3573 = vst.msk [vmem:[%s6900_s25 + $0x8] sm:$0xff] %vm3032_vm3, %v7111_v55  ;;  %v3248_v58 = vld [vmem:[#allocation3 + $0xdb] sm:$0x1]  ;;  %v3249_v37 = vld [vmem:[#allocation3 + $0xeb] sm:$0x1]  ;;  %v3283_v49 = vrot.slane %v3245_v61, 6  ;;  %v3426_v40 = vsel %vm2526_vm9, %v3425_v7, %v3424_v22 }
 0x52b   : > { %3835 = vst.msk [vmem:[%s6900_s25 + $0x10] sm:$0xff] %vm2618_vm12, %v3830_v44  ;;  %v3250_v45 = vld [vmem:[#allocation3 + $0xfb] sm:$0x1]  ;;  %v3282_v32 = vsel %vm2514_vm5, %v3281_v31, %v3243_v8  ;;  %v3285_v4 = vrot.slane %v3246_v12, 5  ;;  %v3287_v52 = vrot.slane %v3247_v5, 4  ;;  %v3428_v62 = vsel %vm2529_vm10, %v3427_v51, %v3426_v40 }
 0x52c   : > { %v3284_v1 = vsel %vm2517_vm6, %v3283_v49, %v3282_v32  ;;  %v3289_v23 = vrot.slane %v3248_v58, 3  ;;  %v3291_v55 = vrot.slane %v3249_v37, 2  ;;  %v3311_v47 = vld [vmem:[#allocation3 + $0x8c] sm:$0x1]  ;;  %v3312_v53 = vld [vmem:[#allocation3 + $0x9c] sm:$0x1]  ;;  %v3430_v56 = vsel %vm2532_vm11, %v3429_v25, %v3428_v62 }
 0x52d   : > { %v3286_v50 = vsel %vm2520_vm7, %v3285_v4, %v3284_v1  ;;  %v3293_v39 = vrot.slane %v3250_v45, 1  ;;  %v3313_v41 = vld [vmem:[#allocation3 + $0xac] sm:$0x1]  ;;  %v3314_v28 = vld [vmem:[#allocation3 + $0xbc] sm:$0x1]  ;;  %v3349_v63 = vrot.slane %v3312_v53, 7  ;;  %3433 = vrot.lane.b32.xlu2 %v3430_v56, %s5172_s21  ;;  %v3636_v12 = vadd.f32 %v6943_v36, %v6599_v34 }
 0x52e   : > { %v3288_v0 = vsel %vm2523_vm8, %v3287_v52, %v3286_v50  ;;  %v3315_v38 = vld [vmem:[#allocation3 + $0xcc] sm:$0x1]  ;;  %v3316_v2 = vld [vmem:[#allocation3 + $0xdc] sm:$0x1]  ;;  %v3351_v27 = vrot.slane %v3313_v41, 6  ;;  %v3353_v60 = vrot.slane %v3314_v28, 5  ;;  %v3641_v49 = vadd.f32 %v6943_v36, %v6710_v35 }
 0x52f   : > { %v3317_v17 = vld [vmem:[#allocation3 + $0xec] sm:$0x1]  ;;  %v3290_v11 = vsel %vm2526_vm9, %v3289_v23, %v3288_v0  ;;  %v3318_v54 = vld [vmem:[#allocation3 + $0xfc] sm:$0x1]  ;;  %v3350_v19 = vsel %vm2514_vm5, %v3349_v63, %v3311_v47  ;;  %v4034_v9 = vpop.permute.xlu1 %4033  ;;  %v3355_v15 = vrot.slane %v3315_v38, 4  ;;  %v3357_v18 = vrot.slane %v3316_v2, 3 }
 0x530   : > { %v3292_v44 = vsel %vm2529_vm10, %v3291_v55, %v3290_v11  ;;  %v3359_v7 = vrot.slane %v3317_v17, 2  ;;  %v3898_v51 = vpop.permute.xlu0 %3897  ;;  %v3448_v3 = vld [vmem:[#allocation3 + $0x9e] sm:$0x1]  ;;  %v3352_v25 = vsel %vm2517_vm6, %v3351_v27, %v3350_v19  ;;  %v3361_v8 = vrot.slane %v3318_v54, 1  ;;  %v3447_v43 = vld [vmem:[#allocation3 + $0x8e] sm:$0x1] }
 0x531   : > { %v3294_v48 = vsel %vm2532_vm11, %v3293_v39, %v3292_v44  ;;  %3903 = vst.msk [vmem:[%s6900_s25 + $0x10] sm:$0xff] %vm2687_vm13, %v3898_v51  ;;  %v3449_v61 = vld [vmem:[#allocation3 + $0xae] sm:$0x1]  ;;  %v3450_v24 = vld [vmem:[#allocation3 + $0xbe] sm:$0x1]  ;;  %v3354_v5 = vsel %vm2520_vm7, %v3353_v60, %v3352_v25  ;;  %v3485_v58 = vrot.slane %v3448_v3, 7  ;;  %v3646_v40 = vadd.f32 %v6943_v36, %v6788_v42 }
 0x532   : > { %3297 = vrot.lane.b32.xlu1 %v3294_v48, %s5169_s18  ;;  %3971 = vst.msk [vmem:[%s6900_s25 + $0x10] sm:$0xff] %vm2756_vm14, %v7183_v59  ;;  %v3451_v31 = vld [vmem:[#allocation3 + $0xce] sm:$0x1]  ;;  %v3452_v22 = vld [vmem:[#allocation3 + $0xde] sm:$0x1]  ;;  %v3356_v34 = vsel %vm2523_vm8, %v3355_v15, %v3354_v5  ;;  %v3487_v4 = vrot.slane %v3449_v61, 6  ;;  %v3651_v54 = vadd.f32 %v6943_v36, %v6849_v10 }
 0x533   : > { %v7344_v37 = vld [vmem:[#allocation3 + $0x88] sm:$0x1]  ;;  %4039 = vst.msk [vmem:[%s6900_s25 + $0x10] sm:$0xff] %vm2825_vm15, %v4034_v9  ;;  %v3453_v45 = vld [vmem:[#allocation3 + $0xee] sm:$0x1]  ;;  %v3358_v59 = vsel %vm2526_vm9, %v3357_v18, %v3356_v34  ;;  %v3486_v62 = vsel %vm2514_vm5, %v3485_v58, %v3447_v43  ;;  %v3489_v1 = vrot.slane %v3450_v24, 5  ;;  %v3670_v43 = vpop.f32.mrf.mxu3  ;;  %v3656_v34 = vadd.f32 %v6943_v36, %v6885_v20 }
 0x534   : > { %v3454_v32 = vld [vmem:[#allocation3 + $0xfe] sm:$0x1]  ;;  %v7353_v52 = vld [vmem:[#allocation3 + $0x98] sm:$0x1]  ;;  %v3491_v23 = vrot.slane %v3451_v31, 4  ;;  %v3360_v42 = vsel %vm2529_vm10, %v3359_v7, %v3358_v59  ;;  %v3488_v53 = vsel %vm2517_vm6, %v3487_v4, %v3486_v62  ;;  %v3493_v56 = vrot.slane %v3452_v22, 3 }
 0x535   : > { %v3515_v55 = vld [vmem:[#allocation3 + $0x8f] sm:$0x1]  ;;  %v3516_v35 = vld [vmem:[#allocation3 + $0x9f] sm:$0x1]  ;;  %v7357_v47 = vld [vmem:[#allocation3 + $0xa8] sm:$0x1]  ;;  %v3362_v63 = vsel %vm2532_vm11, %v3361_v8, %v3360_v42  ;;  %v3490_v0 = vsel %vm2520_vm7, %v3489_v1, %v3488_v53  ;;  %v3661_v1 = vadd.f32 %v6943_v36, %v6927_v16 }
 0x536   : > { %v3495_v50 = vrot.slane %v3453_v45, 2  ;;  %v3517_v39 = vld [vmem:[#allocation3 + $0xaf] sm:$0x1]  ;;  %v3518_v41 = vld [vmem:[#allocation3 + $0xbf] sm:$0x1]  ;;  %v3497_v38 = vrot.slane %v3454_v32, 1  ;;  %3365 = vrot.lane.b32.xlu0 %v3362_v63, %s5174_s23  ;;  %v3492_v27 = vsel %vm2523_vm8, %v3491_v23, %v3490_v0 }
 0x537   : > { %v7361_v28 = vld [vmem:[#allocation3 + $0xb8] sm:$0x1]  ;;  %v3519_v2 = vld [vmem:[#allocation3 + $0xcf] sm:$0x1]  ;;  %v3520_v17 = vld [vmem:[#allocation3 + $0xdf] sm:$0x1]  ;;  %v7371_v18 = vpop.permute.xlu1 %4237  ;;  %v3494_v51 = vsel %vm2526_vm9, %v3493_v56, %v3492_v27 }
 0x538   : > { %v3553_v11 = vrot.slane %v3516_v35, 7  ;;  %v7367_v19 = vld [vmem:[#allocation3 + $0xc8] sm:$0x1]  ;;  %v3521_v60 = vld [vmem:[#allocation3 + $0xef] sm:$0x1]  ;;  %v3555_v44 = vrot.slane %v3517_v39, 6  ;;  %v4102_v25 = vpop.permute.xlu0 %4101  ;;  %v3496_v61 = vsel %vm2529_vm10, %v3495_v50, %v3494_v51 }
 0x539   : > { %v3522_v9 = vld [vmem:[#allocation3 + $0xff] sm:$0x1]  ;;  %v3557_v15 = vrot.slane %v3518_v41, 5  ;;  %v7373_v7 = vld [vmem:[#allocation3 + $0xd8] sm:$0x1]  ;;  %v3559_v48 = vrot.slane %v3519_v2, 4 }
 0x53a   : > { %v3554_v3 = vsel %vm2514_vm5, %v3553_v11, %v3515_v55  ;;  %v3561_v10 = vrot.slane %v3520_v17, 3  ;;  %3690 = vst.msk [vmem:[#allocation3 + $0x88] sm:$0xff] %vm404_vm0, %v3636_v12  ;;  %v7378_v8 = vld [vmem:[#allocation3 + $0xe8] sm:$0x1]  ;;  %v3563_v5 = vrot.slane %v3521_v60, 2  ;;  %v3565_v31 = vrot.slane %v3522_v9, 1 }
 0x53b   : > { %v3556_v24 = vsel %vm2517_vm6, %v3555_v44, %v3554_v3  ;;  %3692 = vst.msk [vmem:[#allocation3 + $0x98] sm:$0xff] %vm404_vm0, %v3641_v49  ;;  %v3777_v22 = vld [vmem:[#allocation3 + $0x81] sm:$0x1]  ;;  %v3778_v58 = vld [vmem:[#allocation3 + $0x91] sm:$0x1]  ;;  %v3498_v12 = vsel %vm2532_vm11, %v3497_v38, %v3496_v61  ;;  %v3666_v49 = vadd.f32 %v6943_v36, %v7009_v14 }
 0x53c   : > { %v7385_v45 = vld [vmem:[#allocation3 + $0xf8] sm:$0x1]  ;;  %v3558_v32 = vsel %vm2520_vm7, %v3557_v15, %v3556_v24  ;;  %3694 = vst.msk [vmem:[#allocation3 + $0xa8] sm:$0xff] %vm404_vm0, %v3646_v40  ;;  %v3779_v4 = vld [vmem:[#allocation3 + $0xa1] sm:$0x1]  ;;  %v3815_v62 = vrot.slane %v3778_v58, 7  ;;  %3501 = vrot.lane.b32.xlu1 %v3498_v12, %s5173_s22  ;;  %v3671_v40 = vadd.f32 %v6943_v36, %v3670_v43 }
 0x53d   : > { %v3780_v59 = vld [vmem:[#allocation3 + $0xb1] sm:$0x1]  ;;  %v3560_v20 = vsel %vm2523_vm8, %v3559_v48, %v3558_v32  ;;  %3696 = vst.msk [vmem:[#allocation3 + $0xb8] sm:$0xff] %vm404_vm0, %v3651_v54  ;;  %v3781_v23 = vld [vmem:[#allocation3 + $0xc1] sm:$0x1]  ;;  %v3817_v35 = vrot.slane %v3779_v4, 6 }
 0x53e   : > { %v3782_v55 = vld [vmem:[#allocation3 + $0xd1] sm:$0x1]  ;;  %v3562_v42 = vsel %vm2526_vm9, %v3561_v10, %v3560_v20  ;;  %3698 = vst.msk [vmem:[#allocation3 + $0xc8] sm:$0xff] %vm404_vm0, %v3656_v34  ;;  %v3783_v53 = vld [vmem:[#allocation3 + $0xe1] sm:$0x1]  ;;  %v3816_v56 = vsel %vm2514_vm5, %v3815_v62, %v3777_v22  ;;  %v3819_v14 = vrot.slane %v3780_v59, 5 }
 0x53f   : > { %v3784_v16 = vld [vmem:[#allocation3 + $0xf1] sm:$0x1]  ;;  %v3564_v50 = vsel %vm2529_vm10, %v3563_v5, %v3562_v42  ;;  %3700 = vst.msk [vmem:[#allocation3 + $0xd8] sm:$0xff] %vm404_vm0, %v3661_v1  ;;  %v3818_v39 = vsel %vm2517_vm6, %v3817_v35, %v3816_v56  ;;  %v3821_v41 = vrot.slane %v3781_v23, 4  ;;  %v3823_v63 = vrot.slane %v3782_v55, 3  ;;  %v4438_v5 = vpop.permute.xlu1 %4437 }
 0x540   : > { %v3566_v36 = vsel %vm2532_vm11, %v3565_v31, %v3564_v50  ;;  %3702 = vst.msk [vmem:[#allocation3 + $0xe8] sm:$0xff] %vm404_vm0, %v3666_v49  ;;  %v3820_v0 = vsel %vm2520_vm7, %v3819_v14, %v3818_v39  ;;  %v3825_v38 = vrot.slane %v3783_v53, 2  ;;  %v3827_v2 = vrot.slane %v3784_v16, 1  ;;  %v3913_v17 = vld [vmem:[#allocation3 + $0x83] sm:$0x1]  ;;  %v4506_v34 = vpop.permute.xlu0 %4505 }
 0x541   : > { %v3914_v11 = vld [vmem:[#allocation3 + $0x93] sm:$0x1]  ;;  %3704 = vst.msk [vmem:[#allocation3 + $0xf8] sm:$0xff] %vm404_vm0, %v3671_v40  ;;  %3569 = vrot.lane.b32.xlu0 %v3566_v36, %s5175_s28  ;;  %v3822_v54 = vsel %vm2523_vm8, %v3821_v41, %v3820_v0  ;;  %v3915_v27 = vld [vmem:[#allocation3 + $0xa3] sm:$0x1] }
 0x542   : > { %v3916_v60 = vld [vmem:[#allocation3 + $0xb3] sm:$0x1]  ;;  %v3951_v9 = vrot.slane %v3914_v11, 7  ;;  %v3824_v44 = vsel %vm2526_vm9, %v3823_v63, %v3822_v54  ;;  %4107 = vst.msk [vmem:[%s6900_s25 + $0x10] sm:$0xff] %vm2894_vm1, %v4102_v25  ;;  %v3917_v15 = vld [vmem:[#allocation3 + $0xc3] sm:$0x1] }
 0x543   : > { %v3918_v51 = vld [vmem:[#allocation3 + $0xd3] sm:$0x1]  ;;  %v3953_v3 = vrot.slane %v3915_v27, 6  ;;  %v3826_v48 = vsel %vm2529_vm10, %v3825_v38, %v3824_v44  ;;  %4175 = vst.msk [vmem:[%s6900_s25 + $0x10] sm:$0xff] %vm2963_vm2, %v7262_v21  ;;  %v3919_v10 = vld [vmem:[#allocation3 + $0xe3] sm:$0x1] }
 0x544   : > { %v3920_v43 = vld [vmem:[#allocation3 + $0xf3] sm:$0x1]  ;;  %v3952_v61 = vsel %vm2514_vm5, %v3951_v9, %v3913_v17  ;;  %v3955_v24 = vrot.slane %v3916_v60, 5  ;;  %v3828_v31 = vsel %vm2532_vm11, %v3827_v2, %v3826_v48  ;;  %4243 = vst.msk [vmem:[%s6900_s25 + $0x10] sm:$0xff] %vm3032_vm3, %v7371_v18  ;;  %v3957_v22 = vrot.slane %v3917_v15, 4  ;;  %v4574_v15 = vpop.permute.xlu2 %4573 }
 0x545   : > { %v3954_v25 = vsel %vm2517_vm6, %v3953_v3, %v3952_v61  ;;  %v3959_v58 = vrot.slane %v3918_v51, 3  ;;  %3831 = vrot.lane.b32.xlu2 %v3828_v31, %s5171_s20  ;;  %v3961_v12 = vrot.slane %v3919_v10, 2  ;;  %v3963_v32 = vrot.slane %v3920_v43, 1  ;;  %v3846_v4 = vld [vmem:[#allocation3 + $0x92] sm:$0x1]  ;;  %4443 = vst.msk [vmem:[%s6900_s25 + $0x18] sm:$0xff] %vm2687_vm13, %v4438_v5 }
 0x546   : > { %v3956_v21 = vsel %vm2520_vm7, %v3955_v24, %v3954_v25  ;;  %v3847_v59 = vld [vmem:[#allocation3 + $0xa2] sm:$0x1]  ;;  %v3848_v1 = vld [vmem:[#allocation3 + $0xb2] sm:$0x1]  ;;  %v3883_v35 = vrot.slane %v3846_v4, 7  ;;  %4511 = vst.msk [vmem:[%s6900_s25 + $0x18] sm:$0xff] %vm2756_vm14, %v4506_v34 }
 0x547   : > { %v3958_v62 = vsel %vm2523_vm8, %v3957_v22, %v3956_v21  ;;  %v3849_v49 = vld [vmem:[#allocation3 + $0xc2] sm:$0x1]  ;;  %v3850_v20 = vld [vmem:[#allocation3 + $0xd2] sm:$0x1]  ;;  %v3885_v40 = vrot.slane %v3847_v59, 6  ;;  %v3887_v16 = vrot.slane %v3848_v1, 5  ;;  %v4642_v22 = vpop.permute.xlu1 %4641 }
 0x548   : > { %v3960_v18 = vsel %vm2526_vm9, %v3959_v58, %v3958_v62  ;;  %v3851_v23 = vld [vmem:[#allocation3 + $0xe2] sm:$0x1]  ;;  %v3852_v55 = vld [vmem:[#allocation3 + $0xf2] sm:$0x1]  ;;  %v3889_v56 = vrot.slane %v3849_v49, 4  ;;  %v3891_v14 = vrot.slane %v3850_v20, 3  ;;  %v4710_v59 = vpop.permute.xlu0 %4709 }
 0x549   : > { %v3962_v42 = vsel %vm2529_vm10, %v3961_v12, %v3960_v18  ;;  %v3845_v53 = vld [vmem:[#allocation3 + $0x82] sm:$0x1]  ;;  %v3893_v41 = vrot.slane %v3851_v23, 2  ;;  %v3895_v63 = vrot.slane %v3852_v55, 1  ;;  %v3982_v36 = vld [vmem:[#allocation3 + $0x94] sm:$0x1] }
 0x54a   : > { %v3964_v50 = vsel %vm2532_vm11, %v3963_v32, %v3962_v42  ;;  %v3884_v39 = vsel %vm2514_vm5, %v3883_v35, %v3845_v53  ;;  %v3983_v0 = vld [vmem:[#allocation3 + $0xa4] sm:$0x1]  ;;  %v3984_v2 = vld [vmem:[#allocation3 + $0xb4] sm:$0x1]  ;;  %v4019_v9 = vrot.slane %v3982_v36, 7  ;;  %4579 = vst.msk [vmem:[%s6900_s25 + $0x18] sm:$0xff] %vm2825_vm15, %v4574_v15 }
 0x54b   : > { %3967 = vrot.lane.b32.xlu0 %v3964_v50, %s5169_s18  ;;  %v3886_v38 = vsel %vm2517_vm6, %v3885_v40, %v3884_v39  ;;  %v3985_v17 = vld [vmem:[#allocation3 + $0xc4] sm:$0x1]  ;;  %v3986_v11 = vld [vmem:[#allocation3 + $0xd4] sm:$0x1]  ;;  %v4021_v44 = vrot.slane %v3983_v0, 6  ;;  %v4023_v48 = vrot.slane %v3984_v2, 5 }
 0x54c   : > { %v3888_v54 = vsel %vm2520_vm7, %v3887_v16, %v3886_v38  ;;  %v3987_v27 = vld [vmem:[#allocation3 + $0xe4] sm:$0x1]  ;;  %v3988_v60 = vld [vmem:[#allocation3 + $0xf4] sm:$0x1]  ;;  %v4025_v10 = vrot.slane %v3985_v17, 4  ;;  %v4027_v43 = vrot.slane %v3986_v11, 3 }
 0x54d   : > { %v3890_v51 = vsel %vm2523_vm8, %v3889_v56, %v3888_v54  ;;  %v3981_v3 = vld [vmem:[#allocation3 + $0x84] sm:$0x1]  ;;  %v4029_v5 = vrot.slane %v3987_v27, 2  ;;  %v4031_v31 = vrot.slane %v3988_v60, 1  ;;  %v4118_v25 = vld [vmem:[#allocation3 + $0x96] sm:$0x1] }
 0x54e   : > { %v3892_v61 = vsel %vm2526_vm9, %v3891_v14, %v3890_v51  ;;  %v4020_v24 = vsel %vm2514_vm5, %v4019_v9, %v3981_v3  ;;  %v4119_v12 = vld [vmem:[#allocation3 + $0xa6] sm:$0x1]  ;;  %v4120_v32 = vld [vmem:[#allocation3 + $0xb6] sm:$0x1]  ;;  %v4155_v55 = vrot.slane %v4118_v25, 7  ;;  %4647 = vst.msk [vmem:[%s6900_s25 + $0x18] sm:$0xff] %vm2894_vm1, %v4642_v22 }
 0x54f   : > { %v3894_v58 = vsel %vm2529_vm10, %v3893_v41, %v3892_v61  ;;  %v4022_v21 = vsel %vm2517_vm6, %v4021_v44, %v4020_v24  ;;  %v4121_v4 = vld [vmem:[#allocation3 + $0xc6] sm:$0x1]  ;;  %v4122_v1 = vld [vmem:[#allocation3 + $0xd6] sm:$0x1]  ;;  %v4157_v35 = vrot.slane %v4119_v12, 6  ;;  %v4159_v40 = vrot.slane %v4120_v32, 5 }
 0x550   : > { %v3896_v34 = vsel %vm2532_vm11, %v3895_v63, %v3894_v58  ;;  %v4024_v62 = vsel %vm2520_vm7, %v4023_v48, %v4022_v21  ;;  %v4123_v49 = vld [vmem:[#allocation3 + $0xe6] sm:$0x1]  ;;  %v4124_v20 = vld [vmem:[#allocation3 + $0xf6] sm:$0x1]  ;;  %v4161_v53 = vrot.slane %v4121_v4, 4  ;;  %v4163_v16 = vrot.slane %v4122_v1, 3 }
 0x551   : > { %3899 = vrot.lane.b32.xlu1 %v3896_v34, %s5170_s19  ;;  %v4026_v18 = vsel %vm2523_vm8, %v4025_v10, %v4024_v62  ;;  %v4117_v23 = vld [vmem:[#allocation3 + $0x86] sm:$0x1]  ;;  %v4165_v56 = vrot.slane %v4123_v49, 2  ;;  %v4049_v14 = vld [vmem:[#allocation3 + $0x85] sm:$0x1]  ;;  %4715 = vst.msk [vmem:[%s6900_s25 + $0x18] sm:$0xff] %vm2963_vm2, %v4710_v59 }
 0x552   : > { %v4028_v42 = vsel %vm2526_vm9, %v4027_v43, %v4026_v18  ;;  %v4050_v50 = vld [vmem:[#allocation3 + $0x95] sm:$0x1]  ;;  %v4156_v41 = vsel %vm2514_vm5, %v4155_v55, %v4117_v23  ;;  %v4167_v63 = vrot.slane %v4124_v20, 1  ;;  %v4051_v36 = vld [vmem:[#allocation3 + $0xa5] sm:$0x1] }
 0x553   : > { %v4030_v39 = vsel %vm2529_vm10, %v4029_v5, %v4028_v42  ;;  %v4052_v0 = vld [vmem:[#allocation3 + $0xb5] sm:$0x1]  ;;  %v4087_v38 = vrot.slane %v4050_v50, 7  ;;  %v4158_v17 = vsel %vm2517_vm6, %v4157_v35, %v4156_v41  ;;  %v4053_v11 = vld [vmem:[#allocation3 + $0xc5] sm:$0x1]  ;;  %v4089_v15 = vrot.slane %v4051_v36, 6 }
 0x554   : > { %v4032_v2 = vsel %vm2532_vm11, %v4031_v31, %v4030_v39  ;;  %v4054_v54 = vld [vmem:[#allocation3 + $0xd5] sm:$0x1]  ;;  %v4055_v27 = vld [vmem:[#allocation3 + $0xe5] sm:$0x1]  ;;  %v4160_v60 = vsel %vm2520_vm7, %v4159_v40, %v4158_v17  ;;  %v4091_v51 = vrot.slane %v4052_v0, 5  ;;  %v4093_v48 = vrot.slane %v4053_v11, 4 }
 0x555   : > { %4035 = vrot.lane.b32.xlu2 %v4032_v2, %s5174_s23  ;;  %v4056_v9 = vld [vmem:[#allocation3 + $0xf5] sm:$0x1]  ;;  %v4088_v44 = vsel %vm2514_vm5, %v4087_v38, %v4049_v14  ;;  %v4162_v3 = vsel %vm2523_vm8, %v4161_v53, %v4160_v60  ;;  %v4095_v10 = vrot.slane %v4054_v54, 3  ;;  %v4097_v43 = vrot.slane %v4055_v27, 2  ;;  %v4385_v61 = vld [vmem:[#allocation3 + $0x8a] sm:$0x1] }
 0x556   : > { %v4386_v24 = vld [vmem:[#allocation3 + $0x9a] sm:$0x1]  ;;  %v4164_v5 = vsel %vm2526_vm9, %v4163_v16, %v4162_v3  ;;  %v4090_v31 = vsel %vm2517_vm6, %v4089_v15, %v4088_v44  ;;  %v4099_v25 = vrot.slane %v4056_v9, 1  ;;  %v4387_v22 = vld [vmem:[#allocation3 + $0xaa] sm:$0x1] }
 0x557   : > { %v4388_v58 = vld [vmem:[#allocation3 + $0xba] sm:$0x1]  ;;  %v4423_v21 = vrot.slane %v4386_v24, 7  ;;  %v4166_v12 = vsel %vm2529_vm10, %v4165_v56, %v4164_v5  ;;  %v4092_v32 = vsel %vm2520_vm7, %v4091_v51, %v4090_v31  ;;  %v4389_v4 = vld [vmem:[#allocation3 + $0xca] sm:$0x1]  ;;  %v4425_v18 = vrot.slane %v4387_v22, 6 }
 0x558   : > { %v4390_v59 = vld [vmem:[#allocation3 + $0xda] sm:$0x1]  ;;  %v4391_v34 = vld [vmem:[#allocation3 + $0xea] sm:$0x1]  ;;  %v4168_v62 = vsel %vm2532_vm11, %v4167_v63, %v4166_v12  ;;  %v4094_v1 = vsel %vm2523_vm8, %v4093_v48, %v4092_v32  ;;  %v4427_v55 = vrot.slane %v4388_v58, 5  ;;  %v4429_v35 = vrot.slane %v4389_v4, 4 }
 0x559   : > { %v4392_v49 = vld [vmem:[#allocation3 + $0xfa] sm:$0x1]  ;;  %v4424_v20 = vsel %vm2514_vm5, %v4423_v21, %v4385_v61  ;;  %4171 = vrot.lane.b32.xlu0 %v4168_v62, %s5173_s22  ;;  %v4096_v23 = vsel %vm2526_vm9, %v4095_v10, %v4094_v1  ;;  %v4431_v40 = vrot.slane %v4390_v59, 3  ;;  %v4318_v42 = vld [vmem:[#allocation3 + $0x99] sm:$0x1]  ;;  %v4433_v14 = vrot.slane %v4391_v34, 2 }
 0x55a   : > { %v7470_v53 = vld [vmem:[#allocation3 + $0x1f] sm:$0x1]  ;;  %v4098_v16 = vsel %vm2529_vm10, %v4097_v43, %v4096_v23  ;;  %v4426_v56 = vsel %vm2517_vm6, %v4425_v18, %v4424_v20  ;;  %v4435_v50 = vrot.slane %v4392_v49, 1  ;;  %v4319_v39 = vld [vmem:[#allocation3 + $0xa9] sm:$0x1]  ;;  %v4355_v54 = vrot.slane %v4318_v42, 7 }
 0x55b   : > { %v4320_v41 = vld [vmem:[#allocation3 + $0xb9] sm:$0x1]  ;;  %v4100_v63 = vsel %vm2532_vm11, %v4099_v25, %v4098_v16  ;;  %v4428_v36 = vsel %vm2520_vm7, %v4427_v55, %v4426_v56  ;;  %v4321_v0 = vld [vmem:[#allocation3 + $0xc9] sm:$0x1]  ;;  %v4357_v27 = vrot.slane %v4319_v39, 6  ;;  %v4749_v5 = vrot.slane %v7470_v53, 7 }
 0x55c   : > { %v4322_v38 = vld [vmem:[#allocation3 + $0xd9] sm:$0x1]  ;;  %v4323_v2 = vld [vmem:[#allocation3 + $0xe9] sm:$0x1]  ;;  %4103 = vrot.lane.b32.xlu1 %v4100_v63, %s5172_s21  ;;  %v4430_v17 = vsel %vm2523_vm8, %v4429_v35, %v4428_v36  ;;  %v4359_v60 = vrot.slane %v4320_v41, 5  ;;  %v4361_v15 = vrot.slane %v4321_v0, 4 }
 0x55d   : > { %v4324_v11 = vld [vmem:[#allocation3 + $0xf9] sm:$0x1]  ;;  %v4432_v9 = vsel %vm2526_vm9, %v4431_v40, %v4430_v17  ;;  %v4317_v44 = vld [vmem:[#allocation3 + $0x89] sm:$0x1]  ;;  %v4363_v51 = vrot.slane %v4322_v38, 3  ;;  %v4365_v3 = vrot.slane %v4323_v2, 2 }
 0x55e   : > { %v4434_v48 = vsel %vm2529_vm10, %v4433_v14, %v4432_v9  ;;  %v4356_v10 = vsel %vm2514_vm5, %v4355_v54, %v4317_v44  ;;  %v4367_v43 = vrot.slane %v4324_v11, 1  ;;  %v4454_v61 = vld [vmem:[#allocation3 + $0x9b] sm:$0x1]  ;;  %v4455_v24 = vld [vmem:[#allocation3 + $0xab] sm:$0x1] }
 0x55f   : > { %v4436_v31 = vsel %vm2532_vm11, %v4435_v50, %v4434_v48  ;;  %v4358_v25 = vsel %vm2517_vm6, %v4357_v27, %v4356_v10  ;;  %v4456_v22 = vld [vmem:[#allocation3 + $0xbb] sm:$0x1]  ;;  %v4457_v58 = vld [vmem:[#allocation3 + $0xcb] sm:$0x1]  ;;  %v4491_v59 = vrot.slane %v4454_v61, 7  ;;  %v4493_v34 = vrot.slane %v4455_v24, 6 }
 0x560   : > { %v4458_v21 = vld [vmem:[#allocation3 + $0xdb] sm:$0x1]  ;;  %4439 = vrot.lane.b32.xlu2 %v4436_v31, %s5170_s19  ;;  %v4360_v12 = vsel %vm2520_vm7, %v4359_v60, %v4358_v25  ;;  %v4459_v32 = vld [vmem:[#allocation3 + $0xeb] sm:$0x1]  ;;  %v4495_v49 = vrot.slane %v4456_v22, 5  ;;  %v4497_v20 = vrot.slane %v4457_v58, 4 }
 0x561   : > { %v4460_v4 = vld [vmem:[#allocation3 + $0xfb] sm:$0x1]  ;;  %v4362_v62 = vsel %vm2523_vm8, %v4361_v15, %v4360_v12  ;;  %v4453_v1 = vld [vmem:[#allocation3 + $0x8b] sm:$0x1]  ;;  %v4499_v18 = vrot.slane %v4458_v21, 3  ;;  %v4501_v35 = vrot.slane %v4459_v32, 2 }
 0x562   : > { %v4364_v23 = vsel %vm2526_vm9, %v4363_v51, %v4362_v62  ;;  %v4492_v55 = vsel %vm2514_vm5, %v4491_v59, %v4453_v1  ;;  %v4503_v40 = vrot.slane %v4460_v4, 1  ;;  %v4590_v42 = vld [vmem:[#allocation3 + $0x9d] sm:$0x1]  ;;  %v4591_v16 = vld [vmem:[#allocation3 + $0xad] sm:$0x1] }
 0x563   : > { %v4366_v56 = vsel %vm2529_vm10, %v4365_v3, %v4364_v23  ;;  %v4494_v14 = vsel %vm2517_vm6, %v4493_v34, %v4492_v55  ;;  %v4592_v50 = vld [vmem:[#allocation3 + $0xbd] sm:$0x1]  ;;  %v4593_v39 = vld [vmem:[#allocation3 + $0xcd] sm:$0x1]  ;;  %v4627_v2 = vrot.slane %v4590_v42, 7  ;;  %v4629_v17 = vrot.slane %v4591_v16, 6 }
 0x564   : > { %v4594_v41 = vld [vmem:[#allocation3 + $0xdd] sm:$0x1]  ;;  %v4368_v63 = vsel %vm2532_vm11, %v4367_v43, %v4366_v56  ;;  %v4496_v36 = vsel %vm2520_vm7, %v4495_v49, %v4494_v14  ;;  %v4595_v0 = vld [vmem:[#allocation3 + $0xed] sm:$0x1]  ;;  %v4631_v27 = vrot.slane %v4592_v50, 5  ;;  %v4633_v60 = vrot.slane %v4593_v39, 4 }
 0x565   : > { %v4596_v38 = vld [vmem:[#allocation3 + $0xfd] sm:$0x1]  ;;  %4371 = vrot.lane.b32.xlu0 %v4368_v63, %s5171_s20  ;;  %v4498_v11 = vsel %vm2523_vm8, %v4497_v20, %v4496_v36  ;;  %v4589_v54 = vld [vmem:[#allocation3 + $0x8d] sm:$0x1]  ;;  %v4635_v9 = vrot.slane %v4594_v41, 3  ;;  %v4637_v51 = vrot.slane %v4595_v0, 2 }
 0x566   : > { %v4500_v44 = vsel %vm2526_vm9, %v4499_v18, %v4498_v11  ;;  %v4628_v15 = vsel %vm2514_vm5, %v4627_v2, %v4589_v54  ;;  %v4639_v3 = vrot.slane %v4596_v38, 1  ;;  %v4522_v48 = vld [vmem:[#allocation3 + $0x9c] sm:$0x1]  ;;  %v4523_v10 = vld [vmem:[#allocation3 + $0xac] sm:$0x1] }
 0x567   : > { %v4502_v43 = vsel %vm2529_vm10, %v4501_v35, %v4500_v44  ;;  %v4630_v61 = vsel %vm2517_vm6, %v4629_v17, %v4628_v15  ;;  %v4524_v24 = vld [vmem:[#allocation3 + $0xbc] sm:$0x1]  ;;  %v4525_v31 = vld [vmem:[#allocation3 + $0xcc] sm:$0x1]  ;;  %v4559_v32 = vrot.slane %v4522_v48, 7  ;;  %v4561_v4 = vrot.slane %v4523_v10, 6 }
 0x568   : > { %v4526_v25 = vld [vmem:[#allocation3 + $0xdc] sm:$0x1]  ;;  %v4504_v22 = vsel %vm2532_vm11, %v4503_v40, %v4502_v43  ;;  %v4632_v58 = vsel %vm2520_vm7, %v4631_v27, %v4630_v61  ;;  %v4527_v21 = vld [vmem:[#allocation3 + $0xec] sm:$0x1]  ;;  %v4563_v62 = vrot.slane %v4524_v24, 5  ;;  %v4565_v1 = vrot.slane %v4525_v31, 4 }
 0x569   : > { %v4528_v12 = vld [vmem:[#allocation3 + $0xfc] sm:$0x1]  ;;  %4507 = vrot.lane.b32.xlu1 %v4504_v22, %s5169_s18  ;;  %v4634_v59 = vsel %vm2523_vm8, %v4633_v60, %v4632_v58  ;;  %v4521_v34 = vld [vmem:[#allocation3 + $0x8c] sm:$0x1]  ;;  %v4567_v49 = vrot.slane %v4526_v25, 3  ;;  %v4569_v23 = vrot.slane %v4527_v21, 2 }
 0x56a   : > { %v4636_v20 = vsel %vm2526_vm9, %v4635_v9, %v4634_v59  ;;  %v4560_v18 = vsel %vm2514_vm5, %v4559_v32, %v4521_v34  ;;  %v4571_v55 = vrot.slane %v4528_v12, 1  ;;  %v4658_v35 = vld [vmem:[#allocation3 + $0x9e] sm:$0x1]  ;;  %v4659_v40 = vld [vmem:[#allocation3 + $0xae] sm:$0x1] }
 0x56b   : > { %v4638_v42 = vsel %vm2529_vm10, %v4637_v51, %v4636_v20  ;;  %v4562_v16 = vsel %vm2517_vm6, %v4561_v4, %v4560_v18  ;;  %v4660_v56 = vld [vmem:[#allocation3 + $0xbe] sm:$0x1]  ;;  %v4661_v14 = vld [vmem:[#allocation3 + $0xce] sm:$0x1]  ;;  %v4695_v0 = vrot.slane %v4658_v35, 7  ;;  %v4697_v38 = vrot.slane %v4659_v40, 6 }
 0x56c   : > { %v4662_v50 = vld [vmem:[#allocation3 + $0xde] sm:$0x1]  ;;  %v4640_v39 = vsel %vm2532_vm11, %v4639_v3, %v4638_v42  ;;  %v4564_v41 = vsel %vm2520_vm7, %v4563_v62, %v4562_v16  ;;  %v4663_v63 = vld [vmem:[#allocation3 + $0xee] sm:$0x1]  ;;  %v4717_v2 = vld [vmem:[#allocation3 + $0xf] sm:$0x1] }
 0x56d   : > { %v4664_v36 = vld [vmem:[#allocation3 + $0xfe] sm:$0x1]  ;;  %4643 = vrot.lane.b32.xlu2 %v4640_v39, %s5172_s21  ;;  %v4566_v17 = vsel %vm2523_vm8, %v4565_v1, %v4564_v41  ;;  %v4657_v11 = vld [vmem:[#allocation3 + $0x8e] sm:$0x1]  ;;  %v4699_v54 = vrot.slane %v4660_v56, 5  ;;  %v4701_v27 = vrot.slane %v4661_v14, 4  ;;  %v4750_v58 = vsel %vm2514_vm5, %v4749_v5, %v4717_v2 }
 0x56e   : > { %v4703_v60 = vrot.slane %v4662_v50, 3  ;;  %v4568_v9 = vsel %vm2526_vm9, %v4567_v49, %v4566_v17  ;;  %v4696_v44 = vsel %vm2514_vm5, %v4695_v0, %v4657_v11  ;;  %v4705_v15 = vrot.slane %v4663_v63, 2  ;;  %v4186_v3 = vld [vmem:[#allocation3 + $0x97] sm:$0x1]  ;;  %v4187_v48 = vld [vmem:[#allocation3 + $0xa7] sm:$0x1] }
 0x56f   : > { %v4707_v51 = vrot.slane %v4664_v36, 1  ;;  %v4719_v10 = vld [vmem:[#allocation3 + $0x2f] sm:$0x1]  ;;  %v4570_v43 = vsel %vm2529_vm10, %v4569_v23, %v4568_v9  ;;  %v4698_v61 = vsel %vm2517_vm6, %v4697_v38, %v4696_v44  ;;  %v4185_v24 = vld [vmem:[#allocation3 + $0x87] sm:$0x1]  ;;  %v4223_v59 = vrot.slane %v4186_v3, 7 }
 0x570   : > { %v4188_v31 = vld [vmem:[#allocation3 + $0xb7] sm:$0x1]  ;;  %v4189_v25 = vld [vmem:[#allocation3 + $0xc7] sm:$0x1]  ;;  %v4572_v21 = vsel %vm2532_vm11, %v4571_v55, %v4570_v43  ;;  %v4700_v12 = vsel %vm2520_vm7, %v4699_v54, %v4698_v61  ;;  %v4225_v34 = vrot.slane %v4187_v48, 6  ;;  %v4751_v50 = vrot.slane %v4719_v10, 6  ;;  %v7533_v48 = vpop.permute.xlu2 %2752 }
 0x571   : > { %v4190_v22 = vld [vmem:[#allocation3 + $0xd7] sm:$0x1]  ;;  %v4191_v32 = vld [vmem:[#allocation3 + $0xe7] sm:$0x1]  ;;  %4575 = vrot.lane.b32.xlu0 %v4572_v21, %s5174_s23  ;;  %v4702_v62 = vsel %vm2523_vm8, %v4701_v27, %v4700_v12  ;;  %v4227_v1 = vrot.slane %v4188_v31, 5  ;;  %v4229_v49 = vrot.slane %v4189_v25, 4  ;;  %v4224_v5 = vsel %vm2514_vm5, %v4223_v59, %v4185_v24 }
 0x572   : > { %v4192_v4 = vld [vmem:[#allocation3 + $0xf7] sm:$0x1]  ;;  %v4231_v20 = vrot.slane %v4190_v22, 3  ;;  %v4720_v18 = vld [vmem:[#allocation3 + $0x3f] sm:$0x1]  ;;  %v4704_v53 = vsel %vm2526_vm9, %v4703_v60, %v4702_v62  ;;  %v4233_v23 = vrot.slane %v4191_v32, 2  ;;  %v4226_v16 = vsel %vm2517_vm6, %v4225_v34, %v4224_v5 }
 0x573   : > { %v4235_v55 = vrot.slane %v4192_v4, 1  ;;  %v4721_v35 = vld [vmem:[#allocation3 + $0x4f] sm:$0x1]  ;;  %v4722_v40 = vld [vmem:[#allocation3 + $0x5f] sm:$0x1]  ;;  %v4706_v42 = vsel %vm2529_vm10, %v4705_v15, %v4704_v53  ;;  %v4753_v39 = vrot.slane %v4720_v18, 5  ;;  %v4228_v63 = vsel %vm2520_vm7, %v4227_v1, %v4226_v16 }
 0x574   : > { %v4723_v56 = vld [vmem:[#allocation3 + $0x6f] sm:$0x1]  ;;  %v4724_v14 = vld [vmem:[#allocation3 + $0x7f] sm:$0x1]  ;;  %v4708_v41 = vsel %vm2532_vm11, %v4707_v51, %v4706_v42  ;;  %v4755_v36 = vrot.slane %v4721_v35, 4  ;;  %v4757_v0 = vrot.slane %v4722_v40, 3  ;;  %v4230_v2 = vsel %vm2523_vm8, %v4229_v49, %v4228_v63 }
 0x575   : > { %v4726_v38 = vld [vmem:[#allocation3 + $0x9f] sm:$0x1]  ;;  %4711 = vrot.lane.b32.xlu1 %v4708_v41, %s5173_s22  ;;  %v4752_v17 = vsel %vm2517_vm6, %v4751_v50, %v4750_v58  ;;  %v4759_v11 = vrot.slane %v4723_v56, 2  ;;  %v4761_v54 = vrot.slane %v4724_v14, 1  ;;  %v4727_v27 = vld [vmem:[#allocation3 + $0xaf] sm:$0x1]  ;;  %v4232_v9 = vsel %vm2526_vm9, %v4231_v20, %v4230_v2 }
 0x576   : > { %v4728_v60 = vld [vmem:[#allocation3 + $0xbf] sm:$0x1]  ;;  %v4754_v44 = vsel %vm2520_vm7, %v4753_v39, %v4752_v17  ;;  %v4729_v15 = vld [vmem:[#allocation3 + $0xcf] sm:$0x1]  ;;  %v4234_v10 = vsel %vm2529_vm10, %v4233_v23, %v4232_v9  ;;  %v4763_v24 = vrot.slane %v4726_v38, 7  ;;  %v4765_v31 = vrot.slane %v4727_v27, 6 }
 0x577   : > { %v4730_v51 = vld [vmem:[#allocation3 + $0xdf] sm:$0x1]  ;;  %v4731_v3 = vld [vmem:[#allocation3 + $0xef] sm:$0x1]  ;;  %v4756_v43 = vsel %vm2523_vm8, %v4755_v36, %v4754_v44  ;;  %v4236_v25 = vsel %vm2532_vm11, %v4235_v55, %v4234_v10  ;;  %v4767_v21 = vrot.slane %v4728_v60, 5  ;;  %v4769_v12 = vrot.slane %v4729_v15, 4 }
 0x578   : > { %v4732_v61 = vld [vmem:[#allocation3 + $0xff] sm:$0x1]  ;;  %v4758_v22 = vsel %vm2526_vm9, %v4757_v0, %v4756_v43  ;;  %v4725_v58 = vld [vmem:[#allocation3 + $0x8f] sm:$0x1]  ;;  %4239 = vrot.lane.b32.xlu2 %v4236_v25, %s5175_s28  ;;  %v4771_v59 = vrot.slane %v4730_v51, 3  ;;  %v4773_v34 = vrot.slane %v4731_v3, 2 }
 0x579   : > { %v4760_v32 = vsel %vm2529_vm10, %v4759_v11, %v4758_v22  ;;  %v4764_v4 = vsel %vm2514_vm5, %v4763_v24, %v4725_v58  ;;  %v4775_v49 = vrot.slane %v4732_v61, 1  ;;  %v2534_v20 = vrot.slane %v7179_v30, 7  ;;  %v3714_v18 = vld [vmem:[#allocation3 + $0x90] sm:$0x1]  ;;  %v3715_v53 = vld [vmem:[#allocation3 + $0xa0] sm:$0x1] }
 0x57a   : > { %v4762_v62 = vsel %vm2532_vm11, %v4761_v54, %v4760_v32  ;;  %v4766_v1 = vsel %vm2517_vm6, %v4765_v31, %v4764_v4  ;;  %v2536_v23 = vrot.slane %v7190_v6, 6  ;;  %v2538_v55 = vrot.slane %v7206_v57, 5  ;;  %v3716_v40 = vld [vmem:[#allocation3 + $0xb0] sm:$0x1]  ;;  %v3717_v14 = vld [vmem:[#allocation3 + $0xc0] sm:$0x1] }
 0x57b   : > { %4777 = vrot.lane.b32.xlu0 %v4762_v62, %s5175_s28  ;;  %v4768_v5 = vsel %vm2520_vm7, %v4767_v21, %v4766_v1  ;;  %v2540_v35 = vrot.slane %v7222_v33, 4  ;;  %v2535_v16 = vsel %vm2514_vm5, %v2534_v20, %v7169_v46  ;;  %v2542_v30 = vrot.slane %v7231_v13, 3  ;;  %v3718_v57 = vld [vmem:[#allocation3 + $0xd0] sm:$0x1]  ;;  %v3719_v41 = vld [vmem:[#allocation3 + $0xe0] sm:$0x1] }
 0x57c   : > { %v4770_v42 = vsel %vm2523_vm8, %v4769_v12, %v4768_v5  ;;  %v2544_v56 = vrot.slane %v7258_v29, 2  ;;  %v2537_v39 = vsel %vm2517_vm6, %v2536_v23, %v2535_v16  ;;  %v2546_v6 = vrot.slane %v7268_v26, 1  ;;  %v3713_v0 = vld [vmem:[#allocation3 + $0x80] sm:$0x1]  ;;  %v3720_v11 = vld [vmem:[#allocation3 + $0xf0] sm:$0x1]  ;;  %v2960_v26 = vpop.permute.xlu2 %2959 }
 0x57d   : > { %v4772_v50 = vsel %vm2526_vm9, %v4771_v59, %v4770_v42  ;;  %v3751_v33 = vrot.slane %v3714_v18, 7  ;;  %v2539_v36 = vsel %vm2520_vm7, %v2538_v55, %v2537_v39  ;;  %v3753_v46 = vrot.slane %v3715_v53, 6  ;;  %v4254_v55 = vld [vmem:[#allocation3 + $0x98] sm:$0x1]  ;;  %v4257_v16 = vld [vmem:[#allocation3 + $0xc8] sm:$0x1] }
 0x57e   : > { %v4774_v63 = vsel %vm2529_vm10, %v4773_v34, %v4772_v50  ;;  %v3755_v38 = vrot.slane %v3716_v40, 5  ;;  %v2541_v29 = vsel %vm2523_vm8, %v2540_v35, %v2539_v36  ;;  %v3757_v17 = vrot.slane %v3717_v14, 4  ;;  %v4255_v35 = vld [vmem:[#allocation3 + $0xa8] sm:$0x1]  ;;  %v4256_v42 = vld [vmem:[#allocation3 + $0xb8] sm:$0x1] }
 0x57f   : > { %v4776_v13 = vsel %vm2532_vm11, %v4775_v49, %v4774_v63  ;;  %v3752_v2 = vsel %vm2514_vm5, %v3751_v33, %v3713_v0  ;;  %v2543_v54 = vsel %vm2526_vm9, %v2542_v30, %v2541_v29  ;;  %v3759_v60 = vrot.slane %v3718_v57, 3  ;;  %v4258_v30 = vld [vmem:[#allocation3 + $0xd8] sm:$0x1]  ;;  %v4253_v39 = vld [vmem:[#allocation3 + $0x88] sm:$0x1] }
 0x580   : > { %4779 = vrot.lane.b32.xlu1 %v4776_v13, %s5175_s28  ;;  %v3754_v27 = vsel %vm2517_vm6, %v3753_v46, %v3752_v2  ;;  %v3761_v9 = vrot.slane %v3719_v41, 2  ;;  %v2545_v44 = vsel %vm2529_vm10, %v2544_v56, %v2543_v54  ;;  %v3763_v51 = vrot.slane %v3720_v11, 1  ;;  %v4259_v56 = vld [vmem:[#allocation3 + $0xe8] sm:$0x1] }
 0x581   : > { %v3756_v15 = vsel %vm2520_vm7, %v3755_v38, %v3754_v27  ;;  %v3081_v3 = vrot.slane %v7353_v52, 7  ;;  %v2547_v10 = vsel %vm2532_vm11, %v2546_v6, %v2545_v44  ;;  %v3083_v61 = vrot.slane %v7357_v47, 6  ;;  %v4260_v6 = vld [vmem:[#allocation3 + $0xf8] sm:$0x1] }
 0x582   : > { %v3758_v43 = vsel %vm2523_vm8, %v3757_v17, %v3756_v15  ;;  %v3085_v24 = vrot.slane %v7361_v28, 5  ;;  %2551 = vst.msk [vmem:[%s6900_s25 + $0x20] sm:$0xff] %vm404_vm0, %v2547_v10  ;;  %v3087_v22 = vrot.slane %v7367_v19, 4  ;;  %v3089_v52 = vrot.slane %v7373_v7, 3 }
 0x583   : > { %v3760_v31 = vsel %vm2526_vm9, %v3759_v60, %v3758_v43  ;;  %v3082_v25 = vsel %vm2514_vm5, %v3081_v3, %v7344_v37  ;;  %v3091_v28 = vrot.slane %v7378_v8, 2  ;;  %v3093_v37 = vrot.slane %v7385_v45, 1 }
 0x584   : > { %v3762_v58 = vsel %vm2529_vm10, %v3761_v9, %v3760_v31  ;;  %v3084_v47 = vsel %vm2517_vm6, %v3083_v61, %v3082_v25  ;;  %v3230_v8 = vpop.permute.xlu2 %3229  ;;  %v4291_v14 = vrot.slane %v4254_v55, 7  ;;  %v4293_v50 = vrot.slane %v4255_v35, 6 }
 0x585   : > { %v3764_v21 = vsel %vm2532_vm11, %v3763_v51, %v3762_v58  ;;  %v3086_v12 = vsel %vm2520_vm7, %v3085_v24, %v3084_v47  ;;  %v4295_v57 = vrot.slane %v4256_v42, 5  ;;  %v4297_v41 = vrot.slane %v4257_v16, 4 }
 0x586   : > { %3768 = vst.msk [vmem:[%s6900_s25 + $0x30] sm:$0xff] %vm404_vm0, %v3764_v21  ;;  %v3088_v19 = vsel %vm2523_vm8, %v3087_v22, %v3086_v12  ;;  %v4292_v33 = vsel %vm2514_vm5, %v4291_v14, %v4253_v39  ;;  %v4299_v63 = vrot.slane %v4258_v30, 3  ;;  %v4301_v0 = vrot.slane %v4259_v56, 2 }
 0x587   : > { %v3090_v7 = vsel %vm2526_vm9, %v3089_v52, %v3088_v19  ;;  %v2684_v59 = vpop.permute.xlu1 %2683  ;;  %v4294_v36 = vsel %vm2517_vm6, %v4293_v50, %v4292_v33  ;;  %v4303_v38 = vrot.slane %v4260_v6, 1 }
 0x588   : > { %v3092_v32 = vsel %vm2529_vm10, %v3091_v28, %v3090_v7  ;;  %v2615_v45 = vpop.permute.xlu0 %2614  ;;  %v4296_v46 = vsel %vm2520_vm7, %v4295_v57, %v4294_v36 }
 0x589   : > { %v3094_v4 = vsel %vm2532_vm11, %v3093_v37, %v3092_v32  ;;  %2620 = vst.msk [vmem:[%s6900_s25 + $0x20] sm:$0xff] %vm2618_vm12, %v2615_v45  ;;  %v4298_v13 = vsel %vm2523_vm8, %v4297_v41, %v4296_v46 }
 0x58a   : > { %3098 = vst.msk [vmem:[%s6900_s25 + $0x28] sm:$0xff] %vm404_vm0, %v3094_v4  ;;  %v4300_v29 = vsel %vm2526_vm9, %v4299_v63, %v4298_v13 }
 0x58b   : > { %2689 = vst.msk [vmem:[%s6900_s25 + $0x20] sm:$0xff] %vm2687_vm13, %v2684_v59  ;;  %v4302_v2 = vsel %vm2529_vm10, %v4301_v0, %v4300_v29 }
 0x58c   : > { %2758 = vst.msk [vmem:[%s6900_s25 + $0x20] sm:$0xff] %vm2756_vm14, %v7533_v48  ;;  %v3434_v1 = vpop.permute.xlu2 %3433  ;;  %v4304_v17 = vsel %vm2532_vm11, %v4303_v38, %v4302_v2 }
 0x58d   : > { %4308 = vst.msk [vmem:[%s6900_s25 + $0x38] sm:$0xff] %vm404_vm0, %v4304_v17 }
 0x58f   : > { %v2822_v34 = vpop.permute.xlu1 %2821 }
 0x590   : > { %v2891_v62 = vpop.permute.xlu0 %2890  ;;  %2827 = vst.msk [vmem:[%s6900_s25 + $0x20] sm:$0xff] %vm2825_vm15, %v2822_v34 }
 0x591   : > { %2896 = vst.msk [vmem:[%s6900_s25 + $0x20] sm:$0xff] %vm2894_vm1, %v2891_v62 }
 0x592   : > { %2965 = vst.msk [vmem:[%s6900_s25 + $0x20] sm:$0xff] %vm2963_vm2, %v2960_v26 }
 0x597   : > { %v3029_v49 = vpop.permute.xlu1 %3028 }
 0x598   : > { %3034 = vst.msk [vmem:[%s6900_s25 + $0x20] sm:$0xff] %vm3032_vm3, %v3029_v49 }
 0x599   : > { %v3162_v20 = vpop.permute.xlu0 %3161 }
 0x59a   : > { %3166 = vst.msk [vmem:[%s6900_s25 + $0x28] sm:$0xff] %vm2618_vm12, %v3162_v20 }
 0x59b   : > { %3234 = vst.msk [vmem:[%s6900_s25 + $0x28] sm:$0xff] %vm2687_vm13, %v3230_v8 }
 0x59f   : > { %v3832_v48 = vpop.permute.xlu2 %3831 }
 0x5a0   : > { %3836 = vst.msk [vmem:[%s6900_s25 + $0x30] sm:$0xff] %vm2618_vm12, %v3832_v48 }
 0x5a4   : > { %v3298_v18 = vpop.permute.xlu1 %3297 }
 0x5a5   : > { %3302 = vst.msk [vmem:[%s6900_s25 + $0x28] sm:$0xff] %vm2756_vm14, %v3298_v18 }
 0x5a8   : > { %v3366_v53 = vpop.permute.xlu0 %3365 }
 0x5a9   : > { %3370 = vst.msk [vmem:[%s6900_s25 + $0x28] sm:$0xff] %vm2825_vm15, %v3366_v53 }
 0x5aa   : > { %3438 = vst.msk [vmem:[%s6900_s25 + $0x28] sm:$0xff] %vm2894_vm1, %v3434_v1 }
 0x5ae   : > { %v3502_v5 = vpop.permute.xlu1 %3501 }
 0x5af   : > { %3506 = vst.msk [vmem:[%s6900_s25 + $0x28] sm:$0xff] %vm2963_vm2, %v3502_v5  ;;  %v4036_v40 = vpop.permute.xlu2 %4035 }
 0x5b3   : > { %v3570_v23 = vpop.permute.xlu0 %3569 }
 0x5b4   : > { %3574 = vst.msk [vmem:[%s6900_s25 + $0x28] sm:$0xff] %vm3032_vm3, %v3570_v23 }
 0x5ba   : > { %v4440_v11 = vpop.permute.xlu2 %4439 }
 0x5bd   : > { %v3968_v26 = vpop.permute.xlu0 %3967 }
 0x5c3   : > { %v3900_v54 = vpop.permute.xlu1 %3899 }
 0x5c4   : > { %3904 = vst.msk [vmem:[%s6900_s25 + $0x30] sm:$0xff] %vm2687_vm13, %v3900_v54 }
 0x5c5   : > { %3972 = vst.msk [vmem:[%s6900_s25 + $0x30] sm:$0xff] %vm2756_vm14, %v3968_v26 }
 0x5c6   : > { %4040 = vst.msk [vmem:[%s6900_s25 + $0x30] sm:$0xff] %vm2825_vm15, %v4036_v40 }
 0x5c7   : > { %v4644_v27 = vpop.permute.xlu2 %4643 }
 0x5cb   : > { %v4172_v60 = vpop.permute.xlu0 %4171 }
 0x5ce   : > { %v4104_v9 = vpop.permute.xlu1 %4103 }
 0x5cf   : > { %4108 = vst.msk [vmem:[%s6900_s25 + $0x30] sm:$0xff] %vm2894_vm1, %v4104_v9 }
 0x5d0   : > { %4176 = vst.msk [vmem:[%s6900_s25 + $0x30] sm:$0xff] %vm2963_vm2, %v4172_v60 }
 0x5d2   : > { %v4240_v44 = vpop.permute.xlu2 %4239 }
 0x5d3   : > { %4244 = vst.msk [vmem:[%s6900_s25 + $0x30] sm:$0xff] %vm3032_vm3, %v4240_v44 }
 0x5d7   : > { %v4372_v15 = vpop.permute.xlu0 %4371 }
 0x5d8   : > { %4376 = vst.msk [vmem:[%s6900_s25 + $0x38] sm:$0xff] %vm2618_vm12, %v4372_v15 }
 0x5d9   : > { %4444 = vst.msk [vmem:[%s6900_s25 + $0x38] sm:$0xff] %vm2687_vm13, %v4440_v11 }
 0x5db   : > { %v4508_v51 = vpop.permute.xlu1 %4507 }
 0x5dc   : > { %4512 = vst.msk [vmem:[%s6900_s25 + $0x38] sm:$0xff] %vm2756_vm14, %v4508_v51 }
 0x5e3   : > { %v4576_v3 = vpop.permute.xlu0 %4575 }
 0x5e4   : > { %4580 = vst.msk [vmem:[%s6900_s25 + $0x38] sm:$0xff] %vm2825_vm15, %v4576_v3 }
 0x5e5   : > { %4648 = vst.msk [vmem:[%s6900_s25 + $0x38] sm:$0xff] %vm2894_vm1, %v4644_v27 }
 0x5e7   : > { %v4712_v10 = vpop.permute.xlu1 %4711 }
 0x5e8   : > { %4716 = vst.msk [vmem:[%s6900_s25 + $0x38] sm:$0xff] %vm2963_vm2, %v4712_v10 }
 0x5ed   : > { %v4778_v43 = vpop.permute.xlu0 %4777 }
 0x5ee   : > { %4783 = vst.msk [vmem:[%s6900_s25 + $0x18] sm:$0xff] %vm3032_vm3, %v4778_v43 }
 0x5f2   : > { %v4780_v61 = vpop.permute.xlu1 %4779 }
 0x5f3   : > { %4784 = vst.msk [vmem:[%s6900_s25 + $0x38] sm:$0xff] %vm3032_vm3, %v4780_v61 }
 0x5f4 PF: > { %s17_s24 = sadd.s32 1, %s5167_s24  }
 0x5f5   : > { %p14_p4 = scmp.ge.s32.totalorder %s17_s24, 4  }
 0x5f7   :  { %16 = sbr.rel (!%p14_p4) target bundleno = 1 (0x1), region = 88 }

</bundles_post_ra>
